<compile_context>
chip_gen: v6e
topology: v6e:2x2x1
jax: 0.10.0
libtpu: 0.0.40
codegen_flags: <defaults>
</compile_context>

<pallas_src>
import functools

import jax
import jax.numpy as jnp
from jax.experimental import pallas as pl
from jax.experimental.pallas import tpu as pltpu

INPUT_SIZE = 129
HIDDEN_SIZE = 129
NUM_LAYERS = 2   # para.num_layers
SEQ_LEN = 8      # para.seq_len
BATCH = 8        # = 8 sublanes -> aligned per-timestep slices of the flat slab


def _gru_reg_kernel(x_ref, wih_ref, whh_ref, bc_ref, bhn_ref, out_ref, gi_ref,
                    *, seq_len, batch, hidden, num_layers):
    """Whole GRU_REG forward, everything VMEM-resident.

    x_ref:   (S*B, I)      flattened input sequence
    wih_ref: (L, 3, I, H)  input->hidden weights, gate order (r, z, n), transposed
    whh_ref: (L, 3, H, H)  hidden->hidden weights, transposed
    bc_ref:  (L, 3, 1, H)  combined biases: [b_ir+b_hr, b_iz+b_hz, b_in]
    bhn_ref: (L, 1, H)     b_hn (kept separate: it is scaled by the reset gate)
    out_ref: (S*B, H)      output slab (also reused as the next layer's input)
    gi_ref:  (3, S*B, H)   VMEM scratch holding the hoisted input projections
    """
    for layer in range(num_layers):
        # ---- hoisted input->hidden projection: one big matmul per gate ----
        xin = x_ref[...] if layer == 0 else out_ref[...]
        for g in range(3):
            gi_ref[g] = (
                jnp.dot(xin, wih_ref[layer, g], preferred_element_type=jnp.float32)
                + bc_ref[layer, g])

        # ---- sequential recurrence: only hidden->hidden matmuls remain ----
        h = jnp.zeros((batch, hidden), jnp.float32)
        for t in range(seq_len):              # static unroll; tiny trip count
            lo = t * batch                     # sublane-aligned (batch == 8)
            gh_r = jnp.dot(h, whh_ref[layer, 0], preferred_element_type=jnp.float32)
            gh_z = jnp.dot(h, whh_ref[layer, 1], preferred_element_type=jnp.float32)
            gh_n = (jnp.dot(h, whh_ref[layer, 2], preferred_element_type=jnp.float32)
                    + bhn_ref[layer])
            r = jax.nn.sigmoid(gi_ref[0, lo:lo + batch, :] + gh_r)
            z = jax.nn.sigmoid(gi_ref[1, lo:lo + batch, :] + gh_z)
            n = jnp.tanh(gi_ref[2, lo:lo + batch, :] + r * gh_n)
            h = (1.0 - z) * n + z * h
            out_ref[lo:lo + batch, :] = h

    # ---- Softplus(beta=1, threshold=20) applied once to the final slab ----
    y = out_ref[...]
    out_ref[...] = jnp.where(y > 20.0, y,
                             jnp.log1p(jnp.exp(jnp.minimum(y, 20.0))))


@jax.jit
def gru_reg_forward(x, wih, whh, bc, bhn):
    """x: (S, B, I) -> (S, B, H).  Whole stacked GRU + Softplus in one kernel."""
    S, B, I = x.shape
    L = whh.shape[0]
    H = whh.shape[-1]
    kernel = functools.partial(_gru_reg_kernel, seq_len=S, batch=B,
                               hidden=H, num_layers=L)
    out_flat = pl.pallas_call(
        kernel,
        out_shape=jax.ShapeDtypeStruct((S * B, H), jnp.float32),
        scratch_shapes=[pltpu.VMEM((3, S * B, H), jnp.float32)],
    )(x.reshape(S * B, I), wih, whh, bc, bhn)
    return out_flat.reshape(S, B, H)


def init_params(key, num_layers, input_size, hidden_size):
    """Deterministic synthetic weights, PyTorch-style U(-1/sqrt(H), 1/sqrt(H)).

    Per layer: W_ih -> (3, in, H), W_hh -> (3, H, H), biases -> (3, 1, H),
    gate order (r, z, n), weights already transposed for x @ W."""
    k = 1.0 / jnp.sqrt(jnp.float32(hidden_size))
    params = []
    for layer in range(num_layers):
        in_sz = input_size if layer == 0 else hidden_size
        key, k1, k2, k3, k4 = jax.random.split(key, 5)
        wih = jax.random.uniform(k1, (3, in_sz, hidden_size), jnp.float32, -k, k)
        whh = jax.random.uniform(k2, (3, hidden_size, hidden_size), jnp.float32, -k, k)
        bih = jax.random.uniform(k3, (3, 1, hidden_size), jnp.float32, -k, k)
        bhh = jax.random.uniform(k4, (3, 1, hidden_size), jnp.float32, -k, k)
        params.append((wih, whh, bih, bhh))
    return params


def pack_params(params):
    """Stack per-layer params for the kernel (requires input_size == hidden_size,
    true for GRU_REG: both are 129) and pre-combine the r/z biases."""
    wih = jnp.stack([p[0] for p in params])                       # (L, 3, I, H)
    whh = jnp.stack([p[1] for p in params])                       # (L, 3, H, H)
    bc = jnp.stack([jnp.stack([p[2][0] + p[3][0],                 # b_ir + b_hr
                               p[2][1] + p[3][1],                 # b_iz + b_hz
                               p[2][2]])                          # b_in
                    for p in params])                             # (L, 3, 1, H)
    bhn = jnp.stack([p[3][2] for p in params])                    # (L, 1, H)
    return wih, whh, bc, bhn


def _reference_forward(x, params):
    """Pure-JAX reference (same math) for a sanity check."""
    out = x
    n_layers = len(params)
    for li, (wih, whh, bih, bhh) in enumerate(params):
        S, B, _ = out.shape
        H = whh.shape[-1]
        h = jnp.zeros((B, H), jnp.float32)
        ys = []
        for t in range(S):
            xt = out[t]
            gi = [xt @ wih[g] + bih[g] for g in range(3)]
            gh = [h @ whh[g] + bhh[g] for g in range(3)]
            r = jax.nn.sigmoid(gi[0] + gh[0])
            z = jax.nn.sigmoid(gi[1] + gh[1])
            n = jnp.tanh(gi[2] + r * gh[2])
            h = (1.0 - z) * n + z * h
            ys.append(h)
        out = jnp.stack(ys, axis=0)
        if li == n_layers - 1:
            out = jnp.where(out > 20.0, out, jnp.log1p(jnp.exp(jnp.minimum(out, 20.0))))
    return out


if __name__ == "__main__":
    key = jax.random.PRNGKey(0)
    key, pkey, xkey = jax.random.split(key, 3)

    params = init_params(pkey, NUM_LAYERS, INPUT_SIZE, HIDDEN_SIZE)
    wih, whh, bc, bhn = pack_params(params)

    # layout: (seq_len, batch, input_size) -- PyTorch nn.GRU default (batch_first=False)
    x = jax.random.normal(xkey, (SEQ_LEN, BATCH, INPUT_SIZE), jnp.float32)

    y = gru_reg_forward(x, wih, whh, bc, bhn)
    y = jax.block_until_ready(y)

    assert y.shape == (SEQ_LEN, BATCH, HIDDEN_SIZE), y.shape

    # sanity check against pure-JAX reference (loose tol: MXU default precision)
    y_ref = _reference_forward(x, params)
    max_err = float(jnp.max(jnp.abs(y - y_ref)))
    assert max_err < 5e-2, f"max abs err {max_err}"

    print("KERNEL_OK")
</pallas_src>

<mosaic_0001>
module attributes {stable_mosaic.version = 11 : i64} {
  func.func @_gru_reg_kernel(%arg0: memref<64x129xf32, #tpu.memory_space<vmem>>, %arg1: memref<2x3x129x129xf32, #tpu.memory_space<vmem>>, %arg2: memref<2x3x129x129xf32, #tpu.memory_space<vmem>>, %arg3: memref<2x3x1x129xf32, #tpu.memory_space<vmem>>, %arg4: memref<2x1x129xf32, #tpu.memory_space<vmem>>, %arg5: memref<64x129xf32, #tpu.memory_space<vmem>>, %arg6: memref<3x64x129xf32, #tpu.memory_space<vmem>>) attributes {dimension_semantics = [], scalar_prefetch = 0 : i64, scratch_operands = 1 : i64, tpu.core_type = #tpu.core_type<tc>} {
    %c0 = arith.constant 0 : index
    %c0_0 = arith.constant 0 : index
    %0 = vector.load %arg0[%c0, %c0_0] : memref<64x129xf32, #tpu.memory_space<vmem>>, vector<64x129xf32>
    %c0_1 = arith.constant 0 : index
    %c0_2 = arith.constant 0 : index
    %c0_3 = arith.constant 0 : index
    %c0_4 = arith.constant 0 : index
    %1 = vector.load %arg1[%c0_1, %c0_2, %c0_3, %c0_4] : memref<2x3x129x129xf32, #tpu.memory_space<vmem>>, vector<1x1x129x129xf32>
    %2 = vector.shape_cast %1 : vector<1x1x129x129xf32> to vector<129x129xf32>
    %cst = arith.constant dense<0.000000e+00> : vector<64x129xf32>
    %3 = tpu.matmul %0, %2, %cst {dimension_numbers = #tpu.dot_dimension_numbers<[1], [0], [0], [1], [0, 0, 1, 1], [], []>} : vector<64x129xf32>, vector<129x129xf32>, vector<64x129xf32> -> vector<64x129xf32>
    %c0_5 = arith.constant 0 : index
    %c0_6 = arith.constant 0 : index
    %c0_7 = arith.constant 0 : index
    %c0_8 = arith.constant 0 : index
    %4 = vector.load %arg3[%c0_5, %c0_6, %c0_7, %c0_8] : memref<2x3x1x129xf32, #tpu.memory_space<vmem>>, vector<1x1x1x129xf32>
    %5 = vector.shape_cast %4 : vector<1x1x1x129xf32> to vector<1x129xf32>
    %6 = vector.broadcast %5 : vector<1x129xf32> to vector<64x129xf32>
    %7 = arith.addf %3, %6 : vector<64x129xf32>
    %c0_9 = arith.constant 0 : index
    %c0_10 = arith.constant 0 : index
    %c0_11 = arith.constant 0 : index
    %8 = vector.load %arg6[%c0_9, %c0_10, %c0_11] : memref<3x64x129xf32, #tpu.memory_space<vmem>>, vector<1x64x129xf32>
    %9 = vector.shape_cast %8 : vector<1x64x129xf32> to vector<64x129xf32>
    %10 = vector.shape_cast %7 : vector<64x129xf32> to vector<1x64x129xf32>
    tpu.vector_store %arg6[%c0_9, %c0_10, %c0_11], %10 {strides = array<i32>} : memref<3x64x129xf32, #tpu.memory_space<vmem>>, vector<1x64x129xf32>,
    %c0_12 = arith.constant 0 : index
    %c1 = arith.constant 1 : index
    %c0_13 = arith.constant 0 : index
    %c0_14 = arith.constant 0 : index
    %11 = vector.load %arg1[%c0_12, %c1, %c0_13, %c0_14] : memref<2x3x129x129xf32, #tpu.memory_space<vmem>>, vector<1x1x129x129xf32>
    %12 = vector.shape_cast %11 : vector<1x1x129x129xf32> to vector<129x129xf32>
    %cst_15 = arith.constant dense<0.000000e+00> : vector<64x129xf32>
    %13 = tpu.matmul %0, %12, %cst_15 {dimension_numbers = #tpu.dot_dimension_numbers<[1], [0], [0], [1], [0, 0, 1, 1], [], []>} : vector<64x129xf32>, vector<129x129xf32>, vector<64x129xf32> -> vector<64x129xf32>
    %c0_16 = arith.constant 0 : index
    %c1_17 = arith.constant 1 : index
    %c0_18 = arith.constant 0 : index
    %c0_19 = arith.constant 0 : index
    %14 = vector.load %arg3[%c0_16, %c1_17, %c0_18, %c0_19] : memref<2x3x1x129xf32, #tpu.memory_space<vmem>>, vector<1x1x1x129xf32>
    %15 = vector.shape_cast %14 : vector<1x1x1x129xf32> to vector<1x129xf32>
    %16 = vector.broadcast %15 : vector<1x129xf32> to vector<64x129xf32>
    %17 = arith.addf %13, %16 : vector<64x129xf32>
    %c1_20 = arith.constant 1 : index
    %c0_21 = arith.constant 0 : index
    %c0_22 = arith.constant 0 : index
    %18 = vector.load %arg6[%c1_20, %c0_21, %c0_22] : memref<3x64x129xf32, #tpu.memory_space<vmem>>, vector<1x64x129xf32>
    %19 = vector.shape_cast %18 : vector<1x64x129xf32> to vector<64x129xf32>
    %20 = vector.shape_cast %17 : vector<64x129xf32> to vector<1x64x129xf32>
    tpu.vector_store %arg6[%c1_20, %c0_21, %c0_22], %20 {strides = array<i32>} : memref<3x64x129xf32, #tpu.memory_space<vmem>>, vector<1x64x129xf32>,
    %c0_23 = arith.constant 0 : index
    %c2 = arith.constant 2 : index
    %c0_24 = arith.constant 0 : index
    %c0_25 = arith.constant 0 : index
    %21 = vector.load %arg1[%c0_23, %c2, %c0_24, %c0_25] : memref<2x3x129x129xf32, #tpu.memory_space<vmem>>, vector<1x1x129x129xf32>
    %22 = vector.shape_cast %21 : vector<1x1x129x129xf32> to vector<129x129xf32>
    %cst_26 = arith.constant dense<0.000000e+00> : vector<64x129xf32>
    %23 = tpu.matmul %0, %22, %cst_26 {dimension_numbers = #tpu.dot_dimension_numbers<[1], [0], [0], [1], [0, 0, 1, 1], [], []>} : vector<64x129xf32>, vector<129x129xf32>, vector<64x129xf32> -> vector<64x129xf32>
    %c0_27 = arith.constant 0 : index
    %c2_28 = arith.constant 2 : index
    %c0_29 = arith.constant 0 : index
    %c0_30 = arith.constant 0 : index
    %24 = vector.load %arg3[%c0_27, %c2_28, %c0_29, %c0_30] : memref<2x3x1x129xf32, #tpu.memory_space<vmem>>, vector<1x1x1x129xf32>
    %25 = vector.shape_cast %24 : vector<1x1x1x129xf32> to vector<1x129xf32>
    %26 = vector.broadcast %25 : vector<1x129xf32> to vector<64x129xf32>
    %27 = arith.addf %23, %26 : vector<64x129xf32>
    %c2_31 = arith.constant 2 : index
    %c0_32 = arith.constant 0 : index
    %c0_33 = arith.constant 0 : index
    %28 = vector.load %arg6[%c2_31, %c0_32, %c0_33] : memref<3x64x129xf32, #tpu.memory_space<vmem>>, vector<1x64x129xf32>
    %29 = vector.shape_cast %28 : vector<1x64x129xf32> to vector<64x129xf32>
    %30 = vector.shape_cast %27 : vector<64x129xf32> to vector<1x64x129xf32>
    tpu.vector_store %arg6[%c2_31, %c0_32, %c0_33], %30 {strides = array<i32>} : memref<3x64x129xf32, #tpu.memory_space<vmem>>, vector<1x64x129xf32>,
    %cst_34 = arith.constant 0.000000e+00 : f32
    %31 = vector.broadcast %cst_34 : f32 to vector<8x129xf32>
    %c0_35 = arith.constant 0 : index
    %c0_36 = arith.constant 0 : index
    %c0_37 = arith.constant 0 : index
    %c0_38 = arith.constant 0 : index
    %32 = vector.load %arg2[%c0_35, %c0_36, %c0_37, %c0_38] : memref<2x3x129x129xf32, #tpu.memory_space<vmem>>, vector<1x1x129x129xf32>
    %33 = vector.shape_cast %32 : vector<1x1x129x129xf32> to vector<129x129xf32>
    %cst_39 = arith.constant dense<0.000000e+00> : vector<8x129xf32>
    %34 = tpu.matmul %31, %33, %cst_39 {dimension_numbers = #tpu.dot_dimension_numbers<[1], [0], [0], [1], [0, 0, 1, 1], [], []>} : vector<8x129xf32>, vector<129x129xf32>, vector<8x129xf32> -> vector<8x129xf32>
    %c0_40 = arith.constant 0 : index
    %c1_41 = arith.constant 1 : index
    %c0_42 = arith.constant 0 : index
    %c0_43 = arith.constant 0 : index
    %35 = vector.load %arg2[%c0_40, %c1_41, %c0_42, %c0_43] : memref<2x3x129x129xf32, #tpu.memory_space<vmem>>, vector<1x1x129x129xf32>
    %36 = vector.shape_cast %35 : vector<1x1x129x129xf32> to vector<129x129xf32>
    %cst_44 = arith.constant dense<0.000000e+00> : vector<8x129xf32>
    %37 = tpu.matmul %31, %36, %cst_44 {dimension_numbers = #tpu.dot_dimension_numbers<[1], [0], [0], [1], [0, 0, 1, 1], [], []>} : vector<8x129xf32>, vector<129x129xf32>, vector<8x129xf32> -> vector<8x129xf32>
    %c0_45 = arith.constant 0 : index
    %c2_46 = arith.constant 2 : index
    %c0_47 = arith.constant 0 : index
    %c0_48 = arith.constant 0 : index
    %38 = vector.load %arg2[%c0_45, %c2_46, %c0_47, %c0_48] : memref<2x3x129x129xf32, #tpu.memory_space<vmem>>, vector<1x1x129x129xf32>
    %39 = vector.shape_cast %38 : vector<1x1x129x129xf32> to vector<129x129xf32>
    %cst_49 = arith.constant dense<0.000000e+00> : vector<8x129xf32>
    %40 = tpu.matmul %31, %39, %cst_49 {dimension_numbers = #tpu.dot_dimension_numbers<[1], [0], [0], [1], [0, 0, 1, 1], [], []>} : vector<8x129xf32>, vector<129x129xf32>, vector<8x129xf32> -> vector<8x129xf32>
    %c0_50 = arith.constant 0 : index
    %c0_51 = arith.constant 0 : index
    %c0_52 = arith.constant 0 : index
    %41 = vector.load %arg4[%c0_50, %c0_51, %c0_52] : memref<2x1x129xf32, #tpu.memory_space<vmem>>, vector<1x1x129xf32>
    %42 = vector.shape_cast %41 : vector<1x1x129xf32> to vector<1x129xf32>
    %43 = vector.broadcast %42 : vector<1x129xf32> to vector<8x129xf32>
    %44 = arith.addf %40, %43 : vector<8x129xf32>
    %c0_53 = arith.constant 0 : index
    %c0_54 = arith.constant 0 : index
    %c0_55 = arith.constant 0 : index
    %45 = vector.load %arg6[%c0_53, %c0_54, %c0_55] : memref<3x64x129xf32, #tpu.memory_space<vmem>>, vector<1x8x129xf32>
    %46 = vector.shape_cast %45 : vector<1x8x129xf32> to vector<8x129xf32>
    %47 = arith.addf %46, %34 : vector<8x129xf32>
    %48 = arith.negf %47 : vector<8x129xf32>
    %49 = math.exp %48 : vector<8x129xf32>
    %cst_56 = arith.constant 1.000000e+00 : f32
    %50 = vector.broadcast %cst_56 : f32 to vector<8x129xf32>
    %51 = arith.addf %50, %49 : vector<8x129xf32>
    %52 = arith.divf %50, %51 : vector<8x129xf32>
    %c1_57 = arith.constant 1 : index
    %c0_58 = arith.constant 0 : index
    %c0_59 = arith.constant 0 : index
    %53 = vector.load %arg6[%c1_57, %c0_58, %c0_59] : memref<3x64x129xf32, #tpu.memory_space<vmem>>, vector<1x8x129xf32>
    %54 = vector.shape_cast %53 : vector<1x8x129xf32> to vector<8x129xf32>
    %55 = arith.addf %54, %37 : vector<8x129xf32>
    %56 = arith.negf %55 : vector<8x129xf32>
    %57 = math.exp %56 : vector<8x129xf32>
    %cst_60 = arith.constant 1.000000e+00 : f32
    %58 = vector.broadcast %cst_60 : f32 to vector<8x129xf32>
    %59 = arith.addf %58, %57 : vector<8x129xf32>
    %60 = arith.divf %58, %59 : vector<8x129xf32>
    %c2_61 = arith.constant 2 : index
    %c0_62 = arith.constant 0 : index
    %c0_63 = arith.constant 0 : index
    %61 = vector.load %arg6[%c2_61, %c0_62, %c0_63] : memref<3x64x129xf32, #tpu.memory_space<vmem>>, vector<1x8x129xf32>
    %62 = vector.shape_cast %61 : vector<1x8x129xf32> to vector<8x129xf32>
    %63 = arith.mulf %52, %44 : vector<8x129xf32>
    %64 = arith.addf %62, %63 : vector<8x129xf32>
    %65 = math.tanh %64 : vector<8x129xf32>
    %cst_64 = arith.constant 1.000000e+00 : f32
    %66 = vector.broadcast %cst_64 : f32 to vector<8x129xf32>
    %67 = arith.subf %66, %60 : vector<8x129xf32>
    %68 = arith.mulf %67, %65 : vector<8x129xf32>
    %69 = arith.mulf %60, %31 : vector<8x129xf32>
    %70 = arith.addf %68, %69 : vector<8x129xf32>
    %c0_65 = arith.constant 0 : index
    %c0_66 = arith.constant 0 : index
    %71 = vector.load %arg5[%c0_65, %c0_66] : memref<64x129xf32, #tpu.memory_space<vmem>>, vector<8x129xf32>
    tpu.vector_store %arg5[%c0_65, %c0_66], %70 {strides = array<i32>} : memref<64x129xf32, #tpu.memory_space<vmem>>, vector<8x129xf32>,
    %c0_67 = arith.constant 0 : index
    %c0_68 = arith.constant 0 : index
    %c0_69 = arith.constant 0 : index
    %c0_70 = arith.constant 0 : index
    %72 = vector.load %arg2[%c0_67, %c0_68, %c0_69, %c0_70] : memref<2x3x129x129xf32, #tpu.memory_space<vmem>>, vector<1x1x129x129xf32>
    %73 = vector.shape_cast %72 : vector<1x1x129x129xf32> to vector<129x129xf32>
    %cst_71 = arith.constant dense<0.000000e+00> : vector<8x129xf32>
    %74 = tpu.matmul %70, %73, %cst_71 {dimension_numbers = #tpu.dot_dimension_numbers<[1], [0], [0], [1], [0, 0, 1, 1], [], []>} : vector<8x129xf32>, vector<129x129xf32>, vector<8x129xf32> -> vector<8x129xf32>
    %c0_72 = arith.constant 0 : index
    %c1_73 = arith.constant 1 : index
    %c0_74 = arith.constant 0 : index
    %c0_75 = arith.constant 0 : index
    %75 = vector.load %arg2[%c0_72, %c1_73, %c0_74, %c0_75] : memref<2x3x129x129xf32, #tpu.memory_space<vmem>>, vector<1x1x129x129xf32>
    %76 = vector.shape_cast %75 : vector<1x1x129x129xf32> to vector<129x129xf32>
    %cst_76 = arith.constant dense<0.000000e+00> : vector<8x129xf32>
    %77 = tpu.matmul %70, %76, %cst_76 {dimension_numbers = #tpu.dot_dimension_numbers<[1], [0], [0], [1], [0, 0, 1, 1], [], []>} : vector<8x129xf32>, vector<129x129xf32>, vector<8x129xf32> -> vector<8x129xf32>
    %c0_77 = arith.constant 0 : index
    %c2_78 = arith.constant 2 : index
    %c0_79 = arith.constant 0 : index
    %c0_80 = arith.constant 0 : index
    %78 = vector.load %arg2[%c0_77, %c2_78, %c0_79, %c0_80] : memref<2x3x129x129xf32, #tpu.memory_space<vmem>>, vector<1x1x129x129xf32>
    %79 = vector.shape_cast %78 : vector<1x1x129x129xf32> to vector<129x129xf32>
    %cst_81 = arith.constant dense<0.000000e+00> : vector<8x129xf32>
    %80 = tpu.matmul %70, %79, %cst_81 {dimension_numbers = #tpu.dot_dimension_numbers<[1], [0], [0], [1], [0, 0, 1, 1], [], []>} : vector<8x129xf32>, vector<129x129xf32>, vector<8x129xf32> -> vector<8x129xf32>
    %c0_82 = arith.constant 0 : index
    %c0_83 = arith.constant 0 : index
    %c0_84 = arith.constant 0 : index
    %81 = vector.load %arg4[%c0_82, %c0_83, %c0_84] : memref<2x1x129xf32, #tpu.memory_space<vmem>>, vector<1x1x129xf32>
    %82 = vector.shape_cast %81 : vector<1x1x129xf32> to vector<1x129xf32>
    %83 = vector.broadcast %82 : vector<1x129xf32> to vector<8x129xf32>
    %84 = arith.addf %80, %83 : vector<8x129xf32>
    %c0_85 = arith.constant 0 : index
    %c8 = arith.constant 8 : index
    %c0_86 = arith.constant 0 : index
    %85 = vector.load %arg6[%c0_85, %c8, %c0_86] : memref<3x64x129xf32, #tpu.memory_space<vmem>>, vector<1x8x129xf32>
    %86 = vector.shape_cast %85 : vector<1x8x129xf32> to vector<8x129xf32>
    %87 = arith.addf %86, %74 : vector<8x129xf32>
    %88 = arith.negf %87 : vector<8x129xf32>
    %89 = math.exp %88 : vector<8x129xf32>
    %cst_87 = arith.constant 1.000000e+00 : f32
    %90 = vector.broadcast %cst_87 : f32 to vector<8x129xf32>
    %91 = arith.addf %90, %89 : vector<8x129xf32>
    %92 = arith.divf %90, %91 : vector<8x129xf32>
    %c1_88 = arith.constant 1 : index
    %c8_89 = arith.constant 8 : index
    %c0_90 = arith.constant 0 : index
    %93 = vector.load %arg6[%c1_88, %c8_89, %c0_90] : memref<3x64x129xf32, #tpu.memory_space<vmem>>, vector<1x8x129xf32>
    %94 = vector.shape_cast %93 : vector<1x8x129xf32> to vector<8x129xf32>
    %95 = arith.addf %94, %77 : vector<8x129xf32>
    %96 = arith.negf %95 : vector<8x129xf32>
    %97 = math.exp %96 : vector<8x129xf32>
    %cst_91 = arith.constant 1.000000e+00 : f32
    %98 = vector.broadcast %cst_91 : f32 to vector<8x129xf32>
    %99 = arith.addf %98, %97 : vector<8x129xf32>
    %100 = arith.divf %98, %99 : vector<8x129xf32>
    %c2_92 = arith.constant 2 : index
    %c8_93 = arith.constant 8 : index
    %c0_94 = arith.constant 0 : index
    %101 = vector.load %arg6[%c2_92, %c8_93, %c0_94] : memref<3x64x129xf32, #tpu.memory_space<vmem>>, vector<1x8x129xf32>
    %102 = vector.shape_cast %101 : vector<1x8x129xf32> to vector<8x129xf32>
    %103 = arith.mulf %92, %84 : vector<8x129xf32>
    %104 = arith.addf %102, %103 : vector<8x129xf32>
    %105 = math.tanh %104 : vector<8x129xf32>
    %cst_95 = arith.constant 1.000000e+00 : f32
    %106 = vector.broadcast %cst_95 : f32 to vector<8x129xf32>
    %107 = arith.subf %106, %100 : vector<8x129xf32>
    %108 = arith.mulf %107, %105 : vector<8x129xf32>
    %109 = arith.mulf %100, %70 : vector<8x129xf32>
    %110 = arith.addf %108, %109 : vector<8x129xf32>
    %c8_96 = arith.constant 8 : index
    %c0_97 = arith.constant 0 : index
    %111 = vector.load %arg5[%c8_96, %c0_97] : memref<64x129xf32, #tpu.memory_space<vmem>>, vector<8x129xf32>
    tpu.vector_store %arg5[%c8_96, %c0_97], %110 {strides = array<i32>} : memref<64x129xf32, #tpu.memory_space<vmem>>, vector<8x129xf32>,
    %c0_98 = arith.constant 0 : index
    %c0_99 = arith.constant 0 : index
    %c0_100 = arith.constant 0 : index
    %c0_101 = arith.constant 0 : index
    %112 = vector.load %arg2[%c0_98, %c0_99, %c0_100, %c0_101] : memref<2x3x129x129xf32, #tpu.memory_space<vmem>>, vector<1x1x129x129xf32>
    %113 = vector.shape_cast %112 : vector<1x1x129x129xf32> to vector<129x129xf32>
    %cst_102 = arith.constant dense<0.000000e+00> : vector<8x129xf32>
    %114 = tpu.matmul %110, %113, %cst_102 {dimension_numbers = #tpu.dot_dimension_numbers<[1], [0], [0], [1], [0, 0, 1, 1], [], []>} : vector<8x129xf32>, vector<129x129xf32>, vector<8x129xf32> -> vector<8x129xf32>
    %c0_103 = arith.constant 0 : index
    %c1_104 = arith.constant 1 : index
    %c0_105 = arith.constant 0 : index
    %c0_106 = arith.constant 0 : index
    %115 = vector.load %arg2[%c0_103, %c1_104, %c0_105, %c0_106] : memref<2x3x129x129xf32, #tpu.memory_space<vmem>>, vector<1x1x129x129xf32>
    %116 = vector.shape_cast %115 : vector<1x1x129x129xf32> to vector<129x129xf32>
    %cst_107 = arith.constant dense<0.000000e+00> : vector<8x129xf32>
    %117 = tpu.matmul %110, %116, %cst_107 {dimension_numbers = #tpu.dot_dimension_numbers<[1], [0], [0], [1], [0, 0, 1, 1], [], []>} : vector<8x129xf32>, vector<129x129xf32>, vector<8x129xf32> -> vector<8x129xf32>
    %c0_108 = arith.constant 0 : index
    %c2_109 = arith.constant 2 : index
    %c0_110 = arith.constant 0 : index
    %c0_111 = arith.constant 0 : index
    %118 = vector.load %arg2[%c0_108, %c2_109, %c0_110, %c0_111] : memref<2x3x129x129xf32, #tpu.memory_space<vmem>>, vector<1x1x129x129xf32>
    %119 = vector.shape_cast %118 : vector<1x1x129x129xf32> to vector<129x129xf32>
    %cst_112 = arith.constant dense<0.000000e+00> : vector<8x129xf32>
    %120 = tpu.matmul %110, %119, %cst_112 {dimension_numbers = #tpu.dot_dimension_numbers<[1], [0], [0], [1], [0, 0, 1, 1], [], []>} : vector<8x129xf32>, vector<129x129xf32>, vector<8x129xf32> -> vector<8x129xf32>
    %c0_113 = arith.constant 0 : index
    %c0_114 = arith.constant 0 : index
    %c0_115 = arith.constant 0 : index
    %121 = vector.load %arg4[%c0_113, %c0_114, %c0_115] : memref<2x1x129xf32, #tpu.memory_space<vmem>>, vector<1x1x129xf32>
    %122 = vector.shape_cast %121 : vector<1x1x129xf32> to vector<1x129xf32>
    %123 = vector.broadcast %122 : vector<1x129xf32> to vector<8x129xf32>
    %124 = arith.addf %120, %123 : vector<8x129xf32>
    %c0_116 = arith.constant 0 : index
    %c16 = arith.constant 16 : index
    %c0_117 = arith.constant 0 : index
    %125 = vector.load %arg6[%c0_116, %c16, %c0_117] : memref<3x64x129xf32, #tpu.memory_space<vmem>>, vector<1x8x129xf32>
    %126 = vector.shape_cast %125 : vector<1x8x129xf32> to vector<8x129xf32>
    %127 = arith.addf %126, %114 : vector<8x129xf32>
    %128 = arith.negf %127 : vector<8x129xf32>
    %129 = math.exp %128 : vector<8x129xf32>
    %cst_118 = arith.constant 1.000000e+00 : f32
    %130 = vector.broadcast %cst_118 : f32 to vector<8x129xf32>
    %131 = arith.addf %130, %129 : vector<8x129xf32>
    %132 = arith.divf %130, %131 : vector<8x129xf32>
    %c1_119 = arith.constant 1 : index
    %c16_120 = arith.constant 16 : index
    %c0_121 = arith.constant 0 : index
    %133 = vector.load %arg6[%c1_119, %c16_120, %c0_121] : memref<3x64x129xf32, #tpu.memory_space<vmem>>, vector<1x8x129xf32>
    %134 = vector.shape_cast %133 : vector<1x8x129xf32> to vector<8x129xf32>
    %135 = arith.addf %134, %117 : vector<8x129xf32>
    %136 = arith.negf %135 : vector<8x129xf32>
    %137 = math.exp %136 : vector<8x129xf32>
    %cst_122 = arith.constant 1.000000e+00 : f32
    %138 = vector.broadcast %cst_122 : f32 to vector<8x129xf32>
    %139 = arith.addf %138, %137 : vector<8x129xf32>
    %140 = arith.divf %138, %139 : vector<8x129xf32>
    %c2_123 = arith.constant 2 : index
    %c16_124 = arith.constant 16 : index
    %c0_125 = arith.constant 0 : index
    %141 = vector.load %arg6[%c2_123, %c16_124, %c0_125] : memref<3x64x129xf32, #tpu.memory_space<vmem>>, vector<1x8x129xf32>
    %142 = vector.shape_cast %141 : vector<1x8x129xf32> to vector<8x129xf32>
    %143 = arith.mulf %132, %124 : vector<8x129xf32>
    %144 = arith.addf %142, %143 : vector<8x129xf32>
    %145 = math.tanh %144 : vector<8x129xf32>
    %cst_126 = arith.constant 1.000000e+00 : f32
    %146 = vector.broadcast %cst_126 : f32 to vector<8x129xf32>
    %147 = arith.subf %146, %140 : vector<8x129xf32>
    %148 = arith.mulf %147, %145 : vector<8x129xf32>
    %149 = arith.mulf %140, %110 : vector<8x129xf32>
    %150 = arith.addf %148, %149 : vector<8x129xf32>
    %c16_127 = arith.constant 16 : index
    %c0_128 = arith.constant 0 : index
    %151 = vector.load %arg5[%c16_127, %c0_128] : memref<64x129xf32, #tpu.memory_space<vmem>>, vector<8x129xf32>
    tpu.vector_store %arg5[%c16_127, %c0_128], %150 {strides = array<i32>} : memref<64x129xf32, #tpu.memory_space<vmem>>, vector<8x129xf32>,
    %c0_129 = arith.constant 0 : index
    %c0_130 = arith.constant 0 : index
    %c0_131 = arith.constant 0 : index
    %c0_132 = arith.constant 0 : index
    %152 = vector.load %arg2[%c0_129, %c0_130, %c0_131, %c0_132] : memref<2x3x129x129xf32, #tpu.memory_space<vmem>>, vector<1x1x129x129xf32>
    %153 = vector.shape_cast %152 : vector<1x1x129x129xf32> to vector<129x129xf32>
    %cst_133 = arith.constant dense<0.000000e+00> : vector<8x129xf32>
    %154 = tpu.matmul %150, %153, %cst_133 {dimension_numbers = #tpu.dot_dimension_numbers<[1], [0], [0], [1], [0, 0, 1, 1], [], []>} : vector<8x129xf32>, vector<129x129xf32>, vector<8x129xf32> -> vector<8x129xf32>
    %c0_134 = arith.constant 0 : index
    %c1_135 = arith.constant 1 : index
    %c0_136 = arith.constant 0 : index
    %c0_137 = arith.constant 0 : index
    %155 = vector.load %arg2[%c0_134, %c1_135, %c0_136, %c0_137] : memref<2x3x129x129xf32, #tpu.memory_space<vmem>>, vector<1x1x129x129xf32>
    %156 = vector.shape_cast %155 : vector<1x1x129x129xf32> to vector<129x129xf32>
    %cst_138 = arith.constant dense<0.000000e+00> : vector<8x129xf32>
    %157 = tpu.matmul %150, %156, %cst_138 {dimension_numbers = #tpu.dot_dimension_numbers<[1], [0], [0], [1], [0, 0, 1, 1], [], []>} : vector<8x129xf32>, vector<129x129xf32>, vector<8x129xf32> -> vector<8x129xf32>
    %c0_139 = arith.constant 0 : index
    %c2_140 = arith.constant 2 : index
    %c0_141 = arith.constant 0 : index
    %c0_142 = arith.constant 0 : index
    %158 = vector.load %arg2[%c0_139, %c2_140, %c0_141, %c0_142] : memref<2x3x129x129xf32, #tpu.memory_space<vmem>>, vector<1x1x129x129xf32>
    %159 = vector.shape_cast %158 : vector<1x1x129x129xf32> to vector<129x129xf32>
    %cst_143 = arith.constant dense<0.000000e+00> : vector<8x129xf32>
    %160 = tpu.matmul %150, %159, %cst_143 {dimension_numbers = #tpu.dot_dimension_numbers<[1], [0], [0], [1], [0, 0, 1, 1], [], []>} : vector<8x129xf32>, vector<129x129xf32>, vector<8x129xf32> -> vector<8x129xf32>
    %c0_144 = arith.constant 0 : index
    %c0_145 = arith.constant 0 : index
    %c0_146 = arith.constant 0 : index
    %161 = vector.load %arg4[%c0_144, %c0_145, %c0_146] : memref<2x1x129xf32, #tpu.memory_space<vmem>>, vector<1x1x129xf32>
    %162 = vector.shape_cast %161 : vector<1x1x129xf32> to vector<1x129xf32>
    %163 = vector.broadcast %162 : vector<1x129xf32> to vector<8x129xf32>
    %164 = arith.addf %160, %163 : vector<8x129xf32>
    %c0_147 = arith.constant 0 : index
    %c24 = arith.constant 24 : index
    %c0_148 = arith.constant 0 : index
    %165 = vector.load %arg6[%c0_147, %c24, %c0_148] : memref<3x64x129xf32, #tpu.memory_space<vmem>>, vector<1x8x129xf32>
    %166 = vector.shape_cast %165 : vector<1x8x129xf32> to vector<8x129xf32>
    %167 = arith.addf %166, %154 : vector<8x129xf32>
    %168 = arith.negf %167 : vector<8x129xf32>
    %169 = math.exp %168 : vector<8x129xf32>
    %cst_149 = arith.constant 1.000000e+00 : f32
    %170 = vector.broadcast %cst_149 : f32 to vector<8x129xf32>
    %171 = arith.addf %170, %169 : vector<8x129xf32>
    %172 = arith.divf %170, %171 : vector<8x129xf32>
    %c1_150 = arith.constant 1 : index
    %c24_151 = arith.constant 24 : index
    %c0_152 = arith.constant 0 : index
    %173 = vector.load %arg6[%c1_150, %c24_151, %c0_152] : memref<3x64x129xf32, #tpu.memory_space<vmem>>, vector<1x8x129xf32>
    %174 = vector.shape_cast %173 : vector<1x8x129xf32> to vector<8x129xf32>
    %175 = arith.addf %174, %157 : vector<8x129xf32>
    %176 = arith.negf %175 : vector<8x129xf32>
    %177 = math.exp %176 : vector<8x129xf32>
    %cst_153 = arith.constant 1.000000e+00 : f32
    %178 = vector.broadcast %cst_153 : f32 to vector<8x129xf32>
    %179 = arith.addf %178, %177 : vector<8x129xf32>
    %180 = arith.divf %178, %179 : vector<8x129xf32>
    %c2_154 = arith.constant 2 : index
    %c24_155 = arith.constant 24 : index
    %c0_156 = arith.constant 0 : index
    %181 = vector.load %arg6[%c2_154, %c24_155, %c0_156] : memref<3x64x129xf32, #tpu.memory_space<vmem>>, vector<1x8x129xf32>
    %182 = vector.shape_cast %181 : vector<1x8x129xf32> to vector<8x129xf32>
    %183 = arith.mulf %172, %164 : vector<8x129xf32>
    %184 = arith.addf %182, %183 : vector<8x129xf32>
    %185 = math.tanh %184 : vector<8x129xf32>
    %cst_157 = arith.constant 1.000000e+00 : f32
    %186 = vector.broadcast %cst_157 : f32 to vector<8x129xf32>
    %187 = arith.subf %186, %180 : vector<8x129xf32>
    %188 = arith.mulf %187, %185 : vector<8x129xf32>
    %189 = arith.mulf %180, %150 : vector<8x129xf32>
    %190 = arith.addf %188, %189 : vector<8x129xf32>
    %c24_158 = arith.constant 24 : index
    %c0_159 = arith.constant 0 : index
    %191 = vector.load %arg5[%c24_158, %c0_159] : memref<64x129xf32, #tpu.memory_space<vmem>>, vector<8x129xf32>
    tpu.vector_store %arg5[%c24_158, %c0_159], %190 {strides = array<i32>} : memref<64x129xf32, #tpu.memory_space<vmem>>, vector<8x129xf32>,
    %c0_160 = arith.constant 0 : index
    %c0_161 = arith.constant 0 : index
    %c0_162 = arith.constant 0 : index
    %c0_163 = arith.constant 0 : index
    %192 = vector.load %arg2[%c0_160, %c0_161, %c0_162, %c0_163] : memref<2x3x129x129xf32, #tpu.memory_space<vmem>>, vector<1x1x129x129xf32>
    %193 = vector.shape_cast %192 : vector<1x1x129x129xf32> to vector<129x129xf32>
    %cst_164 = arith.constant dense<0.000000e+00> : vector<8x129xf32>
    %194 = tpu.matmul %190, %193, %cst_164 {dimension_numbers = #tpu.dot_dimension_numbers<[1], [0], [0], [1], [0, 0, 1, 1], [], []>} : vector<8x129xf32>, vector<129x129xf32>, vector<8x129xf32> -> vector<8x129xf32>
    %c0_165 = arith.constant 0 : index
    %c1_166 = arith.constant 1 : index
    %c0_167 = arith.constant 0 : index
    %c0_168 = arith.constant 0 : index
    %195 = vector.load %arg2[%c0_165, %c1_166, %c0_167, %c0_168] : memref<2x3x129x129xf32, #tpu.memory_space<vmem>>, vector<1x1x129x129xf32>
    %196 = vector.shape_cast %195 : vector<1x1x129x129xf32> to vector<129x129xf32>
    %cst_169 = arith.constant dense<0.000000e+00> : vector<8x129xf32>
    %197 = tpu.matmul %190, %196, %cst_169 {dimension_numbers = #tpu.dot_dimension_numbers<[1], [0], [0], [1], [0, 0, 1, 1], [], []>} : vector<8x129xf32>, vector<129x129xf32>, vector<8x129xf32> -> vector<8x129xf32>
    %c0_170 = arith.constant 0 : index
    %c2_171 = arith.constant 2 : index
    %c0_172 = arith.constant 0 : index
    %c0_173 = arith.constant 0 : index
    %198 = vector.load %arg2[%c0_170, %c2_171, %c0_172, %c0_173] : memref<2x3x129x129xf32, #tpu.memory_space<vmem>>, vector<1x1x129x129xf32>
    %199 = vector.shape_cast %198 : vector<1x1x129x129xf32> to vector<129x129xf32>
    %cst_174 = arith.constant dense<0.000000e+00> : vector<8x129xf32>
    %200 = tpu.matmul %190, %199, %cst_174 {dimension_numbers = #tpu.dot_dimension_numbers<[1], [0], [0], [1], [0, 0, 1, 1], [], []>} : vector<8x129xf32>, vector<129x129xf32>, vector<8x129xf32> -> vector<8x129xf32>
    %c0_175 = arith.constant 0 : index
    %c0_176 = arith.constant 0 : index
    %c0_177 = arith.constant 0 : index
    %201 = vector.load %arg4[%c0_175, %c0_176, %c0_177] : memref<2x1x129xf32, #tpu.memory_space<vmem>>, vector<1x1x129xf32>
    %202 = vector.shape_cast %201 : vector<1x1x129xf32> to vector<1x129xf32>
    %203 = vector.broadcast %202 : vector<1x129xf32> to vector<8x129xf32>
    %204 = arith.addf %200, %203 : vector<8x129xf32>
    %c0_178 = arith.constant 0 : index
    %c32 = arith.constant 32 : index
    %c0_179 = arith.constant 0 : index
    %205 = vector.load %arg6[%c0_178, %c32, %c0_179] : memref<3x64x129xf32, #tpu.memory_space<vmem>>, vector<1x8x129xf32>
    %206 = vector.shape_cast %205 : vector<1x8x129xf32> to vector<8x129xf32>
    %207 = arith.addf %206, %194 : vector<8x129xf32>
    %208 = arith.negf %207 : vector<8x129xf32>
    %209 = math.exp %208 : vector<8x129xf32>
    %cst_180 = arith.constant 1.000000e+00 : f32
    %210 = vector.broadcast %cst_180 : f32 to vector<8x129xf32>
    %211 = arith.addf %210, %209 : vector<8x129xf32>
    %212 = arith.divf %210, %211 : vector<8x129xf32>
    %c1_181 = arith.constant 1 : index
    %c32_182 = arith.constant 32 : index
    %c0_183 = arith.constant 0 : index
    %213 = vector.load %arg6[%c1_181, %c32_182, %c0_183] : memref<3x64x129xf32, #tpu.memory_space<vmem>>, vector<1x8x129xf32>
    %214 = vector.shape_cast %213 : vector<1x8x129xf32> to vector<8x129xf32>
    %215 = arith.addf %214, %197 : vector<8x129xf32>
    %216 = arith.negf %215 : vector<8x129xf32>
    %217 = math.exp %216 : vector<8x129xf32>
    %cst_184 = arith.constant 1.000000e+00 : f32
    %218 = vector.broadcast %cst_184 : f32 to vector<8x129xf32>
    %219 = arith.addf %218, %217 : vector<8x129xf32>
    %220 = arith.divf %218, %219 : vector<8x129xf32>
    %c2_185 = arith.constant 2 : index
    %c32_186 = arith.constant 32 : index
    %c0_187 = arith.constant 0 : index
    %221 = vector.load %arg6[%c2_185, %c32_186, %c0_187] : memref<3x64x129xf32, #tpu.memory_space<vmem>>, vector<1x8x129xf32>
    %222 = vector.shape_cast %221 : vector<1x8x129xf32> to vector<8x129xf32>
    %223 = arith.mulf %212, %204 : vector<8x129xf32>
    %224 = arith.addf %222, %223 : vector<8x129xf32>
    %225 = math.tanh %224 : vector<8x129xf32>
    %cst_188 = arith.constant 1.000000e+00 : f32
    %226 = vector.broadcast %cst_188 : f32 to vector<8x129xf32>
    %227 = arith.subf %226, %220 : vector<8x129xf32>
    %228 = arith.mulf %227, %225 : vector<8x129xf32>
    %229 = arith.mulf %220, %190 : vector<8x129xf32>
    %230 = arith.addf %228, %229 : vector<8x129xf32>
    %c32_189 = arith.constant 32 : index
    %c0_190 = arith.constant 0 : index
    %231 = vector.load %arg5[%c32_189, %c0_190] : memref<64x129xf32, #tpu.memory_space<vmem>>, vector<8x129xf32>
    tpu.vector_store %arg5[%c32_189, %c0_190], %230 {strides = array<i32>} : memref<64x129xf32, #tpu.memory_space<vmem>>, vector<8x129xf32>,
    %c0_191 = arith.constant 0 : index
    %c0_192 = arith.constant 0 : index
    %c0_193 = arith.constant 0 : index
    %c0_194 = arith.constant 0 : index
    %232 = vector.load %arg2[%c0_191, %c0_192, %c0_193, %c0_194] : memref<2x3x129x129xf32, #tpu.memory_space<vmem>>, vector<1x1x129x129xf32>
    %233 = vector.shape_cast %232 : vector<1x1x129x129xf32> to vector<129x129xf32>
    %cst_195 = arith.constant dense<0.000000e+00> : vector<8x129xf32>
    %234 = tpu.matmul %230, %233, %cst_195 {dimension_numbers = #tpu.dot_dimension_numbers<[1], [0], [0], [1], [0, 0, 1, 1], [], []>} : vector<8x129xf32>, vector<129x129xf32>, vector<8x129xf32> -> vector<8x129xf32>
    %c0_196 = arith.constant 0 : index
    %c1_197 = arith.constant 1 : index
    %c0_198 = arith.constant 0 : index
    %c0_199 = arith.constant 0 : index
    %235 = vector.load %arg2[%c0_196, %c1_197, %c0_198, %c0_199] : memref<2x3x129x129xf32, #tpu.memory_space<vmem>>, vector<1x1x129x129xf32>
    %236 = vector.shape_cast %235 : vector<1x1x129x129xf32> to vector<129x129xf32>
    %cst_200 = arith.constant dense<0.000000e+00> : vector<8x129xf32>
    %237 = tpu.matmul %230, %236, %cst_200 {dimension_numbers = #tpu.dot_dimension_numbers<[1], [0], [0], [1], [0, 0, 1, 1], [], []>} : vector<8x129xf32>, vector<129x129xf32>, vector<8x129xf32> -> vector<8x129xf32>
    %c0_201 = arith.constant 0 : index
    %c2_202 = arith.constant 2 : index
    %c0_203 = arith.constant 0 : index
    %c0_204 = arith.constant 0 : index
    %238 = vector.load %arg2[%c0_201, %c2_202, %c0_203, %c0_204] : memref<2x3x129x129xf32, #tpu.memory_space<vmem>>, vector<1x1x129x129xf32>
    %239 = vector.shape_cast %238 : vector<1x1x129x129xf32> to vector<129x129xf32>
    %cst_205 = arith.constant dense<0.000000e+00> : vector<8x129xf32>
    %240 = tpu.matmul %230, %239, %cst_205 {dimension_numbers = #tpu.dot_dimension_numbers<[1], [0], [0], [1], [0, 0, 1, 1], [], []>} : vector<8x129xf32>, vector<129x129xf32>, vector<8x129xf32> -> vector<8x129xf32>
    %c0_206 = arith.constant 0 : index
    %c0_207 = arith.constant 0 : index
    %c0_208 = arith.constant 0 : index
    %241 = vector.load %arg4[%c0_206, %c0_207, %c0_208] : memref<2x1x129xf32, #tpu.memory_space<vmem>>, vector<1x1x129xf32>
    %242 = vector.shape_cast %241 : vector<1x1x129xf32> to vector<1x129xf32>
    %243 = vector.broadcast %242 : vector<1x129xf32> to vector<8x129xf32>
    %244 = arith.addf %240, %243 : vector<8x129xf32>
    %c0_209 = arith.constant 0 : index
    %c40 = arith.constant 40 : index
    %c0_210 = arith.constant 0 : index
    %245 = vector.load %arg6[%c0_209, %c40, %c0_210] : memref<3x64x129xf32, #tpu.memory_space<vmem>>, vector<1x8x129xf32>
    %246 = vector.shape_cast %245 : vector<1x8x129xf32> to vector<8x129xf32>
    %247 = arith.addf %246, %234 : vector<8x129xf32>
    %248 = arith.negf %247 : vector<8x129xf32>
    %249 = math.exp %248 : vector<8x129xf32>
    %cst_211 = arith.constant 1.000000e+00 : f32
    %250 = vector.broadcast %cst_211 : f32 to vector<8x129xf32>
    %251 = arith.addf %250, %249 : vector<8x129xf32>
    %252 = arith.divf %250, %251 : vector<8x129xf32>
    %c1_212 = arith.constant 1 : index
    %c40_213 = arith.constant 40 : index
    %c0_214 = arith.constant 0 : index
    %253 = vector.load %arg6[%c1_212, %c40_213, %c0_214] : memref<3x64x129xf32, #tpu.memory_space<vmem>>, vector<1x8x129xf32>
    %254 = vector.shape_cast %253 : vector<1x8x129xf32> to vector<8x129xf32>
    %255 = arith.addf %254, %237 : vector<8x129xf32>
    %256 = arith.negf %255 : vector<8x129xf32>
    %257 = math.exp %256 : vector<8x129xf32>
    %cst_215 = arith.constant 1.000000e+00 : f32
    %258 = vector.broadcast %cst_215 : f32 to vector<8x129xf32>
    %259 = arith.addf %258, %257 : vector<8x129xf32>
    %260 = arith.divf %258, %259 : vector<8x129xf32>
    %c2_216 = arith.constant 2 : index
    %c40_217 = arith.constant 40 : index
    %c0_218 = arith.constant 0 : index
    %261 = vector.load %arg6[%c2_216, %c40_217, %c0_218] : memref<3x64x129xf32, #tpu.memory_space<vmem>>, vector<1x8x129xf32>
    %262 = vector.shape_cast %261 : vector<1x8x129xf32> to vector<8x129xf32>
    %263 = arith.mulf %252, %244 : vector<8x129xf32>
    %264 = arith.addf %262, %263 : vector<8x129xf32>
    %265 = math.tanh %264 : vector<8x129xf32>
    %cst_219 = arith.constant 1.000000e+00 : f32
    %266 = vector.broadcast %cst_219 : f32 to vector<8x129xf32>
    %267 = arith.subf %266, %260 : vector<8x129xf32>
    %268 = arith.mulf %267, %265 : vector<8x129xf32>
    %269 = arith.mulf %260, %230 : vector<8x129xf32>
    %270 = arith.addf %268, %269 : vector<8x129xf32>
    %c40_220 = arith.constant 40 : index
    %c0_221 = arith.constant 0 : index
    %271 = vector.load %arg5[%c40_220, %c0_221] : memref<64x129xf32, #tpu.memory_space<vmem>>, vector<8x129xf32>
    tpu.vector_store %arg5[%c40_220, %c0_221], %270 {strides = array<i32>} : memref<64x129xf32, #tpu.memory_space<vmem>>, vector<8x129xf32>,
    %c0_222 = arith.constant 0 : index
    %c0_223 = arith.constant 0 : index
    %c0_224 = arith.constant 0 : index
    %c0_225 = arith.constant 0 : index
    %272 = vector.load %arg2[%c0_222, %c0_223, %c0_224, %c0_225] : memref<2x3x129x129xf32, #tpu.memory_space<vmem>>, vector<1x1x129x129xf32>
    %273 = vector.shape_cast %272 : vector<1x1x129x129xf32> to vector<129x129xf32>
    %cst_226 = arith.constant dense<0.000000e+00> : vector<8x129xf32>
    %274 = tpu.matmul %270, %273, %cst_226 {dimension_numbers = #tpu.dot_dimension_numbers<[1], [0], [0], [1], [0, 0, 1, 1], [], []>} : vector<8x129xf32>, vector<129x129xf32>, vector<8x129xf32> -> vector<8x129xf32>
    %c0_227 = arith.constant 0 : index
    %c1_228 = arith.constant 1 : index
    %c0_229 = arith.constant 0 : index
    %c0_230 = arith.constant 0 : index
    %275 = vector.load %arg2[%c0_227, %c1_228, %c0_229, %c0_230] : memref<2x3x129x129xf32, #tpu.memory_space<vmem>>, vector<1x1x129x129xf32>
    %276 = vector.shape_cast %275 : vector<1x1x129x129xf32> to vector<129x129xf32>
    %cst_231 = arith.constant dense<0.000000e+00> : vector<8x129xf32>
    %277 = tpu.matmul %270, %276, %cst_231 {dimension_numbers = #tpu.dot_dimension_numbers<[1], [0], [0], [1], [0, 0, 1, 1], [], []>} : vector<8x129xf32>, vector<129x129xf32>, vector<8x129xf32> -> vector<8x129xf32>
    %c0_232 = arith.constant 0 : index
    %c2_233 = arith.constant 2 : index
    %c0_234 = arith.constant 0 : index
    %c0_235 = arith.constant 0 : index
    %278 = vector.load %arg2[%c0_232, %c2_233, %c0_234, %c0_235] : memref<2x3x129x129xf32, #tpu.memory_space<vmem>>, vector<1x1x129x129xf32>
    %279 = vector.shape_cast %278 : vector<1x1x129x129xf32> to vector<129x129xf32>
    %cst_236 = arith.constant dense<0.000000e+00> : vector<8x129xf32>
    %280 = tpu.matmul %270, %279, %cst_236 {dimension_numbers = #tpu.dot_dimension_numbers<[1], [0], [0], [1], [0, 0, 1, 1], [], []>} : vector<8x129xf32>, vector<129x129xf32>, vector<8x129xf32> -> vector<8x129xf32>
    %c0_237 = arith.constant 0 : index
    %c0_238 = arith.constant 0 : index
    %c0_239 = arith.constant 0 : index
    %281 = vector.load %arg4[%c0_237, %c0_238, %c0_239] : memref<2x1x129xf32, #tpu.memory_space<vmem>>, vector<1x1x129xf32>
    %282 = vector.shape_cast %281 : vector<1x1x129xf32> to vector<1x129xf32>
    %283 = vector.broadcast %282 : vector<1x129xf32> to vector<8x129xf32>
    %284 = arith.addf %280, %283 : vector<8x129xf32>
    %c0_240 = arith.constant 0 : index
    %c48 = arith.constant 48 : index
    %c0_241 = arith.constant 0 : index
    %285 = vector.load %arg6[%c0_240, %c48, %c0_241] : memref<3x64x129xf32, #tpu.memory_space<vmem>>, vector<1x8x129xf32>
    %286 = vector.shape_cast %285 : vector<1x8x129xf32> to vector<8x129xf32>
    %287 = arith.addf %286, %274 : vector<8x129xf32>
    %288 = arith.negf %287 : vector<8x129xf32>
    %289 = math.exp %288 : vector<8x129xf32>
    %cst_242 = arith.constant 1.000000e+00 : f32
    %290 = vector.broadcast %cst_242 : f32 to vector<8x129xf32>
    %291 = arith.addf %290, %289 : vector<8x129xf32>
    %292 = arith.divf %290, %291 : vector<8x129xf32>
    %c1_243 = arith.constant 1 : index
    %c48_244 = arith.constant 48 : index
    %c0_245 = arith.constant 0 : index
    %293 = vector.load %arg6[%c1_243, %c48_244, %c0_245] : memref<3x64x129xf32, #tpu.memory_space<vmem>>, vector<1x8x129xf32>
    %294 = vector.shape_cast %293 : vector<1x8x129xf32> to vector<8x129xf32>
    %295 = arith.addf %294, %277 : vector<8x129xf32>
    %296 = arith.negf %295 : vector<8x129xf32>
    %297 = math.exp %296 : vector<8x129xf32>
    %cst_246 = arith.constant 1.000000e+00 : f32
    %298 = vector.broadcast %cst_246 : f32 to vector<8x129xf32>
    %299 = arith.addf %298, %297 : vector<8x129xf32>
    %300 = arith.divf %298, %299 : vector<8x129xf32>
    %c2_247 = arith.constant 2 : index
    %c48_248 = arith.constant 48 : index
    %c0_249 = arith.constant 0 : index
    %301 = vector.load %arg6[%c2_247, %c48_248, %c0_249] : memref<3x64x129xf32, #tpu.memory_space<vmem>>, vector<1x8x129xf32>
    %302 = vector.shape_cast %301 : vector<1x8x129xf32> to vector<8x129xf32>
    %303 = arith.mulf %292, %284 : vector<8x129xf32>
    %304 = arith.addf %302, %303 : vector<8x129xf32>
    %305 = math.tanh %304 : vector<8x129xf32>
    %cst_250 = arith.constant 1.000000e+00 : f32
    %306 = vector.broadcast %cst_250 : f32 to vector<8x129xf32>
    %307 = arith.subf %306, %300 : vector<8x129xf32>
    %308 = arith.mulf %307, %305 : vector<8x129xf32>
    %309 = arith.mulf %300, %270 : vector<8x129xf32>
    %310 = arith.addf %308, %309 : vector<8x129xf32>
    %c48_251 = arith.constant 48 : index
    %c0_252 = arith.constant 0 : index
    %311 = vector.load %arg5[%c48_251, %c0_252] : memref<64x129xf32, #tpu.memory_space<vmem>>, vector<8x129xf32>
    tpu.vector_store %arg5[%c48_251, %c0_252], %310 {strides = array<i32>} : memref<64x129xf32, #tpu.memory_space<vmem>>, vector<8x129xf32>,
    %c0_253 = arith.constant 0 : index
    %c0_254 = arith.constant 0 : index
    %c0_255 = arith.constant 0 : index
    %c0_256 = arith.constant 0 : index
    %312 = vector.load %arg2[%c0_253, %c0_254, %c0_255, %c0_256] : memref<2x3x129x129xf32, #tpu.memory_space<vmem>>, vector<1x1x129x129xf32>
    %313 = vector.shape_cast %312 : vector<1x1x129x129xf32> to vector<129x129xf32>
    %cst_257 = arith.constant dense<0.000000e+00> : vector<8x129xf32>
    %314 = tpu.matmul %310, %313, %cst_257 {dimension_numbers = #tpu.dot_dimension_numbers<[1], [0], [0], [1], [0, 0, 1, 1], [], []>} : vector<8x129xf32>, vector<129x129xf32>, vector<8x129xf32> -> vector<8x129xf32>
    %c0_258 = arith.constant 0 : index
    %c1_259 = arith.constant 1 : index
    %c0_260 = arith.constant 0 : index
    %c0_261 = arith.constant 0 : index
    %315 = vector.load %arg2[%c0_258, %c1_259, %c0_260, %c0_261] : memref<2x3x129x129xf32, #tpu.memory_space<vmem>>, vector<1x1x129x129xf32>
    %316 = vector.shape_cast %315 : vector<1x1x129x129xf32> to vector<129x129xf32>
    %cst_262 = arith.constant dense<0.000000e+00> : vector<8x129xf32>
    %317 = tpu.matmul %310, %316, %cst_262 {dimension_numbers = #tpu.dot_dimension_numbers<[1], [0], [0], [1], [0, 0, 1, 1], [], []>} : vector<8x129xf32>, vector<129x129xf32>, vector<8x129xf32> -> vector<8x129xf32>
    %c0_263 = arith.constant 0 : index
    %c2_264 = arith.constant 2 : index
    %c0_265 = arith.constant 0 : index
    %c0_266 = arith.constant 0 : index
    %318 = vector.load %arg2[%c0_263, %c2_264, %c0_265, %c0_266] : memref<2x3x129x129xf32, #tpu.memory_space<vmem>>, vector<1x1x129x129xf32>
    %319 = vector.shape_cast %318 : vector<1x1x129x129xf32> to vector<129x129xf32>
    %cst_267 = arith.constant dense<0.000000e+00> : vector<8x129xf32>
    %320 = tpu.matmul %310, %319, %cst_267 {dimension_numbers = #tpu.dot_dimension_numbers<[1], [0], [0], [1], [0, 0, 1, 1], [], []>} : vector<8x129xf32>, vector<129x129xf32>, vector<8x129xf32> -> vector<8x129xf32>
    %c0_268 = arith.constant 0 : index
    %c0_269 = arith.constant 0 : index
    %c0_270 = arith.constant 0 : index
    %321 = vector.load %arg4[%c0_268, %c0_269, %c0_270] : memref<2x1x129xf32, #tpu.memory_space<vmem>>, vector<1x1x129xf32>
    %322 = vector.shape_cast %321 : vector<1x1x129xf32> to vector<1x129xf32>
    %323 = vector.broadcast %322 : vector<1x129xf32> to vector<8x129xf32>
    %324 = arith.addf %320, %323 : vector<8x129xf32>
    %c0_271 = arith.constant 0 : index
    %c56 = arith.constant 56 : index
    %c0_272 = arith.constant 0 : index
    %325 = vector.load %arg6[%c0_271, %c56, %c0_272] : memref<3x64x129xf32, #tpu.memory_space<vmem>>, vector<1x8x129xf32>
    %326 = vector.shape_cast %325 : vector<1x8x129xf32> to vector<8x129xf32>
    %327 = arith.addf %326, %314 : vector<8x129xf32>
    %328 = arith.negf %327 : vector<8x129xf32>
    %329 = math.exp %328 : vector<8x129xf32>
    %cst_273 = arith.constant 1.000000e+00 : f32
    %330 = vector.broadcast %cst_273 : f32 to vector<8x129xf32>
    %331 = arith.addf %330, %329 : vector<8x129xf32>
    %332 = arith.divf %330, %331 : vector<8x129xf32>
    %c1_274 = arith.constant 1 : index
    %c56_275 = arith.constant 56 : index
    %c0_276 = arith.constant 0 : index
    %333 = vector.load %arg6[%c1_274, %c56_275, %c0_276] : memref<3x64x129xf32, #tpu.memory_space<vmem>>, vector<1x8x129xf32>
    %334 = vector.shape_cast %333 : vector<1x8x129xf32> to vector<8x129xf32>
    %335 = arith.addf %334, %317 : vector<8x129xf32>
    %336 = arith.negf %335 : vector<8x129xf32>
    %337 = math.exp %336 : vector<8x129xf32>
    %cst_277 = arith.constant 1.000000e+00 : f32
    %338 = vector.broadcast %cst_277 : f32 to vector<8x129xf32>
    %339 = arith.addf %338, %337 : vector<8x129xf32>
    %340 = arith.divf %338, %339 : vector<8x129xf32>
    %c2_278 = arith.constant 2 : index
    %c56_279 = arith.constant 56 : index
    %c0_280 = arith.constant 0 : index
    %341 = vector.load %arg6[%c2_278, %c56_279, %c0_280] : memref<3x64x129xf32, #tpu.memory_space<vmem>>, vector<1x8x129xf32>
    %342 = vector.shape_cast %341 : vector<1x8x129xf32> to vector<8x129xf32>
    %343 = arith.mulf %332, %324 : vector<8x129xf32>
    %344 = arith.addf %342, %343 : vector<8x129xf32>
    %345 = math.tanh %344 : vector<8x129xf32>
    %cst_281 = arith.constant 1.000000e+00 : f32
    %346 = vector.broadcast %cst_281 : f32 to vector<8x129xf32>
    %347 = arith.subf %346, %340 : vector<8x129xf32>
    %348 = arith.mulf %347, %345 : vector<8x129xf32>
    %349 = arith.mulf %340, %310 : vector<8x129xf32>
    %350 = arith.addf %348, %349 : vector<8x129xf32>
    %c56_282 = arith.constant 56 : index
    %c0_283 = arith.constant 0 : index
    %351 = vector.load %arg5[%c56_282, %c0_283] : memref<64x129xf32, #tpu.memory_space<vmem>>, vector<8x129xf32>
    tpu.vector_store %arg5[%c56_282, %c0_283], %350 {strides = array<i32>} : memref<64x129xf32, #tpu.memory_space<vmem>>, vector<8x129xf32>,
    %c0_284 = arith.constant 0 : index
    %c0_285 = arith.constant 0 : index
    %352 = vector.load %arg5[%c0_284, %c0_285] : memref<64x129xf32, #tpu.memory_space<vmem>>, vector<64x129xf32>
    %c1_286 = arith.constant 1 : index
    %c0_287 = arith.constant 0 : index
    %c0_288 = arith.constant 0 : index
    %c0_289 = arith.constant 0 : index
    %353 = vector.load %arg1[%c1_286, %c0_287, %c0_288, %c0_289] : memref<2x3x129x129xf32, #tpu.memory_space<vmem>>, vector<1x1x129x129xf32>
    %354 = vector.shape_cast %353 : vector<1x1x129x129xf32> to vector<129x129xf32>
    %cst_290 = arith.constant dense<0.000000e+00> : vector<64x129xf32>
    %355 = tpu.matmul %352, %354, %cst_290 {dimension_numbers = #tpu.dot_dimension_numbers<[1], [0], [0], [1], [0, 0, 1, 1], [], []>} : vector<64x129xf32>, vector<129x129xf32>, vector<64x129xf32> -> vector<64x129xf32>
    %c1_291 = arith.constant 1 : index
    %c0_292 = arith.constant 0 : index
    %c0_293 = arith.constant 0 : index
    %c0_294 = arith.constant 0 : index
    %356 = vector.load %arg3[%c1_291, %c0_292, %c0_293, %c0_294] : memref<2x3x1x129xf32, #tpu.memory_space<vmem>>, vector<1x1x1x129xf32>
    %357 = vector.shape_cast %356 : vector<1x1x1x129xf32> to vector<1x129xf32>
    %358 = vector.broadcast %357 : vector<1x129xf32> to vector<64x129xf32>
    %359 = arith.addf %355, %358 : vector<64x129xf32>
    %c0_295 = arith.constant 0 : index
    %c0_296 = arith.constant 0 : index
    %c0_297 = arith.constant 0 : index
    %360 = vector.load %arg6[%c0_295, %c0_296, %c0_297] : memref<3x64x129xf32, #tpu.memory_space<vmem>>, vector<1x64x129xf32>
    %361 = vector.shape_cast %360 : vector<1x64x129xf32> to vector<64x129xf32>
    %362 = vector.shape_cast %359 : vector<64x129xf32> to vector<1x64x129xf32>
    tpu.vector_store %arg6[%c0_295, %c0_296, %c0_297], %362 {strides = array<i32>} : memref<3x64x129xf32, #tpu.memory_space<vmem>>, vector<1x64x129xf32>,
    %c1_298 = arith.constant 1 : index
    %c1_299 = arith.constant 1 : index
    %c0_300 = arith.constant 0 : index
    %c0_301 = arith.constant 0 : index
    %363 = vector.load %arg1[%c1_298, %c1_299, %c0_300, %c0_301] : memref<2x3x129x129xf32, #tpu.memory_space<vmem>>, vector<1x1x129x129xf32>
    %364 = vector.shape_cast %363 : vector<1x1x129x129xf32> to vector<129x129xf32>
    %cst_302 = arith.constant dense<0.000000e+00> : vector<64x129xf32>
    %365 = tpu.matmul %352, %364, %cst_302 {dimension_numbers = #tpu.dot_dimension_numbers<[1], [0], [0], [1], [0, 0, 1, 1], [], []>} : vector<64x129xf32>, vector<129x129xf32>, vector<64x129xf32> -> vector<64x129xf32>
    %c1_303 = arith.constant 1 : index
    %c1_304 = arith.constant 1 : index
    %c0_305 = arith.constant 0 : index
    %c0_306 = arith.constant 0 : index
    %366 = vector.load %arg3[%c1_303, %c1_304, %c0_305, %c0_306] : memref<2x3x1x129xf32, #tpu.memory_space<vmem>>, vector<1x1x1x129xf32>
    %367 = vector.shape_cast %366 : vector<1x1x1x129xf32> to vector<1x129xf32>
    %368 = vector.broadcast %367 : vector<1x129xf32> to vector<64x129xf32>
    %369 = arith.addf %365, %368 : vector<64x129xf32>
    %c1_307 = arith.constant 1 : index
    %c0_308 = arith.constant 0 : index
    %c0_309 = arith.constant 0 : index
    %370 = vector.load %arg6[%c1_307, %c0_308, %c0_309] : memref<3x64x129xf32, #tpu.memory_space<vmem>>, vector<1x64x129xf32>
    %371 = vector.shape_cast %370 : vector<1x64x129xf32> to vector<64x129xf32>
    %372 = vector.shape_cast %369 : vector<64x129xf32> to vector<1x64x129xf32>
    tpu.vector_store %arg6[%c1_307, %c0_308, %c0_309], %372 {strides = array<i32>} : memref<3x64x129xf32, #tpu.memory_space<vmem>>, vector<1x64x129xf32>,
    %c1_310 = arith.constant 1 : index
    %c2_311 = arith.constant 2 : index
    %c0_312 = arith.constant 0 : index
    %c0_313 = arith.constant 0 : index
    %373 = vector.load %arg1[%c1_310, %c2_311, %c0_312, %c0_313] : memref<2x3x129x129xf32, #tpu.memory_space<vmem>>, vector<1x1x129x129xf32>
    %374 = vector.shape_cast %373 : vector<1x1x129x129xf32> to vector<129x129xf32>
    %cst_314 = arith.constant dense<0.000000e+00> : vector<64x129xf32>
    %375 = tpu.matmul %352, %374, %cst_314 {dimension_numbers = #tpu.dot_dimension_numbers<[1], [0], [0], [1], [0, 0, 1, 1], [], []>} : vector<64x129xf32>, vector<129x129xf32>, vector<64x129xf32> -> vector<64x129xf32>
    %c1_315 = arith.constant 1 : index
    %c2_316 = arith.constant 2 : index
    %c0_317 = arith.constant 0 : index
    %c0_318 = arith.constant 0 : index
    %376 = vector.load %arg3[%c1_315, %c2_316, %c0_317, %c0_318] : memref<2x3x1x129xf32, #tpu.memory_space<vmem>>, vector<1x1x1x129xf32>
    %377 = vector.shape_cast %376 : vector<1x1x1x129xf32> to vector<1x129xf32>
    %378 = vector.broadcast %377 : vector<1x129xf32> to vector<64x129xf32>
    %379 = arith.addf %375, %378 : vector<64x129xf32>
    %c2_319 = arith.constant 2 : index
    %c0_320 = arith.constant 0 : index
    %c0_321 = arith.constant 0 : index
    %380 = vector.load %arg6[%c2_319, %c0_320, %c0_321] : memref<3x64x129xf32, #tpu.memory_space<vmem>>, vector<1x64x129xf32>
    %381 = vector.shape_cast %380 : vector<1x64x129xf32> to vector<64x129xf32>
    %382 = vector.shape_cast %379 : vector<64x129xf32> to vector<1x64x129xf32>
    tpu.vector_store %arg6[%c2_319, %c0_320, %c0_321], %382 {strides = array<i32>} : memref<3x64x129xf32, #tpu.memory_space<vmem>>, vector<1x64x129xf32>,
    %cst_322 = arith.constant 0.000000e+00 : f32
    %383 = vector.broadcast %cst_322 : f32 to vector<8x129xf32>
    %c1_323 = arith.constant 1 : index
    %c0_324 = arith.constant 0 : index
    %c0_325 = arith.constant 0 : index
    %c0_326 = arith.constant 0 : index
    %384 = vector.load %arg2[%c1_323, %c0_324, %c0_325, %c0_326] : memref<2x3x129x129xf32, #tpu.memory_space<vmem>>, vector<1x1x129x129xf32>
    %385 = vector.shape_cast %384 : vector<1x1x129x129xf32> to vector<129x129xf32>
    %cst_327 = arith.constant dense<0.000000e+00> : vector<8x129xf32>
    %386 = tpu.matmul %383, %385, %cst_327 {dimension_numbers = #tpu.dot_dimension_numbers<[1], [0], [0], [1], [0, 0, 1, 1], [], []>} : vector<8x129xf32>, vector<129x129xf32>, vector<8x129xf32> -> vector<8x129xf32>
    %c1_328 = arith.constant 1 : index
    %c1_329 = arith.constant 1 : index
    %c0_330 = arith.constant 0 : index
    %c0_331 = arith.constant 0 : index
    %387 = vector.load %arg2[%c1_328, %c1_329, %c0_330, %c0_331] : memref<2x3x129x129xf32, #tpu.memory_space<vmem>>, vector<1x1x129x129xf32>
    %388 = vector.shape_cast %387 : vector<1x1x129x129xf32> to vector<129x129xf32>
    %cst_332 = arith.constant dense<0.000000e+00> : vector<8x129xf32>
    %389 = tpu.matmul %383, %388, %cst_332 {dimension_numbers = #tpu.dot_dimension_numbers<[1], [0], [0], [1], [0, 0, 1, 1], [], []>} : vector<8x129xf32>, vector<129x129xf32>, vector<8x129xf32> -> vector<8x129xf32>
    %c1_333 = arith.constant 1 : index
    %c2_334 = arith.constant 2 : index
    %c0_335 = arith.constant 0 : index
    %c0_336 = arith.constant 0 : index
    %390 = vector.load %arg2[%c1_333, %c2_334, %c0_335, %c0_336] : memref<2x3x129x129xf32, #tpu.memory_space<vmem>>, vector<1x1x129x129xf32>
    %391 = vector.shape_cast %390 : vector<1x1x129x129xf32> to vector<129x129xf32>
    %cst_337 = arith.constant dense<0.000000e+00> : vector<8x129xf32>
    %392 = tpu.matmul %383, %391, %cst_337 {dimension_numbers = #tpu.dot_dimension_numbers<[1], [0], [0], [1], [0, 0, 1, 1], [], []>} : vector<8x129xf32>, vector<129x129xf32>, vector<8x129xf32> -> vector<8x129xf32>
    %c1_338 = arith.constant 1 : index
    %c0_339 = arith.constant 0 : index
    %c0_340 = arith.constant 0 : index
    %393 = vector.load %arg4[%c1_338, %c0_339, %c0_340] : memref<2x1x129xf32, #tpu.memory_space<vmem>>, vector<1x1x129xf32>
    %394 = vector.shape_cast %393 : vector<1x1x129xf32> to vector<1x129xf32>
    %395 = vector.broadcast %394 : vector<1x129xf32> to vector<8x129xf32>
    %396 = arith.addf %392, %395 : vector<8x129xf32>
    %c0_341 = arith.constant 0 : index
    %c0_342 = arith.constant 0 : index
    %c0_343 = arith.constant 0 : index
    %397 = vector.load %arg6[%c0_341, %c0_342, %c0_343] : memref<3x64x129xf32, #tpu.memory_space<vmem>>, vector<1x8x129xf32>
    %398 = vector.shape_cast %397 : vector<1x8x129xf32> to vector<8x129xf32>
    %399 = arith.addf %398, %386 : vector<8x129xf32>
    %400 = arith.negf %399 : vector<8x129xf32>
    %401 = math.exp %400 : vector<8x129xf32>
    %cst_344 = arith.constant 1.000000e+00 : f32
    %402 = vector.broadcast %cst_344 : f32 to vector<8x129xf32>
    %403 = arith.addf %402, %401 : vector<8x129xf32>
    %404 = arith.divf %402, %403 : vector<8x129xf32>
    %c1_345 = arith.constant 1 : index
    %c0_346 = arith.constant 0 : index
    %c0_347 = arith.constant 0 : index
    %405 = vector.load %arg6[%c1_345, %c0_346, %c0_347] : memref<3x64x129xf32, #tpu.memory_space<vmem>>, vector<1x8x129xf32>
    %406 = vector.shape_cast %405 : vector<1x8x129xf32> to vector<8x129xf32>
    %407 = arith.addf %406, %389 : vector<8x129xf32>
    %408 = arith.negf %407 : vector<8x129xf32>
    %409 = math.exp %408 : vector<8x129xf32>
    %cst_348 = arith.constant 1.000000e+00 : f32
    %410 = vector.broadcast %cst_348 : f32 to vector<8x129xf32>
    %411 = arith.addf %410, %409 : vector<8x129xf32>
    %412 = arith.divf %410, %411 : vector<8x129xf32>
    %c2_349 = arith.constant 2 : index
    %c0_350 = arith.constant 0 : index
    %c0_351 = arith.constant 0 : index
    %413 = vector.load %arg6[%c2_349, %c0_350, %c0_351] : memref<3x64x129xf32, #tpu.memory_space<vmem>>, vector<1x8x129xf32>
    %414 = vector.shape_cast %413 : vector<1x8x129xf32> to vector<8x129xf32>
    %415 = arith.mulf %404, %396 : vector<8x129xf32>
    %416 = arith.addf %414, %415 : vector<8x129xf32>
    %417 = math.tanh %416 : vector<8x129xf32>
    %cst_352 = arith.constant 1.000000e+00 : f32
    %418 = vector.broadcast %cst_352 : f32 to vector<8x129xf32>
    %419 = arith.subf %418, %412 : vector<8x129xf32>
    %420 = arith.mulf %419, %417 : vector<8x129xf32>
    %421 = arith.mulf %412, %383 : vector<8x129xf32>
    %422 = arith.addf %420, %421 : vector<8x129xf32>
    %c0_353 = arith.constant 0 : index
    %c0_354 = arith.constant 0 : index
    %423 = vector.load %arg5[%c0_353, %c0_354] : memref<64x129xf32, #tpu.memory_space<vmem>>, vector<8x129xf32>
    tpu.vector_store %arg5[%c0_353, %c0_354], %422 {strides = array<i32>} : memref<64x129xf32, #tpu.memory_space<vmem>>, vector<8x129xf32>,
    %c1_355 = arith.constant 1 : index
    %c0_356 = arith.constant 0 : index
    %c0_357 = arith.constant 0 : index
    %c0_358 = arith.constant 0 : index
    %424 = vector.load %arg2[%c1_355, %c0_356, %c0_357, %c0_358] : memref<2x3x129x129xf32, #tpu.memory_space<vmem>>, vector<1x1x129x129xf32>
    %425 = vector.shape_cast %424 : vector<1x1x129x129xf32> to vector<129x129xf32>
    %cst_359 = arith.constant dense<0.000000e+00> : vector<8x129xf32>
    %426 = tpu.matmul %422, %425, %cst_359 {dimension_numbers = #tpu.dot_dimension_numbers<[1], [0], [0], [1], [0, 0, 1, 1], [], []>} : vector<8x129xf32>, vector<129x129xf32>, vector<8x129xf32> -> vector<8x129xf32>
    %c1_360 = arith.constant 1 : index
    %c1_361 = arith.constant 1 : index
    %c0_362 = arith.constant 0 : index
    %c0_363 = arith.constant 0 : index
    %427 = vector.load %arg2[%c1_360, %c1_361, %c0_362, %c0_363] : memref<2x3x129x129xf32, #tpu.memory_space<vmem>>, vector<1x1x129x129xf32>
    %428 = vector.shape_cast %427 : vector<1x1x129x129xf32> to vector<129x129xf32>
    %cst_364 = arith.constant dense<0.000000e+00> : vector<8x129xf32>
    %429 = tpu.matmul %422, %428, %cst_364 {dimension_numbers = #tpu.dot_dimension_numbers<[1], [0], [0], [1], [0, 0, 1, 1], [], []>} : vector<8x129xf32>, vector<129x129xf32>, vector<8x129xf32> -> vector<8x129xf32>
    %c1_365 = arith.constant 1 : index
    %c2_366 = arith.constant 2 : index
    %c0_367 = arith.constant 0 : index
    %c0_368 = arith.constant 0 : index
    %430 = vector.load %arg2[%c1_365, %c2_366, %c0_367, %c0_368] : memref<2x3x129x129xf32, #tpu.memory_space<vmem>>, vector<1x1x129x129xf32>
    %431 = vector.shape_cast %430 : vector<1x1x129x129xf32> to vector<129x129xf32>
    %cst_369 = arith.constant dense<0.000000e+00> : vector<8x129xf32>
    %432 = tpu.matmul %422, %431, %cst_369 {dimension_numbers = #tpu.dot_dimension_numbers<[1], [0], [0], [1], [0, 0, 1, 1], [], []>} : vector<8x129xf32>, vector<129x129xf32>, vector<8x129xf32> -> vector<8x129xf32>
    %c1_370 = arith.constant 1 : index
    %c0_371 = arith.constant 0 : index
    %c0_372 = arith.constant 0 : index
    %433 = vector.load %arg4[%c1_370, %c0_371, %c0_372] : memref<2x1x129xf32, #tpu.memory_space<vmem>>, vector<1x1x129xf32>
    %434 = vector.shape_cast %433 : vector<1x1x129xf32> to vector<1x129xf32>
    %435 = vector.broadcast %434 : vector<1x129xf32> to vector<8x129xf32>
    %436 = arith.addf %432, %435 : vector<8x129xf32>
    %c0_373 = arith.constant 0 : index
    %c8_374 = arith.constant 8 : index
    %c0_375 = arith.constant 0 : index
    %437 = vector.load %arg6[%c0_373, %c8_374, %c0_375] : memref<3x64x129xf32, #tpu.memory_space<vmem>>, vector<1x8x129xf32>
    %438 = vector.shape_cast %437 : vector<1x8x129xf32> to vector<8x129xf32>
    %439 = arith.addf %438, %426 : vector<8x129xf32>
    %440 = arith.negf %439 : vector<8x129xf32>
    %441 = math.exp %440 : vector<8x129xf32>
    %cst_376 = arith.constant 1.000000e+00 : f32
    %442 = vector.broadcast %cst_376 : f32 to vector<8x129xf32>
    %443 = arith.addf %442, %441 : vector<8x129xf32>
    %444 = arith.divf %442, %443 : vector<8x129xf32>
    %c1_377 = arith.constant 1 : index
    %c8_378 = arith.constant 8 : index
    %c0_379 = arith.constant 0 : index
    %445 = vector.load %arg6[%c1_377, %c8_378, %c0_379] : memref<3x64x129xf32, #tpu.memory_space<vmem>>, vector<1x8x129xf32>
    %446 = vector.shape_cast %445 : vector<1x8x129xf32> to vector<8x129xf32>
    %447 = arith.addf %446, %429 : vector<8x129xf32>
    %448 = arith.negf %447 : vector<8x129xf32>
    %449 = math.exp %448 : vector<8x129xf32>
    %cst_380 = arith.constant 1.000000e+00 : f32
    %450 = vector.broadcast %cst_380 : f32 to vector<8x129xf32>
    %451 = arith.addf %450, %449 : vector<8x129xf32>
    %452 = arith.divf %450, %451 : vector<8x129xf32>
    %c2_381 = arith.constant 2 : index
    %c8_382 = arith.constant 8 : index
    %c0_383 = arith.constant 0 : index
    %453 = vector.load %arg6[%c2_381, %c8_382, %c0_383] : memref<3x64x129xf32, #tpu.memory_space<vmem>>, vector<1x8x129xf32>
    %454 = vector.shape_cast %453 : vector<1x8x129xf32> to vector<8x129xf32>
    %455 = arith.mulf %444, %436 : vector<8x129xf32>
    %456 = arith.addf %454, %455 : vector<8x129xf32>
    %457 = math.tanh %456 : vector<8x129xf32>
    %cst_384 = arith.constant 1.000000e+00 : f32
    %458 = vector.broadcast %cst_384 : f32 to vector<8x129xf32>
    %459 = arith.subf %458, %452 : vector<8x129xf32>
    %460 = arith.mulf %459, %457 : vector<8x129xf32>
    %461 = arith.mulf %452, %422 : vector<8x129xf32>
    %462 = arith.addf %460, %461 : vector<8x129xf32>
    %c8_385 = arith.constant 8 : index
    %c0_386 = arith.constant 0 : index
    %463 = vector.load %arg5[%c8_385, %c0_386] : memref<64x129xf32, #tpu.memory_space<vmem>>, vector<8x129xf32>
    tpu.vector_store %arg5[%c8_385, %c0_386], %462 {strides = array<i32>} : memref<64x129xf32, #tpu.memory_space<vmem>>, vector<8x129xf32>,
    %c1_387 = arith.constant 1 : index
    %c0_388 = arith.constant 0 : index
    %c0_389 = arith.constant 0 : index
    %c0_390 = arith.constant 0 : index
    %464 = vector.load %arg2[%c1_387, %c0_388, %c0_389, %c0_390] : memref<2x3x129x129xf32, #tpu.memory_space<vmem>>, vector<1x1x129x129xf32>
    %465 = vector.shape_cast %464 : vector<1x1x129x129xf32> to vector<129x129xf32>
    %cst_391 = arith.constant dense<0.000000e+00> : vector<8x129xf32>
    %466 = tpu.matmul %462, %465, %cst_391 {dimension_numbers = #tpu.dot_dimension_numbers<[1], [0], [0], [1], [0, 0, 1, 1], [], []>} : vector<8x129xf32>, vector<129x129xf32>, vector<8x129xf32> -> vector<8x129xf32>
    %c1_392 = arith.constant 1 : index
    %c1_393 = arith.constant 1 : index
    %c0_394 = arith.constant 0 : index
    %c0_395 = arith.constant 0 : index
    %467 = vector.load %arg2[%c1_392, %c1_393, %c0_394, %c0_395] : memref<2x3x129x129xf32, #tpu.memory_space<vmem>>, vector<1x1x129x129xf32>
    %468 = vector.shape_cast %467 : vector<1x1x129x129xf32> to vector<129x129xf32>
    %cst_396 = arith.constant dense<0.000000e+00> : vector<8x129xf32>
    %469 = tpu.matmul %462, %468, %cst_396 {dimension_numbers = #tpu.dot_dimension_numbers<[1], [0], [0], [1], [0, 0, 1, 1], [], []>} : vector<8x129xf32>, vector<129x129xf32>, vector<8x129xf32> -> vector<8x129xf32>
    %c1_397 = arith.constant 1 : index
    %c2_398 = arith.constant 2 : index
    %c0_399 = arith.constant 0 : index
    %c0_400 = arith.constant 0 : index
    %470 = vector.load %arg2[%c1_397, %c2_398, %c0_399, %c0_400] : memref<2x3x129x129xf32, #tpu.memory_space<vmem>>, vector<1x1x129x129xf32>
    %471 = vector.shape_cast %470 : vector<1x1x129x129xf32> to vector<129x129xf32>
    %cst_401 = arith.constant dense<0.000000e+00> : vector<8x129xf32>
    %472 = tpu.matmul %462, %471, %cst_401 {dimension_numbers = #tpu.dot_dimension_numbers<[1], [0], [0], [1], [0, 0, 1, 1], [], []>} : vector<8x129xf32>, vector<129x129xf32>, vector<8x129xf32> -> vector<8x129xf32>
    %c1_402 = arith.constant 1 : index
    %c0_403 = arith.constant 0 : index
    %c0_404 = arith.constant 0 : index
    %473 = vector.load %arg4[%c1_402, %c0_403, %c0_404] : memref<2x1x129xf32, #tpu.memory_space<vmem>>, vector<1x1x129xf32>
    %474 = vector.shape_cast %473 : vector<1x1x129xf32> to vector<1x129xf32>
    %475 = vector.broadcast %474 : vector<1x129xf32> to vector<8x129xf32>
    %476 = arith.addf %472, %475 : vector<8x129xf32>
    %c0_405 = arith.constant 0 : index
    %c16_406 = arith.constant 16 : index
    %c0_407 = arith.constant 0 : index
    %477 = vector.load %arg6[%c0_405, %c16_406, %c0_407] : memref<3x64x129xf32, #tpu.memory_space<vmem>>, vector<1x8x129xf32>
    %478 = vector.shape_cast %477 : vector<1x8x129xf32> to vector<8x129xf32>
    %479 = arith.addf %478, %466 : vector<8x129xf32>
    %480 = arith.negf %479 : vector<8x129xf32>
    %481 = math.exp %480 : vector<8x129xf32>
    %cst_408 = arith.constant 1.000000e+00 : f32
    %482 = vector.broadcast %cst_408 : f32 to vector<8x129xf32>
    %483 = arith.addf %482, %481 : vector<8x129xf32>
    %484 = arith.divf %482, %483 : vector<8x129xf32>
    %c1_409 = arith.constant 1 : index
    %c16_410 = arith.constant 16 : index
    %c0_411 = arith.constant 0 : index
    %485 = vector.load %arg6[%c1_409, %c16_410, %c0_411] : memref<3x64x129xf32, #tpu.memory_space<vmem>>, vector<1x8x129xf32>
    %486 = vector.shape_cast %485 : vector<1x8x129xf32> to vector<8x129xf32>
    %487 = arith.addf %486, %469 : vector<8x129xf32>
    %488 = arith.negf %487 : vector<8x129xf32>
    %489 = math.exp %488 : vector<8x129xf32>
    %cst_412 = arith.constant 1.000000e+00 : f32
    %490 = vector.broadcast %cst_412 : f32 to vector<8x129xf32>
    %491 = arith.addf %490, %489 : vector<8x129xf32>
    %492 = arith.divf %490, %491 : vector<8x129xf32>
    %c2_413 = arith.constant 2 : index
    %c16_414 = arith.constant 16 : index
    %c0_415 = arith.constant 0 : index
    %493 = vector.load %arg6[%c2_413, %c16_414, %c0_415] : memref<3x64x129xf32, #tpu.memory_space<vmem>>, vector<1x8x129xf32>
    %494 = vector.shape_cast %493 : vector<1x8x129xf32> to vector<8x129xf32>
    %495 = arith.mulf %484, %476 : vector<8x129xf32>
    %496 = arith.addf %494, %495 : vector<8x129xf32>
    %497 = math.tanh %496 : vector<8x129xf32>
    %cst_416 = arith.constant 1.000000e+00 : f32
    %498 = vector.broadcast %cst_416 : f32 to vector<8x129xf32>
    %499 = arith.subf %498, %492 : vector<8x129xf32>
    %500 = arith.mulf %499, %497 : vector<8x129xf32>
    %501 = arith.mulf %492, %462 : vector<8x129xf32>
    %502 = arith.addf %500, %501 : vector<8x129xf32>
    %c16_417 = arith.constant 16 : index
    %c0_418 = arith.constant 0 : index
    %503 = vector.load %arg5[%c16_417, %c0_418] : memref<64x129xf32, #tpu.memory_space<vmem>>, vector<8x129xf32>
    tpu.vector_store %arg5[%c16_417, %c0_418], %502 {strides = array<i32>} : memref<64x129xf32, #tpu.memory_space<vmem>>, vector<8x129xf32>,
    %c1_419 = arith.constant 1 : index
    %c0_420 = arith.constant 0 : index
    %c0_421 = arith.constant 0 : index
    %c0_422 = arith.constant 0 : index
    %504 = vector.load %arg2[%c1_419, %c0_420, %c0_421, %c0_422] : memref<2x3x129x129xf32, #tpu.memory_space<vmem>>, vector<1x1x129x129xf32>
    %505 = vector.shape_cast %504 : vector<1x1x129x129xf32> to vector<129x129xf32>
    %cst_423 = arith.constant dense<0.000000e+00> : vector<8x129xf32>
    %506 = tpu.matmul %502, %505, %cst_423 {dimension_numbers = #tpu.dot_dimension_numbers<[1], [0], [0], [1], [0, 0, 1, 1], [], []>} : vector<8x129xf32>, vector<129x129xf32>, vector<8x129xf32> -> vector<8x129xf32>
    %c1_424 = arith.constant 1 : index
    %c1_425 = arith.constant 1 : index
    %c0_426 = arith.constant 0 : index
    %c0_427 = arith.constant 0 : index
    %507 = vector.load %arg2[%c1_424, %c1_425, %c0_426, %c0_427] : memref<2x3x129x129xf32, #tpu.memory_space<vmem>>, vector<1x1x129x129xf32>
    %508 = vector.shape_cast %507 : vector<1x1x129x129xf32> to vector<129x129xf32>
    %cst_428 = arith.constant dense<0.000000e+00> : vector<8x129xf32>
    %509 = tpu.matmul %502, %508, %cst_428 {dimension_numbers = #tpu.dot_dimension_numbers<[1], [0], [0], [1], [0, 0, 1, 1], [], []>} : vector<8x129xf32>, vector<129x129xf32>, vector<8x129xf32> -> vector<8x129xf32>
    %c1_429 = arith.constant 1 : index
    %c2_430 = arith.constant 2 : index
    %c0_431 = arith.constant 0 : index
    %c0_432 = arith.constant 0 : index
    %510 = vector.load %arg2[%c1_429, %c2_430, %c0_431, %c0_432] : memref<2x3x129x129xf32, #tpu.memory_space<vmem>>, vector<1x1x129x129xf32>
    %511 = vector.shape_cast %510 : vector<1x1x129x129xf32> to vector<129x129xf32>
    %cst_433 = arith.constant dense<0.000000e+00> : vector<8x129xf32>
    %512 = tpu.matmul %502, %511, %cst_433 {dimension_numbers = #tpu.dot_dimension_numbers<[1], [0], [0], [1], [0, 0, 1, 1], [], []>} : vector<8x129xf32>, vector<129x129xf32>, vector<8x129xf32> -> vector<8x129xf32>
    %c1_434 = arith.constant 1 : index
    %c0_435 = arith.constant 0 : index
    %c0_436 = arith.constant 0 : index
    %513 = vector.load %arg4[%c1_434, %c0_435, %c0_436] : memref<2x1x129xf32, #tpu.memory_space<vmem>>, vector<1x1x129xf32>
    %514 = vector.shape_cast %513 : vector<1x1x129xf32> to vector<1x129xf32>
    %515 = vector.broadcast %514 : vector<1x129xf32> to vector<8x129xf32>
    %516 = arith.addf %512, %515 : vector<8x129xf32>
    %c0_437 = arith.constant 0 : index
    %c24_438 = arith.constant 24 : index
    %c0_439 = arith.constant 0 : index
    %517 = vector.load %arg6[%c0_437, %c24_438, %c0_439] : memref<3x64x129xf32, #tpu.memory_space<vmem>>, vector<1x8x129xf32>
    %518 = vector.shape_cast %517 : vector<1x8x129xf32> to vector<8x129xf32>
    %519 = arith.addf %518, %506 : vector<8x129xf32>
    %520 = arith.negf %519 : vector<8x129xf32>
    %521 = math.exp %520 : vector<8x129xf32>
    %cst_440 = arith.constant 1.000000e+00 : f32
    %522 = vector.broadcast %cst_440 : f32 to vector<8x129xf32>
    %523 = arith.addf %522, %521 : vector<8x129xf32>
    %524 = arith.divf %522, %523 : vector<8x129xf32>
    %c1_441 = arith.constant 1 : index
    %c24_442 = arith.constant 24 : index
    %c0_443 = arith.constant 0 : index
    %525 = vector.load %arg6[%c1_441, %c24_442, %c0_443] : memref<3x64x129xf32, #tpu.memory_space<vmem>>, vector<1x8x129xf32>
    %526 = vector.shape_cast %525 : vector<1x8x129xf32> to vector<8x129xf32>
    %527 = arith.addf %526, %509 : vector<8x129xf32>
    %528 = arith.negf %527 : vector<8x129xf32>
    %529 = math.exp %528 : vector<8x129xf32>
    %cst_444 = arith.constant 1.000000e+00 : f32
    %530 = vector.broadcast %cst_444 : f32 to vector<8x129xf32>
    %531 = arith.addf %530, %529 : vector<8x129xf32>
    %532 = arith.divf %530, %531 : vector<8x129xf32>
    %c2_445 = arith.constant 2 : index
    %c24_446 = arith.constant 24 : index
    %c0_447 = arith.constant 0 : index
    %533 = vector.load %arg6[%c2_445, %c24_446, %c0_447] : memref<3x64x129xf32, #tpu.memory_space<vmem>>, vector<1x8x129xf32>
    %534 = vector.shape_cast %533 : vector<1x8x129xf32> to vector<8x129xf32>
    %535 = arith.mulf %524, %516 : vector<8x129xf32>
    %536 = arith.addf %534, %535 : vector<8x129xf32>
    %537 = math.tanh %536 : vector<8x129xf32>
    %cst_448 = arith.constant 1.000000e+00 : f32
    %538 = vector.broadcast %cst_448 : f32 to vector<8x129xf32>
    %539 = arith.subf %538, %532 : vector<8x129xf32>
    %540 = arith.mulf %539, %537 : vector<8x129xf32>
    %541 = arith.mulf %532, %502 : vector<8x129xf32>
    %542 = arith.addf %540, %541 : vector<8x129xf32>
    %c24_449 = arith.constant 24 : index
    %c0_450 = arith.constant 0 : index
    %543 = vector.load %arg5[%c24_449, %c0_450] : memref<64x129xf32, #tpu.memory_space<vmem>>, vector<8x129xf32>
    tpu.vector_store %arg5[%c24_449, %c0_450], %542 {strides = array<i32>} : memref<64x129xf32, #tpu.memory_space<vmem>>, vector<8x129xf32>,
    %c1_451 = arith.constant 1 : index
    %c0_452 = arith.constant 0 : index
    %c0_453 = arith.constant 0 : index
    %c0_454 = arith.constant 0 : index
    %544 = vector.load %arg2[%c1_451, %c0_452, %c0_453, %c0_454] : memref<2x3x129x129xf32, #tpu.memory_space<vmem>>, vector<1x1x129x129xf32>
    %545 = vector.shape_cast %544 : vector<1x1x129x129xf32> to vector<129x129xf32>
    %cst_455 = arith.constant dense<0.000000e+00> : vector<8x129xf32>
    %546 = tpu.matmul %542, %545, %cst_455 {dimension_numbers = #tpu.dot_dimension_numbers<[1], [0], [0], [1], [0, 0, 1, 1], [], []>} : vector<8x129xf32>, vector<129x129xf32>, vector<8x129xf32> -> vector<8x129xf32>
    %c1_456 = arith.constant 1 : index
    %c1_457 = arith.constant 1 : index
    %c0_458 = arith.constant 0 : index
    %c0_459 = arith.constant 0 : index
    %547 = vector.load %arg2[%c1_456, %c1_457, %c0_458, %c0_459] : memref<2x3x129x129xf32, #tpu.memory_space<vmem>>, vector<1x1x129x129xf32>
    %548 = vector.shape_cast %547 : vector<1x1x129x129xf32> to vector<129x129xf32>
    %cst_460 = arith.constant dense<0.000000e+00> : vector<8x129xf32>
    %549 = tpu.matmul %542, %548, %cst_460 {dimension_numbers = #tpu.dot_dimension_numbers<[1], [0], [0], [1], [0, 0, 1, 1], [], []>} : vector<8x129xf32>, vector<129x129xf32>, vector<8x129xf32> -> vector<8x129xf32>
    %c1_461 = arith.constant 1 : index
    %c2_462 = arith.constant 2 : index
    %c0_463 = arith.constant 0 : index
    %c0_464 = arith.constant 0 : index
    %550 = vector.load %arg2[%c1_461, %c2_462, %c0_463, %c0_464] : memref<2x3x129x129xf32, #tpu.memory_space<vmem>>, vector<1x1x129x129xf32>
    %551 = vector.shape_cast %550 : vector<1x1x129x129xf32> to vector<129x129xf32>
    %cst_465 = arith.constant dense<0.000000e+00> : vector<8x129xf32>
    %552 = tpu.matmul %542, %551, %cst_465 {dimension_numbers = #tpu.dot_dimension_numbers<[1], [0], [0], [1], [0, 0, 1, 1], [], []>} : vector<8x129xf32>, vector<129x129xf32>, vector<8x129xf32> -> vector<8x129xf32>
    %c1_466 = arith.constant 1 : index
    %c0_467 = arith.constant 0 : index
    %c0_468 = arith.constant 0 : index
    %553 = vector.load %arg4[%c1_466, %c0_467, %c0_468] : memref<2x1x129xf32, #tpu.memory_space<vmem>>, vector<1x1x129xf32>
    %554 = vector.shape_cast %553 : vector<1x1x129xf32> to vector<1x129xf32>
    %555 = vector.broadcast %554 : vector<1x129xf32> to vector<8x129xf32>
    %556 = arith.addf %552, %555 : vector<8x129xf32>
    %c0_469 = arith.constant 0 : index
    %c32_470 = arith.constant 32 : index
    %c0_471 = arith.constant 0 : index
    %557 = vector.load %arg6[%c0_469, %c32_470, %c0_471] : memref<3x64x129xf32, #tpu.memory_space<vmem>>, vector<1x8x129xf32>
    %558 = vector.shape_cast %557 : vector<1x8x129xf32> to vector<8x129xf32>
    %559 = arith.addf %558, %546 : vector<8x129xf32>
    %560 = arith.negf %559 : vector<8x129xf32>
    %561 = math.exp %560 : vector<8x129xf32>
    %cst_472 = arith.constant 1.000000e+00 : f32
    %562 = vector.broadcast %cst_472 : f32 to vector<8x129xf32>
    %563 = arith.addf %562, %561 : vector<8x129xf32>
    %564 = arith.divf %562, %563 : vector<8x129xf32>
    %c1_473 = arith.constant 1 : index
    %c32_474 = arith.constant 32 : index
    %c0_475 = arith.constant 0 : index
    %565 = vector.load %arg6[%c1_473, %c32_474, %c0_475] : memref<3x64x129xf32, #tpu.memory_space<vmem>>, vector<1x8x129xf32>
    %566 = vector.shape_cast %565 : vector<1x8x129xf32> to vector<8x129xf32>
    %567 = arith.addf %566, %549 : vector<8x129xf32>
    %568 = arith.negf %567 : vector<8x129xf32>
    %569 = math.exp %568 : vector<8x129xf32>
    %cst_476 = arith.constant 1.000000e+00 : f32
    %570 = vector.broadcast %cst_476 : f32 to vector<8x129xf32>
    %571 = arith.addf %570, %569 : vector<8x129xf32>
    %572 = arith.divf %570, %571 : vector<8x129xf32>
    %c2_477 = arith.constant 2 : index
    %c32_478 = arith.constant 32 : index
    %c0_479 = arith.constant 0 : index
    %573 = vector.load %arg6[%c2_477, %c32_478, %c0_479] : memref<3x64x129xf32, #tpu.memory_space<vmem>>, vector<1x8x129xf32>
    %574 = vector.shape_cast %573 : vector<1x8x129xf32> to vector<8x129xf32>
    %575 = arith.mulf %564, %556 : vector<8x129xf32>
    %576 = arith.addf %574, %575 : vector<8x129xf32>
    %577 = math.tanh %576 : vector<8x129xf32>
    %cst_480 = arith.constant 1.000000e+00 : f32
    %578 = vector.broadcast %cst_480 : f32 to vector<8x129xf32>
    %579 = arith.subf %578, %572 : vector<8x129xf32>
    %580 = arith.mulf %579, %577 : vector<8x129xf32>
    %581 = arith.mulf %572, %542 : vector<8x129xf32>
    %582 = arith.addf %580, %581 : vector<8x129xf32>
    %c32_481 = arith.constant 32 : index
    %c0_482 = arith.constant 0 : index
    %583 = vector.load %arg5[%c32_481, %c0_482] : memref<64x129xf32, #tpu.memory_space<vmem>>, vector<8x129xf32>
    tpu.vector_store %arg5[%c32_481, %c0_482], %582 {strides = array<i32>} : memref<64x129xf32, #tpu.memory_space<vmem>>, vector<8x129xf32>,
    %c1_483 = arith.constant 1 : index
    %c0_484 = arith.constant 0 : index
    %c0_485 = arith.constant 0 : index
    %c0_486 = arith.constant 0 : index
    %584 = vector.load %arg2[%c1_483, %c0_484, %c0_485, %c0_486] : memref<2x3x129x129xf32, #tpu.memory_space<vmem>>, vector<1x1x129x129xf32>
    %585 = vector.shape_cast %584 : vector<1x1x129x129xf32> to vector<129x129xf32>
    %cst_487 = arith.constant dense<0.000000e+00> : vector<8x129xf32>
    %586 = tpu.matmul %582, %585, %cst_487 {dimension_numbers = #tpu.dot_dimension_numbers<[1], [0], [0], [1], [0, 0, 1, 1], [], []>} : vector<8x129xf32>, vector<129x129xf32>, vector<8x129xf32> -> vector<8x129xf32>
    %c1_488 = arith.constant 1 : index
    %c1_489 = arith.constant 1 : index
    %c0_490 = arith.constant 0 : index
    %c0_491 = arith.constant 0 : index
    %587 = vector.load %arg2[%c1_488, %c1_489, %c0_490, %c0_491] : memref<2x3x129x129xf32, #tpu.memory_space<vmem>>, vector<1x1x129x129xf32>
    %588 = vector.shape_cast %587 : vector<1x1x129x129xf32> to vector<129x129xf32>
    %cst_492 = arith.constant dense<0.000000e+00> : vector<8x129xf32>
    %589 = tpu.matmul %582, %588, %cst_492 {dimension_numbers = #tpu.dot_dimension_numbers<[1], [0], [0], [1], [0, 0, 1, 1], [], []>} : vector<8x129xf32>, vector<129x129xf32>, vector<8x129xf32> -> vector<8x129xf32>
    %c1_493 = arith.constant 1 : index
    %c2_494 = arith.constant 2 : index
    %c0_495 = arith.constant 0 : index
    %c0_496 = arith.constant 0 : index
    %590 = vector.load %arg2[%c1_493, %c2_494, %c0_495, %c0_496] : memref<2x3x129x129xf32, #tpu.memory_space<vmem>>, vector<1x1x129x129xf32>
    %591 = vector.shape_cast %590 : vector<1x1x129x129xf32> to vector<129x129xf32>
    %cst_497 = arith.constant dense<0.000000e+00> : vector<8x129xf32>
    %592 = tpu.matmul %582, %591, %cst_497 {dimension_numbers = #tpu.dot_dimension_numbers<[1], [0], [0], [1], [0, 0, 1, 1], [], []>} : vector<8x129xf32>, vector<129x129xf32>, vector<8x129xf32> -> vector<8x129xf32>
    %c1_498 = arith.constant 1 : index
    %c0_499 = arith.constant 0 : index
    %c0_500 = arith.constant 0 : index
    %593 = vector.load %arg4[%c1_498, %c0_499, %c0_500] : memref<2x1x129xf32, #tpu.memory_space<vmem>>, vector<1x1x129xf32>
    %594 = vector.shape_cast %593 : vector<1x1x129xf32> to vector<1x129xf32>
    %595 = vector.broadcast %594 : vector<1x129xf32> to vector<8x129xf32>
    %596 = arith.addf %592, %595 : vector<8x129xf32>
    %c0_501 = arith.constant 0 : index
    %c40_502 = arith.constant 40 : index
    %c0_503 = arith.constant 0 : index
    %597 = vector.load %arg6[%c0_501, %c40_502, %c0_503] : memref<3x64x129xf32, #tpu.memory_space<vmem>>, vector<1x8x129xf32>
    %598 = vector.shape_cast %597 : vector<1x8x129xf32> to vector<8x129xf32>
    %599 = arith.addf %598, %586 : vector<8x129xf32>
    %600 = arith.negf %599 : vector<8x129xf32>
    %601 = math.exp %600 : vector<8x129xf32>
    %cst_504 = arith.constant 1.000000e+00 : f32
    %602 = vector.broadcast %cst_504 : f32 to vector<8x129xf32>
    %603 = arith.addf %602, %601 : vector<8x129xf32>
    %604 = arith.divf %602, %603 : vector<8x129xf32>
    %c1_505 = arith.constant 1 : index
    %c40_506 = arith.constant 40 : index
    %c0_507 = arith.constant 0 : index
    %605 = vector.load %arg6[%c1_505, %c40_506, %c0_507] : memref<3x64x129xf32, #tpu.memory_space<vmem>>, vector<1x8x129xf32>
    %606 = vector.shape_cast %605 : vector<1x8x129xf32> to vector<8x129xf32>
    %607 = arith.addf %606, %589 : vector<8x129xf32>
    %608 = arith.negf %607 : vector<8x129xf32>
    %609 = math.exp %608 : vector<8x129xf32>
    %cst_508 = arith.constant 1.000000e+00 : f32
    %610 = vector.broadcast %cst_508 : f32 to vector<8x129xf32>
    %611 = arith.addf %610, %609 : vector<8x129xf32>
    %612 = arith.divf %610, %611 : vector<8x129xf32>
    %c2_509 = arith.constant 2 : index
    %c40_510 = arith.constant 40 : index
    %c0_511 = arith.constant 0 : index
    %613 = vector.load %arg6[%c2_509, %c40_510, %c0_511] : memref<3x64x129xf32, #tpu.memory_space<vmem>>, vector<1x8x129xf32>
    %614 = vector.shape_cast %613 : vector<1x8x129xf32> to vector<8x129xf32>
    %615 = arith.mulf %604, %596 : vector<8x129xf32>
    %616 = arith.addf %614, %615 : vector<8x129xf32>
    %617 = math.tanh %616 : vector<8x129xf32>
    %cst_512 = arith.constant 1.000000e+00 : f32
    %618 = vector.broadcast %cst_512 : f32 to vector<8x129xf32>
    %619 = arith.subf %618, %612 : vector<8x129xf32>
    %620 = arith.mulf %619, %617 : vector<8x129xf32>
    %621 = arith.mulf %612, %582 : vector<8x129xf32>
    %622 = arith.addf %620, %621 : vector<8x129xf32>
    %c40_513 = arith.constant 40 : index
    %c0_514 = arith.constant 0 : index
    %623 = vector.load %arg5[%c40_513, %c0_514] : memref<64x129xf32, #tpu.memory_space<vmem>>, vector<8x129xf32>
    tpu.vector_store %arg5[%c40_513, %c0_514], %622 {strides = array<i32>} : memref<64x129xf32, #tpu.memory_space<vmem>>, vector<8x129xf32>,
    %c1_515 = arith.constant 1 : index
    %c0_516 = arith.constant 0 : index
    %c0_517 = arith.constant 0 : index
    %c0_518 = arith.constant 0 : index
    %624 = vector.load %arg2[%c1_515, %c0_516, %c0_517, %c0_518] : memref<2x3x129x129xf32, #tpu.memory_space<vmem>>, vector<1x1x129x129xf32>
    %625 = vector.shape_cast %624 : vector<1x1x129x129xf32> to vector<129x129xf32>
    %cst_519 = arith.constant dense<0.000000e+00> : vector<8x129xf32>
    %626 = tpu.matmul %622, %625, %cst_519 {dimension_numbers = #tpu.dot_dimension_numbers<[1], [0], [0], [1], [0, 0, 1, 1], [], []>} : vector<8x129xf32>, vector<129x129xf32>, vector<8x129xf32> -> vector<8x129xf32>
    %c1_520 = arith.constant 1 : index
    %c1_521 = arith.constant 1 : index
    %c0_522 = arith.constant 0 : index
    %c0_523 = arith.constant 0 : index
    %627 = vector.load %arg2[%c1_520, %c1_521, %c0_522, %c0_523] : memref<2x3x129x129xf32, #tpu.memory_space<vmem>>, vector<1x1x129x129xf32>
    %628 = vector.shape_cast %627 : vector<1x1x129x129xf32> to vector<129x129xf32>
    %cst_524 = arith.constant dense<0.000000e+00> : vector<8x129xf32>
    %629 = tpu.matmul %622, %628, %cst_524 {dimension_numbers = #tpu.dot_dimension_numbers<[1], [0], [0], [1], [0, 0, 1, 1], [], []>} : vector<8x129xf32>, vector<129x129xf32>, vector<8x129xf32> -> vector<8x129xf32>
    %c1_525 = arith.constant 1 : index
    %c2_526 = arith.constant 2 : index
    %c0_527 = arith.constant 0 : index
    %c0_528 = arith.constant 0 : index
    %630 = vector.load %arg2[%c1_525, %c2_526, %c0_527, %c0_528] : memref<2x3x129x129xf32, #tpu.memory_space<vmem>>, vector<1x1x129x129xf32>
    %631 = vector.shape_cast %630 : vector<1x1x129x129xf32> to vector<129x129xf32>
    %cst_529 = arith.constant dense<0.000000e+00> : vector<8x129xf32>
    %632 = tpu.matmul %622, %631, %cst_529 {dimension_numbers = #tpu.dot_dimension_numbers<[1], [0], [0], [1], [0, 0, 1, 1], [], []>} : vector<8x129xf32>, vector<129x129xf32>, vector<8x129xf32> -> vector<8x129xf32>
    %c1_530 = arith.constant 1 : index
    %c0_531 = arith.constant 0 : index
    %c0_532 = arith.constant 0 : index
    %633 = vector.load %arg4[%c1_530, %c0_531, %c0_532] : memref<2x1x129xf32, #tpu.memory_space<vmem>>, vector<1x1x129xf32>
    %634 = vector.shape_cast %633 : vector<1x1x129xf32> to vector<1x129xf32>
    %635 = vector.broadcast %634 : vector<1x129xf32> to vector<8x129xf32>
    %636 = arith.addf %632, %635 : vector<8x129xf32>
    %c0_533 = arith.constant 0 : index
    %c48_534 = arith.constant 48 : index
    %c0_535 = arith.constant 0 : index
    %637 = vector.load %arg6[%c0_533, %c48_534, %c0_535] : memref<3x64x129xf32, #tpu.memory_space<vmem>>, vector<1x8x129xf32>
    %638 = vector.shape_cast %637 : vector<1x8x129xf32> to vector<8x129xf32>
    %639 = arith.addf %638, %626 : vector<8x129xf32>
    %640 = arith.negf %639 : vector<8x129xf32>
    %641 = math.exp %640 : vector<8x129xf32>
    %cst_536 = arith.constant 1.000000e+00 : f32
    %642 = vector.broadcast %cst_536 : f32 to vector<8x129xf32>
    %643 = arith.addf %642, %641 : vector<8x129xf32>
    %644 = arith.divf %642, %643 : vector<8x129xf32>
    %c1_537 = arith.constant 1 : index
    %c48_538 = arith.constant 48 : index
    %c0_539 = arith.constant 0 : index
    %645 = vector.load %arg6[%c1_537, %c48_538, %c0_539] : memref<3x64x129xf32, #tpu.memory_space<vmem>>, vector<1x8x129xf32>
    %646 = vector.shape_cast %645 : vector<1x8x129xf32> to vector<8x129xf32>
    %647 = arith.addf %646, %629 : vector<8x129xf32>
    %648 = arith.negf %647 : vector<8x129xf32>
    %649 = math.exp %648 : vector<8x129xf32>
    %cst_540 = arith.constant 1.000000e+00 : f32
    %650 = vector.broadcast %cst_540 : f32 to vector<8x129xf32>
    %651 = arith.addf %650, %649 : vector<8x129xf32>
    %652 = arith.divf %650, %651 : vector<8x129xf32>
    %c2_541 = arith.constant 2 : index
    %c48_542 = arith.constant 48 : index
    %c0_543 = arith.constant 0 : index
    %653 = vector.load %arg6[%c2_541, %c48_542, %c0_543] : memref<3x64x129xf32, #tpu.memory_space<vmem>>, vector<1x8x129xf32>
    %654 = vector.shape_cast %653 : vector<1x8x129xf32> to vector<8x129xf32>
    %655 = arith.mulf %644, %636 : vector<8x129xf32>
    %656 = arith.addf %654, %655 : vector<8x129xf32>
    %657 = math.tanh %656 : vector<8x129xf32>
    %cst_544 = arith.constant 1.000000e+00 : f32
    %658 = vector.broadcast %cst_544 : f32 to vector<8x129xf32>
    %659 = arith.subf %658, %652 : vector<8x129xf32>
    %660 = arith.mulf %659, %657 : vector<8x129xf32>
    %661 = arith.mulf %652, %622 : vector<8x129xf32>
    %662 = arith.addf %660, %661 : vector<8x129xf32>
    %c48_545 = arith.constant 48 : index
    %c0_546 = arith.constant 0 : index
    %663 = vector.load %arg5[%c48_545, %c0_546] : memref<64x129xf32, #tpu.memory_space<vmem>>, vector<8x129xf32>
    tpu.vector_store %arg5[%c48_545, %c0_546], %662 {strides = array<i32>} : memref<64x129xf32, #tpu.memory_space<vmem>>, vector<8x129xf32>,
    %c1_547 = arith.constant 1 : index
    %c0_548 = arith.constant 0 : index
    %c0_549 = arith.constant 0 : index
    %c0_550 = arith.constant 0 : index
    %664 = vector.load %arg2[%c1_547, %c0_548, %c0_549, %c0_550] : memref<2x3x129x129xf32, #tpu.memory_space<vmem>>, vector<1x1x129x129xf32>
    %665 = vector.shape_cast %664 : vector<1x1x129x129xf32> to vector<129x129xf32>
    %cst_551 = arith.constant dense<0.000000e+00> : vector<8x129xf32>
    %666 = tpu.matmul %662, %665, %cst_551 {dimension_numbers = #tpu.dot_dimension_numbers<[1], [0], [0], [1], [0, 0, 1, 1], [], []>} : vector<8x129xf32>, vector<129x129xf32>, vector<8x129xf32> -> vector<8x129xf32>
    %c1_552 = arith.constant 1 : index
    %c1_553 = arith.constant 1 : index
    %c0_554 = arith.constant 0 : index
    %c0_555 = arith.constant 0 : index
    %667 = vector.load %arg2[%c1_552, %c1_553, %c0_554, %c0_555] : memref<2x3x129x129xf32, #tpu.memory_space<vmem>>, vector<1x1x129x129xf32>
    %668 = vector.shape_cast %667 : vector<1x1x129x129xf32> to vector<129x129xf32>
    %cst_556 = arith.constant dense<0.000000e+00> : vector<8x129xf32>
    %669 = tpu.matmul %662, %668, %cst_556 {dimension_numbers = #tpu.dot_dimension_numbers<[1], [0], [0], [1], [0, 0, 1, 1], [], []>} : vector<8x129xf32>, vector<129x129xf32>, vector<8x129xf32> -> vector<8x129xf32>
    %c1_557 = arith.constant 1 : index
    %c2_558 = arith.constant 2 : index
    %c0_559 = arith.constant 0 : index
    %c0_560 = arith.constant 0 : index
    %670 = vector.load %arg2[%c1_557, %c2_558, %c0_559, %c0_560] : memref<2x3x129x129xf32, #tpu.memory_space<vmem>>, vector<1x1x129x129xf32>
    %671 = vector.shape_cast %670 : vector<1x1x129x129xf32> to vector<129x129xf32>
    %cst_561 = arith.constant dense<0.000000e+00> : vector<8x129xf32>
    %672 = tpu.matmul %662, %671, %cst_561 {dimension_numbers = #tpu.dot_dimension_numbers<[1], [0], [0], [1], [0, 0, 1, 1], [], []>} : vector<8x129xf32>, vector<129x129xf32>, vector<8x129xf32> -> vector<8x129xf32>
    %c1_562 = arith.constant 1 : index
    %c0_563 = arith.constant 0 : index
    %c0_564 = arith.constant 0 : index
    %673 = vector.load %arg4[%c1_562, %c0_563, %c0_564] : memref<2x1x129xf32, #tpu.memory_space<vmem>>, vector<1x1x129xf32>
    %674 = vector.shape_cast %673 : vector<1x1x129xf32> to vector<1x129xf32>
    %675 = vector.broadcast %674 : vector<1x129xf32> to vector<8x129xf32>
    %676 = arith.addf %672, %675 : vector<8x129xf32>
    %c0_565 = arith.constant 0 : index
    %c56_566 = arith.constant 56 : index
    %c0_567 = arith.constant 0 : index
    %677 = vector.load %arg6[%c0_565, %c56_566, %c0_567] : memref<3x64x129xf32, #tpu.memory_space<vmem>>, vector<1x8x129xf32>
    %678 = vector.shape_cast %677 : vector<1x8x129xf32> to vector<8x129xf32>
    %679 = arith.addf %678, %666 : vector<8x129xf32>
    %680 = arith.negf %679 : vector<8x129xf32>
    %681 = math.exp %680 : vector<8x129xf32>
    %cst_568 = arith.constant 1.000000e+00 : f32
    %682 = vector.broadcast %cst_568 : f32 to vector<8x129xf32>
    %683 = arith.addf %682, %681 : vector<8x129xf32>
    %684 = arith.divf %682, %683 : vector<8x129xf32>
    %c1_569 = arith.constant 1 : index
    %c56_570 = arith.constant 56 : index
    %c0_571 = arith.constant 0 : index
    %685 = vector.load %arg6[%c1_569, %c56_570, %c0_571] : memref<3x64x129xf32, #tpu.memory_space<vmem>>, vector<1x8x129xf32>
    %686 = vector.shape_cast %685 : vector<1x8x129xf32> to vector<8x129xf32>
    %687 = arith.addf %686, %669 : vector<8x129xf32>
    %688 = arith.negf %687 : vector<8x129xf32>
    %689 = math.exp %688 : vector<8x129xf32>
    %cst_572 = arith.constant 1.000000e+00 : f32
    %690 = vector.broadcast %cst_572 : f32 to vector<8x129xf32>
    %691 = arith.addf %690, %689 : vector<8x129xf32>
    %692 = arith.divf %690, %691 : vector<8x129xf32>
    %c2_573 = arith.constant 2 : index
    %c56_574 = arith.constant 56 : index
    %c0_575 = arith.constant 0 : index
    %693 = vector.load %arg6[%c2_573, %c56_574, %c0_575] : memref<3x64x129xf32, #tpu.memory_space<vmem>>, vector<1x8x129xf32>
    %694 = vector.shape_cast %693 : vector<1x8x129xf32> to vector<8x129xf32>
    %695 = arith.mulf %684, %676 : vector<8x129xf32>
    %696 = arith.addf %694, %695 : vector<8x129xf32>
    %697 = math.tanh %696 : vector<8x129xf32>
    %cst_576 = arith.constant 1.000000e+00 : f32
    %698 = vector.broadcast %cst_576 : f32 to vector<8x129xf32>
    %699 = arith.subf %698, %692 : vector<8x129xf32>
    %700 = arith.mulf %699, %697 : vector<8x129xf32>
    %701 = arith.mulf %692, %662 : vector<8x129xf32>
    %702 = arith.addf %700, %701 : vector<8x129xf32>
    %c56_577 = arith.constant 56 : index
    %c0_578 = arith.constant 0 : index
    %703 = vector.load %arg5[%c56_577, %c0_578] : memref<64x129xf32, #tpu.memory_space<vmem>>, vector<8x129xf32>
    tpu.vector_store %arg5[%c56_577, %c0_578], %702 {strides = array<i32>} : memref<64x129xf32, #tpu.memory_space<vmem>>, vector<8x129xf32>,
    %c0_579 = arith.constant 0 : index
    %c0_580 = arith.constant 0 : index
    %704 = vector.load %arg5[%c0_579, %c0_580] : memref<64x129xf32, #tpu.memory_space<vmem>>, vector<64x129xf32>
    %cst_581 = arith.constant 2.000000e+01 : f32
    %705 = vector.broadcast %cst_581 : f32 to vector<64x129xf32>
    %706 = arith.cmpf ogt, %704, %705 : vector<64x129xf32>
    %cst_582 = arith.constant 2.000000e+01 : f32
    %707 = vector.broadcast %cst_582 : f32 to vector<64x129xf32>
    %708 = arith.minimumf %704, %707 : vector<64x129xf32>
    %709 = math.exp %708 : vector<64x129xf32>
    %710 = math.log1p %709 : vector<64x129xf32>
    %711 = arith.select %706, %704, %710 : vector<64x129xi1>, vector<64x129xf32>
    %c0_583 = arith.constant 0 : index
    %c0_584 = arith.constant 0 : index
    %712 = vector.load %arg5[%c0_583, %c0_584] : memref<64x129xf32, #tpu.memory_space<vmem>>, vector<64x129xf32>
    tpu.vector_store %arg5[%c0_583, %c0_584], %711 {strides = array<i32>} : memref<64x129xf32, #tpu.memory_space<vmem>>, vector<64x129xf32>,
    return
  }
}

</mosaic_0001>

<bundles_post_ra>
// kernel: gru_reg_forward.1
= control target key start
LH: loop header
LB: loop body
LE: loop exit
PB: predicated region body
PF: predicated region fallthrough
CT: control target
= control target key end

     0   :  { %vm108_vm0 = vcmask 1040384   ;;  %vm83_vm1 = vcmask 7168   ;;  %s17286_s0 = inlined_call_operand.vmem [shape: f32[64,129], index: 0, kind: input, shape index: {}]   ;;  %s17287_s1 = inlined_call_operand.vmem [shape: f32[2,3,129,129], index: 1, kind: input, shape index: {}]   ;;  %s17288_s2 = inlined_call_operand.vmem [shape: f32[2,3,129,129], index: 2, kind: input, shape index: {}]   ;;  %s17289_s3 = inlined_call_operand.vmem [shape: f32[2,3,1,129], index: 3, kind: input, shape index: {}]   ;;  %s17290_s4 = inlined_call_operand.vmem [shape: f32[2,1,129], index: 4, kind: input, shape index: {}]   ;;  %s17291_s5 = inlined_call_operand.hbm [shape: f32[64,129], index: 5, kind: output, shape index: {}]  }
   0x1   :  { %v68_v0 = vld [vmem:[%s17287_s1 + $0xf8] sm:$0xff]  ;;  %v7885_v1 = vld [vmem:[%s17287_s1 + $0x208] sm:$0xff]  ;;  %v67_v2 = vld [vmem:[%s17287_s1 + $0xf0] sm:$0xff] }
   0x2   :  { %115 = vmatprep.subr.mxu0 %v68_v0  ;;  %298 = vmatprep.subr.mxu1 %v7885_v1  ;;  %v7884_v3 = vld [vmem:[%s17287_s1 + $0x200] sm:$0xff]  ;;  %v66_v4 = vld [vmem:[%s17287_s1 + $0xe8] sm:$0xff]  ;;  %v7883_v5 = vld [vmem:[%s17287_s1 + $0x1f8] sm:$0xff] }
   0x3   :  { %116 = vmatpush1.msra.mxu0 %v67_v2  ;;  %299 = vmatpush1.msra.mxu1 %v7884_v3  ;;  %v65_v6 = vld [vmem:[%s17287_s1 + $0xe0] sm:$0xff]  ;;  %v7882_v7 = vld [vmem:[%s17287_s1 + $0x1f0] sm:$0xff]  ;;  %v64_v8 = vld [vmem:[%s17287_s1 + $0xd8] sm:$0xff] }
   0x4   :  { %117 = vmatprep.subr.mxu0 %v66_v4  ;;  %300 = vmatprep.subr.mxu1 %v7883_v5  ;;  %v7881_v9 = vld [vmem:[%s17287_s1 + $0x1e8] sm:$0xff]  ;;  %v63_v10 = vld [vmem:[%s17287_s1 + $0xd0] sm:$0xff]  ;;  %v7880_v11 = vld [vmem:[%s17287_s1 + $0x1e0] sm:$0xff] }
   0x5   :  { %118 = vmatpush1.msra.mxu0 %v65_v6  ;;  %301 = vmatpush1.msra.mxu1 %v7882_v7  ;;  %v62_v12 = vld [vmem:[%s17287_s1 + $0xc8] sm:$0xff]  ;;  %v7879_v13 = vld [vmem:[%s17287_s1 + $0x1d8] sm:$0xff]  ;;  %v61_v14 = vld [vmem:[%s17287_s1 + $0xc0] sm:$0xff] }
   0x6   :  { %119 = vmatprep.subr.mxu0 %v64_v8  ;;  %302 = vmatprep.subr.mxu1 %v7881_v9  ;;  %v7878_v15 = vld [vmem:[%s17287_s1 + $0x1d0] sm:$0xff]  ;;  %v60_v16 = vld [vmem:[%s17287_s1 + $0xb8] sm:$0xff]  ;;  %v7877_v17 = vld [vmem:[%s17287_s1 + $0x1c8] sm:$0xff] }
   0x7   :  { %120 = vmatpush1.msra.mxu0 %v63_v10  ;;  %303 = vmatpush1.msra.mxu1 %v7880_v11  ;;  %v59_v18 = vld [vmem:[%s17287_s1 + $0xb0] sm:$0xff]  ;;  %v7876_v19 = vld [vmem:[%s17287_s1 + $0x1c0] sm:$0xff]  ;;  %v58_v20 = vld [vmem:[%s17287_s1 + $0xa8] sm:$0xff] }
   0x8   :  { %121 = vmatprep.subr.mxu0 %v62_v12  ;;  %304 = vmatprep.subr.mxu1 %v7879_v13  ;;  %v7875_v21 = vld [vmem:[%s17287_s1 + $0x1b8] sm:$0xff]  ;;  %v57_v22 = vld [vmem:[%s17287_s1 + $0xa0] sm:$0xff]  ;;  %v7874_v23 = vld [vmem:[%s17287_s1 + $0x1b0] sm:$0xff] }
   0x9   :  { %122 = vmatpush1.msra.mxu0 %v61_v14  ;;  %305 = vmatpush1.msra.mxu1 %v7878_v15  ;;  %v56_v24 = vld [vmem:[%s17287_s1 + $0x98] sm:$0xff]  ;;  %v7873_v25 = vld [vmem:[%s17287_s1 + $0x1a8] sm:$0xff]  ;;  %v55_v26 = vld [vmem:[%s17287_s1 + $0x90] sm:$0xff] }
   0xa   :  { %123 = vmatprep.subr.mxu0 %v60_v16  ;;  %306 = vmatprep.subr.mxu1 %v7877_v17  ;;  %v7872_v27 = vld [vmem:[%s17287_s1 + $0x1a0] sm:$0xff]  ;;  %v54_v28 = vld [vmem:[%s17287_s1 + $0x88] sm:$0xff]  ;;  %v7871_v29 = vld [vmem:[%s17287_s1 + $0x198] sm:$0xff] }
   0xb   :  { %124 = vmatpush1.msra.mxu0 %v59_v18  ;;  %307 = vmatpush1.msra.mxu1 %v7876_v19  ;;  %v53_v30 = vld [vmem:[%s17287_s1 + $0x80] sm:$0xff]  ;;  %v7870_v31 = vld [vmem:[%s17287_s1 + $0x190] sm:$0xff]  ;;  %v52_v32 = vld [vmem:[%s17287_s1 + $0x78] sm:$0xff] }
   0xc   :  { %125 = vmatprep.subr.mxu0 %v58_v20  ;;  %308 = vmatprep.subr.mxu1 %v7875_v21  ;;  %v7869_v33 = vld [vmem:[%s17287_s1 + $0x188] sm:$0xff]  ;;  %v51_v34 = vld [vmem:[%s17287_s1 + $0x70] sm:$0xff]  ;;  %v7868_v35 = vld [vmem:[%s17287_s1 + $0x180] sm:$0xff] }
   0xd   :  { %126 = vmatpush1.msra.mxu0 %v57_v22  ;;  %309 = vmatpush1.msra.mxu1 %v7874_v23  ;;  %v50_v36 = vld [vmem:[%s17287_s1 + $0x68] sm:$0xff]  ;;  %v7867_v37 = vld [vmem:[%s17287_s1 + $0x178] sm:$0xff]  ;;  %v49_v38 = vld [vmem:[%s17287_s1 + $0x60] sm:$0xff] }
   0xe   :  { %127 = vmatprep.subr.mxu0 %v56_v24  ;;  %310 = vmatprep.subr.mxu1 %v7873_v25  ;;  %v7866_v39 = vld [vmem:[%s17287_s1 + $0x170] sm:$0xff]  ;;  %v48_v40 = vld [vmem:[%s17287_s1 + $0x58] sm:$0xff]  ;;  %v7865_v41 = vld [vmem:[%s17287_s1 + $0x168] sm:$0xff] }
   0xf   :  { %128 = vmatpush1.msra.mxu0 %v55_v26  ;;  %311 = vmatpush1.msra.mxu1 %v7872_v27  ;;  %v47_v42 = vld [vmem:[%s17287_s1 + $0x50] sm:$0xff]  ;;  %v7864_v43 = vld [vmem:[%s17287_s1 + $0x160] sm:$0xff]  ;;  %v46_v44 = vld [vmem:[%s17287_s1 + $0x48] sm:$0xff] }
  0x10   :  { %129 = vmatprep.subr.mxu0 %v54_v28  ;;  %312 = vmatprep.subr.mxu1 %v7871_v29  ;;  %v7863_v45 = vld [vmem:[%s17287_s1 + $0x158] sm:$0xff]  ;;  %v45_v46 = vld [vmem:[%s17287_s1 + $0x40] sm:$0xff]  ;;  %v7862_v47 = vld [vmem:[%s17287_s1 + $0x150] sm:$0xff] }
  0x11   :  { %130 = vmatpush1.msra.mxu0 %v53_v30  ;;  %313 = vmatpush1.msra.mxu1 %v7870_v31  ;;  %v44_v48 = vld [vmem:[%s17287_s1 + $0x38] sm:$0xff]  ;;  %v7861_v49 = vld [vmem:[%s17287_s1 + $0x148] sm:$0xff]  ;;  %v43_v50 = vld [vmem:[%s17287_s1 + $0x30] sm:$0xff] }
  0x12   :  { %131 = vmatprep.subr.mxu0 %v52_v32  ;;  %314 = vmatprep.subr.mxu1 %v7869_v33  ;;  %v7860_v51 = vld [vmem:[%s17287_s1 + $0x140] sm:$0xff]  ;;  %v42_v52 = vld [vmem:[%s17287_s1 + $0x28] sm:$0xff]  ;;  %v7859_v53 = vld [vmem:[%s17287_s1 + $0x138] sm:$0xff] }
  0x13   :  { %132 = vmatpush1.msra.mxu0 %v51_v34  ;;  %315 = vmatpush1.msra.mxu1 %v7868_v35  ;;  %v41_v54 = vld [vmem:[%s17287_s1 + $0x20] sm:$0xff]  ;;  %v7858_v55 = vld [vmem:[%s17287_s1 + $0x130] sm:$0xff]  ;;  %v40_v56 = vld [vmem:[%s17287_s1 + $0x18] sm:$0xff] }
  0x14   :  { %133 = vmatprep.subr.mxu0 %v50_v36  ;;  %316 = vmatprep.subr.mxu1 %v7867_v37  ;;  %v7857_v57 = vld [vmem:[%s17287_s1 + $0x128] sm:$0xff]  ;;  %v39_v58 = vld [vmem:[%s17287_s1 + $0x10] sm:$0xff]  ;;  %v7856_v59 = vld [vmem:[%s17287_s1 + $0x120] sm:$0xff] }
  0x15   :  { %134 = vmatpush1.msra.mxu0 %v49_v38  ;;  %317 = vmatpush1.msra.mxu1 %v7866_v39  ;;  %v38_v60 = vld [vmem:[%s17287_s1 + $0x8] sm:$0xff]  ;;  %v7855_v61 = vld [vmem:[%s17287_s1 + $0x118] sm:$0xff]  ;;  %v37_v62 = vld [vmem:[%s17287_s1] sm:$0xff] }
  0x16   :  { %135 = vmatprep.subr.mxu0 %v48_v40  ;;  %318 = vmatprep.subr.mxu1 %v7865_v41  ;;  %v7854_v63 = vld [vmem:[%s17287_s1 + $0x110] sm:$0xff]  ;;  %v70_v0 = vld [vmem:[%s17287_s1 + $0x108] sm:$0x1]  ;;  %v7887_v1 = vld [vmem:[%s17287_s1 + $0x218] sm:$0x1] }
  0x17   :  { %136 = vmatpush1.msra.mxu0 %v47_v42  ;;  %319 = vmatpush1.msra.mxu1 %v7864_v43  ;;  %v69_v2 = vld [vmem:[%s17287_s1 + $0x100] sm:$0x1]  ;;  %v10297_v3 = vld [vmem:[%s17286_s0 + $0x8] sm:$0xff]  ;;  %v7886_v4 = vld [vmem:[%s17287_s1 + $0x210] sm:$0x1] }
  0x18   :  { %137 = vmatprep.subr.mxu0 %v46_v44  ;;  %320 = vmatprep.subr.mxu1 %v7863_v45  ;;  %v10305_v5 = vld [vmem:[%s17286_s0] sm:$0xff]  ;;  %v7930_v6 = vld [vmem:[%s17287_s1 + $0x318] sm:$0xff]  ;;  %v7929_v8 = vld [vmem:[%s17287_s1 + $0x310] sm:$0xff] }
  0x19   :  { %138 = vmatpush1.msra.mxu0 %v45_v46  ;;  %321 = vmatpush1.msra.mxu1 %v7862_v47  ;;  %v643_v7 = vld [vmem:[%s17288_s2 + $0xf8] sm:$0xff]  ;;  %v642_v9 = vld [vmem:[%s17288_s2 + $0xf0] sm:$0xff]  ;;  %v7928_v10 = vld [vmem:[%s17287_s1 + $0x308] sm:$0xff] }
  0x1a   :  { %139 = vmatprep.subr.mxu0 %v44_v48  ;;  %322 = vmatprep.subr.mxu1 %v7861_v49  ;;  %v641_v11 = vld [vmem:[%s17288_s2 + $0xe8] sm:$0xff]  ;;  %v7927_v12 = vld [vmem:[%s17287_s1 + $0x300] sm:$0xff]  ;;  %v10344_v14 = vld [vmem:[%s17286_s0 + $0x18] sm:$0xff] }
  0x1b   :  { %140 = vmatpush1.msra.mxu0 %v43_v50  ;;  %323 = vmatpush1.msra.mxu1 %v7860_v51  ;;  %v640_v13 = vld [vmem:[%s17288_s2 + $0xe0] sm:$0xff]  ;;  %v7926_v15 = vld [vmem:[%s17287_s1 + $0x2f8] sm:$0xff]  ;;  %v10355_v17 = vld [vmem:[%s17286_s0 + $0x10] sm:$0xff] }
  0x1c   :  { %141 = vmatprep.subr.mxu0 %v42_v52  ;;  %324 = vmatprep.subr.mxu1 %v7859_v53  ;;  %v639_v16 = vld [vmem:[%s17288_s2 + $0xd8] sm:$0xff]  ;;  %v7925_v18 = vld [vmem:[%s17287_s1 + $0x2f0] sm:$0xff]  ;;  %v7924_v20 = vld [vmem:[%s17287_s1 + $0x2e8] sm:$0xff] }
  0x1d   :  { %142 = vmatpush1.msra.mxu0 %v41_v54  ;;  %325 = vmatpush1.msra.mxu1 %v7858_v55  ;;  %v638_v19 = vld [vmem:[%s17288_s2 + $0xd0] sm:$0xff]  ;;  %v637_v21 = vld [vmem:[%s17288_s2 + $0xc8] sm:$0xff]  ;;  %v7923_v22 = vld [vmem:[%s17287_s1 + $0x2e0] sm:$0xff] }
  0x1e   :  { %143 = vmatprep.subr.mxu0 %v40_v56  ;;  %326 = vmatprep.subr.mxu1 %v7857_v57  ;;  %v636_v23 = vld [vmem:[%s17288_s2 + $0xc0] sm:$0xff]  ;;  %v10383_v24 = vld [vmem:[%s17286_s0 + $0x28] sm:$0xff]  ;;  %v7922_v25 = vld [vmem:[%s17287_s1 + $0x2d8] sm:$0xff] }
  0x1f   :  { %144 = vmatpush1.msra.mxu0 %v39_v58  ;;  %327 = vmatpush1.msra.mxu1 %v7856_v59  ;;  %v635_v26 = vld [vmem:[%s17288_s2 + $0xb8] sm:$0xff]  ;;  %v10395_v27 = vld [vmem:[%s17286_s0 + $0x20] sm:$0xff]  ;;  %v7921_v28 = vld [vmem:[%s17287_s1 + $0x2d0] sm:$0xff] }
  0x20   :  { %145 = vmatprep.subr.mxu0 %v38_v60  ;;  %328 = vmatprep.subr.mxu1 %v7855_v61  ;;  %v634_v29 = vld [vmem:[%s17288_s2 + $0xb0] sm:$0xff]  ;;  %v7920_v30 = vld [vmem:[%s17287_s1 + $0x2c8] sm:$0xff]  ;;  %v7919_v32 = vld [vmem:[%s17287_s1 + $0x2c0] sm:$0xff] }
  0x21   :  { %146 = vmatpush1.msra.mxu0 %v37_v62  ;;  %329 = vmatpush1.msra.mxu1 %v7854_v63  ;;  %v633_v31 = vld [vmem:[%s17288_s2 + $0xa8] sm:$0xff]  ;;  %v632_v33 = vld [vmem:[%s17288_s2 + $0xa0] sm:$0xff]  ;;  %v10423_v34 = vld [vmem:[%s17286_s0 + $0x38] sm:$0xff] }
  0x22   :  { %7844 = vmatprep.subr.msk.mxu0 %vm108_vm0, %v70_v0  ;;  %7889 = vmatprep.subr.msk.mxu1 %vm108_vm0, %v7887_v1  ;;  %v7918_v35 = vld [vmem:[%s17287_s1 + $0x2b8] sm:$0xff]  ;;  %v10435_v37 = vld [vmem:[%s17286_s0 + $0x30] sm:$0xff]  ;;  %v7916_v40 = vld [vmem:[%s17287_s1 + $0x2a8] sm:$0xff] }
  0x23   :  { %7845 = vmatpush2.msk.msra.mxu0 %vm108_vm0, %v69_v2  ;;  %7846 = vmatprep.mubr.msk.f32.mxu0 %vm83_vm1, %v10297_v3  ;;  %v631_v36 = vld [vmem:[%s17288_s2 + $0x98] sm:$0xff]  ;;  %v7917_v38 = vld [vmem:[%s17287_s1 + $0x2b0] sm:$0xff]  ;;  %v629_v41 = vld [vmem:[%s17288_s2 + $0x88] sm:$0xff] }
  0x24   :  { %7890 = vmatpush2.msk.msra.mxu1 %vm108_vm0, %v7886_v4  ;;  %180 = vmatmul.mubr.f32.vlgmr.msra.gmra.mxu0 %v10305_v5  ;;  %v630_v39 = vld [vmem:[%s17288_s2 + $0x90] sm:$0xff]  ;;  %v7915_v42 = vld [vmem:[%s17287_s1 + $0x2a0] sm:$0xff]  ;;  %v10463_v44 = vld [vmem:[%s17286_s0 + $0x48] sm:$0xff] }
  0x25   :  { %7891 = vmatprep.mubr.msk.f32.mxu1 %vm83_vm1, %v10297_v3  ;;  %482 = vmatprep.subr.mxu0 %v7930_v6  ;;  %v628_v43 = vld [vmem:[%s17288_s2 + $0x80] sm:$0xff]  ;;  %v7914_v45 = vld [vmem:[%s17287_s1 + $0x298] sm:$0xff]  ;;  %v7913_v48 = vld [vmem:[%s17287_s1 + $0x290] sm:$0xff] }
  0x26   :  { %655 = vmatprep.subr.mxu1 %v643_v7  ;;  %363 = vmatmul.mubr.f32.vlgmr.msra.gmra.mxu1 %v10305_v5  ;;  %v627_v46 = vld [vmem:[%s17288_s2 + $0x78] sm:$0xff]  ;;  %v10475_v47 = vld [vmem:[%s17286_s0 + $0x40] sm:$0xff]  ;;  %v10485_v49 = vld [vmem:[%s17288_s2 + $0x70] sm:$0xff] }
  0x27   :  { %483 = vmatpush1.msra.mxu0 %v7929_v8  ;;  %656 = vmatpush1.msra.mxu1 %v642_v9  ;;  %v7912_v50 = vld [vmem:[%s17287_s1 + $0x288] sm:$0xff]  ;;  %v7911_v52 = vld [vmem:[%s17287_s1 + $0x280] sm:$0xff]  ;;  %v10510_v54 = vld [vmem:[%s17286_s0 + $0x58] sm:$0xff] }
  0x28   :  { %484 = vmatprep.subr.mxu0 %v7928_v10  ;;  %657 = vmatprep.subr.mxu1 %v641_v11  ;;  %v10494_v51 = vld [vmem:[%s17288_s2 + $0x68] sm:$0xff]  ;;  %v10504_v53 = vld [vmem:[%s17288_s2 + $0x60] sm:$0xff]  ;;  %v7910_v55 = vld [vmem:[%s17287_s1 + $0x278] sm:$0xff] }
  0x29   :  { %485 = vmatpush1.msra.mxu0 %v7927_v12  ;;  %658 = vmatpush1.msra.mxu1 %v640_v13  ;;  %v10520_v56 = vld [vmem:[%s17288_s2 + $0x58] sm:$0xff]  ;;  %v10525_v57 = vld [vmem:[%s17286_s0 + $0x50] sm:$0xff]  ;;  %v7908_v60 = vld [vmem:[%s17287_s1 + $0x268] sm:$0xff] }
  0x2a   :  { %7847 = vmatprep.mubr.msk.f32.mxu0 %vm83_vm1, %v10344_v14  ;;  %486 = vmatprep.subr.mxu0 %v7926_v15  ;;  %v7909_v58 = vld [vmem:[%s17287_s1 + $0x270] sm:$0xff]  ;;  %v10546_v61 = vld [vmem:[%s17288_s2 + $0x48] sm:$0xff]  ;;  %v7907_v62 = vld [vmem:[%s17287_s1 + $0x260] sm:$0xff] }
  0x2b   :  { %659 = vmatprep.subr.mxu1 %v639_v16  ;;  %186 = vmatmul.mubr.f32.gmra.mxu0 %v10355_v17  ;;  %v10536_v59 = vld [vmem:[%s17288_s2 + $0x50] sm:$0xff]  ;;  %v10556_v63 = vld [vmem:[%s17288_s2 + $0x40] sm:$0xff]  ;;  %v10562_v0 = vld [vmem:[%s17286_s0 + $0x68] sm:$0xff] }
  0x2c   :  { %7892 = vmatprep.mubr.msk.f32.mxu1 %vm83_vm1, %v10344_v14  ;;  %487 = vmatpush1.msra.mxu0 %v7925_v18  ;;  %v7906_v1 = vld [vmem:[%s17287_s1 + $0x258] sm:$0xff]  ;;  %v10577_v4 = vld [vmem:[%s17286_s0 + $0x60] sm:$0xff]  ;;  %v7905_v6 = vld [vmem:[%s17287_s1 + $0x250] sm:$0xff] }
  0x2d   :  { %660 = vmatpush1.msra.mxu1 %v638_v19  ;;  %488 = vmatprep.subr.mxu0 %v7924_v20  ;;  %v10572_v2 = vld [vmem:[%s17288_s2 + $0x38] sm:$0xff]  ;;  %v10588_v7 = vld [vmem:[%s17288_s2 + $0x30] sm:$0xff]  ;;  %v7904_v8 = vld [vmem:[%s17287_s1 + $0x248] sm:$0xff] }
  0x2e   :  { %369 = vmatmul.mubr.f32.gmra.mxu1 %v10355_v17  ;;  %661 = vmatprep.subr.mxu1 %v637_v21  ;;  %v10598_v9 = vld [vmem:[%s17288_s2 + $0x28] sm:$0xff]  ;;  %v7903_v10 = vld [vmem:[%s17287_s1 + $0x240] sm:$0xff] }
  0x2f   :  { %489 = vmatpush1.msra.mxu0 %v7923_v22  ;;  %662 = vmatpush1.msra.mxu1 %v636_v23  ;;  %v10608_v11 = vld [vmem:[%s17288_s2 + $0x20] sm:$0xff] }
  0x30   :  { %7848 = vmatprep.mubr.msk.f32.mxu0 %vm83_vm1, %v10383_v24  ;;  %490 = vmatprep.subr.mxu0 %v7922_v25 }
  0x31   :  { %663 = vmatprep.subr.mxu1 %v635_v26  ;;  %192 = vmatmul.mubr.f32.gmra.mxu0 %v10395_v27 }
  0x32   :  { %7893 = vmatprep.mubr.msk.f32.mxu1 %vm83_vm1, %v10383_v24  ;;  %491 = vmatpush1.msra.mxu0 %v7921_v28 }
  0x33   :  { %664 = vmatpush1.msra.mxu1 %v634_v29  ;;  %492 = vmatprep.subr.mxu0 %v7920_v30 }
  0x34   :  { %375 = vmatmul.mubr.f32.gmra.mxu1 %v10395_v27  ;;  %665 = vmatprep.subr.mxu1 %v633_v31 }
  0x35   :  { %493 = vmatpush1.msra.mxu0 %v7919_v32  ;;  %666 = vmatpush1.msra.mxu1 %v632_v33 }
  0x36   :  { %7849 = vmatprep.mubr.msk.f32.mxu0 %vm83_vm1, %v10423_v34  ;;  %494 = vmatprep.subr.mxu0 %v7918_v35 }
  0x37   :  { %667 = vmatprep.subr.mxu1 %v631_v36  ;;  %198 = vmatmul.mubr.f32.gmra.mxu0 %v10435_v37 }
  0x38   :  { %7894 = vmatprep.mubr.msk.f32.mxu1 %vm83_vm1, %v10423_v34  ;;  %495 = vmatpush1.msra.mxu0 %v7917_v38 }
  0x39   :  { %668 = vmatpush1.msra.mxu1 %v630_v39  ;;  %496 = vmatprep.subr.mxu0 %v7916_v40 }
  0x3a   :  { %381 = vmatmul.mubr.f32.gmra.mxu1 %v10435_v37  ;;  %669 = vmatprep.subr.mxu1 %v629_v41 }
  0x3b   :  { %497 = vmatpush1.msra.mxu0 %v7915_v42  ;;  %670 = vmatpush1.msra.mxu1 %v628_v43 }
  0x3c   :  { %7850 = vmatprep.mubr.msk.f32.mxu0 %vm83_vm1, %v10463_v44  ;;  %498 = vmatprep.subr.mxu0 %v7914_v45 }
  0x3d   :  { %671 = vmatprep.subr.mxu1 %v627_v46  ;;  %204 = vmatmul.mubr.f32.gmra.mxu0 %v10475_v47 }
  0x3e   :  { %7895 = vmatprep.mubr.msk.f32.mxu1 %vm83_vm1, %v10463_v44  ;;  %499 = vmatpush1.msra.mxu0 %v7913_v48 }
  0x3f   :  { %672 = vmatpush1.msra.mxu1 %v10485_v49  ;;  %500 = vmatprep.subr.mxu0 %v7912_v50 }
  0x40   :  { %387 = vmatmul.mubr.f32.gmra.mxu1 %v10475_v47  ;;  %673 = vmatprep.subr.mxu1 %v10494_v51 }
  0x41   :  { %501 = vmatpush1.msra.mxu0 %v7911_v52  ;;  %674 = vmatpush1.msra.mxu1 %v10504_v53 }
  0x42   :  { %7851 = vmatprep.mubr.msk.f32.mxu0 %vm83_vm1, %v10510_v54  ;;  %502 = vmatprep.subr.mxu0 %v7910_v55 }
  0x43   :  { %675 = vmatprep.subr.mxu1 %v10520_v56  ;;  %210 = vmatmul.mubr.f32.gmra.mxu0 %v10525_v57 }
  0x44   :  { %7896 = vmatprep.mubr.msk.f32.mxu1 %vm83_vm1, %v10510_v54  ;;  %503 = vmatpush1.msra.mxu0 %v7909_v58 }
  0x45   :  { %676 = vmatpush1.msra.mxu1 %v10536_v59  ;;  %504 = vmatprep.subr.mxu0 %v7908_v60 }
  0x46   :  { %393 = vmatmul.mubr.f32.gmra.mxu1 %v10525_v57  ;;  %677 = vmatprep.subr.mxu1 %v10546_v61 }
  0x47   :  { %505 = vmatpush1.msra.mxu0 %v7907_v62  ;;  %678 = vmatpush1.msra.mxu1 %v10556_v63 }
  0x48   :  { %7852 = vmatprep.mubr.msk.f32.mxu0 %vm83_vm1, %v10562_v0  ;;  %506 = vmatprep.subr.mxu0 %v7906_v1 }
  0x49   :  { %679 = vmatprep.subr.mxu1 %v10572_v2  ;;  %216 = vmatmul.mubr.f32.gmra.mxu0 %v10577_v4 }
  0x4a   :  { %7897 = vmatprep.mubr.msk.f32.mxu1 %vm83_vm1, %v10562_v0  ;;  %507 = vmatpush1.msra.mxu0 %v7905_v6 }
  0x4b   :  { %10 = vsyncpa [#allocation4], 0  ;;  %680 = vmatpush1.msra.mxu1 %v10588_v7  ;;  %508 = vmatprep.subr.mxu0 %v7904_v8  ;;  %v10614_v12 = vld [vmem:[%s17286_s0 + $0x78] sm:$0xff]  ;;  %v10629_v16 = vld [vmem:[%s17286_s0 + $0x70] sm:$0xff]  ;;  %v17292_v32 = vmov 0.0  }
  0x4c   :  { %v7902_v13 = vld [vmem:[%s17287_s1 + $0x238] sm:$0xff]  ;;  %399 = vmatmul.mubr.f32.gmra.mxu1 %v10577_v4  ;;  %681 = vmatprep.subr.mxu1 %v10598_v9  ;;  %v7901_v18 = vld [vmem:[%s17287_s1 + $0x230] sm:$0xff]  ;;  %v7900_v20 = vld [vmem:[%s17287_s1 + $0x228] sm:$0xff] }
  0x4d   :  { %v10624_v15 = vld [vmem:[%s17288_s2 + $0x18] sm:$0xff]  ;;  %509 = vmatpush1.msra.mxu0 %v7903_v10  ;;  %682 = vmatpush1.msra.mxu1 %v10608_v11  ;;  %v10640_v19 = vld [vmem:[%s17288_s2 + $0x10] sm:$0xff]  ;;  %v10650_v21 = vld [vmem:[%s17288_s2 + $0x8] sm:$0xff] }
  0x4e   :  { %7853 = vmatprep.mubr.msk.f32.mxu0 %vm83_vm1, %v10614_v12  ;;  %510 = vmatprep.subr.mxu0 %v7902_v13  ;;  %v7899_v22 = vld [vmem:[%s17287_s1 + $0x220] sm:$0xff]  ;;  %v7932_v25 = vld [vmem:[%s17287_s1 + $0x328] sm:$0x1]  ;;  %v10691_v31 = vld [vmem:[%s17288_s2 + $0x318] sm:$0xff] }
  0x4f   :  { %683 = vmatprep.subr.mxu1 %v10624_v15  ;;  %222 = vmatmul.mubr.f32.gmra.mxu0 %v10629_v16  ;;  %v10660_v23 = vld [vmem:[%s17288_s2] sm:$0xff]  ;;  %v645_v26 = vld [vmem:[%s17288_s2 + $0x108] sm:$0x1]  ;;  %v10710_v35 = vld [vmem:[%s17288_s2 + $0x1f8] sm:$0xff] }
  0x50   :  { %7898 = vmatprep.mubr.msk.f32.mxu1 %vm83_vm1, %v10614_v12  ;;  %511 = vmatpush1.msra.mxu0 %v7901_v18  ;;  %v7931_v28 = vld [vmem:[%s17287_s1 + $0x320] sm:$0x1]  ;;  %v10686_v30 = vld [vmem:[%s17288_s2 + $0x208] sm:$0xff]  ;;  %v10741_v40 = vld [vmem:[%s17288_s2 + $0x2f8] sm:$0xff] }
  0x51   :  { %684 = vmatpush1.msra.mxu1 %v10640_v19  ;;  %512 = vmatprep.subr.mxu0 %v7900_v20  ;;  %v644_v29 = vld [vmem:[%s17288_s2 + $0x100] sm:$0x1]  ;;  %v10715_v36 = vld [vmem:[%s17288_s2 + $0x308] sm:$0xff]  ;;  %v10754_v42 = vld [vmem:[%s17288_s2 + $0x2f0] sm:$0xff] }
  0x52   :  { %405 = vmatmul.mubr.f32.gmra.mxu1 %v10629_v16  ;;  %685 = vmatprep.subr.mxu1 %v10650_v21  ;;  %v10698_v33 = vld [vmem:[%s17288_s2 + $0x200] sm:$0xff]  ;;  %v10736_v39 = vld [vmem:[%s17288_s2 + $0x1e8] sm:$0xff]  ;;  %v10773_v45 = vld [vmem:[%s17288_s2 + $0x1d0] sm:$0xff] }
  0x53   :  { %513 = vmatpush1.msra.mxu0 %v7899_v22  ;;  %686 = vmatpush1.msra.mxu1 %v10660_v23  ;;  %v10729_v38 = vld [vmem:[%s17288_s2 + $0x300] sm:$0xff]  ;;  %v10766_v43 = vld [vmem:[%s17288_s2 + $0x2e8] sm:$0xff]  ;;  %v10792_v48 = vld [vmem:[%s17288_s2 + $0x2d8] sm:$0xff] }
  0x54   :  { %7934 = vmatprep.subr.msk.mxu0 %vm108_vm0, %v7932_v25  ;;  %7944 = vmatprep.subr.msk.mxu1 %vm108_vm0, %v645_v26  ;;  %v10749_v41 = vld [vmem:[%s17288_s2 + $0x1e0] sm:$0xff]  ;;  %v10787_v46 = vld [vmem:[%s17288_s2 + $0x1c8] sm:$0xff]  ;;  %v10805_v52 = vld [vmem:[%s17288_s2 + $0x2d0] sm:$0xff] }
  0x55   :  { %7935 = vmatpush2.msk.msra.mxu0 %vm108_vm0, %v7931_v28  ;;  %7936 = vmatprep.mubr.msk.f32.mxu0 %vm83_vm1, %v10297_v3  ;;  %v10703_v3 = vld [vmem:[%s17288_s2 + $0x310] sm:$0xff]  ;;  %v10800_v50 = vld [vmem:[%s17288_s2 + $0x1c0] sm:$0xff]  ;;  %v10817_v55 = vld [vmem:[%s17288_s2 + $0x2c8] sm:$0xff] }
  0x56   :  { %7945 = vmatpush2.msk.msra.mxu1 %vm108_vm0, %v644_v29  ;;  %719 = vmatprep.mubr.f32.mxu1 %v17292_v32  ;;  %17501 = vst [vmem:[#allocation6_spill] sm:$0xff] %v10817_v55  ;;  %v10824_v58 = vld [vmem:[%s17288_s2 + $0x1b0] sm:$0xff]  ;;  %v10838_v60 = vld [vmem:[%s17288_s2 + $0x1a8] sm:$0xff]  ;;  %v10843_v62 = vld [vmem:[%s17288_s2 + $0x2b8] sm:$0xff] }
  0x57   :  { %547 = vmatmul.mubr.f32.vlgmr.msra.gmra.mxu0 %v10305_v5  ;;  %720 = vmatmul.mubr.f32.vlgmr.msra.gmra.mxu1 %v17292_v32  ;;  %v10722_v5 = vld [vmem:[%s17288_s2 + $0x1f0] sm:$0xff]  ;;  %17503 = vst [vmem:[#allocation8_spill] sm:$0xff] %v10843_v62  ;;  %v10851_v1 = vld [vmem:[%s17288_s2 + $0x1a0] sm:$0xff]  ;;  %v10868_v8 = vld [vmem:[%s17288_s2 + $0x2a8] sm:$0xff] }
  0x58   :  { %767 = vmatprep.subr.mxu0 %v10686_v30  ;;  %891 = vmatprep.subr.mxu1 %v10691_v31  ;;  %v10856_v6 = vld [vmem:[%s17288_s2 + $0x2b0] sm:$0xff]  ;;  %17505 = vst [vmem:[#allocation10_spill] sm:$0xff] %v10868_v8  ;;  %v10889_v13 = vld [vmem:[%s17288_s2 + $0x188] sm:$0xff]  ;;  %v10894_v18 = vld [vmem:[%s17288_s2 + $0x298] sm:$0xff] }
  0x59   :  { %768 = vmatpush1.msra.mxu0 %v10698_v33  ;;  %892 = vmatpush1.msra.mxu1 %v10703_v3  ;;  %17504 = vst [vmem:[#allocation9_spill] sm:$0xff] %v10856_v6  ;;  %v10875_v10 = vld [vmem:[%s17288_s2 + $0x190] sm:$0xff]  ;;  %17507 = vst [vmem:[#allocation12_spill] sm:$0xff] %v10894_v18  ;;  %v10902_v20 = vld [vmem:[%s17288_s2 + $0x180] sm:$0xff] }
  0x5a   :  { %769 = vmatprep.subr.mxu0 %v10710_v35  ;;  %893 = vmatprep.subr.mxu1 %v10715_v36  ;;  %v10907_v22 = vld [vmem:[%s17288_s2 + $0x290] sm:$0xff]  ;;  %v10919_v25 = vld [vmem:[%s17288_s2 + $0x288] sm:$0xff]  ;;  %v10945_v29 = vld [vmem:[%s17288_s2 + $0x278] sm:$0xff] }
  0x5b   :  { %7937 = vmatprep.mubr.msk.f32.mxu0 %vm83_vm1, %v10344_v14  ;;  %770 = vmatpush1.msra.mxu0 %v10722_v5  ;;  %v10761_v14 = vld [vmem:[%s17288_s2 + $0x1d8] sm:$0xff]  ;;  %17508 = vst [vmem:[#allocation13_spill] sm:$0xff] %v10907_v22  ;;  %17509 = vst [vmem:[#allocation14_spill] sm:$0xff] %v10919_v25  ;;  %v10926_v26 = vld [vmem:[%s17288_s2 + $0x170] sm:$0xff] }
  0x5c   :  { %894 = vmatpush1.msra.mxu1 %v10729_v38  ;;  %553 = vmatmul.mubr.f32.gmra.mxu0 %v10355_v17  ;;  %v10780_v17 = vld [vmem:[%s17288_s2 + $0x2e0] sm:$0xff]  ;;  %v10940_v28 = vld [vmem:[%s17288_s2 + $0x168] sm:$0xff]  ;;  %17511 = vst [vmem:[#allocation16_spill] sm:$0xff] %v10945_v29 }
  0x5d   :  { %771 = vmatprep.subr.mxu0 %v10736_v39  ;;  %895 = vmatprep.subr.mxu1 %v10741_v40  ;;  %v10953_v32 = vld [vmem:[%s17288_s2 + $0x160] sm:$0xff] }
  0x5e   :  { %772 = vmatpush1.msra.mxu0 %v10749_v41  ;;  %896 = vmatpush1.msra.mxu1 %v10754_v42 }
  0x5f   :  { %773 = vmatprep.subr.mxu0 %v10761_v14  ;;  %897 = vmatprep.subr.mxu1 %v10766_v43 }
  0x60   :  { %7938 = vmatprep.mubr.msk.f32.mxu0 %vm83_vm1, %v10383_v24  ;;  %774 = vmatpush1.msra.mxu0 %v10773_v45  ;;  %v10812_v24 = vld [vmem:[%s17288_s2 + $0x1b8] sm:$0xff] }
  0x61   :  { %898 = vmatpush1.msra.mxu1 %v10780_v17  ;;  %559 = vmatmul.mubr.f32.gmra.mxu0 %v10395_v27  ;;  %v10831_v27 = vld [vmem:[%s17288_s2 + $0x2c0] sm:$0xff] }
  0x62   :  { %775 = vmatprep.subr.mxu0 %v10787_v46  ;;  %899 = vmatprep.subr.mxu1 %v10792_v48  ;;  %17502 = vst [vmem:[#allocation7_spill] sm:$0xff] %v10831_v27 }
  0x63   :  { %776 = vmatpush1.msra.mxu0 %v10800_v50  ;;  %900 = vmatpush1.msra.mxu1 %v10805_v52 }
  0x64   :  { %777 = vmatprep.subr.mxu0 %v10812_v24  ;;  %901 = vmatprep.subr.mxu1 %v10817_v55  ;;  %v17521_v55 = vmov 0.0  }
  0x65   :  { %7939 = vmatprep.mubr.msk.f32.mxu0 %vm83_vm1, %v10423_v34  ;;  %778 = vmatpush1.msra.mxu0 %v10824_v58  ;;  %v10863_v34 = vld [vmem:[%s17288_s2 + $0x198] sm:$0xff] }
  0x66   :  { %902 = vmatpush1.msra.mxu1 %v10831_v27  ;;  %565 = vmatmul.mubr.f32.gmra.mxu0 %v10435_v37  ;;  %v10882_v37 = vld [vmem:[%s17288_s2 + $0x2a0] sm:$0xff]  ;;  %v7978_v27 = vld [vmem:[%s17288_s2 + $0x210] sm:$0x1] }
  0x67   :  { %779 = vmatprep.subr.mxu0 %v10838_v60  ;;  %903 = vmatprep.subr.mxu1 %v10843_v62  ;;  %17506 = vst [vmem:[#allocation11_spill] sm:$0xff] %v10882_v37  ;;  %v7946_v62 = vld [vmem:[%s17288_s2 + $0x110] sm:$0xff] }
  0x68   :  { %780 = vmatpush1.msra.mxu0 %v10851_v1  ;;  %904 = vmatpush1.msra.mxu1 %v10856_v6  ;;  %v7947_v6 = vld [vmem:[%s17288_s2 + $0x118] sm:$0xff] }
  0x69   :  { %781 = vmatprep.subr.mxu0 %v10863_v34  ;;  %905 = vmatprep.subr.mxu1 %v10868_v8  ;;  %v11045_v8 = vld [vmem:[%s17288_s2 + $0x238] sm:$0xff] }
  0x6a   :  { %7940 = vmatprep.mubr.msk.f32.mxu0 %vm83_vm1, %v10463_v44  ;;  %782 = vmatpush1.msra.mxu0 %v10875_v10  ;;  %v10914_v44 = vld [vmem:[%s17288_s2 + $0x178] sm:$0xff]  ;;  %17519 = vst [vmem:[#allocation24_spill] sm:$0xff] %v11045_v8 }
  0x6b   :  { %906 = vmatpush1.msra.mxu1 %v10882_v37  ;;  %571 = vmatmul.mubr.f32.gmra.mxu0 %v10475_v47  ;;  %v10933_v47 = vld [vmem:[%s17288_s2 + $0x280] sm:$0xff]  ;;  %v11021_v37 = vld [vmem:[%s17288_s2 + $0x248] sm:$0xff] }
  0x6c   :  { %783 = vmatprep.subr.mxu0 %v10889_v13  ;;  %907 = vmatprep.subr.mxu1 %v10894_v18  ;;  %17510 = vst [vmem:[#allocation15_spill] sm:$0xff] %v10933_v47  ;;  %v10996_v18 = vld [vmem:[%s17288_s2 + $0x258] sm:$0xff]  ;;  %17517 = vst [vmem:[#allocation22_spill] sm:$0xff] %v11021_v37 }
  0x6d   :  { %784 = vmatpush1.msra.mxu0 %v10902_v20  ;;  %908 = vmatpush1.msra.mxu1 %v10907_v22  ;;  %v10970_v22 = vld [vmem:[%s17288_s2 + $0x268] sm:$0xff]  ;;  %17515 = vst [vmem:[#allocation20_spill] sm:$0xff] %v10996_v18 }
  0x6e   :  { %785 = vmatprep.subr.mxu0 %v10914_v44  ;;  %909 = vmatprep.subr.mxu1 %v10919_v25  ;;  %v10958_v25 = vld [vmem:[%s17288_s2 + $0x270] sm:$0xff]  ;;  %17513 = vst [vmem:[#allocation18_spill] sm:$0xff] %v10970_v22 }
  0x6f   :  { %7941 = vmatprep.mubr.msk.f32.mxu0 %vm83_vm1, %v10510_v54  ;;  %786 = vmatpush1.msra.mxu0 %v10926_v26  ;;  %17512 = vst [vmem:[#allocation17_spill] sm:$0xff] %v10958_v25  ;;  %v10965_v54 = vld [vmem:[%s17288_s2 + $0x158] sm:$0xff] }
  0x70   :  { %910 = vmatpush1.msra.mxu1 %v10933_v47  ;;  %577 = vmatmul.mubr.f32.gmra.mxu0 %v10525_v57  ;;  %v10977_v47 = vld [vmem:[%s17288_s2 + $0x150] sm:$0xff]  ;;  %v10984_v57 = vld [vmem:[%s17288_s2 + $0x260] sm:$0xff] }
  0x71   :  { %787 = vmatprep.subr.mxu0 %v10940_v28  ;;  %911 = vmatprep.subr.mxu1 %v10945_v29  ;;  %17514 = vst [vmem:[#allocation19_spill] sm:$0xff] %v10984_v57  ;;  %v10991_v29 = vld [vmem:[%s17288_s2 + $0x148] sm:$0xff] }
  0x72   :  { %788 = vmatpush1.msra.mxu0 %v10953_v32  ;;  %912 = vmatpush1.msra.mxu1 %v10958_v25  ;;  %v11004_v25 = vld [vmem:[%s17288_s2 + $0x140] sm:$0xff] }
  0x73   :  { %789 = vmatprep.subr.mxu0 %v10965_v54  ;;  %913 = vmatprep.subr.mxu1 %v10970_v22  ;;  %v11009_v22 = vld [vmem:[%s17288_s2 + $0x250] sm:$0xff] }
  0x74   :  { %7942 = vmatprep.mubr.msk.f32.mxu0 %vm83_vm1, %v10562_v0  ;;  %790 = vmatpush1.msra.mxu0 %v10977_v47  ;;  %17516 = vst [vmem:[#allocation21_spill] sm:$0xff] %v11009_v22  ;;  %v11016_v0 = vld [vmem:[%s17288_s2 + $0x138] sm:$0xff] }
  0x75   :  { %914 = vmatpush1.msra.mxu1 %v10984_v57  ;;  %583 = vmatmul.mubr.f32.gmra.mxu0 %v10577_v4  ;;  %v11028_v57 = vld [vmem:[%s17288_s2 + $0x130] sm:$0xff]  ;;  %v11035_v4 = vld [vmem:[%s17288_s2 + $0x240] sm:$0xff] }
  0x76   :  { %791 = vmatprep.subr.mxu0 %v10991_v29  ;;  %915 = vmatprep.subr.mxu1 %v10996_v18  ;;  %17518 = vst [vmem:[#allocation23_spill] sm:$0xff] %v11035_v4  ;;  %v7949_v18 = vld [vmem:[%s17288_s2 + $0x128] sm:$0xff] }
  0x77   :  { %792 = vmatpush1.msra.mxu0 %v11004_v25  ;;  %916 = vmatpush1.msra.mxu1 %v11009_v22  ;;  %v7948_v22 = vld [vmem:[%s17288_s2 + $0x120] sm:$0xff] }
  0x78   :  { %793 = vmatprep.subr.mxu0 %v11016_v0  ;;  %917 = vmatprep.subr.mxu1 %v11021_v37  ;;  %v11056_v37 = vld [vmem:[%s17288_s2 + $0x230] sm:$0xff] }
  0x79   :  { %7943 = vmatprep.mubr.msk.f32.mxu0 %vm83_vm1, %v10614_v12  ;;  %794 = vmatpush1.msra.mxu0 %v11028_v57  ;;  %17520 = vst [vmem:[#allocation25_spill] sm:$0xff] %v11056_v37  ;;  %v11066_v12 = vld [vmem:[%s17288_s2 + $0x228] sm:$0xff] }
  0x7a   :  { %918 = vmatpush1.msra.mxu1 %v11035_v4  ;;  %589 = vmatmul.mubr.f32.gmra.mxu0 %v10629_v16  ;;  %v11075_v16 = vld [vmem:[%s17288_s2 + $0x220] sm:$0xff]  ;;  %v7979_v4 = vld [vmem:[%s17288_s2 + $0x218] sm:$0x1] }
  0x7b   :  { %795 = vmatprep.subr.mxu0 %v7949_v18  ;;  %919 = vmatprep.subr.mxu1 %v11045_v8  ;;  %v8015_v8 = vld [vmem:[%s17288_s2 + $0x328] sm:$0x1] }
  0x7c   :  { %796 = vmatpush1.msra.mxu0 %v7948_v22  ;;  %920 = vmatpush1.msra.mxu1 %v11056_v37  ;;  %v8014_v37 = vld [vmem:[%s17288_s2 + $0x320] sm:$0x1] }
  0x7d   :  { %797 = vmatprep.subr.mxu0 %v7947_v6  ;;  %921 = vmatprep.subr.mxu1 %v11066_v12 }
  0x7e   :  { %798 = vmatpush1.msra.mxu0 %v7946_v62  ;;  %922 = vmatpush1.msra.mxu1 %v11075_v16 }
  0x7f   :  { %7980 = vmatprep.subr.msk.mxu0 %vm108_vm0, %v7979_v4  ;;  %8016 = vmatprep.subr.msk.mxu1 %vm108_vm0, %v8015_v8  ;;  %v8058_v8 = vld [vmem:[%s17288_s2 + $0x218] sm:$0x1] }
  0x80   :  { %7981 = vmatpush2.msk.msra.mxu0 %vm108_vm0, %v7978_v27  ;;  %831 = vmatprep.mubr.f32.mxu0 %v17521_v55  ;;  %v11203_v27 = vld [vmem:[%s17288_s2 + $0x98] sm:$0xff] }
  0x81   :  { %8017 = vmatpush2.msk.msra.mxu1 %vm108_vm0, %v8014_v37  ;;  %955 = vmatprep.mubr.f32.mxu1 %v17521_v55  ;;  %v71_v37 = vld [vmem:[%s17289_s3] sm:$0x3] }
  0x82   :  { %832 = vmatmul.mubr.f32.vlgmr.msra.gmra.mxu0 %v17521_v55  ;;  %956 = vmatmul.mubr.f32.vlgmr.msra.gmra.mxu1 %v17521_v55  ;;  %v8139_v55 = vld [vmem:[%s17288_s2 + $0x218] sm:$0x1] }
  0x83   :  { %1166 = vmatprep.subr.mxu1 %v10686_v30  ;;  %v11131_v30 = vld [vmem:[%s17288_s2 + $0xf8] sm:$0xff] }
  0x84   :  { %1167 = vmatpush1.msra.mxu1 %v10698_v33  ;;  %1055 = vmatprep.subr.mxu0 %v11131_v30  ;;  %v11143_v33 = vld [vmem:[%s17288_s2 + $0xe8] sm:$0xff] }
  0x85   :  { %1168 = vmatprep.subr.mxu1 %v10710_v35  ;;  %v11149_v35 = vld [vmem:[%s17288_s2 + $0xe0] sm:$0xff] }
  0x86   :  { %1169 = vmatpush1.msra.mxu1 %v10722_v5  ;;  %v11155_v5 = vld [vmem:[%s17288_s2 + $0xd8] sm:$0xff] }
  0x87   :  { %1170 = vmatprep.subr.mxu1 %v10736_v39  ;;  %v11161_v39 = vld [vmem:[%s17288_s2 + $0xd0] sm:$0xff] }
  0x88   :  { %1171 = vmatpush1.msra.mxu1 %v10749_v41  ;;  %v11167_v41 = vld [vmem:[%s17288_s2 + $0xc8] sm:$0xff] }
  0x89   :  { %1172 = vmatprep.subr.mxu1 %v10761_v14  ;;  %v11173_v14 = vld [vmem:[%s17288_s2 + $0xc0] sm:$0xff] }
  0x8a   :  { %1173 = vmatpush1.msra.mxu1 %v10773_v45  ;;  %v11179_v45 = vld [vmem:[%s17288_s2 + $0xb8] sm:$0xff] }
  0x8b   :  { %1174 = vmatprep.subr.mxu1 %v10787_v46  ;;  %v11185_v46 = vld [vmem:[%s17288_s2 + $0xb0] sm:$0xff] }
  0x8c   :  { %1175 = vmatpush1.msra.mxu1 %v10800_v50  ;;  %v73_v50 = vlaneseq }
  0x8d   :  { %1176 = vmatprep.subr.mxu1 %v10812_v24  ;;  %v11191_v24 = vld [vmem:[%s17288_s2 + $0xa8] sm:$0xff] }
  0x8e   :  { %1177 = vmatpush1.msra.mxu1 %v10824_v58  ;;  %v11197_v58 = vld [vmem:[%s17288_s2 + $0xa0] sm:$0xff] }
  0x8f   :  { %1178 = vmatprep.subr.mxu1 %v10838_v60  ;;  %v11209_v60 = vld [vmem:[%s17288_s2 + $0x90] sm:$0xff] }
  0x90   :  { %1179 = vmatpush1.msra.mxu1 %v10851_v1  ;;  %v11215_v1 = vld [vmem:[%s17288_s2 + $0x88] sm:$0xff] }
  0x91   :  { %1180 = vmatprep.subr.mxu1 %v10863_v34  ;;  %v11226_v34 = vld [vmem:[%s17288_s2 + $0x78] sm:$0xff] }
  0x92   :  { %1181 = vmatpush1.msra.mxu1 %v10875_v10 }
  0x93   :  { %1182 = vmatprep.subr.mxu1 %v10889_v13 }
  0x94   :  { %1183 = vmatpush1.msra.mxu1 %v10902_v20 }
  0x95   :  { %1184 = vmatprep.subr.mxu1 %v10914_v44 }
  0x96   :  { %1185 = vmatpush1.msra.mxu1 %v10926_v26 }
  0x97   :  { %1186 = vmatprep.subr.mxu1 %v10940_v28 }
  0x98   :  { %1187 = vmatpush1.msra.mxu1 %v10953_v32  ;;  %v11137_v32 = vld [vmem:[%s17288_s2 + $0xf0] sm:$0xff] }
  0x99   :  { %1188 = vmatprep.subr.mxu1 %v10965_v54  ;;  %1056 = vmatpush1.msra.mxu0 %v11137_v32 }
  0x9a   :  { %1189 = vmatpush1.msra.mxu1 %v10977_v47  ;;  %1057 = vmatprep.subr.mxu0 %v11143_v33 }
  0x9b   :  { %1190 = vmatprep.subr.mxu1 %v10991_v29  ;;  %1058 = vmatpush1.msra.mxu0 %v11149_v35 }
  0x9c   :  { %1191 = vmatpush1.msra.mxu1 %v11004_v25  ;;  %1059 = vmatprep.subr.mxu0 %v11155_v5 }
  0x9d   :  { %1192 = vmatprep.subr.mxu1 %v11016_v0  ;;  %1060 = vmatpush1.msra.mxu0 %v11161_v39 }
  0x9e   :  { %1193 = vmatpush1.msra.mxu1 %v11028_v57  ;;  %1061 = vmatprep.subr.mxu0 %v11167_v41 }
  0x9f   :  { %1194 = vmatprep.subr.mxu1 %v7949_v18  ;;  %1062 = vmatpush1.msra.mxu0 %v11173_v14  ;;  %v7888_v18 = vld [vmem:[%s17289_s3 + $0x2] sm:$0x3] }
  0xa0   :  { %1195 = vmatpush1.msra.mxu1 %v7948_v22  ;;  %1063 = vmatprep.subr.mxu0 %v11179_v45 }
  0xa1   :  { %1196 = vmatprep.subr.mxu1 %v7947_v6  ;;  %1064 = vmatpush1.msra.mxu0 %v11185_v46  ;;  %v11221_v6 = vld [vmem:[%s17288_s2 + $0x80] sm:$0xff] }
  0xa2   :  { %1197 = vmatpush1.msra.mxu1 %v7946_v62  ;;  %1065 = vmatprep.subr.mxu0 %v11191_v24  ;;  %v74_v62 = vshrl.u32 %v73_v50, 7 }
  0xa3   :  { %1066 = vmatpush1.msra.mxu0 %v11197_v58  ;;  %8059 = vmatprep.subr.msk.mxu1 %vm108_vm0, %v8058_v8 }
  0xa4   :  { %1067 = vmatprep.subr.mxu0 %v11203_v27  ;;  %v11234_v10 = vsub.s32 0, %v74_v62  ;;  %v11241_v13 = vsub.s32 1, %v74_v62 }
  0xa5   :  { %1068 = vmatpush1.msra.mxu0 %v11209_v60 }
  0xa6   :  { %1069 = vmatprep.subr.mxu0 %v11215_v1  ;;  %17522 = vst [vmem:[#allocation26_spill] sm:$0xff] %v11234_v10  ;;  %17523 = vst [vmem:[#allocation27_spill] sm:$0xff] %v11241_v13  ;;  %v11249_v20 = vrot.slane %v71_v37, %v11234_v10  ;;  %v11265_v22 = vrot.slane %v7888_v18, %v11241_v13 }
  0xa7   :  { %1070 = vmatpush1.msra.mxu0 %v11221_v6 }
  0xa8   :  { %1071 = vmatprep.subr.mxu0 %v11226_v34 }
  0xa9   :  { %1072 = vmatpush1.msra.mxu0 %v10485_v49  ;;  %v11254_v49 = vrot.slane %v71_v37, %v11241_v13 }
  0xaa   :  { %1073 = vmatprep.subr.mxu0 %v10494_v51  ;;  %v11257_v51 = vrot.slane %v7888_v18, %v11234_v10 }
  0xab   :  { %1074 = vmatpush1.msra.mxu0 %v10504_v53 }
  0xac   :  { %1075 = vmatprep.subr.mxu0 %v10520_v56 }
  0xad   :  { %1076 = vmatpush1.msra.mxu0 %v10536_v59 }
  0xae   :  { %1077 = vmatprep.subr.mxu0 %v10546_v61 }
  0xaf   :  { %1078 = vmatpush1.msra.mxu0 %v10556_v63 }
  0xb0   :  { %1079 = vmatprep.subr.mxu0 %v10572_v2 }
  0xb1   :  { %1080 = vmatpush1.msra.mxu0 %v10588_v7  ;;  %v1045_v7 = vld [vmem:[%s17288_s2 + $0x108] sm:$0x1] }
  0xb2   :  { %1081 = vmatprep.subr.mxu0 %v10598_v9  ;;  %v1044_v9 = vld [vmem:[%s17288_s2 + $0x100] sm:$0x1] }
  0xb3   :  { %1082 = vmatpush1.msra.mxu0 %v10608_v11 }
  0xb4   :  { %1083 = vmatprep.subr.mxu0 %v10624_v15 }
  0xb5   :  { %1084 = vmatpush1.msra.mxu0 %v10640_v19 }
  0xb6   :  { %1085 = vmatprep.subr.mxu0 %v10650_v21  ;;  %v8057_v21 = vld [vmem:[%s17288_s2 + $0x210] sm:$0x1] }
  0xb7   :  { %1086 = vmatpush1.msra.mxu0 %v10660_v23  ;;  %8060 = vmatpush2.msk.msra.mxu1 %vm108_vm0, %v8057_v21 }
  0xb8   :  { %8022 = vmatprep.subr.msk.mxu0 %vm108_vm0, %v1045_v7  ;;  %1453 = vmatprep.subr.mxu1 %v11131_v30 }
  0xb9   :  { %8023 = vmatpush2.msk.msra.mxu0 %vm108_vm0, %v1044_v9 }
  0xba   :  { %1289 = vmatprep.subr.mxu0 %v10691_v31 }
  0xe4   :  { %v181_v53 = vpop.f32.mrf.mxu0 }
  0xe5   :  { %v11262_v56 = vadd.f32 %v181_v53, %v11249_v20 }
  0xe6   :  { %v183_v59 = vpop.f32.mrf.mxu0  ;;  %v364_v61 = vpop.f32.mrf.mxu1 }
  0xe7   :  { %v184_v44 = vadd.f32 %v183_v59, %v11254_v49  ;;  %v11271_v25 = vadd.f32 %v364_v61, %v11257_v51 }
  0xe8   :  { %v366_v63 = vpop.f32.mrf.mxu1 }
  0xe9   :  { %229 = vst.msk [vmem:[#allocation2 + $0x8] sm:$0xff] %vm83_vm1, %v184_v44  ;;  %v367_v2 = vadd.f32 %v366_v63, %v11265_v22 }
  0xeb   :  { %413 = vst.msk [vmem:[#allocation2 + $0x88] sm:$0xff] %vm83_vm1, %v367_v2  ;;  %v187_v11 = vpop.f32.mrf.mxu0 }
  0xec   :  { %v11288_v15 = vadd.f32 %v187_v11, %v11249_v20 }
  0xed   :  { %v189_v19 = vpop.f32.mrf.mxu0 }
  0xee   :  { %v370_v26 = vpop.f32.mrf.mxu1  ;;  %v190_v47 = vadd.f32 %v189_v19, %v11254_v49 }
  0xef   :  { %v11299_v23 = vadd.f32 %v370_v26, %v11257_v51 }
  0xf0   :  { %231 = vst.msk [vmem:[#allocation2 + $0x18] sm:$0xff] %vm83_vm1, %v190_v47  ;;  %v372_v28 = vpop.f32.mrf.mxu1 }
  0xf1   :  { %v373_v29 = vadd.f32 %v372_v28, %v11265_v22  ;;  %v193_v54 = vpop.f32.mrf.mxu0 }
  0xf2   :  { %v194_v57 = vadd.f32 %v193_v54, %v11249_v20 }
  0xf3   :  { %415 = vst.msk [vmem:[#allocation2 + $0x98] sm:$0xff] %vm83_vm1, %v373_v29  ;;  %v195_v0 = vpop.f32.mrf.mxu0 }
  0xf4   :  { %232 = vst [vmem:[#allocation2 + $0x20] sm:$0xff] %v194_v57  ;;  %v376_v4 = vpop.f32.mrf.mxu1  ;;  %v196_v31 = vadd.f32 %v195_v0, %v11254_v49 }
  0xf5   :  { %v377_v50 = vadd.f32 %v376_v4, %v11257_v51 }
  0xf6   :  { %233 = vst.msk [vmem:[#allocation2 + $0x28] sm:$0xff] %vm83_vm1, %v196_v31  ;;  %v378_v62 = vpop.f32.mrf.mxu1 }
  0xf7   :  { %416 = vst [vmem:[#allocation2 + $0xa0] sm:$0xff] %v377_v50  ;;  %v379_v8 = vadd.f32 %v378_v62, %v11265_v22  ;;  %v199_v37 = vpop.f32.mrf.mxu0 }
  0xf8   :  { %v200_v18 = vadd.f32 %v199_v37, %v11249_v20 }
  0xf9   :  { %417 = vst.msk [vmem:[#allocation2 + $0xa8] sm:$0xff] %vm83_vm1, %v379_v8  ;;  %v201_v53 = vpop.f32.mrf.mxu0 }
  0xfa   :  { %234 = vst [vmem:[#allocation2 + $0x30] sm:$0xff] %v200_v18  ;;  %v382_v59 = vpop.f32.mrf.mxu1  ;;  %v202_v61 = vadd.f32 %v201_v53, %v11254_v49 }
  0xfb   :  { %v383_v44 = vadd.f32 %v382_v59, %v11257_v51 }
  0xfc   :  { %235 = vst.msk [vmem:[#allocation2 + $0x38] sm:$0xff] %vm83_vm1, %v202_v61  ;;  %v384_v63 = vpop.f32.mrf.mxu1 }
  0xfd   :  { %418 = vst [vmem:[#allocation2 + $0xb0] sm:$0xff] %v383_v44  ;;  %v385_v2 = vadd.f32 %v384_v63, %v11265_v22  ;;  %v205_v7 = vpop.f32.mrf.mxu0 }
  0xfe   :  { %v206_v9 = vadd.f32 %v205_v7, %v11249_v20 }
  0xff   :  { %419 = vst.msk [vmem:[#allocation2 + $0xb8] sm:$0xff] %vm83_vm1, %v385_v2  ;;  %v207_v11 = vpop.f32.mrf.mxu0 }
 0x100   :  { %236 = vst [vmem:[#allocation2 + $0x40] sm:$0xff] %v206_v9  ;;  %v388_v19 = vpop.f32.mrf.mxu1  ;;  %v208_v21 = vadd.f32 %v207_v11, %v11254_v49 }
 0x101   :  { %v389_v26 = vadd.f32 %v388_v19, %v11257_v51 }
 0x102   :  { %237 = vst.msk [vmem:[#allocation2 + $0x48] sm:$0xff] %vm83_vm1, %v208_v21  ;;  %v390_v47 = vpop.f32.mrf.mxu1 }
 0x103   :  { %420 = vst [vmem:[#allocation2 + $0xc0] sm:$0xff] %v389_v26  ;;  %v391_v28 = vadd.f32 %v390_v47, %v11265_v22  ;;  %v211_v29 = vpop.f32.mrf.mxu0  ;;  %v7933_v26 = vld [vmem:[%s17289_s3 + $0x4] sm:$0x3] }
 0x104   :  { %v212_v54 = vadd.f32 %v211_v29, %v11249_v20 }
 0x105   :  { %421 = vst.msk [vmem:[#allocation2 + $0xc8] sm:$0xff] %vm83_vm1, %v391_v28  ;;  %v213_v57 = vpop.f32.mrf.mxu0 }
 0x106   :  { %238 = vst [vmem:[#allocation2 + $0x50] sm:$0xff] %v212_v54  ;;  %v394_v0 = vpop.f32.mrf.mxu1  ;;  %v214_v4 = vadd.f32 %v213_v57, %v11254_v49 }
 0x107   :  { %v395_v31 = vadd.f32 %v394_v0, %v11257_v51 }
 0x108   :  { %239 = vst.msk [vmem:[#allocation2 + $0x58] sm:$0xff] %vm83_vm1, %v214_v4  ;;  %v396_v50 = vpop.f32.mrf.mxu1 }
 0x109   :  { %422 = vst [vmem:[#allocation2 + $0xd0] sm:$0xff] %v395_v31  ;;  %v397_v62 = vadd.f32 %v396_v50, %v11265_v22  ;;  %v217_v8 = vpop.f32.mrf.mxu0 }
 0x10a   :  { %v218_v37 = vadd.f32 %v217_v8, %v11249_v20 }
 0x10b   :  { %423 = vst.msk [vmem:[#allocation2 + $0xd8] sm:$0xff] %vm83_vm1, %v397_v62  ;;  %v219_v18 = vpop.f32.mrf.mxu0 }
 0x10c   :  { %240 = vst [vmem:[#allocation2 + $0x60] sm:$0xff] %v218_v37  ;;  %v400_v53 = vpop.f32.mrf.mxu1  ;;  %v220_v59 = vadd.f32 %v219_v18, %v11254_v49 }
 0x10d   :  { %v401_v61 = vadd.f32 %v400_v53, %v11257_v51 }
 0x10e   :  { %241 = vst.msk [vmem:[#allocation2 + $0x68] sm:$0xff] %vm83_vm1, %v220_v59  ;;  %v402_v44 = vpop.f32.mrf.mxu1 }
 0x10f   :  { %424 = vst [vmem:[#allocation2 + $0xe0] sm:$0xff] %v401_v61  ;;  %v403_v63 = vadd.f32 %v402_v44, %v11265_v22  ;;  %v223_v2 = vpop.f32.mrf.mxu0 }
 0x110   :  { %v224_v7 = vadd.f32 %v223_v2, %v11249_v20  ;;  %v473_v20 = vrot.slane %v7933_v26, %v11241_v13 }
 0x111   :  { %425 = vst.msk [vmem:[#allocation2 + $0xe8] sm:$0xff] %vm83_vm1, %v403_v63  ;;  %v225_v9 = vpop.f32.mrf.mxu0  ;;  %v963_v63 = vld [vmem:[#allocation2 + $0x8] sm:$0xff] }
 0x112   :  { %242 = vst [vmem:[#allocation2 + $0x70] sm:$0xff] %v224_v7  ;;  %v406_v11 = vpop.f32.mrf.mxu1  ;;  %v226_v19 = vadd.f32 %v225_v9, %v11254_v49 }
 0x113   :  { %v407_v21 = vadd.f32 %v406_v11, %v11257_v51  ;;  %v11348_v51 = vrot.slane %v7933_v26, %v11234_v10 }
 0x114   :  { %243 = vst.msk [vmem:[#allocation2 + $0x78] sm:$0xff] %vm83_vm1, %v226_v19  ;;  %v408_v47 = vpop.f32.mrf.mxu1 }
 0x115   :  { %426 = vst [vmem:[#allocation2 + $0xf0] sm:$0xff] %v407_v21  ;;  %v409_v28 = vadd.f32 %v408_v47, %v11265_v22 }
 0x117   :  { %427 = vst.msk [vmem:[#allocation2 + $0xf8] sm:$0xff] %vm83_vm1, %v409_v28  ;;  %v11345_v29 = vpop.f32.mrf.mxu0  ;;  %v721_v62 = vpop.f32.mrf.mxu1 }
 0x118   :  { %v964_v53 = vadd.f32 %v721_v62, %v11262_v56 }
 0x119   :  { %v550_v54 = vpop.f32.mrf.mxu0  ;;  %v723_v59 = vpop.f32.mrf.mxu1 }
 0x11a   :  { %v551_v49 = vadd.f32 %v550_v54, %v473_v20  ;;  %v965_v7 = vadd.f32 %v963_v63, %v723_v59  ;;  %v8018_v9 = vmul.f32 -1.442695, %v964_v53 }
 0x11c   :  { %597 = vst.msk [vmem:[#allocation2 + $0x108] sm:$0xff] %vm83_vm1, %v551_v49  ;;  %v554_v57 = vpop.f32.mrf.mxu0  ;;  %v8019_v26 = vmul.f32 -1.442695, %v965_v7  ;;  %9653 = vpow2.f32 %v8018_v9  ;;  %v979_v7 = vld [vmem:[#allocation2 + $0x88] sm:$0xff] }
 0x11d   :  { %v11352_v0 = vadd.f32 %v554_v57, %v11348_v51 }
 0x11e   :  { %v556_v4 = vpop.f32.mrf.mxu0  ;;  %9655 = vpow2.f32 %v8019_v26 }
 0x11f   :  { %v557_v31 = vadd.f32 %v556_v4, %v473_v20 }
 0x121   :  { %599 = vst.msk [vmem:[#allocation2 + $0x118] sm:$0xff] %vm83_vm1, %v557_v31  ;;  %v560_v22 = vpop.f32.mrf.mxu0 }
 0x122   :  { %v561_v50 = vadd.f32 %v560_v22, %v11348_v51 }
 0x123   :  { %v562_v8 = vpop.f32.mrf.mxu0 }
 0x124   :  { %600 = vst [vmem:[#allocation2 + $0x120] sm:$0xff] %v561_v50  ;;  %v563_v37 = vadd.f32 %v562_v8, %v473_v20 }
 0x126   :  { %601 = vst.msk [vmem:[#allocation2 + $0x128] sm:$0xff] %vm83_vm1, %v563_v37  ;;  %v566_v18 = vpop.f32.mrf.mxu0 }
 0x127   :  { %v567_v61 = vadd.f32 %v566_v18, %v11348_v51 }
 0x128   :  { %v568_v44 = vpop.f32.mrf.mxu0 }
 0x129   :  { %602 = vst [vmem:[#allocation2 + $0x130] sm:$0xff] %v567_v61  ;;  %v569_v2 = vadd.f32 %v568_v44, %v473_v20  ;;  %v9654_v8 = vpop.eup %9653 }
 0x12a   :  { %v972_v59 = vadd.f32 1.0, %v9654_v8 }
 0x12b   :  { %603 = vst.msk [vmem:[#allocation2 + $0x138] sm:$0xff] %vm83_vm1, %v569_v2  ;;  %v572_v11 = vpop.f32.mrf.mxu0  ;;  %v9656_v53 = vpop.eup %9655 }
 0x12c   :  { %v573_v19 = vadd.f32 %v572_v11, %v11348_v51  ;;  %v973_v61 = vadd.f32 1.0, %v9656_v53  ;;  %9657 = vrcp.f32 %v972_v59 }
 0x12d   :  { %v574_v21 = vpop.f32.mrf.mxu0 }
 0x12e   :  { %604 = vst [vmem:[#allocation2 + $0x140] sm:$0xff] %v573_v19  ;;  %v575_v47 = vadd.f32 %v574_v21, %v473_v20  ;;  %9659 = vrcp.f32 %v973_v61  ;;  %v873_v19 = vld [vmem:[%s17290_s4] sm:$0x3] }
 0x12f   :  { %v878_v21 = vrot.slane %v873_v19, %v11234_v10 }
 0x130   :  { %605 = vst.msk [vmem:[#allocation2 + $0x148] sm:$0xff] %vm83_vm1, %v575_v47  ;;  %v578_v56 = vpop.f32.mrf.mxu0  ;;  %v882_v47 = vrot.slane %v873_v19, %v11241_v13 }
 0x131   :  { %v579_v28 = vadd.f32 %v578_v56, %v11348_v51 }
 0x132   :  { %v580_v54 = vpop.f32.mrf.mxu0 }
 0x133   :  { %606 = vst [vmem:[#allocation2 + $0x150] sm:$0xff] %v579_v28  ;;  %v581_v49 = vadd.f32 %v580_v54, %v473_v20 }
 0x135   :  { %607 = vst.msk [vmem:[#allocation2 + $0x158] sm:$0xff] %vm83_vm1, %v581_v49  ;;  %v584_v57 = vpop.f32.mrf.mxu0 }
 0x136   :  { %v585_v4 = vadd.f32 %v584_v57, %v11348_v51 }
 0x137   :  { %v586_v31 = vpop.f32.mrf.mxu0 }
 0x138   :  { %608 = vst [vmem:[#allocation2 + $0x160] sm:$0xff] %v585_v4  ;;  %v587_v22 = vadd.f32 %v586_v31, %v473_v20  ;;  %v549_v4 = vadd.f32 %v11345_v29, %v11348_v51 }
 0x13a   :  { %609 = vst.msk [vmem:[#allocation2 + $0x168] sm:$0xff] %vm83_vm1, %v587_v22  ;;  %v590_v50 = vpop.f32.mrf.mxu0 }
 0x13b   :  { %v591_v62 = vadd.f32 %v590_v50, %v11348_v51 }
 0x13c   :  { %v592_v37 = vpop.f32.mrf.mxu0 }
 0x13d   :  { %610 = vst [vmem:[#allocation2 + $0x170] sm:$0xff] %v591_v62  ;;  %v593_v18 = vadd.f32 %v592_v37, %v473_v20  ;;  %v995_v37 = vld [vmem:[#allocation2 + $0x108] sm:$0xff] }
 0x13f   :  { %611 = vst.msk [vmem:[#allocation2 + $0x178] sm:$0xff] %vm83_vm1, %v593_v18 }
 0x142   :  { %v833_v44 = vpop.f32.mrf.mxu0  ;;  %v957_v26 = vpop.f32.mrf.mxu1 }
 0x143   :  { %v980_v63 = vadd.f32 %v833_v44, %v11271_v25  ;;  %v958_v56 = vadd.f32 %v957_v26, %v878_v21  ;;  %v9658_v25 = vpop.eup %9657  ;;  %v17543_v21 = vld [vmem:[#allocation25_spill] sm:$0xff]  ;;  %v8095_v26 = vld [vmem:[%s17288_s2 + $0x328] sm:$0x1] }
 0x144   :  { %v835_v2 = vpop.f32.mrf.mxu0  ;;  %v959_v28 = vpop.f32.mrf.mxu1 }
 0x145   :  { %v8020_v9 = vmul.f32 -1.442695, %v980_v63  ;;  %v981_v11 = vadd.f32 %v979_v7, %v835_v2  ;;  %v960_v54 = vadd.f32 %v959_v28, %v882_v47  ;;  %v996_v49 = vmul.f32 %v9658_v25, %v958_v56  ;;  %v9660_v57 = vpop.eup %9659  ;;  %v8094_v47 = vld [vmem:[%s17288_s2 + $0x320] sm:$0x1]  ;;  %v11450_v56 = vld [vmem:[%s17288_s2 + $0x208] sm:$0xff]  ;;  %v11466_v28 = vld [vmem:[%s17288_s2 + $0x1f0] sm:$0xff] }
 0x146   :  { %v11472_v25 = vld [vmem:[%s17288_s2 + $0x1e8] sm:$0xff] }
 0x147   :  { %9661 = vpow2.f32 %v8020_v9  ;;  %v8021_v20 = vmul.f32 -1.442695, %v981_v11  ;;  %v997_v22 = vmul.f32 %v9660_v57, %v960_v54  ;;  %v998_v62 = vadd.f32 %v996_v49, %v549_v4  ;;  %v11478_v54 = vld [vmem:[%s17288_s2 + $0x1e0] sm:$0xff]  ;;  %v11486_v49 = vld [vmem:[%s17288_s2 + $0x1d8] sm:$0xff]  ;;  %v11492_v57 = vld [vmem:[%s17288_s2 + $0x1d0] sm:$0xff] }
 0x148   :  { %v11498_v4 = vld [vmem:[%s17288_s2 + $0x1c8] sm:$0xff] }
 0x149   :  { %9663 = vpow2.f32 %v8021_v20  ;;  %v999_v53 = vadd.f32 %v997_v22, %v995_v37  ;;  %v11510_v22 = vld [vmem:[%s17288_s2 + $0x1b8] sm:$0xff] }
 0x14a   :  { %v11534_v37 = vld [vmem:[%s17288_s2 + $0x198] sm:$0xff] }
 0x154   :  { %v9662_v31 = vpop.eup %9661 }
 0x155   :  { %v988_v50 = vadd.f32 1.0, %v9662_v31  ;;  %v11504_v31 = vld [vmem:[%s17288_s2 + $0x1c0] sm:$0xff] }
 0x156   :  { %v9664_v8 = vpop.eup %9663 }
 0x157   :  { %9665 = vrcp.f32 %v988_v50  ;;  %v989_v18 = vadd.f32 1.0, %v9664_v8  ;;  %v11516_v50 = vld [vmem:[%s17288_s2 + $0x1b0] sm:$0xff]  ;;  %v11528_v8 = vld [vmem:[%s17288_s2 + $0x1a0] sm:$0xff] }
 0x158   :  { %9667 = vtanh.f32 %v998_v62  ;;  %v11522_v62 = vld [vmem:[%s17288_s2 + $0x1a8] sm:$0xff] }
 0x159   :  { %9669 = vrcp.f32 %v989_v18  ;;  %v11540_v18 = vld [vmem:[%s17288_s2 + $0x190] sm:$0xff] }
 0x15a   :  { %9671 = vtanh.f32 %v999_v53  ;;  %v11546_v53 = vld [vmem:[%s17288_s2 + $0x70] sm:$0xff] }
 0x164   :  { %v9666_v59 = vpop.eup %9665 }
 0x165   :  { %v1002_v61 = vsub.f32 1.0, %v9666_v59  ;;  %v9668_v44 = vpop.eup %9667  ;;  %v1006_v7 = vmul.f32 0.0, %v9666_v59  ;;  %v11551_v59 = vld [vmem:[%s17288_s2 + $0x188] sm:$0xff] }
 0x166   :  { %v9670_v63 = vpop.eup %9669 }
 0x167   :  { %v1004_v2 = vmul.f32 %v9668_v44, %v1002_v61  ;;  %v1003_v9 = vsub.f32 1.0, %v9670_v63  ;;  %v9672_v29 = vpop.eup %9671  ;;  %v1007_v19 = vmul.f32 0.0, %v9670_v63  ;;  %v11556_v61 = vld [vmem:[%s17288_s2 + $0x68] sm:$0xff]  ;;  %v11563_v44 = vld [vmem:[%s17288_s2 + $0x180] sm:$0xff] }
 0x168   :  { %v11568_v63 = vld [vmem:[%s17288_s2 + $0x60] sm:$0xff] }
 0x169   :  { %v11376_v51 = vadd.f32 %v1006_v7, %v1004_v2  ;;  %v1005_v11 = vmul.f32 %v9672_v29, %v1003_v9  ;;  %v11573_v2 = vld [vmem:[%s17288_s2 + $0x178] sm:$0xff]  ;;  %v11585_v9 = vld [vmem:[%s17288_s2 + $0x170] sm:$0xff] }
 0x16a   :  { %v11580_v7 = vld [vmem:[%s17288_s2 + $0x58] sm:$0xff]  ;;  %v11590_v29 = vld [vmem:[%s17288_s2 + $0x50] sm:$0xff] }
 0x16b   :  { %1010 = vst [vmem:[#allocation3] sm:$0xff] %v11376_v51  ;;  %v11379_v20 = vadd.f32 %v1007_v19, %v1005_v11  ;;  %v11597_v11 = vld [vmem:[%s17288_s2 + $0x168] sm:$0xff] }
 0x16c   :  { %v11602_v19 = vld [vmem:[%s17288_s2 + $0x48] sm:$0xff] }
 0x16d   :  { %1011 = vst.msk [vmem:[#allocation3 + $0x8] sm:$0xff] %vm83_vm1, %v11379_v20  ;;  %8024 = vmatprep.mubr.msk.f32.mxu0 %vm83_vm1, %v11379_v20  ;;  %8061 = vmatprep.mubr.msk.f32.mxu1 %vm83_vm1, %v11379_v20 }
 0x16e   :  { %1120 = vmatmul.mubr.f32.vlgmr.msra.gmra.mxu0 %v11376_v51  ;;  %1231 = vmatmul.mubr.f32.vlgmr.msra.gmra.mxu1 %v11376_v51 }
 0x16f   :  { %1290 = vmatpush1.msra.mxu0 %v10703_v3  ;;  %8098 = vmatprep.mubr.msk.f32.mxu0 %vm83_vm1, %v11379_v20  ;;  %v17524_v3 = vld [vmem:[#allocation6_spill] sm:$0xff] }
 0x170   :  { %1291 = vmatprep.subr.mxu0 %v10715_v36  ;;  %1454 = vmatpush1.msra.mxu1 %v11137_v32  ;;  %v17525_v36 = vld [vmem:[#allocation7_spill] sm:$0xff]  ;;  %17544 = vst [vmem:[#allocation6_spill] sm:$0xff] %v11568_v63 }
 0x171   :  { %1292 = vmatpush1.msra.mxu0 %v10729_v38  ;;  %1455 = vmatprep.subr.mxu1 %v11143_v33  ;;  %v17526_v38 = vld [vmem:[#allocation8_spill] sm:$0xff]  ;;  %17545 = vst [vmem:[#allocation7_spill] sm:$0xff] %v11580_v7 }
 0x172   :  { %1293 = vmatprep.subr.mxu0 %v10741_v40  ;;  %1456 = vmatpush1.msra.mxu1 %v11149_v35  ;;  %v17527_v40 = vld [vmem:[#allocation9_spill] sm:$0xff]  ;;  %17546 = vst [vmem:[#allocation8_spill] sm:$0xff] %v11590_v29 }
 0x173   :  { %1294 = vmatpush1.msra.mxu0 %v10754_v42  ;;  %1457 = vmatprep.subr.mxu1 %v11155_v5  ;;  %v17528_v42 = vld [vmem:[#allocation10_spill] sm:$0xff]  ;;  %17547 = vst [vmem:[#allocation9_spill] sm:$0xff] %v11602_v19 }
 0x174   :  { %1295 = vmatprep.subr.mxu0 %v10766_v43  ;;  %1458 = vmatpush1.msra.mxu1 %v11161_v39  ;;  %v17529_v43 = vld [vmem:[#allocation11_spill] sm:$0xff] }
 0x175   :  { %1296 = vmatpush1.msra.mxu0 %v10780_v17  ;;  %1459 = vmatprep.subr.mxu1 %v11167_v41  ;;  %v17530_v17 = vld [vmem:[#allocation12_spill] sm:$0xff] }
 0x176   :  { %1297 = vmatprep.subr.mxu0 %v10792_v48  ;;  %1460 = vmatpush1.msra.mxu1 %v11173_v14  ;;  %v17531_v48 = vld [vmem:[#allocation13_spill] sm:$0xff]  ;;  %v17533_v14 = vld [vmem:[#allocation15_spill] sm:$0xff] }
 0x177   :  { %1298 = vmatpush1.msra.mxu0 %v10805_v52  ;;  %1461 = vmatprep.subr.mxu1 %v11179_v45  ;;  %v17532_v52 = vld [vmem:[#allocation14_spill] sm:$0xff]  ;;  %v17534_v45 = vld [vmem:[#allocation16_spill] sm:$0xff] }
 0x178   :  { %1299 = vmatprep.subr.mxu0 %v17524_v3  ;;  %1462 = vmatpush1.msra.mxu1 %v11185_v46  ;;  %v17535_v46 = vld [vmem:[#allocation17_spill] sm:$0xff]  ;;  %v11607_v3 = vld [vmem:[%s17288_s2 + $0x160] sm:$0xff] }
 0x179   :  { %1300 = vmatpush1.msra.mxu0 %v17525_v36  ;;  %1463 = vmatprep.subr.mxu1 %v11191_v24  ;;  %v17536_v24 = vld [vmem:[#allocation18_spill] sm:$0xff] }
 0x17a   :  { %1301 = vmatprep.subr.mxu0 %v17526_v38  ;;  %1464 = vmatpush1.msra.mxu1 %v11197_v58  ;;  %v17537_v58 = vld [vmem:[#allocation19_spill] sm:$0xff]  ;;  %v11614_v36 = vld [vmem:[%s17288_s2 + $0x40] sm:$0xff]  ;;  %v11619_v38 = vld [vmem:[%s17288_s2 + $0x158] sm:$0xff] }
 0x17b   :  { %1302 = vmatpush1.msra.mxu0 %v17527_v40  ;;  %1465 = vmatprep.subr.mxu1 %v11203_v27  ;;  %v17538_v27 = vld [vmem:[#allocation20_spill] sm:$0xff]  ;;  %17548 = vst [vmem:[#allocation10_spill] sm:$0xff] %v11614_v36  ;;  %v11626_v40 = vld [vmem:[%s17288_s2 + $0x38] sm:$0xff] }
 0x17c   :  { %1303 = vmatprep.subr.mxu0 %v17528_v42  ;;  %1466 = vmatpush1.msra.mxu1 %v11209_v60  ;;  %v17539_v60 = vld [vmem:[#allocation21_spill] sm:$0xff]  ;;  %17549 = vst [vmem:[#allocation11_spill] sm:$0xff] %v11626_v40  ;;  %v11631_v42 = vld [vmem:[%s17288_s2 + $0x150] sm:$0xff] }
 0x17d   :  { %1304 = vmatpush1.msra.mxu0 %v17529_v43  ;;  %1467 = vmatprep.subr.mxu1 %v11215_v1  ;;  %v17540_v1 = vld [vmem:[#allocation22_spill] sm:$0xff]  ;;  %v11638_v43 = vld [vmem:[%s17288_s2 + $0x30] sm:$0xff] }
 0x17e   :  { %1305 = vmatprep.subr.mxu0 %v17530_v17  ;;  %1468 = vmatpush1.msra.mxu1 %v11221_v6  ;;  %v17541_v6 = vld [vmem:[#allocation23_spill] sm:$0xff]  ;;  %17550 = vst [vmem:[#allocation12_spill] sm:$0xff] %v11638_v43 }
 0x17f   :  { %1306 = vmatpush1.msra.mxu0 %v17531_v48  ;;  %1469 = vmatprep.subr.mxu1 %v11226_v34  ;;  %v17542_v34 = vld [vmem:[#allocation24_spill] sm:$0xff]  ;;  %v11643_v17 = vld [vmem:[%s17288_s2 + $0x148] sm:$0xff] }
 0x180   :  { %1307 = vmatprep.subr.mxu0 %v17532_v52  ;;  %1470 = vmatpush1.msra.mxu1 %v11546_v53  ;;  %v11650_v48 = vld [vmem:[%s17288_s2 + $0x28] sm:$0xff]  ;;  %v11655_v52 = vld [vmem:[%s17288_s2 + $0x140] sm:$0xff] }
 0x181   :  { %1308 = vmatpush1.msra.mxu0 %v17533_v14  ;;  %1471 = vmatprep.subr.mxu1 %v11556_v61  ;;  %17551 = vst [vmem:[#allocation13_spill] sm:$0xff] %v11650_v48  ;;  %v11662_v14 = vld [vmem:[%s17288_s2 + $0x20] sm:$0xff] }
 0x182   :  { %1309 = vmatprep.subr.mxu0 %v17534_v45  ;;  %1472 = vmatpush1.msra.mxu1 %v11568_v63  ;;  %17552 = vst [vmem:[#allocation14_spill] sm:$0xff] %v11662_v14  ;;  %v11667_v45 = vld [vmem:[%s17288_s2 + $0x138] sm:$0xff] }
 0x183   :  { %1310 = vmatpush1.msra.mxu0 %v17535_v46  ;;  %1473 = vmatprep.subr.mxu1 %v11580_v7  ;;  %v11674_v46 = vld [vmem:[%s17288_s2 + $0x18] sm:$0xff] }
 0x184   :  { %1311 = vmatprep.subr.mxu0 %v17536_v24  ;;  %1474 = vmatpush1.msra.mxu1 %v11590_v29  ;;  %17553 = vst [vmem:[#allocation15_spill] sm:$0xff] %v11674_v46  ;;  %v11679_v24 = vld [vmem:[%s17288_s2 + $0x130] sm:$0xff] }
 0x185   :  { %1312 = vmatpush1.msra.mxu0 %v17537_v58  ;;  %1475 = vmatprep.subr.mxu1 %v11602_v19  ;;  %v11686_v58 = vld [vmem:[%s17288_s2 + $0x10] sm:$0xff]  ;;  %v1377_v19 = vld [vmem:[#allocation2 + $0x98] sm:$0xff] }
 0x186   :  { %1313 = vmatprep.subr.mxu0 %v17538_v27  ;;  %1476 = vmatpush1.msra.mxu1 %v11614_v36  ;;  %17554 = vst [vmem:[#allocation16_spill] sm:$0xff] %v11686_v58  ;;  %v11691_v27 = vld [vmem:[%s17288_s2 + $0x128] sm:$0xff] }
 0x187   :  { %1314 = vmatpush1.msra.mxu0 %v17539_v60  ;;  %1477 = vmatprep.subr.mxu1 %v11626_v40  ;;  %v11698_v60 = vld [vmem:[%s17288_s2 + $0x8] sm:$0xff] }
 0x188   :  { %1315 = vmatprep.subr.mxu0 %v17540_v1  ;;  %1478 = vmatpush1.msra.mxu1 %v11638_v43  ;;  %17555 = vst [vmem:[#allocation17_spill] sm:$0xff] %v11698_v60  ;;  %v11703_v1 = vld [vmem:[%s17288_s2 + $0x120] sm:$0xff] }
 0x189   :  { %1316 = vmatpush1.msra.mxu0 %v17541_v6  ;;  %1479 = vmatprep.subr.mxu1 %v11650_v48  ;;  %v11710_v6 = vld [vmem:[%s17288_s2] sm:$0xff] }
 0x18a   :  { %1317 = vmatprep.subr.mxu0 %v17542_v34  ;;  %1480 = vmatpush1.msra.mxu1 %v11662_v14  ;;  %17556 = vst [vmem:[#allocation18_spill] sm:$0xff] %v11710_v6  ;;  %v11715_v34 = vld [vmem:[%s17288_s2 + $0x118] sm:$0xff] }
 0x18b   :  { %1318 = vmatpush1.msra.mxu0 %v17543_v21  ;;  %1481 = vmatprep.subr.mxu1 %v11674_v46  ;;  %v1443_v21 = vld [vmem:[%s17288_s2 + $0x108] sm:$0x1] }
 0x18c   :  { %1319 = vmatprep.subr.mxu0 %v11066_v12  ;;  %v11455_v12 = vld [vmem:[%s17288_s2 + $0x200] sm:$0xff]  ;;  %1482 = vmatpush1.msra.mxu1 %v11686_v58  ;;  %v11747_v58 = vld [vmem:[%s17288_s2 + $0x318] sm:$0xff] }
 0x18d   :  { %1320 = vmatpush1.msra.mxu0 %v11075_v16  ;;  %v11460_v16 = vld [vmem:[%s17288_s2 + $0x1f8] sm:$0xff]  ;;  %1483 = vmatprep.subr.mxu1 %v11698_v60  ;;  %v8138_v60 = vld [vmem:[%s17288_s2 + $0x210] sm:$0x1]  ;;  %17557 = vst [vmem:[#allocation19_spill] sm:$0xff] %v11747_v58 }
 0x18e   :  { %8096 = vmatprep.subr.msk.mxu0 %vm108_vm0, %v8095_v26  ;;  %v11725_v26 = vld [vmem:[%s17288_s2 + $0x110] sm:$0xff]  ;;  %1484 = vmatpush1.msra.mxu1 %v11710_v6 }
 0x18f   :  { %8097 = vmatpush2.msk.msra.mxu0 %vm108_vm0, %v8094_v47  ;;  %v1442_v47 = vld [vmem:[%s17288_s2 + $0x100] sm:$0x1]  ;;  %8103 = vmatprep.subr.msk.mxu1 %vm108_vm0, %v1443_v21 }
 0x190   :  { %1354 = vmatmul.mubr.f32.vlgmr.msra.gmra.mxu0 %v11376_v51  ;;  %1564 = vmatprep.subr.mxu0 %v11450_v56 }
 0x191   :  { %1565 = vmatpush1.msra.mxu0 %v11455_v12  ;;  %8104 = vmatpush2.msk.msra.mxu1 %vm108_vm0, %v1442_v47 }
 0x192   :  { %1566 = vmatprep.subr.mxu0 %v11460_v16  ;;  %1687 = vmatprep.subr.mxu1 %v11747_v58 }
 0x193   :  { %1567 = vmatpush1.msra.mxu0 %v11466_v28 }
 0x194   :  { %1568 = vmatprep.subr.mxu0 %v11472_v25 }
 0x195   :  { %1569 = vmatpush1.msra.mxu0 %v11478_v54 }
 0x196   :  { %1570 = vmatprep.subr.mxu0 %v11486_v49 }
 0x197   :  { %1571 = vmatpush1.msra.mxu0 %v11492_v57 }
 0x198   :  { %1572 = vmatprep.subr.mxu0 %v11498_v4 }
 0x199   :  { %1573 = vmatpush1.msra.mxu0 %v11504_v31 }
 0x19a   :  { %1574 = vmatprep.subr.mxu0 %v11510_v22 }
 0x19b   :  { %1575 = vmatpush1.msra.mxu0 %v11516_v50 }
 0x19c   :  { %1576 = vmatprep.subr.mxu0 %v11522_v62 }
 0x19d   :  { %1577 = vmatpush1.msra.mxu0 %v11528_v8 }
 0x19e   :  { %1578 = vmatprep.subr.mxu0 %v11534_v37 }
 0x19f   :  { %1579 = vmatpush1.msra.mxu0 %v11540_v18 }
 0x1a0   :  { %1580 = vmatprep.subr.mxu0 %v11551_v59 }
 0x1a1   :  { %1581 = vmatpush1.msra.mxu0 %v11563_v44 }
 0x1a2   :  { %1582 = vmatprep.subr.mxu0 %v11573_v2 }
 0x1a3   :  { %1583 = vmatpush1.msra.mxu0 %v11585_v9 }
 0x1a4   :  { %1584 = vmatprep.subr.mxu0 %v11597_v11 }
 0x1a5   :  { %1585 = vmatpush1.msra.mxu0 %v11607_v3 }
 0x1a6   :  { %1586 = vmatprep.subr.mxu0 %v11619_v38 }
 0x1a7   :  { %1587 = vmatpush1.msra.mxu0 %v11631_v42 }
 0x1a8   :  { %1588 = vmatprep.subr.mxu0 %v11643_v17 }
 0x1a9   :  { %1589 = vmatpush1.msra.mxu0 %v11655_v52 }
 0x1aa   :  { %1590 = vmatprep.subr.mxu0 %v11667_v45 }
 0x1ab   :  { %1591 = vmatpush1.msra.mxu0 %v11679_v24 }
 0x1ac   :  { %1592 = vmatprep.subr.mxu0 %v11691_v27 }
 0x1ad   :  { %1593 = vmatpush1.msra.mxu0 %v11703_v1 }
 0x1ae   :  { %1594 = vmatprep.subr.mxu0 %v11715_v34 }
 0x1af   :  { %1595 = vmatpush1.msra.mxu0 %v11725_v26 }
 0x1b0   :  { %8140 = vmatprep.subr.msk.mxu0 %vm108_vm0, %v8139_v55  ;;  %v1361_v55 = vld [vmem:[#allocation2 + $0x18] sm:$0xff] }
 0x1b1   :  { %8141 = vmatpush2.msk.msra.mxu0 %vm108_vm0, %v8138_v60 }
 0x1b2   :  { %1851 = vmatprep.subr.mxu0 %v11131_v30 }
 0x22e   :  { %v1121_v21 = vpop.f32.mrf.mxu0  ;;  %v1232_v48 = vpop.f32.mrf.mxu1 }
 0x22f   :  { %v1362_v47 = vadd.f32 %v1121_v21, %v11288_v15  ;;  %v1378_v36 = vadd.f32 %v1232_v48, %v11299_v23 }
 0x230   :  { %v1123_v6 = vpop.f32.mrf.mxu0  ;;  %v1234_v40 = vpop.f32.mrf.mxu1 }
 0x231   :  { %v8099_v46 = vmul.f32 -1.442695, %v1362_v47  ;;  %v1363_v14 = vadd.f32 %v1361_v55, %v1123_v6  ;;  %v1379_v60 = vadd.f32 %v1377_v19, %v1234_v40  ;;  %v8101_v29 = vmul.f32 -1.442695, %v1378_v36 }
 0x233   :  { %9673 = vpow2.f32 %v8099_v46  ;;  %v8100_v43 = vmul.f32 -1.442695, %v1363_v14  ;;  %v8102_v58 = vmul.f32 -1.442695, %v1379_v60  ;;  %v1271_v14 = vld [vmem:[%s17290_s4] sm:$0x3] }
 0x234   :  { %v1276_v46 = vrot.slane %v1271_v14, %v11234_v10  ;;  %v1280_v19 = vrot.slane %v1271_v14, %v11241_v13 }
 0x235   :  { %9675 = vpow2.f32 %v8100_v43 }
 0x236   :  { %9677 = vpow2.f32 %v8101_v29 }
 0x237   :  { %9679 = vpow2.f32 %v8102_v58 }
 0x240   :  { %v9674_v30 = vpop.eup %9673 }
 0x241   :  { %v1370_v7 = vadd.f32 1.0, %v9674_v30 }
 0x242   :  { %v9676_v15 = vpop.eup %9675 }
 0x243   :  { %9681 = vrcp.f32 %v1370_v7  ;;  %v1371_v21 = vadd.f32 1.0, %v9676_v15  ;;  %v9678_v43 = vpop.eup %9677  ;;  %v1393_v15 = vld [vmem:[#allocation2 + $0x118] sm:$0xff] }
 0x244   :  { %v9680_v23 = vpop.eup %9679  ;;  %v1386_v48 = vadd.f32 1.0, %v9678_v43 }
 0x245   :  { %9683 = vrcp.f32 %v1371_v21  ;;  %v1387_v40 = vadd.f32 1.0, %v9680_v23 }
 0x246   :  { %9685 = vrcp.f32 %v1386_v48 }
 0x247   :  { %9687 = vrcp.f32 %v1387_v40  ;;  %v11770_v40 = vld [vmem:[%s17288_s2 + $0x310] sm:$0xff] }
 0x250   :  { %v9682_v36 = vpop.eup %9681  ;;  %v1355_v29 = vpop.f32.mrf.mxu0 }
 0x251   :  { %v1356_v6 = vadd.f32 %v1355_v29, %v1276_v46 }
 0x252   :  { %v9684_v58 = vpop.eup %9683  ;;  %v1357_v47 = vpop.f32.mrf.mxu0 }
 0x253   :  { %v1394_v7 = vmul.f32 %v9682_v36, %v1356_v6  ;;  %v1358_v55 = vadd.f32 %v1357_v47, %v1280_v19  ;;  %v9686_v43 = vpop.eup %9685  ;;  %v11816_v6 = vld [vmem:[%s17288_s2 + $0x2e0] sm:$0xff] }
 0x254   :  { %v9688_v10 = vpop.eup %9687  ;;  %v1400_v14 = vsub.f32 1.0, %v9686_v43  ;;  %v1404_v46 = vmul.f32 %v9686_v43, %v11376_v51  ;;  %v11796_v51 = vld [vmem:[%s17288_s2 + $0x2f8] sm:$0xff]  ;;  %v11868_v47 = vld [vmem:[%s17288_s2 + $0x2a0] sm:$0xff]  ;;  %v11910_v43 = vld [vmem:[%s17288_s2 + $0x268] sm:$0xff] }
 0x255   :  { %v1396_v60 = vadd.f32 %v1394_v7, %v11352_v0  ;;  %v1395_v30 = vmul.f32 %v9684_v58, %v1358_v55  ;;  %v1401_v63 = vsub.f32 1.0, %v9688_v10  ;;  %v1405_v19 = vmul.f32 %v9688_v10, %v11379_v20  ;;  %v11781_v10 = vld [vmem:[%s17288_s2 + $0x308] sm:$0xff]  ;;  %v11802_v20 = vld [vmem:[%s17288_s2 + $0x2f0] sm:$0xff]  ;;  %v11874_v7 = vld [vmem:[%s17288_s2 + $0x298] sm:$0xff] }
 0x256   :  { %v11862_v58 = vld [vmem:[%s17288_s2 + $0x2a8] sm:$0xff]  ;;  %v11880_v55 = vld [vmem:[%s17288_s2 + $0x290] sm:$0xff] }
 0x257   :  { %9689 = vtanh.f32 %v1396_v60  ;;  %v1397_v21 = vadd.f32 %v1395_v30, %v1393_v15  ;;  %v11886_v60 = vld [vmem:[%s17288_s2 + $0x288] sm:$0xff]  ;;  %v11892_v30 = vld [vmem:[%s17288_s2 + $0x280] sm:$0xff]  ;;  %v11898_v15 = vld [vmem:[%s17288_s2 + $0x278] sm:$0xff] }
 0x259   :  { %9691 = vtanh.f32 %v1397_v21  ;;  %v11904_v21 = vld [vmem:[%s17288_s2 + $0x270] sm:$0xff] }
 0x264   :  { %v9690_v13 = vpop.eup %9689 }
 0x265   :  { %v1402_v23 = vmul.f32 %v9690_v13, %v1400_v14  ;;  %v11788_v13 = vld [vmem:[%s17288_s2 + $0x300] sm:$0xff] }
 0x266   :  { %v9692_v29 = vpop.eup %9691  ;;  %v11916_v14 = vld [vmem:[%s17288_s2 + $0x260] sm:$0xff] }
 0x267   :  { %v1403_v48 = vmul.f32 %v9692_v29, %v1401_v63  ;;  %v11762_v36 = vadd.f32 %v1404_v46, %v1402_v23  ;;  %v11809_v63 = vld [vmem:[%s17288_s2 + $0x2e8] sm:$0xff]  ;;  %17558 = vst [vmem:[#allocation20_spill] sm:$0xff] %v11916_v14  ;;  %v11922_v23 = vld [vmem:[%s17288_s2 + $0x258] sm:$0xff]  ;;  %v11928_v46 = vld [vmem:[%s17288_s2 + $0x250] sm:$0xff] }
 0x268   :  { %17559 = vst [vmem:[#allocation21_spill] sm:$0xff] %v11922_v23  ;;  %17560 = vst [vmem:[#allocation22_spill] sm:$0xff] %v11928_v46  ;;  %v11934_v29 = vld [vmem:[%s17288_s2 + $0x248] sm:$0xff] }
 0x269   :  { %v11764_v0 = vadd.f32 %v1405_v19, %v1403_v48  ;;  %1408 = vst [vmem:[#allocation3 + $0x10] sm:$0xff] %v11762_v36  ;;  %17561 = vst [vmem:[#allocation23_spill] sm:$0xff] %v11934_v29  ;;  %v11940_v48 = vld [vmem:[%s17288_s2 + $0x240] sm:$0xff]  ;;  %v11946_v19 = vld [vmem:[%s17288_s2 + $0x238] sm:$0xff] }
 0x26a   :  { %17562 = vst [vmem:[#allocation24_spill] sm:$0xff] %v11940_v48 }
 0x26b   :  { %1409 = vst.msk [vmem:[#allocation3 + $0x18] sm:$0xff] %vm83_vm1, %v11764_v0  ;;  %8105 = vmatprep.mubr.msk.f32.mxu1 %vm83_vm1, %v11764_v0  ;;  %8142 = vmatprep.mubr.msk.f32.mxu0 %vm83_vm1, %v11764_v0 }
 0x26c   :  { %1518 = vmatmul.mubr.f32.vlgmr.msra.gmra.mxu1 %v11762_v36  ;;  %1629 = vmatmul.mubr.f32.vlgmr.msra.gmra.mxu0 %v11762_v36 }
 0x26d   :  { %1688 = vmatpush1.msra.mxu1 %v11770_v40  ;;  %8179 = vmatprep.mubr.msk.f32.mxu1 %vm83_vm1, %v11764_v0 }
 0x26e   :  { %1689 = vmatprep.subr.mxu1 %v11781_v10  ;;  %1852 = vmatpush1.msra.mxu0 %v11137_v32  ;;  %v11823_v32 = vld [vmem:[%s17288_s2 + $0x2d8] sm:$0xff] }
 0x26f   :  { %1690 = vmatpush1.msra.mxu1 %v11788_v13  ;;  %1853 = vmatprep.subr.mxu0 %v11143_v33  ;;  %v11830_v33 = vld [vmem:[%s17288_s2 + $0x2d0] sm:$0xff] }
 0x270   :  { %1691 = vmatprep.subr.mxu1 %v11796_v51  ;;  %1854 = vmatpush1.msra.mxu0 %v11149_v35  ;;  %v11837_v35 = vld [vmem:[%s17288_s2 + $0x2c8] sm:$0xff] }
 0x271   :  { %1692 = vmatpush1.msra.mxu1 %v11802_v20  ;;  %1855 = vmatprep.subr.mxu0 %v11155_v5  ;;  %v11844_v5 = vld [vmem:[%s17288_s2 + $0x2c0] sm:$0xff] }
 0x272   :  { %1693 = vmatprep.subr.mxu1 %v11809_v63  ;;  %1856 = vmatpush1.msra.mxu0 %v11161_v39  ;;  %v11850_v39 = vld [vmem:[%s17288_s2 + $0x2b8] sm:$0xff] }
 0x273   :  { %1694 = vmatpush1.msra.mxu1 %v11816_v6  ;;  %1857 = vmatprep.subr.mxu0 %v11167_v41  ;;  %v11856_v41 = vld [vmem:[%s17288_s2 + $0x2b0] sm:$0xff] }
 0x274   :  { %1695 = vmatprep.subr.mxu1 %v11823_v32 }
 0x275   :  { %1696 = vmatpush1.msra.mxu1 %v11830_v33 }
 0x276   :  { %1697 = vmatprep.subr.mxu1 %v11837_v35 }
 0x277   :  { %1698 = vmatpush1.msra.mxu1 %v11844_v5 }
 0x278   :  { %1699 = vmatprep.subr.mxu1 %v11850_v39 }
 0x279   :  { %1700 = vmatpush1.msra.mxu1 %v11856_v41 }
 0x27a   :  { %1701 = vmatprep.subr.mxu1 %v11862_v58 }
 0x27b   :  { %1702 = vmatpush1.msra.mxu1 %v11868_v47 }
 0x27c   :  { %1703 = vmatprep.subr.mxu1 %v11874_v7 }
 0x27d   :  { %1704 = vmatpush1.msra.mxu1 %v11880_v55 }
 0x27e   :  { %1705 = vmatprep.subr.mxu1 %v11886_v60 }
 0x27f   :  { %1706 = vmatpush1.msra.mxu1 %v11892_v30 }
 0x280   :  { %1707 = vmatprep.subr.mxu1 %v11898_v15 }
 0x281   :  { %1708 = vmatpush1.msra.mxu1 %v11904_v21 }
 0x282   :  { %1709 = vmatprep.subr.mxu1 %v11910_v43 }
 0x283   :  { %1710 = vmatpush1.msra.mxu1 %v11916_v14  ;;  %v11952_v14 = vld [vmem:[%s17288_s2 + $0x230] sm:$0xff] }
 0x284   :  { %1711 = vmatprep.subr.mxu1 %v11922_v23  ;;  %v11958_v23 = vld [vmem:[%s17288_s2 + $0x228] sm:$0xff] }
 0x285   :  { %1712 = vmatpush1.msra.mxu1 %v11928_v46  ;;  %v11964_v46 = vld [vmem:[%s17288_s2 + $0x220] sm:$0xff] }
 0x286   :  { %1713 = vmatprep.subr.mxu1 %v11934_v29  ;;  %v8176_v29 = vld [vmem:[%s17288_s2 + $0x328] sm:$0x1] }
 0x287   :  { %1714 = vmatpush1.msra.mxu1 %v11940_v48  ;;  %v8175_v48 = vld [vmem:[%s17288_s2 + $0x320] sm:$0x1] }
 0x288   :  { %1715 = vmatprep.subr.mxu1 %v11946_v19 }
 0x289   :  { %1716 = vmatpush1.msra.mxu1 %v11952_v14 }
 0x28a   :  { %1717 = vmatprep.subr.mxu1 %v11958_v23 }
 0x28b   :  { %1718 = vmatpush1.msra.mxu1 %v11964_v46 }
 0x28c   :  { %8177 = vmatprep.subr.msk.mxu1 %vm108_vm0, %v8176_v29 }
 0x28d   :  { %8178 = vmatpush2.msk.msra.mxu1 %vm108_vm0, %v8175_v48 }
 0x28e   :  { %1752 = vmatmul.mubr.f32.vlgmr.msra.gmra.mxu1 %v11762_v36  ;;  %1962 = vmatprep.subr.mxu1 %v11450_v56  ;;  %v12013_v56 = vld [vmem:[%s17288_s2 + $0xc0] sm:$0xff] }
 0x28f   :  { %1963 = vmatpush1.msra.mxu1 %v11455_v12  ;;  %1858 = vmatpush1.msra.mxu0 %v12013_v56  ;;  %v12019_v12 = vld [vmem:[%s17288_s2 + $0xb8] sm:$0xff] }
 0x290   :  { %1964 = vmatprep.subr.mxu1 %v11460_v16  ;;  %1859 = vmatprep.subr.mxu0 %v12019_v12  ;;  %v12025_v16 = vld [vmem:[%s17288_s2 + $0xb0] sm:$0xff] }
 0x291   :  { %1965 = vmatpush1.msra.mxu1 %v11466_v28  ;;  %1860 = vmatpush1.msra.mxu0 %v12025_v16  ;;  %v12031_v28 = vld [vmem:[%s17288_s2 + $0xa8] sm:$0xff] }
 0x292   :  { %1966 = vmatprep.subr.mxu1 %v11472_v25  ;;  %1861 = vmatprep.subr.mxu0 %v12031_v28  ;;  %v12037_v25 = vld [vmem:[%s17288_s2 + $0xa0] sm:$0xff] }
 0x293   :  { %1967 = vmatpush1.msra.mxu1 %v11478_v54  ;;  %1862 = vmatpush1.msra.mxu0 %v12037_v25  ;;  %v12043_v54 = vld [vmem:[%s17288_s2 + $0x98] sm:$0xff] }
 0x294   :  { %1968 = vmatprep.subr.mxu1 %v11486_v49  ;;  %1863 = vmatprep.subr.mxu0 %v12043_v54  ;;  %v12049_v49 = vld [vmem:[%s17288_s2 + $0x90] sm:$0xff] }
 0x295   :  { %1969 = vmatpush1.msra.mxu1 %v11492_v57  ;;  %1864 = vmatpush1.msra.mxu0 %v12049_v49  ;;  %v12055_v57 = vld [vmem:[%s17288_s2 + $0x88] sm:$0xff] }
 0x296   :  { %1970 = vmatprep.subr.mxu1 %v11498_v4  ;;  %1865 = vmatprep.subr.mxu0 %v12055_v57  ;;  %v12061_v4 = vld [vmem:[%s17288_s2 + $0x80] sm:$0xff] }
 0x297   :  { %1971 = vmatpush1.msra.mxu1 %v11504_v31  ;;  %1866 = vmatpush1.msra.mxu0 %v12061_v4  ;;  %v12067_v31 = vld [vmem:[%s17288_s2 + $0x78] sm:$0xff] }
 0x298   :  { %1972 = vmatprep.subr.mxu1 %v11510_v22  ;;  %1867 = vmatprep.subr.mxu0 %v12067_v31  ;;  %v8220_v22 = vld [vmem:[%s17288_s2 + $0x218] sm:$0x1] }
 0x299   :  { %1973 = vmatpush1.msra.mxu1 %v11516_v50  ;;  %1868 = vmatpush1.msra.mxu0 %v11546_v53  ;;  %v17563_v50 = vld [vmem:[#allocation6_spill] sm:$0xff] }
 0x29a   :  { %1974 = vmatprep.subr.mxu1 %v11522_v62  ;;  %1869 = vmatprep.subr.mxu0 %v11556_v61  ;;  %v17564_v62 = vld [vmem:[#allocation7_spill] sm:$0xff]  ;;  %v17571_v53 = vld [vmem:[#allocation14_spill] sm:$0xff]  ;;  %v17573_v61 = vld [vmem:[#allocation16_spill] sm:$0xff] }
 0x29b   :  { %1975 = vmatpush1.msra.mxu1 %v11528_v8  ;;  %1870 = vmatpush1.msra.mxu0 %v17563_v50  ;;  %v17565_v8 = vld [vmem:[#allocation8_spill] sm:$0xff]  ;;  %v1774_v50 = vld [vmem:[#allocation2 + $0xa0] sm:$0xff] }
 0x29c   :  { %1976 = vmatprep.subr.mxu1 %v11534_v37  ;;  %1871 = vmatprep.subr.mxu0 %v17564_v62  ;;  %v17566_v37 = vld [vmem:[#allocation9_spill] sm:$0xff] }
 0x29d   :  { %1977 = vmatpush1.msra.mxu1 %v11540_v18  ;;  %1872 = vmatpush1.msra.mxu0 %v17565_v8  ;;  %v17567_v18 = vld [vmem:[#allocation10_spill] sm:$0xff] }
 0x29e   :  { %1978 = vmatprep.subr.mxu1 %v11551_v59  ;;  %1873 = vmatprep.subr.mxu0 %v17566_v37  ;;  %v17568_v59 = vld [vmem:[#allocation11_spill] sm:$0xff] }
 0x29f   :  { %1979 = vmatpush1.msra.mxu1 %v11563_v44  ;;  %1874 = vmatpush1.msra.mxu0 %v17567_v18  ;;  %v17569_v44 = vld [vmem:[#allocation12_spill] sm:$0xff]  ;;  %v1775_v37 = vld [vmem:[#allocation2 + $0xa8] sm:$0xff] }
 0x2a0   :  { %1980 = vmatprep.subr.mxu1 %v11573_v2  ;;  %1875 = vmatprep.subr.mxu0 %v17568_v59  ;;  %v17570_v2 = vld [vmem:[#allocation13_spill] sm:$0xff] }
 0x2a1   :  { %1981 = vmatpush1.msra.mxu1 %v11585_v9  ;;  %1876 = vmatpush1.msra.mxu0 %v17569_v44  ;;  %v17572_v9 = vld [vmem:[#allocation15_spill] sm:$0xff] }
 0x2a2   :  { %1982 = vmatprep.subr.mxu1 %v11597_v11  ;;  %1877 = vmatprep.subr.mxu0 %v17570_v2  ;;  %v1841_v11 = vld [vmem:[%s17288_s2 + $0x108] sm:$0x1] }
 0x2a3   :  { %1983 = vmatpush1.msra.mxu1 %v11607_v3  ;;  %1878 = vmatpush1.msra.mxu0 %v17571_v53  ;;  %v17574_v3 = vld [vmem:[#allocation17_spill] sm:$0xff] }
 0x2a4   :  { %1984 = vmatprep.subr.mxu1 %v11619_v38  ;;  %1879 = vmatprep.subr.mxu0 %v17572_v9  ;;  %v1840_v38 = vld [vmem:[%s17288_s2 + $0x100] sm:$0x1] }
 0x2a5   :  { %1985 = vmatpush1.msra.mxu1 %v11631_v42  ;;  %1880 = vmatpush1.msra.mxu0 %v17573_v61  ;;  %v17575_v42 = vld [vmem:[#allocation18_spill] sm:$0xff] }
 0x2a6   :  { %1986 = vmatprep.subr.mxu1 %v11643_v17  ;;  %1881 = vmatprep.subr.mxu0 %v17574_v3  ;;  %v8219_v17 = vld [vmem:[%s17288_s2 + $0x210] sm:$0x1] }
 0x2a7   :  { %1987 = vmatpush1.msra.mxu1 %v11655_v52  ;;  %1882 = vmatpush1.msra.mxu0 %v17575_v42  ;;  %v17576_v52 = vld [vmem:[#allocation19_spill] sm:$0xff] }
 0x2a8   :  { %1988 = vmatprep.subr.mxu1 %v11667_v45  ;;  %8184 = vmatprep.subr.msk.mxu0 %vm108_vm0, %v1841_v11  ;;  %v1669_v11 = vld [vmem:[%s17290_s4] sm:$0x3] }
 0x2a9   :  { %1989 = vmatpush1.msra.mxu1 %v11679_v24  ;;  %8185 = vmatpush2.msk.msra.mxu0 %vm108_vm0, %v1840_v38  ;;  %v1758_v24 = vld [vmem:[#allocation2 + $0x20] sm:$0xff] }
 0x2aa   :  { %1990 = vmatprep.subr.mxu1 %v11691_v27  ;;  %2085 = vmatprep.subr.mxu0 %v17576_v52  ;;  %v17577_v38 = vld [vmem:[#allocation26_spill] sm:$0xff] }
 0x2ab   :  { %1991 = vmatpush1.msra.mxu1 %v11703_v1  ;;  %v1674_v42 = vrot.slane %v1669_v11, %v17577_v38 }
 0x2ac   :  { %1992 = vmatprep.subr.mxu1 %v11715_v34  ;;  %v1759_v34 = vld [vmem:[#allocation2 + $0x28] sm:$0xff] }
 0x2ad   :  { %1993 = vmatpush1.msra.mxu1 %v11725_v26 }
 0x2ae   :  { %8221 = vmatprep.subr.msk.mxu1 %vm108_vm0, %v8220_v22 }
 0x2af   :  { %8222 = vmatpush2.msk.msra.mxu1 %vm108_vm0, %v8219_v17 }
 0x32c   :  { %v1519_v45 = vpop.f32.mrf.mxu1  ;;  %v1630_v48 = vpop.f32.mrf.mxu0 }
 0x32d   :  { %v1760_v27 = vadd.f32 %v1758_v24, %v1519_v45  ;;  %v1776_v8 = vadd.f32 %v1774_v50, %v1630_v48  ;;  %v17578_v45 = vld [vmem:[#allocation27_spill] sm:$0xff] }
 0x32e   :  { %v1521_v1 = vpop.f32.mrf.mxu1  ;;  %v1632_v62 = vpop.f32.mrf.mxu0  ;;  %v1678_v24 = vrot.slane %v1669_v11, %v17578_v45 }
 0x32f   :  { %v8180_v26 = vmul.f32 -1.442695, %v1760_v27  ;;  %v1761_v29 = vadd.f32 %v1759_v34, %v1521_v1  ;;  %v1777_v18 = vadd.f32 %v1775_v37, %v1632_v62  ;;  %v8182_v59 = vmul.f32 -1.442695, %v1776_v8  ;;  %v1790_v62 = vld [vmem:[#allocation2 + $0x120] sm:$0xff] }
 0x331   :  { %9693 = vpow2.f32 %v8180_v26  ;;  %v8181_v22 = vmul.f32 -1.442695, %v1761_v29  ;;  %v8183_v44 = vmul.f32 -1.442695, %v1777_v18  ;;  %v1791_v18 = vld [vmem:[#allocation2 + $0x128] sm:$0xff] }
 0x333   :  { %9695 = vpow2.f32 %v8181_v22 }
 0x334   :  { %9697 = vpow2.f32 %v8182_v59 }
 0x335   :  { %9699 = vpow2.f32 %v8183_v44 }
 0x33e   :  { %v9694_v2 = vpop.eup %9693 }
 0x33f   :  { %v1768_v53 = vadd.f32 1.0, %v9694_v2 }
 0x340   :  { %v9696_v9 = vpop.eup %9695 }
 0x341   :  { %9701 = vrcp.f32 %v1768_v53  ;;  %v1769_v61 = vadd.f32 1.0, %v9696_v9  ;;  %v9698_v3 = vpop.eup %9697 }
 0x342   :  { %v9700_v17 = vpop.eup %9699  ;;  %v1784_v52 = vadd.f32 1.0, %v9698_v3 }
 0x343   :  { %9703 = vrcp.f32 %v1769_v61  ;;  %v1785_v34 = vadd.f32 1.0, %v9700_v17 }
 0x344   :  { %9705 = vrcp.f32 %v1784_v52 }
 0x345   :  { %9707 = vrcp.f32 %v1785_v34  ;;  %v12366_v34 = vld [vmem:[%s17288_s2 + $0x168] sm:$0xff] }
 0x34e   :  { %v9702_v27 = vpop.eup %9701  ;;  %v1753_v1 = vpop.f32.mrf.mxu1 }
 0x34f   :  { %v1754_v26 = vadd.f32 %v1753_v1, %v1674_v42  ;;  %v12359_v1 = vld [vmem:[%s17288_s2 + $0x50] sm:$0xff] }
 0x350   :  { %v9704_v29 = vpop.eup %9703  ;;  %v1755_v48 = vpop.f32.mrf.mxu1  ;;  %17586 = vst [vmem:[#allocation7_spill] sm:$0xff] %v12359_v1 }
 0x351   :  { %v1792_v22 = vmul.f32 %v9702_v27, %v1754_v26  ;;  %v1756_v50 = vadd.f32 %v1755_v48, %v1678_v24  ;;  %v9706_v44 = vpop.eup %9705  ;;  %v12371_v26 = vld [vmem:[%s17288_s2 + $0x48] sm:$0xff]  ;;  %v12383_v48 = vld [vmem:[%s17288_s2 + $0x40] sm:$0xff] }
 0x352   :  { %v9708_v2 = vpop.eup %9707  ;;  %v1798_v53 = vsub.f32 1.0, %v9706_v44  ;;  %v1802_v3 = vmul.f32 %v9706_v44, %v11762_v36  ;;  %v17579_v36 = vld [vmem:[#allocation20_spill] sm:$0xff]  ;;  %17587 = vst [vmem:[#allocation8_spill] sm:$0xff] %v12371_v26  ;;  %17588 = vst [vmem:[#allocation9_spill] sm:$0xff] %v12383_v48  ;;  %v12431_v44 = vld [vmem:[%s17288_s2 + $0x20] sm:$0xff] }
 0x353   :  { %v1794_v8 = vadd.f32 %v1792_v22, %v1790_v62  ;;  %v1793_v37 = vmul.f32 %v9704_v29, %v1756_v50  ;;  %v1799_v61 = vsub.f32 1.0, %v9708_v2  ;;  %v1803_v52 = vmul.f32 %v9708_v2, %v11764_v0  ;;  %v17580_v0 = vld [vmem:[#allocation21_spill] sm:$0xff]  ;;  %v12376_v29 = vld [vmem:[%s17288_s2 + $0x160] sm:$0xff]  ;;  %v12400_v62 = vld [vmem:[%s17288_s2 + $0x150] sm:$0xff]  ;;  %17592 = vst [vmem:[#allocation13_spill] sm:$0xff] %v12431_v44 }
 0x354   :  { %v12388_v22 = vld [vmem:[%s17288_s2 + $0x158] sm:$0xff] }
 0x355   :  { %9709 = vtanh.f32 %v1794_v8  ;;  %v1795_v59 = vadd.f32 %v1793_v37, %v1791_v18  ;;  %v12395_v50 = vld [vmem:[%s17288_s2 + $0x38] sm:$0xff]  ;;  %v12407_v8 = vld [vmem:[%s17288_s2 + $0x30] sm:$0xff]  ;;  %v12412_v37 = vld [vmem:[%s17288_s2 + $0x148] sm:$0xff] }
 0x356   :  { %17589 = vst [vmem:[#allocation10_spill] sm:$0xff] %v12395_v50  ;;  %17590 = vst [vmem:[#allocation11_spill] sm:$0xff] %v12407_v8  ;;  %v12419_v18 = vld [vmem:[%s17288_s2 + $0x28] sm:$0xff]  ;;  %v12436_v2 = vld [vmem:[%s17288_s2 + $0x138] sm:$0xff] }
 0x357   :  { %9711 = vtanh.f32 %v1795_v59  ;;  %17591 = vst [vmem:[#allocation12_spill] sm:$0xff] %v12419_v18  ;;  %v12424_v59 = vld [vmem:[%s17288_s2 + $0x140] sm:$0xff] }
 0x362   :  { %v9710_v9 = vpop.eup %9709 }
 0x363   :  { %v1800_v11 = vmul.f32 %v9710_v9, %v1798_v53  ;;  %v12443_v53 = vld [vmem:[%s17288_s2 + $0x18] sm:$0xff]  ;;  %v12448_v9 = vld [vmem:[%s17288_s2 + $0x130] sm:$0xff] }
 0x364   :  { %v9712_v42 = vpop.eup %9711  ;;  %17593 = vst [vmem:[#allocation14_spill] sm:$0xff] %v12443_v53 }
 0x365   :  { %v1801_v17 = vmul.f32 %v9712_v42, %v1799_v61  ;;  %v12109_v24 = vadd.f32 %v1802_v3, %v1800_v11  ;;  %v12455_v61 = vld [vmem:[%s17288_s2 + $0x10] sm:$0xff]  ;;  %v12460_v11 = vld [vmem:[%s17288_s2 + $0x128] sm:$0xff]  ;;  %v12472_v42 = vld [vmem:[%s17288_s2 + $0x120] sm:$0xff] }
 0x366   :  { %17594 = vst [vmem:[#allocation15_spill] sm:$0xff] %v12455_v61  ;;  %v12467_v3 = vld [vmem:[%s17288_s2 + $0x8] sm:$0xff] }
 0x367   :  { %v12111_v27 = vadd.f32 %v1803_v52, %v1801_v17  ;;  %1806 = vst [vmem:[#allocation3 + $0x20] sm:$0xff] %v12109_v24  ;;  %17595 = vst [vmem:[#allocation16_spill] sm:$0xff] %v12467_v3  ;;  %v12479_v17 = vld [vmem:[%s17288_s2] sm:$0xff]  ;;  %v12484_v52 = vld [vmem:[%s17288_s2 + $0x118] sm:$0xff] }
 0x368   :  { %17596 = vst [vmem:[#allocation17_spill] sm:$0xff] %v12479_v17 }
 0x369   :  { %1807 = vst.msk [vmem:[#allocation3 + $0x28] sm:$0xff] %vm83_vm1, %v12111_v27  ;;  %8186 = vmatprep.mubr.msk.f32.mxu0 %vm83_vm1, %v12111_v27  ;;  %8223 = vmatprep.mubr.msk.f32.mxu1 %vm83_vm1, %v12111_v27 }
 0x36a   :  { %1916 = vmatmul.mubr.f32.vlgmr.msra.gmra.mxu0 %v12109_v24  ;;  %2027 = vmatmul.mubr.f32.vlgmr.msra.gmra.mxu1 %v12109_v24 }
 0x36b   :  { %2086 = vmatpush1.msra.mxu0 %v11770_v40  ;;  %8260 = vmatprep.mubr.msk.f32.mxu0 %vm83_vm1, %v12111_v27  ;;  %v17581_v40 = vld [vmem:[#allocation22_spill] sm:$0xff] }
 0x36c   :  { %2087 = vmatprep.subr.mxu0 %v11781_v10  ;;  %v17582_v10 = vld [vmem:[#allocation23_spill] sm:$0xff] }
 0x36d   :  { %2088 = vmatpush1.msra.mxu0 %v11788_v13  ;;  %v17583_v13 = vld [vmem:[#allocation24_spill] sm:$0xff] }
 0x36e   :  { %2089 = vmatprep.subr.mxu0 %v11796_v51  ;;  %v8257_v51 = vld [vmem:[%s17288_s2 + $0x328] sm:$0x1] }
 0x36f   :  { %2090 = vmatpush1.msra.mxu0 %v11802_v20  ;;  %v8256_v20 = vld [vmem:[%s17288_s2 + $0x320] sm:$0x1] }
 0x370   :  { %2091 = vmatprep.subr.mxu0 %v11809_v63  ;;  %v12167_v63 = vld [vmem:[%s17288_s2 + $0xf8] sm:$0xff] }
 0x371   :  { %2092 = vmatpush1.msra.mxu0 %v11816_v6  ;;  %v12172_v6 = vld [vmem:[%s17288_s2 + $0xf0] sm:$0xff]  ;;  %2249 = vmatprep.subr.mxu1 %v12167_v63 }
 0x372   :  { %2093 = vmatprep.subr.mxu0 %v11823_v32  ;;  %v12177_v32 = vld [vmem:[%s17288_s2 + $0x208] sm:$0xff]  ;;  %2250 = vmatpush1.msra.mxu1 %v12172_v6 }
 0x373   :  { %2094 = vmatpush1.msra.mxu0 %v11830_v33  ;;  %v12184_v33 = vld [vmem:[%s17288_s2 + $0xe8] sm:$0xff] }
 0x374   :  { %2095 = vmatprep.subr.mxu0 %v11837_v35  ;;  %v12189_v35 = vld [vmem:[%s17288_s2 + $0x200] sm:$0xff]  ;;  %2251 = vmatprep.subr.mxu1 %v12184_v33 }
 0x375   :  { %2096 = vmatpush1.msra.mxu0 %v11844_v5  ;;  %v12194_v5 = vld [vmem:[%s17288_s2 + $0xe0] sm:$0xff] }
 0x376   :  { %2097 = vmatprep.subr.mxu0 %v11850_v39  ;;  %v12201_v39 = vld [vmem:[%s17288_s2 + $0x1f8] sm:$0xff]  ;;  %2252 = vmatpush1.msra.mxu1 %v12194_v5 }
 0x377   :  { %2098 = vmatpush1.msra.mxu0 %v11856_v41  ;;  %v12206_v41 = vld [vmem:[%s17288_s2 + $0xd8] sm:$0xff] }
 0x378   :  { %2099 = vmatprep.subr.mxu0 %v11862_v58  ;;  %v12211_v58 = vld [vmem:[%s17288_s2 + $0x1f0] sm:$0xff]  ;;  %2253 = vmatprep.subr.mxu1 %v12206_v41 }
 0x379   :  { %2100 = vmatpush1.msra.mxu0 %v11868_v47  ;;  %v12218_v47 = vld [vmem:[%s17288_s2 + $0xd0] sm:$0xff] }
 0x37a   :  { %2101 = vmatprep.subr.mxu0 %v11874_v7  ;;  %v12223_v7 = vld [vmem:[%s17288_s2 + $0x1e8] sm:$0xff]  ;;  %2254 = vmatpush1.msra.mxu1 %v12218_v47 }
 0x37b   :  { %2102 = vmatpush1.msra.mxu0 %v11880_v55  ;;  %v12230_v55 = vld [vmem:[%s17288_s2 + $0xc8] sm:$0xff] }
 0x37c   :  { %2103 = vmatprep.subr.mxu0 %v11886_v60  ;;  %v12235_v60 = vld [vmem:[%s17288_s2 + $0x1e0] sm:$0xff]  ;;  %2255 = vmatprep.subr.mxu1 %v12230_v55 }
 0x37d   :  { %2104 = vmatpush1.msra.mxu0 %v11892_v30  ;;  %2256 = vmatpush1.msra.mxu1 %v12013_v56  ;;  %v12246_v30 = vld [vmem:[%s17288_s2 + $0x1d8] sm:$0xff] }
 0x37e   :  { %2105 = vmatprep.subr.mxu0 %v11898_v15  ;;  %2257 = vmatprep.subr.mxu1 %v12019_v12  ;;  %v12253_v15 = vld [vmem:[%s17288_s2 + $0x1d0] sm:$0xff]  ;;  %v12302_v56 = vld [vmem:[%s17288_s2 + $0x198] sm:$0xff] }
 0x37f   :  { %2106 = vmatpush1.msra.mxu0 %v11904_v21  ;;  %2258 = vmatpush1.msra.mxu1 %v12025_v16  ;;  %v12260_v21 = vld [vmem:[%s17288_s2 + $0x1c8] sm:$0xff]  ;;  %v12309_v12 = vld [vmem:[%s17288_s2 + $0x190] sm:$0xff] }
 0x380   :  { %2107 = vmatprep.subr.mxu0 %v11910_v43  ;;  %2259 = vmatprep.subr.mxu1 %v12031_v28  ;;  %v12267_v43 = vld [vmem:[%s17288_s2 + $0x1c0] sm:$0xff]  ;;  %v12315_v16 = vld [vmem:[%s17288_s2 + $0x70] sm:$0xff]  ;;  %v12320_v28 = vld [vmem:[%s17288_s2 + $0x188] sm:$0xff] }
 0x381   :  { %2108 = vmatpush1.msra.mxu0 %v17579_v36  ;;  %2260 = vmatpush1.msra.mxu1 %v12037_v25  ;;  %v12325_v25 = vld [vmem:[%s17288_s2 + $0x68] sm:$0xff] }
 0x382   :  { %2109 = vmatprep.subr.mxu0 %v17580_v0  ;;  %2261 = vmatprep.subr.mxu1 %v12043_v54  ;;  %v12332_v54 = vld [vmem:[%s17288_s2 + $0x180] sm:$0xff]  ;;  %v2239_v36 = vld [vmem:[%s17288_s2 + $0x108] sm:$0x1]  ;;  %v12494_v0 = vld [vmem:[%s17288_s2 + $0x110] sm:$0xff] }
 0x383   :  { %2110 = vmatpush1.msra.mxu0 %v17581_v40  ;;  %2262 = vmatpush1.msra.mxu1 %v12049_v49  ;;  %v12337_v49 = vld [vmem:[%s17288_s2 + $0x60] sm:$0xff] }
 0x384   :  { %2111 = vmatprep.subr.mxu0 %v17582_v10  ;;  %2263 = vmatprep.subr.mxu1 %v12055_v57  ;;  %17584 = vst [vmem:[#allocation25_spill] sm:$0xff] %v12337_v49  ;;  %v12342_v57 = vld [vmem:[%s17288_s2 + $0x178] sm:$0xff]  ;;  %v2238_v40 = vld [vmem:[%s17288_s2 + $0x100] sm:$0x1] }
 0x385   :  { %2112 = vmatpush1.msra.mxu0 %v17583_v13  ;;  %2264 = vmatpush1.msra.mxu1 %v12061_v4  ;;  %v12349_v4 = vld [vmem:[%s17288_s2 + $0x58] sm:$0xff]  ;;  %v8300_v13 = vld [vmem:[%s17288_s2 + $0x210] sm:$0x1] }
 0x386   :  { %2113 = vmatprep.subr.mxu0 %v11946_v19  ;;  %v12295_v19 = vld [vmem:[%s17288_s2 + $0x1a0] sm:$0xff]  ;;  %2265 = vmatprep.subr.mxu1 %v12067_v31  ;;  %17585 = vst [vmem:[#allocation6_spill] sm:$0xff] %v12349_v4  ;;  %v12354_v31 = vld [vmem:[%s17288_s2 + $0x170] sm:$0xff]  ;;  %v8301_v10 = vld [vmem:[%s17288_s2 + $0x218] sm:$0x1] }
 0x387   :  { %2114 = vmatpush1.msra.mxu0 %v11952_v14  ;;  %v12274_v14 = vld [vmem:[%s17288_s2 + $0x1b8] sm:$0xff]  ;;  %2266 = vmatpush1.msra.mxu1 %v12315_v16 }
 0x388   :  { %2115 = vmatprep.subr.mxu0 %v11958_v23  ;;  %v12281_v23 = vld [vmem:[%s17288_s2 + $0x1b0] sm:$0xff]  ;;  %2267 = vmatprep.subr.mxu1 %v12325_v25 }
 0x389   :  { %2116 = vmatpush1.msra.mxu0 %v11964_v46  ;;  %v12288_v46 = vld [vmem:[%s17288_s2 + $0x1a8] sm:$0xff]  ;;  %2268 = vmatpush1.msra.mxu1 %v12337_v49 }
 0x38a   :  { %8258 = vmatprep.subr.msk.mxu0 %vm108_vm0, %v8257_v51  ;;  %2269 = vmatprep.subr.mxu1 %v12349_v4  ;;  %v12516_v51 = vld [vmem:[%s17288_s2 + $0x318] sm:$0xff] }
 0x38b   :  { %8259 = vmatpush2.msk.msra.mxu0 %vm108_vm0, %v8256_v20  ;;  %2270 = vmatpush1.msra.mxu1 %v12359_v1  ;;  %17597 = vst [vmem:[#allocation18_spill] sm:$0xff] %v12516_v51 }
 0x38c   :  { %2150 = vmatmul.mubr.f32.vlgmr.msra.gmra.mxu0 %v12109_v24  ;;  %2360 = vmatprep.subr.mxu0 %v12177_v32 }
 0x38d   :  { %2361 = vmatpush1.msra.mxu0 %v12189_v35  ;;  %2271 = vmatprep.subr.mxu1 %v12371_v26 }
 0x38e   :  { %2362 = vmatprep.subr.mxu0 %v12201_v39  ;;  %2272 = vmatpush1.msra.mxu1 %v12383_v48  ;;  %v2173_v48 = vld [vmem:[#allocation2 + $0xb8] sm:$0xff] }
 0x38f   :  { %2363 = vmatpush1.msra.mxu0 %v12211_v58  ;;  %2273 = vmatprep.subr.mxu1 %v12395_v50 }
 0x390   :  { %2364 = vmatprep.subr.mxu0 %v12223_v7  ;;  %2274 = vmatpush1.msra.mxu1 %v12407_v8 }
 0x391   :  { %2365 = vmatpush1.msra.mxu0 %v12235_v60  ;;  %2275 = vmatprep.subr.mxu1 %v12419_v18  ;;  %v2172_v18 = vld [vmem:[#allocation2 + $0xb0] sm:$0xff] }
 0x392   :  { %2366 = vmatprep.subr.mxu0 %v12246_v30  ;;  %2276 = vmatpush1.msra.mxu1 %v12431_v44 }
 0x393   :  { %2367 = vmatpush1.msra.mxu0 %v12253_v15  ;;  %2277 = vmatprep.subr.mxu1 %v12443_v53 }
 0x394   :  { %2368 = vmatprep.subr.mxu0 %v12260_v21  ;;  %2278 = vmatpush1.msra.mxu1 %v12455_v61 }
 0x395   :  { %2369 = vmatpush1.msra.mxu0 %v12267_v43  ;;  %2279 = vmatprep.subr.mxu1 %v12467_v3 }
 0x396   :  { %2370 = vmatprep.subr.mxu0 %v12274_v14  ;;  %2280 = vmatpush1.msra.mxu1 %v12479_v17 }
 0x397   :  { %2371 = vmatpush1.msra.mxu0 %v12281_v23  ;;  %8265 = vmatprep.subr.msk.mxu1 %vm108_vm0, %v2239_v36  ;;  %v2156_v36 = vld [vmem:[#allocation2 + $0x30] sm:$0xff] }
 0x398   :  { %2372 = vmatprep.subr.mxu0 %v12288_v46  ;;  %8266 = vmatpush2.msk.msra.mxu1 %vm108_vm0, %v2238_v40 }
 0x399   :  { %2373 = vmatpush1.msra.mxu0 %v12295_v19  ;;  %2483 = vmatprep.subr.mxu1 %v12516_v51 }
 0x39a   :  { %2374 = vmatprep.subr.mxu0 %v12302_v56 }
 0x39b   :  { %2375 = vmatpush1.msra.mxu0 %v12309_v12 }
 0x39c   :  { %2376 = vmatprep.subr.mxu0 %v12320_v28 }
 0x39d   :  { %2377 = vmatpush1.msra.mxu0 %v12332_v54 }
 0x39e   :  { %2378 = vmatprep.subr.mxu0 %v12342_v57 }
 0x39f   :  { %2379 = vmatpush1.msra.mxu0 %v12354_v31 }
 0x3a0   :  { %2380 = vmatprep.subr.mxu0 %v12366_v34 }
 0x3a1   :  { %2381 = vmatpush1.msra.mxu0 %v12376_v29 }
 0x3a2   :  { %2382 = vmatprep.subr.mxu0 %v12388_v22 }
 0x3a3   :  { %2383 = vmatpush1.msra.mxu0 %v12400_v62 }
 0x3a4   :  { %2384 = vmatprep.subr.mxu0 %v12412_v37 }
 0x3a5   :  { %2385 = vmatpush1.msra.mxu0 %v12424_v59 }
 0x3a6   :  { %2386 = vmatprep.subr.mxu0 %v12436_v2 }
 0x3a7   :  { %2387 = vmatpush1.msra.mxu0 %v12448_v9 }
 0x3a8   :  { %2388 = vmatprep.subr.mxu0 %v12460_v11 }
 0x3a9   :  { %2389 = vmatpush1.msra.mxu0 %v12472_v42 }
 0x3aa   :  { %2390 = vmatprep.subr.mxu0 %v12484_v52 }
 0x3ab   :  { %2391 = vmatpush1.msra.mxu0 %v12494_v0 }
 0x3ac   :  { %8302 = vmatprep.subr.msk.mxu0 %vm108_vm0, %v8301_v10  ;;  %v2157_v10 = vld [vmem:[#allocation2 + $0x38] sm:$0xff] }
 0x3ad   :  { %8303 = vmatpush2.msk.msra.mxu0 %vm108_vm0, %v8300_v13 }
 0x3ae   :  { %2647 = vmatprep.subr.mxu0 %v12167_v63 }
 0x42a   :  { %v1917_v20 = vpop.f32.mrf.mxu0  ;;  %v2028_v53 = vpop.f32.mrf.mxu1 }
 0x42b   :  { %v2158_v40 = vadd.f32 %v2156_v36, %v1917_v20  ;;  %v2174_v50 = vadd.f32 %v2172_v18, %v2028_v53 }
 0x42c   :  { %v1919_v17 = vpop.f32.mrf.mxu0  ;;  %v2030_v8 = vpop.f32.mrf.mxu1 }
 0x42d   :  { %v8261_v3 = vmul.f32 -1.442695, %v2158_v40  ;;  %v2159_v61 = vadd.f32 %v2157_v10, %v1919_v17  ;;  %v2175_v13 = vadd.f32 %v2173_v48, %v2030_v8  ;;  %v8263_v26 = vmul.f32 -1.442695, %v2174_v50 }
 0x42f   :  { %9713 = vpow2.f32 %v8261_v3  ;;  %v8262_v44 = vmul.f32 -1.442695, %v2159_v61  ;;  %v8264_v51 = vmul.f32 -1.442695, %v2175_v13  ;;  %v2067_v61 = vld [vmem:[%s17290_s4] sm:$0x3] }
 0x430   :  { %v2072_v3 = vrot.slane %v2067_v61, %v17577_v38  ;;  %v2076_v48 = vrot.slane %v2067_v61, %v17578_v45  ;;  %v2188_v13 = vld [vmem:[#allocation2 + $0x130] sm:$0xff] }
 0x431   :  { %9715 = vpow2.f32 %v8262_v44 }
 0x432   :  { %9717 = vpow2.f32 %v8263_v26 }
 0x433   :  { %9719 = vpow2.f32 %v8264_v51 }
 0x43c   :  { %v9714_v63 = vpop.eup %9713 }
 0x43d   :  { %v2166_v1 = vadd.f32 1.0, %v9714_v63 }
 0x43e   :  { %v9716_v20 = vpop.eup %9715 }
 0x43f   :  { %9721 = vrcp.f32 %v2166_v1  ;;  %v2167_v36 = vadd.f32 1.0, %v9716_v20  ;;  %v9718_v44 = vpop.eup %9717 }
 0x440   :  { %v9720_v18 = vpop.eup %9719  ;;  %v2182_v53 = vadd.f32 1.0, %v9718_v44 }
 0x441   :  { %9723 = vrcp.f32 %v2167_v36  ;;  %v2183_v8 = vadd.f32 1.0, %v9720_v18  ;;  %v2189_v36 = vld [vmem:[#allocation2 + $0x138] sm:$0xff] }
 0x442   :  { %9725 = vrcp.f32 %v2182_v53 }
 0x443   :  { %9727 = vrcp.f32 %v2183_v8 }
 0x44c   :  { %v9722_v50 = vpop.eup %9721  ;;  %v2151_v26 = vpop.f32.mrf.mxu0 }
 0x44d   :  { %v2152_v17 = vadd.f32 %v2151_v26, %v2072_v3 }
 0x44e   :  { %v9724_v51 = vpop.eup %9723  ;;  %v2153_v40 = vpop.f32.mrf.mxu0 }
 0x44f   :  { %v2190_v1 = vmul.f32 %v9722_v50, %v2152_v17  ;;  %v2154_v10 = vadd.f32 %v2153_v40, %v2076_v48  ;;  %v9726_v44 = vpop.eup %9725  ;;  %v12582_v17 = vld [vmem:[%s17288_s2 + $0x2e0] sm:$0xff] }
 0x450   :  { %v9728_v4 = vpop.eup %9727  ;;  %v2196_v61 = vsub.f32 1.0, %v9726_v44  ;;  %v2200_v3 = vmul.f32 %v9726_v44, %v12109_v24  ;;  %v12554_v24 = vld [vmem:[%s17288_s2 + $0x300] sm:$0xff]  ;;  %v12676_v44 = vld [vmem:[%s17288_s2 + $0x268] sm:$0xff] }
 0x451   :  { %v2192_v63 = vadd.f32 %v2190_v1, %v2188_v13  ;;  %v2191_v20 = vmul.f32 %v9724_v51, %v2154_v10  ;;  %v2197_v49 = vsub.f32 1.0, %v9728_v4  ;;  %v2201_v48 = vmul.f32 %v9728_v4, %v12111_v27  ;;  %v12562_v27 = vld [vmem:[%s17288_s2 + $0x2f8] sm:$0xff]  ;;  %v12575_v4 = vld [vmem:[%s17288_s2 + $0x2e8] sm:$0xff]  ;;  %v12634_v40 = vld [vmem:[%s17288_s2 + $0x2a0] sm:$0xff] }
 0x452   :  { %v12628_v51 = vld [vmem:[%s17288_s2 + $0x2a8] sm:$0xff]  ;;  %v12640_v1 = vld [vmem:[%s17288_s2 + $0x298] sm:$0xff]  ;;  %v12646_v10 = vld [vmem:[%s17288_s2 + $0x290] sm:$0xff] }
 0x453   :  { %9729 = vtanh.f32 %v2192_v63  ;;  %v2193_v38 = vadd.f32 %v2191_v20, %v2189_v36  ;;  %v12652_v13 = vld [vmem:[%s17288_s2 + $0x288] sm:$0xff]  ;;  %v12658_v63 = vld [vmem:[%s17288_s2 + $0x280] sm:$0xff]  ;;  %v12664_v20 = vld [vmem:[%s17288_s2 + $0x278] sm:$0xff] }
 0x454   :  { %v12670_v36 = vld [vmem:[%s17288_s2 + $0x270] sm:$0xff] }
 0x455   :  { %9731 = vtanh.f32 %v2193_v38  ;;  %v12536_v38 = vld [vmem:[%s17288_s2 + $0x310] sm:$0xff] }
 0x460   :  { %v9730_v45 = vpop.eup %9729 }
 0x461   :  { %v2198_v18 = vmul.f32 %v9730_v45, %v2196_v61  ;;  %v12547_v45 = vld [vmem:[%s17288_s2 + $0x308] sm:$0xff]  ;;  %v12682_v61 = vld [vmem:[%s17288_s2 + $0x260] sm:$0xff] }
 0x462   :  { %v9732_v26 = vpop.eup %9731  ;;  %17598 = vst [vmem:[#allocation19_spill] sm:$0xff] %v12682_v61 }
 0x463   :  { %v2199_v53 = vmul.f32 %v9732_v26, %v2197_v49  ;;  %v12528_v50 = vadd.f32 %v2200_v3, %v2198_v18  ;;  %v12568_v49 = vld [vmem:[%s17288_s2 + $0x2f0] sm:$0xff]  ;;  %v12688_v18 = vld [vmem:[%s17288_s2 + $0x258] sm:$0xff]  ;;  %v12700_v26 = vld [vmem:[%s17288_s2 + $0x248] sm:$0xff] }
 0x464   :  { %17599 = vst [vmem:[#allocation20_spill] sm:$0xff] %v12688_v18  ;;  %v12694_v3 = vld [vmem:[%s17288_s2 + $0x250] sm:$0xff]  ;;  %17601 = vst [vmem:[#allocation22_spill] sm:$0xff] %v12700_v26 }
 0x465   :  { %v12530_v8 = vadd.f32 %v2201_v48, %v2199_v53  ;;  %2204 = vst [vmem:[#allocation3 + $0x30] sm:$0xff] %v12528_v50  ;;  %17600 = vst [vmem:[#allocation21_spill] sm:$0xff] %v12694_v3  ;;  %v12706_v53 = vld [vmem:[%s17288_s2 + $0x240] sm:$0xff]  ;;  %v12712_v48 = vld [vmem:[%s17288_s2 + $0x238] sm:$0xff] }
 0x466   :  { %17602 = vst [vmem:[#allocation23_spill] sm:$0xff] %v12706_v53 }
 0x467   :  { %2205 = vst.msk [vmem:[#allocation3 + $0x38] sm:$0xff] %vm83_vm1, %v12530_v8  ;;  %8267 = vmatprep.mubr.msk.f32.mxu1 %vm83_vm1, %v12530_v8  ;;  %8304 = vmatprep.mubr.msk.f32.mxu0 %vm83_vm1, %v12530_v8 }
 0x468   :  { %2314 = vmatmul.mubr.f32.vlgmr.msra.gmra.mxu1 %v12528_v50  ;;  %2425 = vmatmul.mubr.f32.vlgmr.msra.gmra.mxu0 %v12528_v50 }
 0x469   :  { %2484 = vmatpush1.msra.mxu1 %v12536_v38  ;;  %8341 = vmatprep.mubr.msk.f32.mxu1 %vm83_vm1, %v12530_v8 }
 0x46a   :  { %2485 = vmatprep.subr.mxu1 %v12547_v45  ;;  %2648 = vmatpush1.msra.mxu0 %v12172_v6  ;;  %v12589_v6 = vld [vmem:[%s17288_s2 + $0x2d8] sm:$0xff] }
 0x46b   :  { %2486 = vmatpush1.msra.mxu1 %v12554_v24  ;;  %2649 = vmatprep.subr.mxu0 %v12184_v33  ;;  %v12596_v33 = vld [vmem:[%s17288_s2 + $0x2d0] sm:$0xff] }
 0x46c   :  { %2487 = vmatprep.subr.mxu1 %v12562_v27  ;;  %2650 = vmatpush1.msra.mxu0 %v12194_v5  ;;  %v12603_v5 = vld [vmem:[%s17288_s2 + $0x2c8] sm:$0xff] }
 0x46d   :  { %2488 = vmatpush1.msra.mxu1 %v12568_v49  ;;  %2651 = vmatprep.subr.mxu0 %v12206_v41  ;;  %v12610_v41 = vld [vmem:[%s17288_s2 + $0x2c0] sm:$0xff] }
 0x46e   :  { %2489 = vmatprep.subr.mxu1 %v12575_v4  ;;  %2652 = vmatpush1.msra.mxu0 %v12218_v47  ;;  %v12616_v47 = vld [vmem:[%s17288_s2 + $0x2b8] sm:$0xff] }
 0x46f   :  { %2490 = vmatpush1.msra.mxu1 %v12582_v17  ;;  %2653 = vmatprep.subr.mxu0 %v12230_v55  ;;  %v12622_v55 = vld [vmem:[%s17288_s2 + $0x2b0] sm:$0xff] }
 0x470   :  { %2491 = vmatprep.subr.mxu1 %v12589_v6 }
 0x471   :  { %2492 = vmatpush1.msra.mxu1 %v12596_v33 }
 0x472   :  { %2493 = vmatprep.subr.mxu1 %v12603_v5 }
 0x473   :  { %2494 = vmatpush1.msra.mxu1 %v12610_v41 }
 0x474   :  { %2495 = vmatprep.subr.mxu1 %v12616_v47 }
 0x475   :  { %2496 = vmatpush1.msra.mxu1 %v12622_v55 }
 0x476   :  { %2497 = vmatprep.subr.mxu1 %v12628_v51 }
 0x477   :  { %2498 = vmatpush1.msra.mxu1 %v12634_v40 }
 0x478   :  { %2499 = vmatprep.subr.mxu1 %v12640_v1 }
 0x479   :  { %2500 = vmatpush1.msra.mxu1 %v12646_v10 }
 0x47a   :  { %2501 = vmatprep.subr.mxu1 %v12652_v13 }
 0x47b   :  { %2502 = vmatpush1.msra.mxu1 %v12658_v63 }
 0x47c   :  { %2503 = vmatprep.subr.mxu1 %v12664_v20 }
 0x47d   :  { %2504 = vmatpush1.msra.mxu1 %v12670_v36 }
 0x47e   :  { %2505 = vmatprep.subr.mxu1 %v12676_v44 }
 0x47f   :  { %2506 = vmatpush1.msra.mxu1 %v12682_v61  ;;  %v12718_v61 = vld [vmem:[%s17288_s2 + $0x230] sm:$0xff] }
 0x480   :  { %2507 = vmatprep.subr.mxu1 %v12688_v18  ;;  %v12724_v18 = vld [vmem:[%s17288_s2 + $0x228] sm:$0xff] }
 0x481   :  { %2508 = vmatpush1.msra.mxu1 %v12694_v3  ;;  %v12730_v3 = vld [vmem:[%s17288_s2 + $0x220] sm:$0xff] }
 0x482   :  { %2509 = vmatprep.subr.mxu1 %v12700_v26  ;;  %v8338_v26 = vld [vmem:[%s17288_s2 + $0x328] sm:$0x1] }
 0x483   :  { %2510 = vmatpush1.msra.mxu1 %v12706_v53  ;;  %v8337_v53 = vld [vmem:[%s17288_s2 + $0x320] sm:$0x1] }
 0x484   :  { %2511 = vmatprep.subr.mxu1 %v12712_v48 }
 0x485   :  { %2512 = vmatpush1.msra.mxu1 %v12718_v61 }
 0x486   :  { %2513 = vmatprep.subr.mxu1 %v12724_v18 }
 0x487   :  { %2514 = vmatpush1.msra.mxu1 %v12730_v3 }
 0x488   :  { %8339 = vmatprep.subr.msk.mxu1 %vm108_vm0, %v8338_v26 }
 0x489   :  { %8340 = vmatpush2.msk.msra.mxu1 %vm108_vm0, %v8337_v53 }
 0x48a   :  { %2548 = vmatmul.mubr.f32.vlgmr.msra.gmra.mxu1 %v12528_v50  ;;  %2758 = vmatprep.subr.mxu1 %v12177_v32  ;;  %v12779_v32 = vld [vmem:[%s17288_s2 + $0xc0] sm:$0xff] }
 0x48b   :  { %2759 = vmatpush1.msra.mxu1 %v12189_v35  ;;  %2654 = vmatpush1.msra.mxu0 %v12779_v32  ;;  %v12785_v35 = vld [vmem:[%s17288_s2 + $0xb8] sm:$0xff] }
 0x48c   :  { %2760 = vmatprep.subr.mxu1 %v12201_v39  ;;  %2655 = vmatprep.subr.mxu0 %v12785_v35  ;;  %v12791_v39 = vld [vmem:[%s17288_s2 + $0xb0] sm:$0xff] }
 0x48d   :  { %2761 = vmatpush1.msra.mxu1 %v12211_v58  ;;  %2656 = vmatpush1.msra.mxu0 %v12791_v39  ;;  %v12797_v58 = vld [vmem:[%s17288_s2 + $0xa8] sm:$0xff] }
 0x48e   :  { %2762 = vmatprep.subr.mxu1 %v12223_v7  ;;  %2657 = vmatprep.subr.mxu0 %v12797_v58  ;;  %v12803_v7 = vld [vmem:[%s17288_s2 + $0xa0] sm:$0xff] }
 0x48f   :  { %2763 = vmatpush1.msra.mxu1 %v12235_v60  ;;  %2658 = vmatpush1.msra.mxu0 %v12803_v7  ;;  %v12809_v60 = vld [vmem:[%s17288_s2 + $0x98] sm:$0xff] }
 0x490   :  { %2764 = vmatprep.subr.mxu1 %v12246_v30  ;;  %2659 = vmatprep.subr.mxu0 %v12809_v60  ;;  %v12815_v30 = vld [vmem:[%s17288_s2 + $0x90] sm:$0xff] }
 0x491   :  { %2765 = vmatpush1.msra.mxu1 %v12253_v15  ;;  %2660 = vmatpush1.msra.mxu0 %v12815_v30  ;;  %v12821_v15 = vld [vmem:[%s17288_s2 + $0x88] sm:$0xff] }
 0x492   :  { %2766 = vmatprep.subr.mxu1 %v12260_v21  ;;  %2661 = vmatprep.subr.mxu0 %v12821_v15  ;;  %v12827_v21 = vld [vmem:[%s17288_s2 + $0x80] sm:$0xff] }
 0x493   :  { %2767 = vmatpush1.msra.mxu1 %v12267_v43  ;;  %2662 = vmatpush1.msra.mxu0 %v12827_v21  ;;  %v12833_v43 = vld [vmem:[%s17288_s2 + $0x78] sm:$0xff] }
 0x494   :  { %2768 = vmatprep.subr.mxu1 %v12274_v14  ;;  %2663 = vmatprep.subr.mxu0 %v12833_v43  ;;  %v8382_v14 = vld [vmem:[%s17288_s2 + $0x218] sm:$0x1] }
 0x495   :  { %2769 = vmatpush1.msra.mxu1 %v12281_v23  ;;  %2664 = vmatpush1.msra.mxu0 %v12315_v16  ;;  %v17603_v23 = vld [vmem:[#allocation25_spill] sm:$0xff] }
 0x496   :  { %2770 = vmatprep.subr.mxu1 %v12288_v46  ;;  %2665 = vmatprep.subr.mxu0 %v12325_v25  ;;  %v17604_v46 = vld [vmem:[#allocation6_spill] sm:$0xff]  ;;  %v17611_v16 = vld [vmem:[#allocation13_spill] sm:$0xff]  ;;  %v17613_v25 = vld [vmem:[#allocation15_spill] sm:$0xff] }
 0x497   :  { %2771 = vmatpush1.msra.mxu1 %v12295_v19  ;;  %2666 = vmatpush1.msra.mxu0 %v17603_v23  ;;  %v17605_v19 = vld [vmem:[#allocation7_spill] sm:$0xff]  ;;  %v2570_v23 = vld [vmem:[#allocation2 + $0xc0] sm:$0xff] }
 0x498   :  { %2772 = vmatprep.subr.mxu1 %v12302_v56  ;;  %2667 = vmatprep.subr.mxu0 %v17604_v46  ;;  %v17606_v56 = vld [vmem:[#allocation8_spill] sm:$0xff] }
 0x499   :  { %2773 = vmatpush1.msra.mxu1 %v12309_v12  ;;  %2668 = vmatpush1.msra.mxu0 %v17605_v19  ;;  %v17607_v12 = vld [vmem:[#allocation9_spill] sm:$0xff] }
 0x49a   :  { %2774 = vmatprep.subr.mxu1 %v12320_v28  ;;  %2669 = vmatprep.subr.mxu0 %v17606_v56  ;;  %v17608_v28 = vld [vmem:[#allocation10_spill] sm:$0xff]  ;;  %v2571_v56 = vld [vmem:[#allocation2 + $0xc8] sm:$0xff] }
 0x49b   :  { %2775 = vmatpush1.msra.mxu1 %v12332_v54  ;;  %2670 = vmatpush1.msra.mxu0 %v17607_v12  ;;  %v17609_v54 = vld [vmem:[#allocation11_spill] sm:$0xff] }
 0x49c   :  { %2776 = vmatprep.subr.mxu1 %v12342_v57  ;;  %2671 = vmatprep.subr.mxu0 %v17608_v28  ;;  %v17610_v57 = vld [vmem:[#allocation12_spill] sm:$0xff] }
 0x49d   :  { %2777 = vmatpush1.msra.mxu1 %v12354_v31  ;;  %2672 = vmatpush1.msra.mxu0 %v17609_v54  ;;  %v17612_v31 = vld [vmem:[#allocation14_spill] sm:$0xff] }
 0x49e   :  { %2778 = vmatprep.subr.mxu1 %v12366_v34  ;;  %2673 = vmatprep.subr.mxu0 %v17610_v57  ;;  %v2637_v34 = vld [vmem:[%s17288_s2 + $0x108] sm:$0x1] }
 0x49f   :  { %2779 = vmatpush1.msra.mxu1 %v12376_v29  ;;  %2674 = vmatpush1.msra.mxu0 %v17611_v16  ;;  %v17614_v29 = vld [vmem:[#allocation16_spill] sm:$0xff] }
 0x4a0   :  { %2780 = vmatprep.subr.mxu1 %v12388_v22  ;;  %2675 = vmatprep.subr.mxu0 %v17612_v31  ;;  %v2636_v22 = vld [vmem:[%s17288_s2 + $0x100] sm:$0x1] }
 0x4a1   :  { %2781 = vmatpush1.msra.mxu1 %v12400_v62  ;;  %2676 = vmatpush1.msra.mxu0 %v17613_v25  ;;  %v17615_v62 = vld [vmem:[#allocation17_spill] sm:$0xff] }
 0x4a2   :  { %2782 = vmatprep.subr.mxu1 %v12412_v37  ;;  %2677 = vmatprep.subr.mxu0 %v17614_v29  ;;  %v8381_v37 = vld [vmem:[%s17288_s2 + $0x210] sm:$0x1] }
 0x4a3   :  { %2783 = vmatpush1.msra.mxu1 %v12424_v59  ;;  %2678 = vmatpush1.msra.mxu0 %v17615_v62  ;;  %v17616_v59 = vld [vmem:[#allocation18_spill] sm:$0xff] }
 0x4a4   :  { %2784 = vmatprep.subr.mxu1 %v12436_v2  ;;  %8346 = vmatprep.subr.msk.mxu0 %vm108_vm0, %v2637_v34  ;;  %v2465_v34 = vld [vmem:[%s17290_s4] sm:$0x3] }
 0x4a5   :  { %2785 = vmatpush1.msra.mxu1 %v12448_v9  ;;  %8347 = vmatpush2.msk.msra.mxu0 %vm108_vm0, %v2636_v22  ;;  %v2554_v9 = vld [vmem:[#allocation2 + $0x40] sm:$0xff] }
 0x4a6   :  { %2786 = vmatprep.subr.mxu1 %v12460_v11  ;;  %2881 = vmatprep.subr.mxu0 %v17616_v59  ;;  %v17617_v22 = vld [vmem:[#allocation26_spill] sm:$0xff] }
 0x4a7   :  { %2787 = vmatpush1.msra.mxu1 %v12472_v42  ;;  %v2470_v62 = vrot.slane %v2465_v34, %v17617_v22 }
 0x4a8   :  { %2788 = vmatprep.subr.mxu1 %v12484_v52  ;;  %v2555_v52 = vld [vmem:[#allocation2 + $0x48] sm:$0xff] }
 0x4a9   :  { %2789 = vmatpush1.msra.mxu1 %v12494_v0 }
 0x4aa   :  { %8383 = vmatprep.subr.msk.mxu1 %vm108_vm0, %v8382_v14 }
 0x4ab   :  { %8384 = vmatpush2.msk.msra.mxu1 %vm108_vm0, %v8381_v37 }
 0x528   :  { %v2315_v2 = vpop.f32.mrf.mxu1  ;;  %v2426_v53 = vpop.f32.mrf.mxu0 }
 0x529   :  { %v2556_v11 = vadd.f32 %v2554_v9, %v2315_v2  ;;  %v2572_v19 = vadd.f32 %v2570_v23, %v2426_v53  ;;  %v17618_v2 = vld [vmem:[#allocation27_spill] sm:$0xff] }
 0x52a   :  { %v2317_v42 = vpop.f32.mrf.mxu1  ;;  %v2428_v46 = vpop.f32.mrf.mxu0  ;;  %v2474_v9 = vrot.slane %v2465_v34, %v17618_v2 }
 0x52b   :  { %v8342_v0 = vmul.f32 -1.442695, %v2556_v11  ;;  %v2557_v26 = vadd.f32 %v2555_v52, %v2317_v42  ;;  %v2573_v12 = vadd.f32 %v2571_v56, %v2428_v46  ;;  %v8344_v28 = vmul.f32 -1.442695, %v2572_v19  ;;  %v2586_v46 = vld [vmem:[#allocation2 + $0x140] sm:$0xff] }
 0x52d   :  { %9733 = vpow2.f32 %v8342_v0  ;;  %v8343_v14 = vmul.f32 -1.442695, %v2557_v26  ;;  %v8345_v54 = vmul.f32 -1.442695, %v2573_v12  ;;  %v2587_v12 = vld [vmem:[#allocation2 + $0x148] sm:$0xff] }
 0x52f   :  { %9735 = vpow2.f32 %v8343_v14 }
 0x530   :  { %9737 = vpow2.f32 %v8344_v28 }
 0x531   :  { %9739 = vpow2.f32 %v8345_v54 }
 0x53a   :  { %v9734_v57 = vpop.eup %9733 }
 0x53b   :  { %v2564_v16 = vadd.f32 1.0, %v9734_v57 }
 0x53c   :  { %v9736_v31 = vpop.eup %9735 }
 0x53d   :  { %9741 = vrcp.f32 %v2564_v16  ;;  %v2565_v25 = vadd.f32 1.0, %v9736_v31  ;;  %v9738_v29 = vpop.eup %9737 }
 0x53e   :  { %v9740_v37 = vpop.eup %9739  ;;  %v2580_v59 = vadd.f32 1.0, %v9738_v29 }
 0x53f   :  { %9743 = vrcp.f32 %v2565_v25  ;;  %v2581_v52 = vadd.f32 1.0, %v9740_v37 }
 0x540   :  { %9745 = vrcp.f32 %v2580_v59 }
 0x541   :  { %9747 = vrcp.f32 %v2581_v52  ;;  %v13132_v52 = vld [vmem:[%s17288_s2 + $0x168] sm:$0xff] }
 0x54a   :  { %v9742_v11 = vpop.eup %9741  ;;  %v2549_v42 = vpop.f32.mrf.mxu1 }
 0x54b   :  { %v2550_v0 = vadd.f32 %v2549_v42, %v2470_v62  ;;  %v13125_v42 = vld [vmem:[%s17288_s2 + $0x50] sm:$0xff] }
 0x54c   :  { %v9744_v26 = vpop.eup %9743  ;;  %v2551_v53 = vpop.f32.mrf.mxu1  ;;  %17626 = vst [vmem:[#allocation6_spill] sm:$0xff] %v13125_v42 }
 0x54d   :  { %v2588_v14 = vmul.f32 %v9742_v11, %v2550_v0  ;;  %v2552_v23 = vadd.f32 %v2551_v53, %v2474_v9  ;;  %v9746_v54 = vpop.eup %9745  ;;  %v13137_v0 = vld [vmem:[%s17288_s2 + $0x48] sm:$0xff]  ;;  %v13149_v53 = vld [vmem:[%s17288_s2 + $0x40] sm:$0xff] }
 0x54e   :  { %v9748_v57 = vpop.eup %9747  ;;  %v2594_v16 = vsub.f32 1.0, %v9746_v54  ;;  %v2598_v29 = vmul.f32 %v9746_v54, %v12528_v50  ;;  %v17619_v50 = vld [vmem:[#allocation19_spill] sm:$0xff]  ;;  %17627 = vst [vmem:[#allocation7_spill] sm:$0xff] %v13137_v0  ;;  %17628 = vst [vmem:[#allocation8_spill] sm:$0xff] %v13149_v53  ;;  %v13197_v54 = vld [vmem:[%s17288_s2 + $0x20] sm:$0xff] }
 0x54f   :  { %v2590_v19 = vadd.f32 %v2588_v14, %v2586_v46  ;;  %v2589_v56 = vmul.f32 %v9744_v26, %v2552_v23  ;;  %v2595_v25 = vsub.f32 1.0, %v9748_v57  ;;  %v2599_v59 = vmul.f32 %v9748_v57, %v12530_v8  ;;  %v17620_v8 = vld [vmem:[#allocation20_spill] sm:$0xff]  ;;  %v13142_v26 = vld [vmem:[%s17288_s2 + $0x160] sm:$0xff]  ;;  %v13154_v14 = vld [vmem:[%s17288_s2 + $0x158] sm:$0xff]  ;;  %17632 = vst [vmem:[#allocation12_spill] sm:$0xff] %v13197_v54 }
 0x550   :  { %v13161_v23 = vld [vmem:[%s17288_s2 + $0x38] sm:$0xff]  ;;  %v13166_v46 = vld [vmem:[%s17288_s2 + $0x150] sm:$0xff] }
 0x551   :  { %9749 = vtanh.f32 %v2590_v19  ;;  %v2591_v28 = vadd.f32 %v2589_v56, %v2587_v12  ;;  %17629 = vst [vmem:[#allocation9_spill] sm:$0xff] %v13161_v23  ;;  %v13173_v19 = vld [vmem:[%s17288_s2 + $0x30] sm:$0xff]  ;;  %v13178_v56 = vld [vmem:[%s17288_s2 + $0x148] sm:$0xff]  ;;  %v13202_v57 = vld [vmem:[%s17288_s2 + $0x138] sm:$0xff] }
 0x552   :  { %17630 = vst [vmem:[#allocation10_spill] sm:$0xff] %v13173_v19  ;;  %v13185_v12 = vld [vmem:[%s17288_s2 + $0x28] sm:$0xff] }
 0x553   :  { %9751 = vtanh.f32 %v2591_v28  ;;  %17631 = vst [vmem:[#allocation11_spill] sm:$0xff] %v13185_v12  ;;  %v13190_v28 = vld [vmem:[%s17288_s2 + $0x140] sm:$0xff] }
 0x55e   :  { %v9750_v31 = vpop.eup %9749 }
 0x55f   :  { %v2596_v34 = vmul.f32 %v9750_v31, %v2594_v16  ;;  %v13209_v16 = vld [vmem:[%s17288_s2 + $0x18] sm:$0xff]  ;;  %v13214_v31 = vld [vmem:[%s17288_s2 + $0x130] sm:$0xff] }
 0x560   :  { %v9752_v62 = vpop.eup %9751  ;;  %17633 = vst [vmem:[#allocation13_spill] sm:$0xff] %v13209_v16 }
 0x561   :  { %v2597_v37 = vmul.f32 %v9752_v62, %v2595_v25  ;;  %v12875_v9 = vadd.f32 %v2598_v29, %v2596_v34  ;;  %v13221_v25 = vld [vmem:[%s17288_s2 + $0x10] sm:$0xff]  ;;  %v13226_v34 = vld [vmem:[%s17288_s2 + $0x128] sm:$0xff]  ;;  %v13238_v62 = vld [vmem:[%s17288_s2 + $0x120] sm:$0xff] }
 0x562   :  { %17634 = vst [vmem:[#allocation14_spill] sm:$0xff] %v13221_v25  ;;  %v13233_v29 = vld [vmem:[%s17288_s2 + $0x8] sm:$0xff] }
 0x563   :  { %v12877_v11 = vadd.f32 %v2599_v59, %v2597_v37  ;;  %2602 = vst [vmem:[#allocation3 + $0x40] sm:$0xff] %v12875_v9  ;;  %17635 = vst [vmem:[#allocation15_spill] sm:$0xff] %v13233_v29  ;;  %v13245_v37 = vld [vmem:[%s17288_s2] sm:$0xff]  ;;  %v13250_v59 = vld [vmem:[%s17288_s2 + $0x118] sm:$0xff] }
 0x564   :  { %17636 = vst [vmem:[#allocation16_spill] sm:$0xff] %v13245_v37 }
 0x565   :  { %2603 = vst.msk [vmem:[#allocation3 + $0x48] sm:$0xff] %vm83_vm1, %v12877_v11  ;;  %8348 = vmatprep.mubr.msk.f32.mxu0 %vm83_vm1, %v12877_v11  ;;  %8385 = vmatprep.mubr.msk.f32.mxu1 %vm83_vm1, %v12877_v11 }
 0x566   :  { %2712 = vmatmul.mubr.f32.vlgmr.msra.gmra.mxu0 %v12875_v9  ;;  %2823 = vmatmul.mubr.f32.vlgmr.msra.gmra.mxu1 %v12875_v9 }
 0x567   :  { %2882 = vmatpush1.msra.mxu0 %v12536_v38  ;;  %8422 = vmatprep.mubr.msk.f32.mxu0 %vm83_vm1, %v12877_v11  ;;  %v17621_v38 = vld [vmem:[#allocation21_spill] sm:$0xff] }
 0x568   :  { %2883 = vmatprep.subr.mxu0 %v12547_v45  ;;  %v17622_v45 = vld [vmem:[#allocation22_spill] sm:$0xff] }
 0x569   :  { %2884 = vmatpush1.msra.mxu0 %v12554_v24  ;;  %v17623_v24 = vld [vmem:[#allocation23_spill] sm:$0xff] }
 0x56a   :  { %2885 = vmatprep.subr.mxu0 %v12562_v27  ;;  %v8419_v27 = vld [vmem:[%s17288_s2 + $0x328] sm:$0x1] }
 0x56b   :  { %2886 = vmatpush1.msra.mxu0 %v12568_v49  ;;  %v8418_v49 = vld [vmem:[%s17288_s2 + $0x320] sm:$0x1] }
 0x56c   :  { %2887 = vmatprep.subr.mxu0 %v12575_v4  ;;  %v12933_v4 = vld [vmem:[%s17288_s2 + $0xf8] sm:$0xff] }
 0x56d   :  { %2888 = vmatpush1.msra.mxu0 %v12582_v17  ;;  %v12938_v17 = vld [vmem:[%s17288_s2 + $0xf0] sm:$0xff]  ;;  %3045 = vmatprep.subr.mxu1 %v12933_v4 }
 0x56e   :  { %2889 = vmatprep.subr.mxu0 %v12589_v6  ;;  %v12943_v6 = vld [vmem:[%s17288_s2 + $0x208] sm:$0xff]  ;;  %3046 = vmatpush1.msra.mxu1 %v12938_v17 }
 0x56f   :  { %2890 = vmatpush1.msra.mxu0 %v12596_v33  ;;  %v12950_v33 = vld [vmem:[%s17288_s2 + $0xe8] sm:$0xff] }
 0x570   :  { %2891 = vmatprep.subr.mxu0 %v12603_v5  ;;  %v12955_v5 = vld [vmem:[%s17288_s2 + $0x200] sm:$0xff]  ;;  %3047 = vmatprep.subr.mxu1 %v12950_v33 }
 0x571   :  { %2892 = vmatpush1.msra.mxu0 %v12610_v41  ;;  %v12960_v41 = vld [vmem:[%s17288_s2 + $0xe0] sm:$0xff] }
 0x572   :  { %2893 = vmatprep.subr.mxu0 %v12616_v47  ;;  %v12967_v47 = vld [vmem:[%s17288_s2 + $0x1f8] sm:$0xff]  ;;  %3048 = vmatpush1.msra.mxu1 %v12960_v41 }
 0x573   :  { %2894 = vmatpush1.msra.mxu0 %v12622_v55  ;;  %v12972_v55 = vld [vmem:[%s17288_s2 + $0xd8] sm:$0xff] }
 0x574   :  { %2895 = vmatprep.subr.mxu0 %v12628_v51  ;;  %v12977_v51 = vld [vmem:[%s17288_s2 + $0x1f0] sm:$0xff]  ;;  %3049 = vmatprep.subr.mxu1 %v12972_v55 }
 0x575   :  { %2896 = vmatpush1.msra.mxu0 %v12634_v40  ;;  %v12984_v40 = vld [vmem:[%s17288_s2 + $0xd0] sm:$0xff] }
 0x576   :  { %2897 = vmatprep.subr.mxu0 %v12640_v1  ;;  %v12989_v1 = vld [vmem:[%s17288_s2 + $0x1e8] sm:$0xff]  ;;  %3050 = vmatpush1.msra.mxu1 %v12984_v40 }
 0x577   :  { %2898 = vmatpush1.msra.mxu0 %v12646_v10  ;;  %v12996_v10 = vld [vmem:[%s17288_s2 + $0xc8] sm:$0xff] }
 0x578   :  { %2899 = vmatprep.subr.mxu0 %v12652_v13  ;;  %v13001_v13 = vld [vmem:[%s17288_s2 + $0x1e0] sm:$0xff]  ;;  %3051 = vmatprep.subr.mxu1 %v12996_v10 }
 0x579   :  { %2900 = vmatpush1.msra.mxu0 %v12658_v63  ;;  %3052 = vmatpush1.msra.mxu1 %v12779_v32  ;;  %v13012_v63 = vld [vmem:[%s17288_s2 + $0x1d8] sm:$0xff] }
 0x57a   :  { %2901 = vmatprep.subr.mxu0 %v12664_v20  ;;  %3053 = vmatprep.subr.mxu1 %v12785_v35  ;;  %v13019_v20 = vld [vmem:[%s17288_s2 + $0x1d0] sm:$0xff]  ;;  %v13068_v32 = vld [vmem:[%s17288_s2 + $0x198] sm:$0xff] }
 0x57b   :  { %2902 = vmatpush1.msra.mxu0 %v12670_v36  ;;  %3054 = vmatpush1.msra.mxu1 %v12791_v39  ;;  %v13026_v36 = vld [vmem:[%s17288_s2 + $0x1c8] sm:$0xff]  ;;  %v13075_v35 = vld [vmem:[%s17288_s2 + $0x190] sm:$0xff] }
 0x57c   :  { %2903 = vmatprep.subr.mxu0 %v12676_v44  ;;  %3055 = vmatprep.subr.mxu1 %v12797_v58  ;;  %v13033_v44 = vld [vmem:[%s17288_s2 + $0x1c0] sm:$0xff]  ;;  %v13081_v39 = vld [vmem:[%s17288_s2 + $0x70] sm:$0xff]  ;;  %v13086_v58 = vld [vmem:[%s17288_s2 + $0x188] sm:$0xff] }
 0x57d   :  { %2904 = vmatpush1.msra.mxu0 %v17619_v50  ;;  %3056 = vmatpush1.msra.mxu1 %v12803_v7  ;;  %v13091_v7 = vld [vmem:[%s17288_s2 + $0x68] sm:$0xff] }
 0x57e   :  { %2905 = vmatprep.subr.mxu0 %v17620_v8  ;;  %3057 = vmatprep.subr.mxu1 %v12809_v60  ;;  %v13098_v60 = vld [vmem:[%s17288_s2 + $0x180] sm:$0xff]  ;;  %v3035_v50 = vld [vmem:[%s17288_s2 + $0x108] sm:$0x1]  ;;  %v13260_v8 = vld [vmem:[%s17288_s2 + $0x110] sm:$0xff] }
 0x57f   :  { %2906 = vmatpush1.msra.mxu0 %v17621_v38  ;;  %3058 = vmatpush1.msra.mxu1 %v12815_v30  ;;  %v13103_v30 = vld [vmem:[%s17288_s2 + $0x60] sm:$0xff] }
 0x580   :  { %2907 = vmatprep.subr.mxu0 %v17622_v45  ;;  %3059 = vmatprep.subr.mxu1 %v12821_v15  ;;  %17624 = vst [vmem:[#allocation24_spill] sm:$0xff] %v13103_v30  ;;  %v13108_v15 = vld [vmem:[%s17288_s2 + $0x178] sm:$0xff]  ;;  %v3034_v38 = vld [vmem:[%s17288_s2 + $0x100] sm:$0x1] }
 0x581   :  { %2908 = vmatpush1.msra.mxu0 %v17623_v24  ;;  %3060 = vmatpush1.msra.mxu1 %v12827_v21  ;;  %v13115_v21 = vld [vmem:[%s17288_s2 + $0x58] sm:$0xff]  ;;  %v8462_v24 = vld [vmem:[%s17288_s2 + $0x210] sm:$0x1] }
 0x582   :  { %2909 = vmatprep.subr.mxu0 %v12712_v48  ;;  %v13061_v48 = vld [vmem:[%s17288_s2 + $0x1a0] sm:$0xff]  ;;  %3061 = vmatprep.subr.mxu1 %v12833_v43  ;;  %17625 = vst [vmem:[#allocation25_spill] sm:$0xff] %v13115_v21  ;;  %v13120_v43 = vld [vmem:[%s17288_s2 + $0x170] sm:$0xff]  ;;  %v8463_v45 = vld [vmem:[%s17288_s2 + $0x218] sm:$0x1] }
 0x583   :  { %2910 = vmatpush1.msra.mxu0 %v12718_v61  ;;  %v13040_v61 = vld [vmem:[%s17288_s2 + $0x1b8] sm:$0xff]  ;;  %3062 = vmatpush1.msra.mxu1 %v13081_v39 }
 0x584   :  { %2911 = vmatprep.subr.mxu0 %v12724_v18  ;;  %v13047_v18 = vld [vmem:[%s17288_s2 + $0x1b0] sm:$0xff]  ;;  %3063 = vmatprep.subr.mxu1 %v13091_v7 }
 0x585   :  { %2912 = vmatpush1.msra.mxu0 %v12730_v3  ;;  %v13054_v3 = vld [vmem:[%s17288_s2 + $0x1a8] sm:$0xff]  ;;  %3064 = vmatpush1.msra.mxu1 %v13103_v30 }
 0x586   :  { %8420 = vmatprep.subr.msk.mxu0 %vm108_vm0, %v8419_v27  ;;  %3065 = vmatprep.subr.mxu1 %v13115_v21  ;;  %v13282_v27 = vld [vmem:[%s17288_s2 + $0x318] sm:$0xff] }
 0x587   :  { %8421 = vmatpush2.msk.msra.mxu0 %vm108_vm0, %v8418_v49  ;;  %3066 = vmatpush1.msra.mxu1 %v13125_v42  ;;  %17637 = vst [vmem:[#allocation17_spill] sm:$0xff] %v13282_v27 }
 0x588   :  { %2946 = vmatmul.mubr.f32.vlgmr.msra.gmra.mxu0 %v12875_v9  ;;  %3156 = vmatprep.subr.mxu0 %v12943_v6 }
 0x589   :  { %3157 = vmatpush1.msra.mxu0 %v12955_v5  ;;  %3067 = vmatprep.subr.mxu1 %v13137_v0 }
 0x58a   :  { %3158 = vmatprep.subr.mxu0 %v12967_v47  ;;  %3068 = vmatpush1.msra.mxu1 %v13149_v53  ;;  %v2969_v53 = vld [vmem:[#allocation2 + $0xd8] sm:$0xff] }
 0x58b   :  { %3159 = vmatpush1.msra.mxu0 %v12977_v51  ;;  %3069 = vmatprep.subr.mxu1 %v13161_v23 }
 0x58c   :  { %3160 = vmatprep.subr.mxu0 %v12989_v1  ;;  %3070 = vmatpush1.msra.mxu1 %v13173_v19  ;;  %v2968_v19 = vld [vmem:[#allocation2 + $0xd0] sm:$0xff] }
 0x58d   :  { %3161 = vmatpush1.msra.mxu0 %v13001_v13  ;;  %3071 = vmatprep.subr.mxu1 %v13185_v12 }
 0x58e   :  { %3162 = vmatprep.subr.mxu0 %v13012_v63  ;;  %3072 = vmatpush1.msra.mxu1 %v13197_v54 }
 0x58f   :  { %3163 = vmatpush1.msra.mxu0 %v13019_v20  ;;  %3073 = vmatprep.subr.mxu1 %v13209_v16 }
 0x590   :  { %3164 = vmatprep.subr.mxu0 %v13026_v36  ;;  %3074 = vmatpush1.msra.mxu1 %v13221_v25 }
 0x591   :  { %3165 = vmatpush1.msra.mxu0 %v13033_v44  ;;  %3075 = vmatprep.subr.mxu1 %v13233_v29 }
 0x592   :  { %3166 = vmatprep.subr.mxu0 %v13040_v61  ;;  %3076 = vmatpush1.msra.mxu1 %v13245_v37 }
 0x593   :  { %3167 = vmatpush1.msra.mxu0 %v13047_v18  ;;  %8427 = vmatprep.subr.msk.mxu1 %vm108_vm0, %v3035_v50  ;;  %v2952_v50 = vld [vmem:[#allocation2 + $0x50] sm:$0xff] }
 0x594   :  { %3168 = vmatprep.subr.mxu0 %v13054_v3  ;;  %8428 = vmatpush2.msk.msra.mxu1 %vm108_vm0, %v3034_v38 }
 0x595   :  { %3169 = vmatpush1.msra.mxu0 %v13061_v48  ;;  %3279 = vmatprep.subr.mxu1 %v13282_v27 }
 0x596   :  { %3170 = vmatprep.subr.mxu0 %v13068_v32 }
 0x597   :  { %3171 = vmatpush1.msra.mxu0 %v13075_v35 }
 0x598   :  { %3172 = vmatprep.subr.mxu0 %v13086_v58 }
 0x599   :  { %3173 = vmatpush1.msra.mxu0 %v13098_v60 }
 0x59a   :  { %3174 = vmatprep.subr.mxu0 %v13108_v15 }
 0x59b   :  { %3175 = vmatpush1.msra.mxu0 %v13120_v43 }
 0x59c   :  { %3176 = vmatprep.subr.mxu0 %v13132_v52 }
 0x59d   :  { %3177 = vmatpush1.msra.mxu0 %v13142_v26 }
 0x59e   :  { %3178 = vmatprep.subr.mxu0 %v13154_v14 }
 0x59f   :  { %3179 = vmatpush1.msra.mxu0 %v13166_v46 }
 0x5a0   :  { %3180 = vmatprep.subr.mxu0 %v13178_v56 }
 0x5a1   :  { %3181 = vmatpush1.msra.mxu0 %v13190_v28 }
 0x5a2   :  { %3182 = vmatprep.subr.mxu0 %v13202_v57 }
 0x5a3   :  { %3183 = vmatpush1.msra.mxu0 %v13214_v31 }
 0x5a4   :  { %3184 = vmatprep.subr.mxu0 %v13226_v34 }
 0x5a5   :  { %3185 = vmatpush1.msra.mxu0 %v13238_v62 }
 0x5a6   :  { %3186 = vmatprep.subr.mxu0 %v13250_v59 }
 0x5a7   :  { %3187 = vmatpush1.msra.mxu0 %v13260_v8 }
 0x5a8   :  { %8464 = vmatprep.subr.msk.mxu0 %vm108_vm0, %v8463_v45  ;;  %v2953_v45 = vld [vmem:[#allocation2 + $0x58] sm:$0xff] }
 0x5a9   :  { %8465 = vmatpush2.msk.msra.mxu0 %vm108_vm0, %v8462_v24 }
 0x5aa   :  { %3443 = vmatprep.subr.mxu0 %v12933_v4 }
 0x626   :  { %v2713_v49 = vpop.f32.mrf.mxu0  ;;  %v2824_v16 = vpop.f32.mrf.mxu1 }
 0x627   :  { %v2954_v38 = vadd.f32 %v2952_v50, %v2713_v49  ;;  %v2970_v23 = vadd.f32 %v2968_v19, %v2824_v16 }
 0x628   :  { %v2715_v37 = vpop.f32.mrf.mxu0  ;;  %v2826_v12 = vpop.f32.mrf.mxu1 }
 0x629   :  { %v8423_v29 = vmul.f32 -1.442695, %v2954_v38  ;;  %v2955_v25 = vadd.f32 %v2953_v45, %v2715_v37  ;;  %v2971_v24 = vadd.f32 %v2969_v53, %v2826_v12  ;;  %v8425_v0 = vmul.f32 -1.442695, %v2970_v23 }
 0x62b   :  { %9753 = vpow2.f32 %v8423_v29  ;;  %v8424_v54 = vmul.f32 -1.442695, %v2955_v25  ;;  %v8426_v27 = vmul.f32 -1.442695, %v2971_v24  ;;  %v2863_v25 = vld [vmem:[%s17290_s4] sm:$0x3] }
 0x62c   :  { %v2868_v29 = vrot.slane %v2863_v25, %v17617_v22  ;;  %v2872_v53 = vrot.slane %v2863_v25, %v17618_v2  ;;  %v2984_v24 = vld [vmem:[#allocation2 + $0x150] sm:$0xff] }
 0x62d   :  { %9755 = vpow2.f32 %v8424_v54 }
 0x62e   :  { %9757 = vpow2.f32 %v8425_v0 }
 0x62f   :  { %9759 = vpow2.f32 %v8426_v27 }
 0x638   :  { %v9754_v42 = vpop.eup %9753 }
 0x639   :  { %v2962_v4 = vadd.f32 1.0, %v9754_v42 }
 0x63a   :  { %v9756_v49 = vpop.eup %9755 }
 0x63b   :  { %9761 = vrcp.f32 %v2962_v4  ;;  %v2963_v50 = vadd.f32 1.0, %v9756_v49  ;;  %v9758_v54 = vpop.eup %9757 }
 0x63c   :  { %v9760_v19 = vpop.eup %9759  ;;  %v2978_v12 = vadd.f32 1.0, %v9758_v54 }
 0x63d   :  { %9763 = vrcp.f32 %v2963_v50  ;;  %v2979_v0 = vadd.f32 1.0, %v9760_v19  ;;  %v2985_v50 = vld [vmem:[#allocation2 + $0x158] sm:$0xff] }
 0x63e   :  { %9765 = vrcp.f32 %v2978_v12 }
 0x63f   :  { %9767 = vrcp.f32 %v2979_v0 }
 0x648   :  { %v9762_v23 = vpop.eup %9761  ;;  %v2947_v16 = vpop.f32.mrf.mxu0 }
 0x649   :  { %v2948_v42 = vadd.f32 %v2947_v16, %v2868_v29 }
 0x64a   :  { %v9764_v37 = vpop.eup %9763  ;;  %v2949_v27 = vpop.f32.mrf.mxu0 }
 0x64b   :  { %v2986_v38 = vmul.f32 %v9762_v23, %v2948_v42  ;;  %v2950_v45 = vadd.f32 %v2949_v27, %v2872_v53  ;;  %v9766_v21 = vpop.eup %9765  ;;  %v13347_v42 = vld [vmem:[%s17288_s2 + $0x2e0] sm:$0xff] }
 0x64c   :  { %v9768_v25 = vpop.eup %9767  ;;  %v2992_v54 = vsub.f32 1.0, %v9766_v21  ;;  %v2996_v53 = vmul.f32 %v9766_v21, %v12875_v9  ;;  %v13319_v9 = vld [vmem:[%s17288_s2 + $0x300] sm:$0xff]  ;;  %v13340_v21 = vld [vmem:[%s17288_s2 + $0x2e8] sm:$0xff] }
 0x64d   :  { %v2988_v4 = vadd.f32 %v2986_v38, %v2984_v24  ;;  %v2987_v49 = vmul.f32 %v9764_v37, %v2950_v45  ;;  %v2993_v30 = vsub.f32 1.0, %v9768_v25  ;;  %v2997_v23 = vmul.f32 %v9768_v25, %v12877_v11  ;;  %v13327_v11 = vld [vmem:[%s17288_s2 + $0x2f8] sm:$0xff]  ;;  %v13393_v37 = vld [vmem:[%s17288_s2 + $0x2a8] sm:$0xff]  ;;  %v13399_v27 = vld [vmem:[%s17288_s2 + $0x2a0] sm:$0xff] }
 0x64e   :  { %v13405_v38 = vld [vmem:[%s17288_s2 + $0x298] sm:$0xff]  ;;  %v13411_v45 = vld [vmem:[%s17288_s2 + $0x290] sm:$0xff]  ;;  %v13417_v24 = vld [vmem:[%s17288_s2 + $0x288] sm:$0xff] }
 0x64f   :  { %9769 = vtanh.f32 %v2988_v4  ;;  %v2989_v22 = vadd.f32 %v2987_v49, %v2985_v50  ;;  %v13423_v4 = vld [vmem:[%s17288_s2 + $0x280] sm:$0xff]  ;;  %v13429_v49 = vld [vmem:[%s17288_s2 + $0x278] sm:$0xff]  ;;  %v13435_v50 = vld [vmem:[%s17288_s2 + $0x270] sm:$0xff] }
 0x650   :  { %v13441_v25 = vld [vmem:[%s17288_s2 + $0x268] sm:$0xff] }
 0x651   :  { %9771 = vtanh.f32 %v2989_v22  ;;  %v13301_v22 = vld [vmem:[%s17288_s2 + $0x310] sm:$0xff] }
 0x65c   :  { %v9770_v2 = vpop.eup %9769 }
 0x65d   :  { %v2994_v29 = vmul.f32 %v9770_v2, %v2992_v54  ;;  %v13312_v2 = vld [vmem:[%s17288_s2 + $0x308] sm:$0xff]  ;;  %v13447_v54 = vld [vmem:[%s17288_s2 + $0x260] sm:$0xff] }
 0x65e   :  { %v9772_v19 = vpop.eup %9771  ;;  %17638 = vst [vmem:[#allocation18_spill] sm:$0xff] %v13447_v54 }
 0x65f   :  { %v2995_v16 = vmul.f32 %v9772_v19, %v2993_v30  ;;  %v13296_v0 = vadd.f32 %v2996_v53, %v2994_v29  ;;  %v13333_v30 = vld [vmem:[%s17288_s2 + $0x2f0] sm:$0xff]  ;;  %v13453_v19 = vld [vmem:[%s17288_s2 + $0x258] sm:$0xff] }
 0x660   :  { %17639 = vst [vmem:[#allocation19_spill] sm:$0xff] %v13453_v19  ;;  %v13459_v29 = vld [vmem:[%s17288_s2 + $0x250] sm:$0xff]  ;;  %v13477_v53 = vld [vmem:[%s17288_s2 + $0x238] sm:$0xff] }
 0x661   :  { %v13294_v12 = vadd.f32 %v2997_v23, %v2995_v16  ;;  %17640 = vst [vmem:[#allocation20_spill] sm:$0xff] %v13459_v29  ;;  %v13465_v16 = vld [vmem:[%s17288_s2 + $0x248] sm:$0xff]  ;;  %v13471_v23 = vld [vmem:[%s17288_s2 + $0x240] sm:$0xff] }
 0x662   :  { %17641 = vst [vmem:[#allocation21_spill] sm:$0xff] %v13465_v16  ;;  %17642 = vst [vmem:[#allocation22_spill] sm:$0xff] %v13471_v23 }
 0x663   :  { %3001 = vst.msk [vmem:[#allocation3 + $0x58] sm:$0xff] %vm83_vm1, %v13294_v12  ;;  %8429 = vmatprep.mubr.msk.f32.mxu1 %vm83_vm1, %v13294_v12  ;;  %8466 = vmatprep.mubr.msk.f32.mxu0 %vm83_vm1, %v13294_v12 }
 0x664   :  { %3110 = vmatmul.mubr.f32.vlgmr.msra.gmra.mxu1 %v13296_v0  ;;  %3221 = vmatmul.mubr.f32.vlgmr.msra.gmra.mxu0 %v13296_v0 }
 0x665   :  { %3280 = vmatpush1.msra.mxu1 %v13301_v22  ;;  %8503 = vmatprep.mubr.msk.f32.mxu1 %vm83_vm1, %v13294_v12 }
 0x666   :  { %3281 = vmatprep.subr.mxu1 %v13312_v2  ;;  %3444 = vmatpush1.msra.mxu0 %v12938_v17  ;;  %v13354_v17 = vld [vmem:[%s17288_s2 + $0x2d8] sm:$0xff] }
 0x667   :  { %3282 = vmatpush1.msra.mxu1 %v13319_v9  ;;  %3445 = vmatprep.subr.mxu0 %v12950_v33  ;;  %v13361_v33 = vld [vmem:[%s17288_s2 + $0x2d0] sm:$0xff] }
 0x668   :  { %3283 = vmatprep.subr.mxu1 %v13327_v11  ;;  %3446 = vmatpush1.msra.mxu0 %v12960_v41  ;;  %v13368_v41 = vld [vmem:[%s17288_s2 + $0x2c8] sm:$0xff] }
 0x669   :  { %3284 = vmatpush1.msra.mxu1 %v13333_v30  ;;  %3447 = vmatprep.subr.mxu0 %v12972_v55  ;;  %v13375_v55 = vld [vmem:[%s17288_s2 + $0x2c0] sm:$0xff] }
 0x66a   :  { %3285 = vmatprep.subr.mxu1 %v13340_v21  ;;  %3448 = vmatpush1.msra.mxu0 %v12984_v40  ;;  %v13381_v40 = vld [vmem:[%s17288_s2 + $0x2b8] sm:$0xff] }
 0x66b   :  { %3286 = vmatpush1.msra.mxu1 %v13347_v42  ;;  %3449 = vmatprep.subr.mxu0 %v12996_v10  ;;  %v13387_v10 = vld [vmem:[%s17288_s2 + $0x2b0] sm:$0xff] }
 0x66c   :  { %3287 = vmatprep.subr.mxu1 %v13354_v17 }
 0x66d   :  { %3288 = vmatpush1.msra.mxu1 %v13361_v33 }
 0x66e   :  { %3289 = vmatprep.subr.mxu1 %v13368_v41 }
 0x66f   :  { %3290 = vmatpush1.msra.mxu1 %v13375_v55 }
 0x670   :  { %3291 = vmatprep.subr.mxu1 %v13381_v40 }
 0x671   :  { %3292 = vmatpush1.msra.mxu1 %v13387_v10 }
 0x672   :  { %3293 = vmatprep.subr.mxu1 %v13393_v37 }
 0x673   :  { %3294 = vmatpush1.msra.mxu1 %v13399_v27 }
 0x674   :  { %3295 = vmatprep.subr.mxu1 %v13405_v38 }
 0x675   :  { %3296 = vmatpush1.msra.mxu1 %v13411_v45 }
 0x676   :  { %3297 = vmatprep.subr.mxu1 %v13417_v24 }
 0x677   :  { %3298 = vmatpush1.msra.mxu1 %v13423_v4 }
 0x678   :  { %3299 = vmatprep.subr.mxu1 %v13429_v49 }
 0x679   :  { %3300 = vmatpush1.msra.mxu1 %v13435_v50 }
 0x67a   :  { %3301 = vmatprep.subr.mxu1 %v13441_v25 }
 0x67b   :  { %3302 = vmatpush1.msra.mxu1 %v13447_v54  ;;  %v13483_v54 = vld [vmem:[%s17288_s2 + $0x230] sm:$0xff] }
 0x67c   :  { %3303 = vmatprep.subr.mxu1 %v13453_v19  ;;  %v13489_v19 = vld [vmem:[%s17288_s2 + $0x228] sm:$0xff] }
 0x67d   :  { %3304 = vmatpush1.msra.mxu1 %v13459_v29  ;;  %v13495_v29 = vld [vmem:[%s17288_s2 + $0x220] sm:$0xff] }
 0x67e   :  { %3305 = vmatprep.subr.mxu1 %v13465_v16  ;;  %v8500_v16 = vld [vmem:[%s17288_s2 + $0x328] sm:$0x1] }
 0x67f   :  { %3306 = vmatpush1.msra.mxu1 %v13471_v23  ;;  %v8499_v23 = vld [vmem:[%s17288_s2 + $0x320] sm:$0x1] }
 0x680   :  { %3307 = vmatprep.subr.mxu1 %v13477_v53 }
 0x681   :  { %3308 = vmatpush1.msra.mxu1 %v13483_v54 }
 0x682   :  { %3309 = vmatprep.subr.mxu1 %v13489_v19 }
 0x683   :  { %3310 = vmatpush1.msra.mxu1 %v13495_v29 }
 0x684   :  { %8501 = vmatprep.subr.msk.mxu1 %vm108_vm0, %v8500_v16 }
 0x685   :  { %8502 = vmatpush2.msk.msra.mxu1 %vm108_vm0, %v8499_v23 }
 0x686   :  { %3344 = vmatmul.mubr.f32.vlgmr.msra.gmra.mxu1 %v13296_v0  ;;  %3554 = vmatprep.subr.mxu1 %v12943_v6  ;;  %v3424_v6 = vld [vmem:[%s17288_s2 + $0xc0] sm:$0xff] }
 0x687   :  { %3555 = vmatpush1.msra.mxu1 %v12955_v5  ;;  %3450 = vmatpush1.msra.mxu0 %v3424_v6  ;;  %v3423_v5 = vld [vmem:[%s17288_s2 + $0xb8] sm:$0xff] }
 0x688   :  { %3556 = vmatprep.subr.mxu1 %v12967_v47  ;;  %3451 = vmatprep.subr.mxu0 %v3423_v5  ;;  %v3422_v47 = vld [vmem:[%s17288_s2 + $0xb0] sm:$0xff] }
 0x689   :  { %3557 = vmatpush1.msra.mxu1 %v12977_v51  ;;  %3452 = vmatpush1.msra.mxu0 %v3422_v47  ;;  %v3421_v51 = vld [vmem:[%s17288_s2 + $0xa8] sm:$0xff] }
 0x68a   :  { %3558 = vmatprep.subr.mxu1 %v12989_v1  ;;  %3453 = vmatprep.subr.mxu0 %v3421_v51  ;;  %v3420_v1 = vld [vmem:[%s17288_s2 + $0xa0] sm:$0xff] }
 0x68b   :  { %3559 = vmatpush1.msra.mxu1 %v13001_v13  ;;  %3454 = vmatpush1.msra.mxu0 %v3420_v1  ;;  %v3419_v13 = vld [vmem:[%s17288_s2 + $0x98] sm:$0xff]  ;;  %v3366_v51 = vld [vmem:[#allocation2 + $0xe0] sm:$0xff] }
 0x68c   :  { %3560 = vmatprep.subr.mxu1 %v13012_v63  ;;  %3455 = vmatprep.subr.mxu0 %v3419_v13  ;;  %v3418_v63 = vld [vmem:[%s17288_s2 + $0x90] sm:$0xff]  ;;  %v3367_v13 = vld [vmem:[#allocation2 + $0xe8] sm:$0xff] }
 0x68d   :  { %3561 = vmatpush1.msra.mxu1 %v13019_v20  ;;  %3456 = vmatpush1.msra.mxu0 %v3418_v63  ;;  %v3417_v20 = vld [vmem:[%s17288_s2 + $0x88] sm:$0xff] }
 0x68e   :  { %3562 = vmatprep.subr.mxu1 %v13026_v36  ;;  %3457 = vmatprep.subr.mxu0 %v3417_v20  ;;  %v3416_v36 = vld [vmem:[%s17288_s2 + $0x80] sm:$0xff] }
 0x68f   :  { %3563 = vmatpush1.msra.mxu1 %v13033_v44  ;;  %3458 = vmatpush1.msra.mxu0 %v3416_v36  ;;  %v3415_v44 = vld [vmem:[%s17288_s2 + $0x78] sm:$0xff] }
 0x690   :  { %3564 = vmatprep.subr.mxu1 %v13040_v61  ;;  %3459 = vmatprep.subr.mxu0 %v3415_v44  ;;  %v8544_v61 = vld [vmem:[%s17288_s2 + $0x218] sm:$0x1] }
 0x691   :  { %3565 = vmatpush1.msra.mxu1 %v13047_v18  ;;  %3460 = vmatpush1.msra.mxu0 %v13081_v39  ;;  %v8543_v18 = vld [vmem:[%s17288_s2 + $0x210] sm:$0x1]  ;;  %v17648_v39 = vld [vmem:[#allocation9_spill] sm:$0xff] }
 0x692   :  { %3566 = vmatprep.subr.mxu1 %v13054_v3  ;;  %3461 = vmatprep.subr.mxu0 %v13091_v7  ;;  %v17643_v3 = vld [vmem:[#allocation24_spill] sm:$0xff]  ;;  %v17652_v7 = vld [vmem:[#allocation13_spill] sm:$0xff] }
 0x693   :  { %3567 = vmatpush1.msra.mxu1 %v13061_v48  ;;  %3462 = vmatpush1.msra.mxu0 %v17643_v3  ;;  %v17644_v48 = vld [vmem:[#allocation25_spill] sm:$0xff] }
 0x694   :  { %3568 = vmatprep.subr.mxu1 %v13068_v32  ;;  %3463 = vmatprep.subr.mxu0 %v17644_v48  ;;  %v17645_v32 = vld [vmem:[#allocation6_spill] sm:$0xff] }
 0x695   :  { %3569 = vmatpush1.msra.mxu1 %v13075_v35  ;;  %3464 = vmatpush1.msra.mxu0 %v17645_v32  ;;  %v17646_v35 = vld [vmem:[#allocation7_spill] sm:$0xff]  ;;  %v3261_v48 = vld [vmem:[%s17290_s4] sm:$0x3] }
 0x696   :  { %3570 = vmatprep.subr.mxu1 %v13086_v58  ;;  %3465 = vmatprep.subr.mxu0 %v17646_v35  ;;  %v17647_v58 = vld [vmem:[#allocation8_spill] sm:$0xff]  ;;  %v17657_v35 = vld [vmem:[#allocation26_spill] sm:$0xff] }
 0x697   :  { %3571 = vmatpush1.msra.mxu1 %v13098_v60  ;;  %3466 = vmatpush1.msra.mxu0 %v17647_v58  ;;  %v17649_v60 = vld [vmem:[#allocation10_spill] sm:$0xff]  ;;  %v3266_v58 = vrot.slane %v3261_v48, %v17657_v35 }
 0x698   :  { %3572 = vmatprep.subr.mxu1 %v13108_v15  ;;  %3467 = vmatprep.subr.mxu0 %v17648_v39  ;;  %v17650_v15 = vld [vmem:[#allocation11_spill] sm:$0xff] }
 0x699   :  { %3573 = vmatpush1.msra.mxu1 %v13120_v43  ;;  %3468 = vmatpush1.msra.mxu0 %v17649_v60  ;;  %v17651_v43 = vld [vmem:[#allocation12_spill] sm:$0xff]  ;;  %v17658_v60 = vld [vmem:[#allocation27_spill] sm:$0xff] }
 0x69a   :  { %3574 = vmatprep.subr.mxu1 %v13132_v52  ;;  %3469 = vmatprep.subr.mxu0 %v17650_v15  ;;  %v17653_v52 = vld [vmem:[#allocation14_spill] sm:$0xff]  ;;  %v3270_v15 = vrot.slane %v3261_v48, %v17658_v60  ;;  %v8616_v48 = vld [vmem:[%s17287_s1 + $0x408] sm:$0xff] }
 0x69b   :  { %3575 = vmatpush1.msra.mxu1 %v13142_v26  ;;  %3470 = vmatpush1.msra.mxu0 %v17651_v43  ;;  %v3433_v26 = vld [vmem:[%s17288_s2 + $0x108] sm:$0x1] }
 0x69c   :  { %3576 = vmatprep.subr.mxu1 %v13154_v14  ;;  %3471 = vmatprep.subr.mxu0 %v17652_v7  ;;  %v17654_v14 = vld [vmem:[#allocation15_spill] sm:$0xff] }
 0x69d   :  { %3577 = vmatpush1.msra.mxu1 %v13166_v46  ;;  %3472 = vmatpush1.msra.mxu0 %v17653_v52  ;;  %v3432_v46 = vld [vmem:[%s17288_s2 + $0x100] sm:$0x1] }
 0x69e   :  { %3578 = vmatprep.subr.mxu1 %v13178_v56  ;;  %3473 = vmatprep.subr.mxu0 %v17654_v14  ;;  %v17655_v56 = vld [vmem:[#allocation16_spill] sm:$0xff] }
 0x69f   :  { %3579 = vmatpush1.msra.mxu1 %v13190_v28  ;;  %3474 = vmatpush1.msra.mxu0 %v17655_v56  ;;  %v8620_v28 = vld [vmem:[%s17287_s1 + $0x428] sm:$0xff] }
 0x6a0   :  { %3580 = vmatprep.subr.mxu1 %v13202_v57  ;;  %8508 = vmatprep.subr.msk.mxu0 %vm108_vm0, %v3433_v26  ;;  %v17656_v57 = vld [vmem:[#allocation17_spill] sm:$0xff] }
 0x6a1   :  { %3581 = vmatpush1.msra.mxu1 %v13214_v31  ;;  %8509 = vmatpush2.msk.msra.mxu0 %vm108_vm0, %v3432_v46 }
 0x6a2   :  { %3582 = vmatprep.subr.mxu1 %v13226_v34  ;;  %3677 = vmatprep.subr.mxu0 %v17656_v57  ;;  %v3350_v34 = vld [vmem:[#allocation2 + $0x60] sm:$0xff] }
 0x6a3   :  { %3583 = vmatpush1.msra.mxu1 %v13238_v62 }
 0x6a4   :  { %3584 = vmatprep.subr.mxu1 %v13250_v59 }
 0x6a5   :  { %3585 = vmatpush1.msra.mxu1 %v13260_v8  ;;  %v3351_v8 = vld [vmem:[#allocation2 + $0x68] sm:$0xff] }
 0x6a6   :  { %8545 = vmatprep.subr.msk.mxu1 %vm108_vm0, %v8544_v61 }
 0x6a7   :  { %8546 = vmatpush2.msk.msra.mxu1 %vm108_vm0, %v8543_v18 }
 0x6a8   :  { %3892 = vmatprep.subr.mxu1 %v8620_v28 }
 0x724   :  { %v3111_v31 = vpop.f32.mrf.mxu1  ;;  %v3222_v6 = vpop.f32.mrf.mxu0 }
 0x725   :  { %v3352_v62 = vadd.f32 %v3350_v34, %v3111_v31  ;;  %v3368_v1 = vadd.f32 %v3366_v51, %v3222_v6  ;;  %v3382_v31 = vld [vmem:[#allocation2 + $0x160] sm:$0xff] }
 0x726   :  { %v3113_v59 = vpop.f32.mrf.mxu1  ;;  %v3224_v47 = vpop.f32.mrf.mxu0 }
 0x727   :  { %v8504_v16 = vmul.f32 -1.442695, %v3352_v62  ;;  %v3353_v23 = vadd.f32 %v3351_v8, %v3113_v59  ;;  %v3369_v63 = vadd.f32 %v3367_v13, %v3224_v47  ;;  %v8506_v20 = vmul.f32 -1.442695, %v3368_v1  ;;  %v3383_v59 = vld [vmem:[#allocation2 + $0x168] sm:$0xff] }
 0x729   :  { %9773 = vpow2.f32 %v8504_v16  ;;  %v8505_v5 = vmul.f32 -1.442695, %v3353_v23  ;;  %v8507_v36 = vmul.f32 -1.442695, %v3369_v63 }
 0x72b   :  { %9775 = vpow2.f32 %v8505_v5 }
 0x72c   :  { %9777 = vpow2.f32 %v8506_v20 }
 0x72d   :  { %9779 = vpow2.f32 %v8507_v36 }
 0x736   :  { %v9774_v44 = vpop.eup %9773 }
 0x737   :  { %v3360_v61 = vadd.f32 1.0, %v9774_v44 }
 0x738   :  { %v9776_v18 = vpop.eup %9775 }
 0x739   :  { %9781 = vrcp.f32 %v3360_v61  ;;  %v3361_v3 = vadd.f32 1.0, %v9776_v18  ;;  %v9778_v32 = vpop.eup %9777  ;;  %v8619_v61 = vld [vmem:[%s17287_s1 + $0x420] sm:$0xff]  ;;  %v8617_v18 = vld [vmem:[%s17287_s1 + $0x410] sm:$0xff] }
 0x73a   :  { %v9780_v39 = vpop.eup %9779  ;;  %v3376_v7 = vadd.f32 1.0, %v9778_v32  ;;  %v8613_v32 = vld [vmem:[%s17287_s1 + $0x3f0] sm:$0xff] }
 0x73b   :  { %9783 = vrcp.f32 %v3361_v3  ;;  %v3377_v26 = vadd.f32 1.0, %v9780_v39  ;;  %v13638_v3 = vld [vmem:[#allocation3 + $0x8] sm:$0xff]  ;;  %v8594_v39 = vld [vmem:[%s17287_s1 + $0x358] sm:$0xff] }
 0x73c   :  { %9785 = vrcp.f32 %v3376_v7  ;;  %v17662_v7 = vld [vmem:[#allocation21_spill] sm:$0xff] }
 0x73d   :  { %9787 = vrcp.f32 %v3377_v26  ;;  %v17663_v26 = vld [vmem:[#allocation22_spill] sm:$0xff] }
 0x746   :  { %v9782_v43 = vpop.eup %9781  ;;  %v3345_v52 = vpop.f32.mrf.mxu1 }
 0x747   :  { %v3346_v14 = vadd.f32 %v3345_v52, %v3266_v58  ;;  %v8612_v58 = vld [vmem:[%s17287_s1 + $0x3e8] sm:$0xff]  ;;  %v8591_v52 = vld [vmem:[%s17287_s1 + $0x340] sm:$0xff] }
 0x748   :  { %v9784_v46 = vpop.eup %9783  ;;  %v3347_v56 = vpop.f32.mrf.mxu1 }
 0x749   :  { %v3384_v28 = vmul.f32 %v9782_v43, %v3346_v14  ;;  %v3348_v57 = vadd.f32 %v3347_v56, %v3270_v15  ;;  %v9786_v16 = vpop.eup %9785  ;;  %v8593_v15 = vld [vmem:[%s17287_s1 + $0x350] sm:$0xff]  ;;  %v8592_v43 = vld [vmem:[%s17287_s1 + $0x348] sm:$0xff]  ;;  %v8590_v14 = vld [vmem:[%s17287_s1 + $0x338] sm:$0xff] }
 0x74a   :  { %v9788_v23 = vpop.eup %9787  ;;  %v3390_v5 = vsub.f32 1.0, %v9786_v16  ;;  %v3394_v20 = vmul.f32 %v9786_v16, %v13296_v0  ;;  %v8581_v56 = vld [vmem:[%s17288_s2 + $0x328] sm:$0x1]  ;;  %v8660_v16 = vld [vmem:[%s17287_s1 + $0x510] sm:$0xff] }
 0x74b   :  { %v3386_v34 = vadd.f32 %v3384_v28, %v3382_v31  ;;  %v3385_v62 = vmul.f32 %v9784_v46, %v3348_v57  ;;  %v3391_v47 = vsub.f32 1.0, %v9788_v23  ;;  %v3395_v63 = vmul.f32 %v9788_v23, %v13294_v12  ;;  %v8618_v12 = vld [vmem:[%s17287_s1 + $0x418] sm:$0xff]  ;;  %v8589_v46 = vld [vmem:[%s17287_s1 + $0x330] sm:$0xff]  ;;  %v13774_v57 = vld [vmem:[#allocation3] sm:$0xff] }
 0x74c   :  { %v8622_v28 = vld [vmem:[%s17287_s1 + $0x438] sm:$0x1]  ;;  %v8664_v31 = vld [vmem:[%s17287_s1 + $0x530] sm:$0xff]  ;;  %v13802_v23 = vld [vmem:[#allocation3 + $0x28] sm:$0xff] }
 0x74d   :  { %9789 = vtanh.f32 %v3386_v34  ;;  %v3387_v8 = vadd.f32 %v3385_v62, %v3383_v59  ;;  %v8663_v34 = vld [vmem:[%s17287_s1 + $0x528] sm:$0xff]  ;;  %v8662_v62 = vld [vmem:[%s17287_s1 + $0x520] sm:$0xff]  ;;  %v8661_v59 = vld [vmem:[%s17287_s1 + $0x518] sm:$0xff] }
 0x74f   :  { %9791 = vtanh.f32 %v3387_v8  ;;  %v13796_v8 = vld [vmem:[#allocation3 + $0x10] sm:$0xff] }
 0x75a   :  { %v9790_v6 = vpop.eup %9789 }
 0x75b   :  { %v3392_v1 = vmul.f32 %v9790_v6, %v3390_v5  ;;  %v8659_v6 = vld [vmem:[%s17287_s1 + $0x508] sm:$0xff]  ;;  %v8658_v5 = vld [vmem:[%s17287_s1 + $0x500] sm:$0xff] }
 0x75c   :  { %v9792_v51 = vpop.eup %9791 }
 0x75d   :  { %v3393_v13 = vmul.f32 %v9792_v51, %v3391_v47  ;;  %v13615_v44 = vadd.f32 %v3394_v20, %v3392_v1  ;;  %v8657_v47 = vld [vmem:[%s17287_s1 + $0x4f8] sm:$0xff]  ;;  %v13815_v51 = vld [vmem:[#allocation3 + $0x20] sm:$0xff]  ;;  %v8656_v1 = vld [vmem:[%s17287_s1 + $0x4f0] sm:$0xff] }
 0x75e   :  { %v8654_v20 = vld [vmem:[%s17287_s1 + $0x4e0] sm:$0xff] }
 0x75f   :  { %v13613_v36 = vadd.f32 %v3395_v63, %v3393_v13  ;;  %v13821_v13 = vld [vmem:[#allocation3 + $0x38] sm:$0xff]  ;;  %v8655_v63 = vld [vmem:[%s17287_s1 + $0x4e8] sm:$0xff] }
 0x761   :  { %3399 = vst.msk [vmem:[#allocation3 + $0x68] sm:$0xff] %vm83_vm1, %v13613_v36  ;;  %8510 = vmatprep.mubr.msk.f32.mxu0 %vm83_vm1, %v13613_v36  ;;  %8547 = vmatprep.mubr.msk.f32.mxu1 %vm83_vm1, %v13613_v36 }
 0x762   :  { %3508 = vmatmul.mubr.f32.vlgmr.msra.gmra.mxu0 %v13615_v44  ;;  %3619 = vmatmul.mubr.f32.vlgmr.msra.gmra.mxu1 %v13615_v44 }
 0x763   :  { %3678 = vmatpush1.msra.mxu0 %v13301_v22  ;;  %3893 = vmatpush1.msra.mxu1 %v8619_v61  ;;  %v8615_v22 = vld [vmem:[%s17287_s1 + $0x400] sm:$0xff]  ;;  %v8653_v61 = vld [vmem:[%s17287_s1 + $0x4d8] sm:$0xff] }
 0x764   :  { %3679 = vmatprep.subr.mxu0 %v13312_v2  ;;  %8584 = vmatprep.mubr.msk.f32.mxu0 %vm83_vm1, %v13613_v36  ;;  %v8614_v2 = vld [vmem:[%s17287_s1 + $0x3f8] sm:$0xff] }
 0x765   :  { %3894 = vmatprep.subr.mxu1 %v8618_v12  ;;  %8626 = vmatprep.mubr.msk.f32.mxu1 %vm83_vm1, %v13638_v3  ;;  %v13834_v12 = vld [vmem:[#allocation3 + $0x30] sm:$0xff] }
 0x766   :  { %3680 = vmatpush1.msra.mxu0 %v13319_v9  ;;  %3895 = vmatpush1.msra.mxu1 %v8617_v18  ;;  %v8611_v9 = vld [vmem:[%s17287_s1 + $0x3e0] sm:$0xff]  ;;  %v8652_v18 = vld [vmem:[%s17287_s1 + $0x4d0] sm:$0xff] }
 0x767   :  { %3681 = vmatprep.subr.mxu0 %v13327_v11  ;;  %3896 = vmatprep.subr.mxu1 %v8616_v48  ;;  %v8610_v11 = vld [vmem:[%s17287_s1 + $0x3d8] sm:$0xff]  ;;  %v13840_v48 = vld [vmem:[#allocation3 + $0x48] sm:$0xff] }
 0x768   :  { %3682 = vmatpush1.msra.mxu0 %v13333_v30  ;;  %3897 = vmatpush1.msra.mxu1 %v8615_v22  ;;  %v8609_v30 = vld [vmem:[%s17287_s1 + $0x3d0] sm:$0xff]  ;;  %v8651_v22 = vld [vmem:[%s17287_s1 + $0x4c8] sm:$0xff] }
 0x769   :  { %3683 = vmatprep.subr.mxu0 %v13340_v21  ;;  %3898 = vmatprep.subr.mxu1 %v8614_v2  ;;  %v8608_v21 = vld [vmem:[%s17287_s1 + $0x3c8] sm:$0xff]  ;;  %v8650_v2 = vld [vmem:[%s17287_s1 + $0x4c0] sm:$0xff] }
 0x76a   :  { %3684 = vmatpush1.msra.mxu0 %v13347_v42  ;;  %3899 = vmatpush1.msra.mxu1 %v8613_v32  ;;  %v8607_v42 = vld [vmem:[%s17287_s1 + $0x3c0] sm:$0xff]  ;;  %v8649_v32 = vld [vmem:[%s17287_s1 + $0x4b8] sm:$0xff] }
 0x76b   :  { %3685 = vmatprep.subr.mxu0 %v13354_v17  ;;  %3900 = vmatprep.subr.mxu1 %v8612_v58  ;;  %v8606_v17 = vld [vmem:[%s17287_s1 + $0x3b8] sm:$0xff]  ;;  %v13853_v58 = vld [vmem:[#allocation3 + $0x40] sm:$0xff] }
 0x76c   :  { %3686 = vmatpush1.msra.mxu0 %v13361_v33  ;;  %3901 = vmatpush1.msra.mxu1 %v8611_v9  ;;  %v8605_v33 = vld [vmem:[%s17287_s1 + $0x3b0] sm:$0xff] }
 0x76d   :  { %3687 = vmatprep.subr.mxu0 %v13368_v41  ;;  %3902 = vmatprep.subr.mxu1 %v8610_v11  ;;  %v8604_v41 = vld [vmem:[%s17287_s1 + $0x3a8] sm:$0xff]  ;;  %v8648_v9 = vld [vmem:[%s17287_s1 + $0x4b0] sm:$0xff]  ;;  %v13859_v11 = vld [vmem:[#allocation3 + $0x58] sm:$0xff] }
 0x76e   :  { %3688 = vmatpush1.msra.mxu0 %v13375_v55  ;;  %3903 = vmatpush1.msra.mxu1 %v8609_v30  ;;  %v8603_v55 = vld [vmem:[%s17287_s1 + $0x3a0] sm:$0xff]  ;;  %v8647_v30 = vld [vmem:[%s17287_s1 + $0x4a8] sm:$0xff] }
 0x76f   :  { %3689 = vmatprep.subr.mxu0 %v13381_v40  ;;  %3904 = vmatprep.subr.mxu1 %v8608_v21  ;;  %v8602_v40 = vld [vmem:[%s17287_s1 + $0x398] sm:$0xff]  ;;  %v8646_v21 = vld [vmem:[%s17287_s1 + $0x4a0] sm:$0xff] }
 0x770   :  { %3690 = vmatpush1.msra.mxu0 %v13387_v10  ;;  %3905 = vmatpush1.msra.mxu1 %v8607_v42  ;;  %v8601_v10 = vld [vmem:[%s17287_s1 + $0x390] sm:$0xff]  ;;  %v8645_v42 = vld [vmem:[%s17287_s1 + $0x498] sm:$0xff] }
 0x771   :  { %3691 = vmatprep.subr.mxu0 %v13393_v37  ;;  %3906 = vmatprep.subr.mxu1 %v8606_v17  ;;  %v8600_v37 = vld [vmem:[%s17287_s1 + $0x388] sm:$0xff]  ;;  %v8644_v17 = vld [vmem:[%s17287_s1 + $0x490] sm:$0xff] }
 0x772   :  { %3692 = vmatpush1.msra.mxu0 %v13399_v27  ;;  %3907 = vmatpush1.msra.mxu1 %v8605_v33  ;;  %v8599_v27 = vld [vmem:[%s17287_s1 + $0x380] sm:$0xff]  ;;  %v13876_v33 = vld [vmem:[#allocation3 + $0x68] sm:$0xff] }
 0x773   :  { %3693 = vmatprep.subr.mxu0 %v13405_v38  ;;  %3908 = vmatprep.subr.mxu1 %v8604_v41  ;;  %v8598_v38 = vld [vmem:[%s17287_s1 + $0x378] sm:$0xff]  ;;  %v8643_v41 = vld [vmem:[%s17287_s1 + $0x488] sm:$0xff] }
 0x774   :  { %3694 = vmatpush1.msra.mxu0 %v13411_v45  ;;  %3909 = vmatpush1.msra.mxu1 %v8603_v55  ;;  %v8597_v45 = vld [vmem:[%s17287_s1 + $0x370] sm:$0xff]  ;;  %v8642_v55 = vld [vmem:[%s17287_s1 + $0x480] sm:$0xff] }
 0x775   :  { %3695 = vmatprep.subr.mxu0 %v13417_v24  ;;  %3910 = vmatprep.subr.mxu1 %v8602_v40  ;;  %v8596_v24 = vld [vmem:[%s17287_s1 + $0x368] sm:$0xff]  ;;  %v8641_v40 = vld [vmem:[%s17287_s1 + $0x478] sm:$0xff] }
 0x776   :  { %3696 = vmatpush1.msra.mxu0 %v13423_v4  ;;  %3911 = vmatpush1.msra.mxu1 %v8601_v10  ;;  %v8595_v4 = vld [vmem:[%s17287_s1 + $0x360] sm:$0xff]  ;;  %v8640_v10 = vld [vmem:[%s17287_s1 + $0x470] sm:$0xff] }
 0x777   :  { %3697 = vmatprep.subr.mxu0 %v13429_v49  ;;  %3912 = vmatprep.subr.mxu1 %v8600_v37  ;;  %v17659_v49 = vld [vmem:[#allocation18_spill] sm:$0xff]  ;;  %v8639_v37 = vld [vmem:[%s17287_s1 + $0x468] sm:$0xff] }
 0x778   :  { %3698 = vmatpush1.msra.mxu0 %v13435_v50  ;;  %3913 = vmatpush1.msra.mxu1 %v8599_v27  ;;  %v17660_v50 = vld [vmem:[#allocation19_spill] sm:$0xff]  ;;  %v8638_v27 = vld [vmem:[%s17287_s1 + $0x460] sm:$0xff] }
 0x779   :  { %3699 = vmatprep.subr.mxu0 %v13441_v25  ;;  %3914 = vmatprep.subr.mxu1 %v8598_v38  ;;  %v17661_v25 = vld [vmem:[#allocation20_spill] sm:$0xff]  ;;  %v8637_v38 = vld [vmem:[%s17287_s1 + $0x458] sm:$0xff] }
 0x77a   :  { %3700 = vmatpush1.msra.mxu0 %v17659_v49  ;;  %3915 = vmatpush1.msra.mxu1 %v8597_v45  ;;  %v8636_v45 = vld [vmem:[%s17287_s1 + $0x450] sm:$0xff]  ;;  %v8667_v49 = vld [vmem:[%s17287_s1 + $0x548] sm:$0x1] }
 0x77b   :  { %3701 = vmatprep.subr.mxu0 %v17660_v50  ;;  %3916 = vmatprep.subr.mxu1 %v8596_v24  ;;  %v8635_v24 = vld [vmem:[%s17287_s1 + $0x448] sm:$0xff] }
 0x77c   :  { %3702 = vmatpush1.msra.mxu0 %v17661_v25  ;;  %3917 = vmatpush1.msra.mxu1 %v8595_v4  ;;  %v8634_v4 = vld [vmem:[%s17287_s1 + $0x440] sm:$0xff]  ;;  %v8710_v50 = vld [vmem:[%s17287_s1 + $0x648] sm:$0xff] }
 0x77d   :  { %3703 = vmatprep.subr.mxu0 %v17662_v7  ;;  %3918 = vmatprep.subr.mxu1 %v8594_v39  ;;  %v8666_v39 = vld [vmem:[%s17287_s1 + $0x540] sm:$0x1]  ;;  %v8708_v7 = vld [vmem:[%s17287_s1 + $0x638] sm:$0xff] }
 0x77e   :  { %3704 = vmatpush1.msra.mxu0 %v17663_v26  ;;  %3919 = vmatpush1.msra.mxu1 %v8593_v15  ;;  %v13944_v15 = vld [vmem:[%s17288_s2 + $0x428] sm:$0xff]  ;;  %v8709_v25 = vld [vmem:[%s17287_s1 + $0x640] sm:$0xff]  ;;  %v8707_v26 = vld [vmem:[%s17287_s1 + $0x630] sm:$0xff] }
 0x77f   :  { %3705 = vmatprep.subr.mxu0 %v13477_v53  ;;  %3920 = vmatprep.subr.mxu1 %v8592_v43  ;;  %v8580_v53 = vld [vmem:[%s17288_s2 + $0x320] sm:$0x1] }
 0x780   :  { %3706 = vmatpush1.msra.mxu0 %v13483_v54  ;;  %3921 = vmatpush1.msra.mxu1 %v8591_v52  ;;  %v8621_v54 = vld [vmem:[%s17287_s1 + $0x430] sm:$0x1]  ;;  %v13953_v43 = vld [vmem:[%s17288_s2 + $0x420] sm:$0xff]  ;;  %v13962_v52 = vld [vmem:[%s17288_s2 + $0x418] sm:$0xff] }
 0x781   :  { %3707 = vmatprep.subr.mxu0 %v13489_v19  ;;  %3922 = vmatprep.subr.mxu1 %v8590_v14  ;;  %v8665_v19 = vld [vmem:[%s17287_s1 + $0x538] sm:$0xff]  ;;  %v13971_v14 = vld [vmem:[%s17288_s2 + $0x410] sm:$0xff] }
 0x782   :  { %3708 = vmatpush1.msra.mxu0 %v13495_v29  ;;  %3923 = vmatpush1.msra.mxu1 %v8589_v46  ;;  %v13781_v29 = vld [vmem:[#allocation3 + $0x18] sm:$0xff]  ;;  %v8706_v46 = vld [vmem:[%s17287_s1 + $0x628] sm:$0xff] }
 0x783   :  { %8582 = vmatprep.subr.msk.mxu0 %vm108_vm0, %v8581_v56  ;;  %8624 = vmatprep.subr.msk.mxu1 %vm108_vm0, %v8622_v28  ;;  %v13980_v56 = vld [vmem:[%s17288_s2 + $0x408] sm:$0xff]  ;;  %v8705_v28 = vld [vmem:[%s17287_s1 + $0x620] sm:$0xff] }
 0x784   :  { %8583 = vmatpush2.msk.msra.mxu0 %vm108_vm0, %v8580_v53  ;;  %8625 = vmatpush2.msk.msra.mxu1 %vm108_vm0, %v8621_v54  ;;  %v13989_v53 = vld [vmem:[%s17288_s2 + $0x400] sm:$0xff]  ;;  %v8704_v54 = vld [vmem:[%s17287_s1 + $0x618] sm:$0xff] }
 0x785   :  { %3742 = vmatmul.mubr.f32.vlgmr.msra.gmra.mxu0 %v13615_v44  ;;  %3957 = vmatmul.mubr.f32.vlgmr.msra.gmra.mxu1 %v13774_v57 }
 0x786   :  { %4075 = vmatprep.subr.mxu0 %v8665_v19  ;;  %8627 = vmatprep.mubr.msk.f32.mxu1 %vm83_vm1, %v13781_v29  ;;  %v13998_v19 = vld [vmem:[%s17288_s2 + $0x3f8] sm:$0xff] }
 0x787   :  { %4076 = vmatpush1.msra.mxu0 %v8664_v31  ;;  %8671 = vmatprep.mubr.msk.f32.mxu0 %vm83_vm1, %v13638_v3  ;;  %v8703_v31 = vld [vmem:[%s17287_s1 + $0x610] sm:$0xff] }
 0x788   :  { %4077 = vmatprep.subr.mxu0 %v8663_v34  ;;  %4258 = vmatprep.subr.mxu1 %v8710_v50  ;;  %v14007_v34 = vld [vmem:[%s17288_s2 + $0x3f0] sm:$0xff] }
 0x789   :  { %4078 = vmatpush1.msra.mxu0 %v8662_v62  ;;  %3963 = vmatmul.mubr.f32.gmra.mxu1 %v13796_v8  ;;  %v8702_v62 = vld [vmem:[%s17287_s1 + $0x608] sm:$0xff]  ;;  %v14151_v50 = vld [vmem:[%s17288_s2 + $0x370] sm:$0xff] }
 0x78a   :  { %4079 = vmatprep.subr.mxu0 %v8661_v59  ;;  %8628 = vmatprep.mubr.msk.f32.mxu1 %vm83_vm1, %v13802_v23  ;;  %v14016_v59 = vld [vmem:[%s17288_s2 + $0x3e8] sm:$0xff] }
 0x78b   :  { %4080 = vmatpush1.msra.mxu0 %v8660_v16  ;;  %4259 = vmatpush1.msra.mxu1 %v8709_v25  ;;  %v8701_v16 = vld [vmem:[%s17287_s1 + $0x600] sm:$0xff]  ;;  %v8686_v25 = vld [vmem:[%s17287_s1 + $0x588] sm:$0xff] }
 0x78c   :  { %4081 = vmatprep.subr.mxu0 %v8659_v6  ;;  %4260 = vmatprep.subr.mxu1 %v8708_v7  ;;  %v14025_v6 = vld [vmem:[%s17288_s2 + $0x3e0] sm:$0xff]  ;;  %v14160_v7 = vld [vmem:[%s17288_s2 + $0x368] sm:$0xff] }
 0x78d   :  { %4082 = vmatpush1.msra.mxu0 %v8658_v5  ;;  %3969 = vmatmul.mubr.f32.gmra.mxu1 %v13815_v51  ;;  %v8700_v5 = vld [vmem:[%s17287_s1 + $0x5f8] sm:$0xff]  ;;  %17664 = vst [vmem:[#allocation23_spill] sm:$0xff] %v14160_v7 }
 0x78e   :  { %4083 = vmatprep.subr.mxu0 %v8657_v47  ;;  %8629 = vmatprep.mubr.msk.f32.mxu1 %vm83_vm1, %v13821_v13  ;;  %v14034_v47 = vld [vmem:[%s17288_s2 + $0x3d8] sm:$0xff] }
 0x78f   :  { %4084 = vmatpush1.msra.mxu0 %v8656_v1  ;;  %4261 = vmatpush1.msra.mxu1 %v8707_v26  ;;  %v8699_v1 = vld [vmem:[%s17287_s1 + $0x5f0] sm:$0xff]  ;;  %v8685_v26 = vld [vmem:[%s17287_s1 + $0x580] sm:$0xff] }
 0x790   :  { %4085 = vmatprep.subr.mxu0 %v8655_v63  ;;  %4262 = vmatprep.subr.mxu1 %v8706_v46  ;;  %v14043_v63 = vld [vmem:[%s17288_s2 + $0x3d0] sm:$0xff]  ;;  %v14169_v46 = vld [vmem:[%s17288_s2 + $0x360] sm:$0xff] }
 0x791   :  { %4086 = vmatpush1.msra.mxu0 %v8654_v20  ;;  %3975 = vmatmul.mubr.f32.gmra.mxu1 %v13834_v12  ;;  %v8698_v20 = vld [vmem:[%s17287_s1 + $0x5e8] sm:$0xff]  ;;  %17665 = vst [vmem:[#allocation24_spill] sm:$0xff] %v14169_v46 }
 0x792   :  { %4087 = vmatprep.subr.mxu0 %v8653_v61  ;;  %8630 = vmatprep.mubr.msk.f32.mxu1 %vm83_vm1, %v13840_v48  ;;  %v14052_v61 = vld [vmem:[%s17288_s2 + $0x3c8] sm:$0xff] }
 0x793   :  { %4088 = vmatpush1.msra.mxu0 %v8652_v18  ;;  %4263 = vmatpush1.msra.mxu1 %v8705_v28  ;;  %v8697_v18 = vld [vmem:[%s17287_s1 + $0x5e0] sm:$0xff]  ;;  %v8684_v28 = vld [vmem:[%s17287_s1 + $0x578] sm:$0xff] }
 0x794   :  { %4089 = vmatprep.subr.mxu0 %v8651_v22  ;;  %4264 = vmatprep.subr.mxu1 %v8704_v54  ;;  %v14061_v22 = vld [vmem:[%s17288_s2 + $0x3c0] sm:$0xff]  ;;  %v14177_v54 = vld [vmem:[%s17288_s2 + $0x358] sm:$0xff] }
 0x795   :  { %4090 = vmatpush1.msra.mxu0 %v8650_v2  ;;  %3981 = vmatmul.mubr.f32.gmra.mxu1 %v13853_v58  ;;  %v8696_v2 = vld [vmem:[%s17287_s1 + $0x5d8] sm:$0xff]  ;;  %17666 = vst [vmem:[#allocation25_spill] sm:$0xff] %v14177_v54 }
 0x796   :  { %4091 = vmatprep.subr.mxu0 %v8649_v32  ;;  %8631 = vmatprep.mubr.msk.f32.mxu1 %vm83_vm1, %v13859_v11  ;;  %v14070_v32 = vld [vmem:[%s17288_s2 + $0x3b8] sm:$0xff] }
 0x797   :  { %4092 = vmatpush1.msra.mxu0 %v8648_v9  ;;  %4265 = vmatpush1.msra.mxu1 %v8703_v31  ;;  %v8695_v9 = vld [vmem:[%s17287_s1 + $0x5d0] sm:$0xff] }
 0x798   :  { %4093 = vmatprep.subr.mxu0 %v8647_v30  ;;  %4266 = vmatprep.subr.mxu1 %v8702_v62  ;;  %v14079_v30 = vld [vmem:[%s17288_s2 + $0x3b0] sm:$0xff] }
 0x799   :  { %4094 = vmatpush1.msra.mxu0 %v8646_v21  ;;  %3987 = vmatmul.mubr.f32.gmra.mxu1 %v13296_v0  ;;  %v8694_v21 = vld [vmem:[%s17287_s1 + $0x5c8] sm:$0xff]  ;;  %v8683_v31 = vld [vmem:[%s17287_s1 + $0x570] sm:$0xff] }
 0x79a   :  { %4095 = vmatprep.subr.mxu0 %v8645_v42  ;;  %8632 = vmatprep.mubr.msk.f32.mxu1 %vm83_vm1, %v13876_v33  ;;  %v14088_v42 = vld [vmem:[%s17288_s2 + $0x3a8] sm:$0xff]  ;;  %v14186_v62 = vld [vmem:[%s17288_s2 + $0x350] sm:$0xff] }
 0x79b   :  { %4096 = vmatpush1.msra.mxu0 %v8644_v17  ;;  %4267 = vmatpush1.msra.mxu1 %v8701_v16  ;;  %v8693_v17 = vld [vmem:[%s17287_s1 + $0x5c0] sm:$0xff]  ;;  %17667 = vst [vmem:[#allocation6_spill] sm:$0xff] %v14186_v62  ;;  %v8682_v16 = vld [vmem:[%s17287_s1 + $0x568] sm:$0xff] }
 0x79c   :  { %4097 = vmatprep.subr.mxu0 %v8643_v41  ;;  %4268 = vmatprep.subr.mxu1 %v8700_v5  ;;  %v14097_v41 = vld [vmem:[%s17288_s2 + $0x3a0] sm:$0xff]  ;;  %v14195_v5 = vld [vmem:[%s17288_s2 + $0x348] sm:$0xff] }
 0x79d   :  { %4098 = vmatpush1.msra.mxu0 %v8642_v55  ;;  %3993 = vmatmul.mubr.f32.gmra.mxu1 %v13615_v44  ;;  %v8692_v55 = vld [vmem:[%s17287_s1 + $0x5b8] sm:$0xff]  ;;  %17668 = vst [vmem:[#allocation7_spill] sm:$0xff] %v14195_v5 }
 0x79e   :  { %4099 = vmatprep.subr.mxu0 %v8641_v40  ;;  %4269 = vmatpush1.msra.mxu1 %v8699_v1  ;;  %v14106_v40 = vld [vmem:[%s17288_s2 + $0x398] sm:$0xff]  ;;  %v8681_v1 = vld [vmem:[%s17287_s1 + $0x560] sm:$0xff] }
 0x79f   :  { %4100 = vmatpush1.msra.mxu0 %v8640_v10  ;;  %4270 = vmatprep.subr.mxu1 %v8698_v20  ;;  %v8691_v10 = vld [vmem:[%s17287_s1 + $0x5b0] sm:$0xff]  ;;  %v14205_v20 = vld [vmem:[%s17288_s2 + $0x340] sm:$0xff] }
 0x7a0   :  { %4101 = vmatprep.subr.mxu0 %v8639_v37  ;;  %4271 = vmatpush1.msra.mxu1 %v8697_v18  ;;  %v14115_v37 = vld [vmem:[%s17288_s2 + $0x390] sm:$0xff]  ;;  %17669 = vst [vmem:[#allocation8_spill] sm:$0xff] %v14205_v20  ;;  %v8680_v18 = vld [vmem:[%s17287_s1 + $0x558] sm:$0xff] }
 0x7a1   :  { %4102 = vmatpush1.msra.mxu0 %v8638_v27  ;;  %4272 = vmatprep.subr.mxu1 %v8696_v2  ;;  %v8690_v27 = vld [vmem:[%s17287_s1 + $0x5a8] sm:$0xff]  ;;  %v14214_v2 = vld [vmem:[%s17288_s2 + $0x338] sm:$0xff] }
 0x7a2   :  { %4103 = vmatprep.subr.mxu0 %v8637_v38  ;;  %4273 = vmatpush1.msra.mxu1 %v8695_v9  ;;  %v14124_v38 = vld [vmem:[%s17288_s2 + $0x388] sm:$0xff]  ;;  %17670 = vst [vmem:[#allocation9_spill] sm:$0xff] %v14214_v2  ;;  %v8679_v9 = vld [vmem:[%s17287_s1 + $0x550] sm:$0xff] }
 0x7a3   :  { %4104 = vmatpush1.msra.mxu0 %v8636_v45  ;;  %4274 = vmatprep.subr.mxu1 %v8694_v21  ;;  %v8689_v45 = vld [vmem:[%s17287_s1 + $0x5a0] sm:$0xff]  ;;  %v14223_v21 = vld [vmem:[%s17288_s2 + $0x330] sm:$0xff] }
 0x7a4   :  { %4105 = vmatprep.subr.mxu0 %v8635_v24  ;;  %4275 = vmatpush1.msra.mxu1 %v8693_v17  ;;  %v14133_v24 = vld [vmem:[%s17288_s2 + $0x380] sm:$0xff]  ;;  %17671 = vst [vmem:[#allocation10_spill] sm:$0xff] %v14223_v21  ;;  %v8712_v17 = vld [vmem:[%s17287_s1 + $0x658] sm:$0x1] }
 0x7a5   :  { %4106 = vmatpush1.msra.mxu0 %v8634_v4  ;;  %4276 = vmatprep.subr.mxu1 %v8692_v55  ;;  %v8688_v4 = vld [vmem:[%s17287_s1 + $0x598] sm:$0xff] }
 0x7a6   :  { %8669 = vmatprep.subr.msk.mxu0 %vm108_vm0, %v8667_v49  ;;  %4277 = vmatpush1.msra.mxu1 %v8691_v10  ;;  %v14142_v49 = vld [vmem:[%s17288_s2 + $0x378] sm:$0xff]  ;;  %v8711_v10 = vld [vmem:[%s17287_s1 + $0x650] sm:$0x1] }
 0x7a7   :  { %8670 = vmatpush2.msk.msra.mxu0 %vm108_vm0, %v8666_v39  ;;  %4278 = vmatprep.subr.mxu1 %v8690_v27  ;;  %v8687_v39 = vld [vmem:[%s17287_s1 + $0x590] sm:$0xff]  ;;  %v8757_v55 = vld [vmem:[%s17288_s2 + $0x438] sm:$0x1] }
 0x7a8   :  { %4140 = vmatmul.mubr.f32.vlgmr.msra.gmra.mxu0 %v13774_v57  ;;  %4428 = vmatprep.subr.mxu0 %v13944_v15  ;;  %v8756_v27 = vld [vmem:[%s17288_s2 + $0x430] sm:$0x1] }
 0x7a9   :  { %8672 = vmatprep.mubr.msk.f32.mxu0 %vm83_vm1, %v13781_v29  ;;  %4429 = vmatpush1.msra.mxu0 %v13953_v43 }
 0x7aa   :  { %4430 = vmatprep.subr.mxu0 %v13962_v52  ;;  %4279 = vmatpush1.msra.mxu1 %v8689_v45  ;;  %v14245_v45 = vld [vmem:[%s17288_s2 + $0x538] sm:$0xff] }
 0x7ab   :  { %4431 = vmatpush1.msra.mxu0 %v13971_v14  ;;  %4280 = vmatprep.subr.mxu1 %v8688_v4  ;;  %v14250_v4 = vld [vmem:[%s17288_s2 + $0x648] sm:$0xff] }
 0x7ac   :  { %4146 = vmatmul.mubr.f32.gmra.mxu0 %v13796_v8  ;;  %4432 = vmatprep.subr.mxu0 %v13980_v56  ;;  %17672 = vst [vmem:[#allocation11_spill] sm:$0xff] %v14250_v4 }
 0x7ad   :  { %8673 = vmatprep.mubr.msk.f32.mxu0 %vm83_vm1, %v13802_v23  ;;  %4433 = vmatpush1.msra.mxu0 %v13989_v53 }
 0x7ae   :  { %4434 = vmatprep.subr.mxu0 %v13998_v19  ;;  %4281 = vmatpush1.msra.mxu1 %v8687_v39 }
 0x7af   :  { %4435 = vmatpush1.msra.mxu0 %v14007_v34  ;;  %4282 = vmatprep.subr.mxu1 %v8686_v25  ;;  %v3748_v25 = vld [vmem:[#allocation2 + $0x70] sm:$0xff] }
 0x7b0   :  { %4152 = vmatmul.mubr.f32.gmra.mxu0 %v13815_v51  ;;  %4436 = vmatprep.subr.mxu0 %v14016_v59 }
 0x7b1   :  { %8674 = vmatprep.mubr.msk.f32.mxu0 %vm83_vm1, %v13821_v13  ;;  %4437 = vmatpush1.msra.mxu0 %v14025_v6 }
 0x7b2   :  { %4438 = vmatprep.subr.mxu0 %v14034_v47  ;;  %4283 = vmatpush1.msra.mxu1 %v8685_v26 }
 0x7b3   :  { %4439 = vmatpush1.msra.mxu0 %v14043_v63  ;;  %4284 = vmatprep.subr.mxu1 %v8684_v28 }
 0x7b4   :  { %4158 = vmatmul.mubr.f32.gmra.mxu0 %v13834_v12  ;;  %4440 = vmatprep.subr.mxu0 %v14052_v61 }
 0x7b5   :  { %8675 = vmatprep.mubr.msk.f32.mxu0 %vm83_vm1, %v13840_v48  ;;  %4441 = vmatpush1.msra.mxu0 %v14061_v22 }
 0x7b6   :  { %4442 = vmatprep.subr.mxu0 %v14070_v32  ;;  %4285 = vmatpush1.msra.mxu1 %v8683_v31  ;;  %v3749_v31 = vld [vmem:[#allocation2 + $0x78] sm:$0xff] }
 0x7b7   :  { %4443 = vmatpush1.msra.mxu0 %v14079_v30  ;;  %4286 = vmatprep.subr.mxu1 %v8682_v16 }
 0x7b8   :  { %4164 = vmatmul.mubr.f32.gmra.mxu0 %v13853_v58  ;;  %4444 = vmatprep.subr.mxu0 %v14088_v42 }
 0x7b9   :  { %8676 = vmatprep.mubr.msk.f32.mxu0 %vm83_vm1, %v13859_v11  ;;  %4445 = vmatpush1.msra.mxu0 %v14097_v41 }
 0x7ba   :  { %4446 = vmatprep.subr.mxu0 %v14106_v40  ;;  %4287 = vmatpush1.msra.mxu1 %v8681_v1 }
 0x7bb   :  { %4447 = vmatpush1.msra.mxu0 %v14115_v37  ;;  %4288 = vmatprep.subr.mxu1 %v8680_v18 }
 0x7bc   :  { %4170 = vmatmul.mubr.f32.gmra.mxu0 %v13296_v0  ;;  %4448 = vmatprep.subr.mxu0 %v14124_v38 }
 0x7bd   :  { %8677 = vmatprep.mubr.msk.f32.mxu0 %vm83_vm1, %v13876_v33  ;;  %4449 = vmatpush1.msra.mxu0 %v14133_v24 }
 0x7be   :  { %4450 = vmatprep.subr.mxu0 %v14142_v49  ;;  %4289 = vmatpush1.msra.mxu1 %v8679_v9 }
 0x7bf   :  { %4451 = vmatpush1.msra.mxu0 %v14151_v50  ;;  %8714 = vmatprep.subr.msk.mxu1 %vm108_vm0, %v8712_v17 }
 0x7c0   :  { %4176 = vmatmul.mubr.f32.gmra.mxu0 %v13615_v44  ;;  %4452 = vmatprep.subr.mxu0 %v14160_v7  ;;  %v3781_v7 = vld [vmem:[#allocation2 + $0x178] sm:$0xff] }
 0x7c1   :  { %4453 = vmatpush1.msra.mxu0 %v14169_v46  ;;  %8715 = vmatpush2.msk.msra.mxu1 %vm108_vm0, %v8711_v10 }
 0x7c2   :  { %4454 = vmatprep.subr.mxu0 %v14177_v54  ;;  %4540 = vmatprep.subr.mxu1 %v14245_v45 }
 0x7c3   :  { %4455 = vmatpush1.msra.mxu0 %v14186_v62 }
 0x7c4   :  { %4456 = vmatprep.subr.mxu0 %v14195_v5 }
 0x7c5   :  { %4457 = vmatpush1.msra.mxu0 %v14205_v20 }
 0x7c6   :  { %4458 = vmatprep.subr.mxu0 %v14214_v2  ;;  %v3764_v2 = vld [vmem:[#allocation2 + $0xf0] sm:$0xff] }
 0x7c7   :  { %4459 = vmatpush1.msra.mxu0 %v14223_v21 }
 0x7c8   :  { %8758 = vmatprep.subr.msk.mxu0 %vm108_vm0, %v8757_v55  ;;  %v3765_v55 = vld [vmem:[#allocation2 + $0xf8] sm:$0xff] }
 0x7c9   :  { %8759 = vmatpush2.msk.msra.mxu0 %vm108_vm0, %v8756_v27 }
 0x7ca   :  { %4665 = vmatprep.subr.mxu0 %v14250_v4 }
 0x822   :  { %v3509_v39 = vpop.f32.mrf.mxu0  ;;  %v3620_v18 = vpop.f32.mrf.mxu1 }
 0x823   :  { %v3750_v26 = vadd.f32 %v3748_v25, %v3509_v39  ;;  %v3766_v20 = vadd.f32 %v3764_v2, %v3620_v18  ;;  %v8623_v25 = vld [vmem:[%s17289_s3 + $0x6] sm:$0x3] }
 0x824   :  { %v3511_v28 = vpop.f32.mrf.mxu0  ;;  %v3622_v17 = vpop.f32.mrf.mxu1 }
 0x825   :  { %v8585_v16 = vmul.f32 -1.442695, %v3750_v26  ;;  %v3751_v1 = vadd.f32 %v3749_v31, %v3511_v28  ;;  %v3767_v10 = vadd.f32 %v3765_v55, %v3622_v17  ;;  %v8587_v39 = vmul.f32 -1.442695, %v3766_v20  ;;  %v3659_v26 = vld [vmem:[%s17290_s4] sm:$0x3] }
 0x826   :  { %v14261_v28 = vrot.slane %v8623_v25, %v17657_v35  ;;  %v3664_v31 = vrot.slane %v3659_v26, %v17657_v35 }
 0x827   :  { %9793 = vpow2.f32 %v8585_v16  ;;  %v8586_v9 = vmul.f32 -1.442695, %v3751_v1  ;;  %v8588_v27 = vmul.f32 -1.442695, %v3767_v10 }
 0x829   :  { %9795 = vpow2.f32 %v8586_v9 }
 0x82a   :  { %9797 = vpow2.f32 %v8588_v27 }
 0x834   :  { %v9794_v21 = vpop.eup %9793 }
 0x835   :  { %v3758_v4 = vadd.f32 1.0, %v9794_v21  ;;  %v14266_v21 = vrot.slane %v8623_v25, %v17658_v60 }
 0x836   :  { %v9796_v5 = vpop.eup %9795 }
 0x837   :  { %v3759_v62 = vadd.f32 1.0, %v9796_v5  ;;  %v9798_v2 = vpop.eup %9797  ;;  %v3668_v5 = vrot.slane %v3659_v26, %v17658_v60  ;;  %17673 = vst [vmem:[#allocation12_spill] sm:$0xff] %v14266_v21 }
 0x839   :  { %9799 = vrcp.f32 %v3759_v62 }
 0x83a   :  { %9801 = vrcp.f32 %v3758_v4  ;;  %v3775_v4 = vadd.f32 1.0, %v9798_v2 }
 0x83b   :  { %9803 = vpow2.f32 %v8587_v39 }
 0x83c   :  { %9805 = vrcp.f32 %v3775_v4 }
 0x845   :  { %v3743_v20 = vpop.f32.mrf.mxu0  ;;  %v3958_v62 = vpop.f32.mrf.mxu1 }
 0x846   :  { %v14269_v16 = vadd.f32 %v3958_v62, %v14261_v28  ;;  %v9800_v1 = vpop.eup %9799  ;;  %v3744_v18 = vadd.f32 %v3743_v20, %v3664_v31 }
 0x847   :  { %v3745_v9 = vpop.f32.mrf.mxu0  ;;  %v3960_v17 = vpop.f32.mrf.mxu1 }
 0x848   :  { %17674 = vst [vmem:[#allocation13_spill] sm:$0xff] %v14269_v16  ;;  %v9802_v55 = vpop.eup %9801  ;;  %v3746_v10 = vadd.f32 %v3745_v9, %v3668_v5  ;;  %v3961_v27 = vadd.f32 %v3960_v17, %v14266_v21  ;;  %v3780_v5 = vld [vmem:[#allocation2 + $0x170] sm:$0xff] }
 0x849   :  { %v3964_v39 = vpop.f32.mrf.mxu1  ;;  %v9804_v54 = vpop.eup %9803  ;;  %v3782_v25 = vmul.f32 %v9802_v55, %v3744_v18 }
 0x84a   :  { %v3783_v26 = vmul.f32 %v9800_v1, %v3746_v10  ;;  %v3965_v46 = vadd.f32 %v3964_v39, %v14261_v28  ;;  %4006 = vst.msk [vmem:[#allocation2 + $0x8] sm:$0xff] %vm83_vm1, %v3961_v27  ;;  %v3774_v20 = vadd.f32 1.0, %v9804_v54  ;;  %v9806_v10 = vpop.eup %9805 }
 0x84b   :  { %v3966_v2 = vpop.f32.mrf.mxu1  ;;  %v3784_v1 = vadd.f32 %v3782_v25, %v3780_v5  ;;  %v3789_v25 = vsub.f32 1.0, %v9806_v10 }
 0x84c   :  { %v3785_v62 = vadd.f32 %v3783_v26, %v3781_v7  ;;  %4007 = vst [vmem:[#allocation2 + $0x10] sm:$0xff] %v3965_v46  ;;  %v3967_v31 = vadd.f32 %v3966_v2, %v14266_v21 }
 0x84d   :  { %v3970_v16 = vpop.f32.mrf.mxu1 }
 0x84e   :  { %9807 = vtanh.f32 %v3785_v62  ;;  %4008 = vst.msk [vmem:[#allocation2 + $0x18] sm:$0xff] %vm83_vm1, %v3967_v31  ;;  %v3971_v4 = vadd.f32 %v3970_v16, %v14261_v28 }
 0x84f   :  { %v3972_v9 = vpop.f32.mrf.mxu1  ;;  %9809 = vrcp.f32 %v3774_v20  ;;  %v3793_v20 = vmul.f32 %v9806_v10, %v13613_v36  ;;  %v8668_v36 = vld [vmem:[%s17289_s3 + $0x8] sm:$0x3] }
 0x850   :  { %4009 = vst [vmem:[#allocation2 + $0x20] sm:$0xff] %v3971_v4  ;;  %v3973_v18 = vadd.f32 %v3972_v9, %v14266_v21  ;;  %9811 = vtanh.f32 %v3784_v1 }
 0x851   :  { %v3976_v17 = vpop.f32.mrf.mxu1 }
 0x852   :  { %4010 = vst.msk [vmem:[#allocation2 + $0x28] sm:$0xff] %vm83_vm1, %v3973_v18  ;;  %v3977_v7 = vadd.f32 %v3976_v17, %v14261_v28 }
 0x853   :  { %v3978_v46 = vpop.f32.mrf.mxu1 }
 0x854   :  { %4011 = vst [vmem:[#allocation2 + $0x30] sm:$0xff] %v3977_v7  ;;  %v3979_v54 = vadd.f32 %v3978_v46, %v14266_v21 }
 0x855   :  { %v3982_v55 = vpop.f32.mrf.mxu1 }
 0x856   :  { %4012 = vst.msk [vmem:[#allocation2 + $0x38] sm:$0xff] %vm83_vm1, %v3979_v54  ;;  %v3983_v16 = vadd.f32 %v3982_v55, %v14261_v28 }
 0x857   :  { %v3984_v27 = vpop.f32.mrf.mxu1 }
 0x858   :  { %4013 = vst [vmem:[#allocation2 + $0x40] sm:$0xff] %v3983_v16  ;;  %v3985_v39 = vadd.f32 %v3984_v27, %v14266_v21  ;;  %v14298_v27 = vrot.slane %v8668_v36, %v17657_v35  ;;  %v14726_v35 = vld [vmem:[%s17288_s2 + $0x550] sm:$0xff] }
 0x859   :  { %v3988_v26 = vpop.f32.mrf.mxu1 }
 0x85a   :  { %4014 = vst.msk [vmem:[#allocation2 + $0x48] sm:$0xff] %vm83_vm1, %v3985_v39  ;;  %v3989_v2 = vadd.f32 %v3988_v26, %v14261_v28  ;;  %17675 = vst [vmem:[#allocation14_spill] sm:$0xff] %v14298_v27 }
 0x85b   :  { %v9808_v62 = vpop.eup %9807  ;;  %v3990_v31 = vpop.f32.mrf.mxu1 }
 0x85c   :  { %v3791_v5 = vmul.f32 %v9808_v62, %v3789_v25  ;;  %4015 = vst [vmem:[#allocation2 + $0x50] sm:$0xff] %v3989_v2  ;;  %v3991_v4 = vadd.f32 %v3990_v31, %v14266_v21  ;;  %v9810_v9 = vpop.eup %9809  ;;  %v14305_v25 = vrot.slane %v8668_v36, %v17658_v60  ;;  %v14368_v36 = vld [vmem:[%s17288_s2 + $0x628] sm:$0xff]  ;;  %v14594_v60 = vld [vmem:[%s17288_s2 + $0x490] sm:$0xff] }
 0x85d   :  { %v3994_v1 = vpop.f32.mrf.mxu1  ;;  %v9812_v46 = vpop.eup %9811  ;;  %v3788_v55 = vsub.f32 1.0, %v9810_v9  ;;  %v3792_v10 = vmul.f32 %v9810_v9, %v13615_v44  ;;  %17682 = vst [vmem:[#allocation20_spill] sm:$0xff] %v14368_v36 }
 0x85e   :  { %v3795_v18 = vadd.f32 %v3793_v20, %v3791_v5  ;;  %4016 = vst.msk [vmem:[#allocation2 + $0x58] sm:$0xff] %vm83_vm1, %v3991_v4  ;;  %v3995_v17 = vadd.f32 %v3994_v1, %v14261_v28  ;;  %17676 = vst [vmem:[#allocation15_spill] sm:$0xff] %v14305_v25  ;;  %v17678_v20 = vmov 0.0   ;;  %v14323_v4 = vld [vmem:[%s17288_s2 + $0x530] sm:$0xff]  ;;  %v14328_v1 = vld [vmem:[%s17288_s2 + $0x640] sm:$0xff] }
 0x85f   :  { %v3996_v7 = vpop.f32.mrf.mxu1  ;;  %v3790_v16 = vmul.f32 %v9812_v46, %v3788_v55  ;;  %17679 = vst [vmem:[#allocation17_spill] sm:$0xff] %v14328_v1 }
 0x860   :  { %3797 = vst.msk [vmem:[#allocation3 + $0x78] sm:$0xff] %vm83_vm1, %v3795_v18  ;;  %4017 = vst [vmem:[#allocation2 + $0x60] sm:$0xff] %v3995_v17  ;;  %v3997_v54 = vadd.f32 %v3996_v7, %v14266_v21  ;;  %v14333_v18 = vld [vmem:[%s17288_s2 + $0x528] sm:$0xff]  ;;  %v14342_v17 = vld [vmem:[%s17288_s2 + $0x638] sm:$0xff] }
 0x861   :  { %v14300_v39 = vadd.f32 %v3792_v10, %v3790_v16  ;;  %17680 = vst [vmem:[#allocation18_spill] sm:$0xff] %v14342_v17  ;;  %v14347_v7 = vld [vmem:[%s17288_s2 + $0x520] sm:$0xff]  ;;  %v14375_v10 = vld [vmem:[%s17288_s2 + $0x510] sm:$0xff]  ;;  %v14714_v21 = vld [vmem:[%s17288_s2 + $0x558] sm:$0xff] }
 0x862   :  { %4018 = vst.msk [vmem:[#allocation2 + $0x68] sm:$0xff] %vm83_vm1, %v3997_v54  ;;  %v14359_v54 = vld [vmem:[%s17288_s2 + $0x518] sm:$0xff] }
 0x867   :  { %v14302_v26 = vld [vmem:[#allocation3 + $0x78] sm:$0xff] }
 0x868   :  { %v4141_v2 = vpop.f32.mrf.mxu0  ;;  %8633 = vmatprep.mubr.msk.f32.mxu1 %vm83_vm1, %v14302_v26  ;;  %8678 = vmatprep.mubr.msk.f32.mxu0 %vm83_vm1, %v14302_v26 }
 0x869   :  { %v14312_v62 = vadd.f32 %v4141_v2, %v14298_v27  ;;  %3999 = vmatmul.mubr.f32.gmra.mxu1 %v14300_v39  ;;  %4182 = vmatmul.mubr.f32.gmra.mxu0 %v14300_v39 }
 0x86a   :  { %v4143_v31 = vpop.f32.mrf.mxu0  ;;  %8716 = vmatprep.mubr.msk.f32.mxu1 %vm83_vm1, %v13638_v3  ;;  %4492 = vmatprep.mubr.f32.mxu0 %v17678_v20 }
 0x86b   :  { %17677 = vst [vmem:[#allocation16_spill] sm:$0xff] %v14312_v62  ;;  %v4144_v5 = vadd.f32 %v4143_v31, %v14305_v25  ;;  %v14389_v31 = vld [vmem:[%s17288_s2 + $0x508] sm:$0xff]  ;;  %v14566_v62 = vld [vmem:[%s17288_s2 + $0x4a0] sm:$0xff] }
 0x86c   :  { %v4147_v9 = vpop.f32.mrf.mxu0 }
 0x86d   :  { %4189 = vst.msk [vmem:[#allocation2 + $0x88] sm:$0xff] %vm83_vm1, %v4144_v5  ;;  %v4148_v3 = vadd.f32 %v4147_v9, %v14298_v27  ;;  %4323 = vmatmul.mubr.f32.vlgmr.msra.gmra.mxu1 %v13774_v57  ;;  %4493 = vmatmul.mubr.f32.vlgmr.msra.gmra.mxu0 %v17678_v20  ;;  %v14354_v57 = vld [vmem:[%s17288_s2 + $0x630] sm:$0xff]  ;;  %v14396_v9 = vld [vmem:[%s17288_s2 + $0x618] sm:$0xff] }
 0x86e   :  { %v4149_v46 = vpop.f32.mrf.mxu0  ;;  %4541 = vmatpush1.msra.mxu1 %v14323_v4  ;;  %4666 = vmatpush1.msra.mxu0 %v14328_v1  ;;  %17681 = vst [vmem:[#allocation19_spill] sm:$0xff] %v14354_v57  ;;  %17684 = vst [vmem:[#allocation22_spill] sm:$0xff] %v14396_v9  ;;  %v14540_v1 = vld [vmem:[%s17288_s2 + $0x4b0] sm:$0xff] }
 0x86f   :  { %4190 = vst [vmem:[#allocation2 + $0x90] sm:$0xff] %v4148_v3  ;;  %v4150_v55 = vadd.f32 %v4149_v46, %v14305_v25  ;;  %8717 = vmatprep.mubr.msk.f32.mxu1 %vm83_vm1, %v13781_v29  ;;  %4542 = vmatprep.subr.mxu1 %v14333_v18  ;;  %v14380_v29 = vld [vmem:[%s17288_s2 + $0x620] sm:$0xff] }
 0x870   :  { %4667 = vmatprep.subr.mxu0 %v14342_v17  ;;  %v4153_v16 = vpop.f32.mrf.mxu0  ;;  %4543 = vmatpush1.msra.mxu1 %v14347_v7  ;;  %17683 = vst [vmem:[#allocation21_spill] sm:$0xff] %v14380_v29  ;;  %v14401_v3 = vld [vmem:[%s17288_s2 + $0x500] sm:$0xff]  ;;  %v14505_v17 = vld [vmem:[%s17288_s2 + $0x5d8] sm:$0xff] }
 0x871   :  { %4191 = vst.msk [vmem:[#allocation2 + $0x98] sm:$0xff] %vm83_vm1, %v4150_v55  ;;  %v4154_v2 = vadd.f32 %v4153_v16, %v14298_v27  ;;  %4668 = vmatpush1.msra.mxu0 %v14354_v57  ;;  %4544 = vmatprep.subr.mxu1 %v14359_v54  ;;  %v14414_v55 = vld [vmem:[%s17288_s2 + $0x4f8] sm:$0xff]  ;;  %17692 = vst [vmem:[#allocation35_spill] sm:$0xff] %v14505_v17 }
 0x872   :  { %4669 = vmatprep.subr.mxu0 %v14368_v36  ;;  %v4155_v5 = vpop.f32.mrf.mxu0  ;;  %4329 = vmatmul.mubr.f32.gmra.mxu1 %v13796_v8  ;;  %v14409_v8 = vld [vmem:[%s17288_s2 + $0x610] sm:$0xff]  ;;  %v14451_v36 = vld [vmem:[%s17288_s2 + $0x5f8] sm:$0xff] }
 0x873   :  { %4192 = vst [vmem:[#allocation2 + $0xa0] sm:$0xff] %v4154_v2  ;;  %v4156_v46 = vadd.f32 %v4155_v5, %v14305_v25  ;;  %4545 = vmatpush1.msra.mxu1 %v14375_v10  ;;  %4670 = vmatpush1.msra.mxu0 %v14380_v29  ;;  %17685 = vst [vmem:[#allocation28_spill] sm:$0xff] %v14409_v8  ;;  %v14422_v2 = vld [vmem:[%s17288_s2 + $0x608] sm:$0xff]  ;;  %v14436_v29 = vld [vmem:[%s17288_s2 + $0x600] sm:$0xff] }
 0x874   :  { %8718 = vmatprep.mubr.msk.f32.mxu1 %vm83_vm1, %v13802_v23  ;;  %4546 = vmatprep.subr.mxu1 %v14389_v31  ;;  %v4159_v16 = vpop.f32.mrf.mxu0  ;;  %17686 = vst [vmem:[#allocation29_spill] sm:$0xff] %v14422_v2  ;;  %v14431_v23 = vld [vmem:[%s17288_s2 + $0x4f0] sm:$0xff]  ;;  %17687 = vst [vmem:[#allocation30_spill] sm:$0xff] %v14436_v29 }
 0x875   :  { %4193 = vst.msk [vmem:[#allocation2 + $0xa8] sm:$0xff] %vm83_vm1, %v4156_v46  ;;  %4671 = vmatprep.subr.mxu0 %v14396_v9  ;;  %v4160_v5 = vadd.f32 %v4159_v16, %v14298_v27  ;;  %4547 = vmatpush1.msra.mxu1 %v14401_v3  ;;  %v14443_v16 = vld [vmem:[%s17288_s2 + $0x4e8] sm:$0xff]  ;;  %17688 = vst [vmem:[#allocation31_spill] sm:$0xff] %v14451_v36 }
 0x876   :  { %4672 = vmatpush1.msra.mxu0 %v14409_v8  ;;  %4548 = vmatprep.subr.mxu1 %v14414_v55  ;;  %v4161_v46 = vpop.f32.mrf.mxu0  ;;  %v14456_v8 = vld [vmem:[%s17288_s2 + $0x4e0] sm:$0xff] }
 0x877   :  { %4194 = vst [vmem:[#allocation2 + $0xb0] sm:$0xff] %v4160_v5  ;;  %4673 = vmatprep.subr.mxu0 %v14422_v2  ;;  %v4162_v9 = vadd.f32 %v4161_v46, %v14305_v25  ;;  %4335 = vmatmul.mubr.f32.gmra.mxu1 %v13815_v51  ;;  %v14463_v46 = vld [vmem:[%s17288_s2 + $0x5f0] sm:$0xff]  ;;  %v14468_v51 = vld [vmem:[%s17288_s2 + $0x4d8] sm:$0xff]  ;;  %v14478_v2 = vld [vmem:[%s17288_s2 + $0x5e8] sm:$0xff] }
 0x878   :  { %4549 = vmatpush1.msra.mxu1 %v14431_v23  ;;  %4674 = vmatpush1.msra.mxu0 %v14436_v29  ;;  %v4165_v5 = vpop.f32.mrf.mxu0  ;;  %17689 = vst [vmem:[#allocation32_spill] sm:$0xff] %v14463_v46  ;;  %17690 = vst [vmem:[#allocation33_spill] sm:$0xff] %v14478_v2 }
 0x879   :  { %4195 = vst.msk [vmem:[#allocation2 + $0xb8] sm:$0xff] %vm83_vm1, %v4162_v9  ;;  %8719 = vmatprep.mubr.msk.f32.mxu1 %vm83_vm1, %v13821_v13  ;;  %4550 = vmatprep.subr.mxu1 %v14443_v16  ;;  %v4166_v29 = vadd.f32 %v4165_v5, %v14298_v27  ;;  %v14485_v9 = vld [vmem:[%s17288_s2 + $0x4d0] sm:$0xff]  ;;  %v14490_v13 = vld [vmem:[%s17288_s2 + $0x5e0] sm:$0xff] }
 0x87a   :  { %4675 = vmatprep.subr.mxu0 %v14451_v36  ;;  %4551 = vmatpush1.msra.mxu1 %v14456_v8  ;;  %v4167_v57 = vpop.f32.mrf.mxu0  ;;  %17691 = vst [vmem:[#allocation34_spill] sm:$0xff] %v14490_v13  ;;  %v14498_v36 = vld [vmem:[%s17288_s2 + $0x4c8] sm:$0xff] }
 0x87b   :  { %4196 = vst [vmem:[#allocation2 + $0xc0] sm:$0xff] %v4166_v29  ;;  %4676 = vmatpush1.msra.mxu0 %v14463_v46  ;;  %4552 = vmatprep.subr.mxu1 %v14468_v51  ;;  %v4168_v5 = vadd.f32 %v4167_v57, %v14305_v25  ;;  %v14510_v46 = vld [vmem:[%s17288_s2 + $0x4c0] sm:$0xff] }
 0x87c   :  { %4677 = vmatprep.subr.mxu0 %v14478_v2  ;;  %4341 = vmatmul.mubr.f32.gmra.mxu1 %v13834_v12  ;;  %v4171_v29 = vpop.f32.mrf.mxu0  ;;  %v14519_v12 = vld [vmem:[%s17288_s2 + $0x5d0] sm:$0xff]  ;;  %v14524_v2 = vld [vmem:[%s17288_s2 + $0x4b8] sm:$0xff] }
 0x87d   :  { %4197 = vst.msk [vmem:[#allocation2 + $0xc8] sm:$0xff] %vm83_vm1, %v4168_v5  ;;  %4553 = vmatpush1.msra.mxu1 %v14485_v9  ;;  %4678 = vmatpush1.msra.mxu0 %v14490_v13  ;;  %v4172_v57 = vadd.f32 %v4171_v29, %v14298_v27  ;;  %17693 = vst [vmem:[#allocation36_spill] sm:$0xff] %v14519_v12  ;;  %v14532_v5 = vld [vmem:[%s17288_s2 + $0x5c8] sm:$0xff] }
 0x87e   :  { %8720 = vmatprep.mubr.msk.f32.mxu1 %vm83_vm1, %v13840_v48  ;;  %4554 = vmatprep.subr.mxu1 %v14498_v36  ;;  %17694 = vst [vmem:[#allocation37_spill] sm:$0xff] %v14532_v5  ;;  %v4173_v29 = vpop.f32.mrf.mxu0  ;;  %v14545_v48 = vld [vmem:[%s17288_s2 + $0x5c0] sm:$0xff] }
 0x87f   :  { %4679 = vmatprep.subr.mxu0 %v14505_v17  ;;  %4198 = vst [vmem:[#allocation2 + $0xd0] sm:$0xff] %v4172_v57  ;;  %4555 = vmatpush1.msra.mxu1 %v14510_v46  ;;  %v4174_v13 = vadd.f32 %v4173_v29, %v14305_v25  ;;  %17695 = vst [vmem:[#allocation38_spill] sm:$0xff] %v14545_v48  ;;  %v14552_v57 = vld [vmem:[%s17288_s2 + $0x4a8] sm:$0xff]  ;;  %v14560_v17 = vld [vmem:[%s17288_s2 + $0x5b8] sm:$0xff] }
 0x880   :  { %4680 = vmatpush1.msra.mxu0 %v14519_v12  ;;  %4556 = vmatprep.subr.mxu1 %v14524_v2  ;;  %v4177_v29 = vpop.f32.mrf.mxu0  ;;  %17696 = vst [vmem:[#allocation39_spill] sm:$0xff] %v14560_v17 }
 0x881   :  { %4681 = vmatprep.subr.mxu0 %v14532_v5  ;;  %4199 = vst.msk [vmem:[#allocation2 + $0xd8] sm:$0xff] %vm83_vm1, %v4174_v13  ;;  %4347 = vmatmul.mubr.f32.gmra.mxu1 %v13853_v58  ;;  %v4178_v12 = vadd.f32 %v4177_v29, %v14298_v27  ;;  %v14573_v58 = vld [vmem:[%s17288_s2 + $0x5b0] sm:$0xff]  ;;  %v14578_v13 = vld [vmem:[%s17288_s2 + $0x498] sm:$0xff]  ;;  %v8792_v27 = vld [vmem:[%s17288_s2 + $0x540] sm:$0x1] }
 0x882   :  { %4557 = vmatpush1.msra.mxu1 %v14540_v1  ;;  %4682 = vmatpush1.msra.mxu0 %v14545_v48  ;;  %17697 = vst [vmem:[#allocation40_spill] sm:$0xff] %v14573_v58  ;;  %v4179_v29 = vpop.f32.mrf.mxu0  ;;  %v14586_v48 = vld [vmem:[%s17288_s2 + $0x5a8] sm:$0xff] }
 0x883   :  { %8721 = vmatprep.mubr.msk.f32.mxu1 %vm83_vm1, %v13859_v11  ;;  %4558 = vmatprep.subr.mxu1 %v14552_v57  ;;  %4200 = vst [vmem:[#allocation2 + $0xe0] sm:$0xff] %v4178_v12  ;;  %17698 = vst [vmem:[#allocation41_spill] sm:$0xff] %v14586_v48  ;;  %v4180_v5 = vadd.f32 %v4179_v29, %v14305_v25  ;;  %v14599_v11 = vld [vmem:[%s17288_s2 + $0x5a0] sm:$0xff]  ;;  %v14607_v12 = vld [vmem:[%s17288_s2 + $0x488] sm:$0xff] }
 0x884   :  { %4683 = vmatprep.subr.mxu0 %v14560_v17  ;;  %4559 = vmatpush1.msra.mxu1 %v14566_v62  ;;  %17699 = vst [vmem:[#allocation42_spill] sm:$0xff] %v14599_v11  ;;  %v14614_v29 = vld [vmem:[%s17288_s2 + $0x598] sm:$0xff]  ;;  %v14690_v25 = vld [vmem:[%s17288_s2 + $0x568] sm:$0xff] }
 0x885   :  { %4684 = vmatpush1.msra.mxu0 %v14573_v58  ;;  %4560 = vmatprep.subr.mxu1 %v14578_v13  ;;  %4201 = vst.msk [vmem:[#allocation2 + $0xe8] sm:$0xff] %vm83_vm1, %v4180_v5  ;;  %17700 = vst [vmem:[#allocation43_spill] sm:$0xff] %v14614_v29  ;;  %v14619_v58 = vld [vmem:[%s17288_s2 + $0x480] sm:$0xff]  ;;  %v14626_v5 = vld [vmem:[%s17288_s2 + $0x590] sm:$0xff] }
 0x886   :  { %4685 = vmatprep.subr.mxu0 %v14586_v48  ;;  %4353 = vmatmul.mubr.f32.gmra.mxu1 %v13296_v0  ;;  %17701 = vst [vmem:[#allocation44_spill] sm:$0xff] %v14626_v5  ;;  %v14631_v0 = vld [vmem:[%s17288_s2 + $0x478] sm:$0xff]  ;;  %v14639_v48 = vld [vmem:[%s17288_s2 + $0x588] sm:$0xff]  ;;  %17706 = vst [vmem:[#allocation49_spill] sm:$0xff] %v14690_v25 }
 0x887   :  { %4561 = vmatpush1.msra.mxu1 %v14594_v60  ;;  %4686 = vmatpush1.msra.mxu0 %v14599_v11  ;;  %17702 = vst [vmem:[#allocation45_spill] sm:$0xff] %v14639_v48  ;;  %v14646_v11 = vld [vmem:[%s17288_s2 + $0x470] sm:$0xff]  ;;  %v14665_v17 = vld [vmem:[%s17288_s2 + $0x578] sm:$0xff] }
 0x888   :  { %8722 = vmatprep.mubr.msk.f32.mxu1 %vm83_vm1, %v13876_v33  ;;  %4562 = vmatprep.subr.mxu1 %v14607_v12  ;;  %v14651_v33 = vld [vmem:[%s17288_s2 + $0x580] sm:$0xff]  ;;  %17704 = vst [vmem:[#allocation47_spill] sm:$0xff] %v14665_v17 }
 0x889   :  { %4687 = vmatprep.subr.mxu0 %v14614_v29  ;;  %4563 = vmatpush1.msra.mxu1 %v14619_v58  ;;  %17703 = vst [vmem:[#allocation46_spill] sm:$0xff] %v14651_v33  ;;  %v14658_v29 = vld [vmem:[%s17288_s2 + $0x468] sm:$0xff] }
 0x88a   :  { %4688 = vmatpush1.msra.mxu0 %v14626_v5  ;;  %4564 = vmatprep.subr.mxu1 %v14631_v0  ;;  %v14670_v5 = vld [vmem:[%s17288_s2 + $0x460] sm:$0xff] }
 0x88b   :  { %4689 = vmatprep.subr.mxu0 %v14639_v48  ;;  %4359 = vmatmul.mubr.f32.gmra.mxu1 %v13615_v44  ;;  %v14677_v48 = vld [vmem:[%s17288_s2 + $0x570] sm:$0xff]  ;;  %v14682_v44 = vld [vmem:[%s17288_s2 + $0x458] sm:$0xff] }
 0x88c   :  { %4565 = vmatpush1.msra.mxu1 %v14646_v11  ;;  %4690 = vmatpush1.msra.mxu0 %v14651_v33  ;;  %17705 = vst [vmem:[#allocation48_spill] sm:$0xff] %v14677_v48  ;;  %v14697_v33 = vld [vmem:[%s17288_s2 + $0x450] sm:$0xff] }
 0x88d   :  { %8723 = vmatprep.mubr.msk.f32.mxu1 %vm83_vm1, %v14302_v26  ;;  %4566 = vmatprep.subr.mxu1 %v14658_v29  ;;  %v14702_v26 = vld [vmem:[%s17288_s2 + $0x560] sm:$0xff] }
 0x88e   :  { %4691 = vmatprep.subr.mxu0 %v14665_v17  ;;  %4567 = vmatpush1.msra.mxu1 %v14670_v5  ;;  %17707 = vst [vmem:[#allocation50_spill] sm:$0xff] %v14702_v26  ;;  %v14709_v17 = vld [vmem:[%s17288_s2 + $0x448] sm:$0xff] }
 0x88f   :  { %4692 = vmatpush1.msra.mxu0 %v14677_v48  ;;  %4568 = vmatprep.subr.mxu1 %v14682_v44  ;;  %v14721_v48 = vld [vmem:[%s17288_s2 + $0x440] sm:$0xff] }
 0x890   :  { %4693 = vmatprep.subr.mxu0 %v14690_v25  ;;  %4365 = vmatmul.mubr.f32.gmra.mxu1 %v14300_v39  ;;  %v8793_v25 = vld [vmem:[%s17288_s2 + $0x548] sm:$0x1]  ;;  %v8829_v39 = vld [vmem:[%s17288_s2 + $0x658] sm:$0x1] }
 0x891   :  { %4569 = vmatpush1.msra.mxu1 %v14697_v33  ;;  %4694 = vmatpush1.msra.mxu0 %v14702_v26  ;;  %v8828_v26 = vld [vmem:[%s17288_s2 + $0x650] sm:$0x1] }
 0x892   :  { %4570 = vmatprep.subr.mxu1 %v14709_v17  ;;  %4695 = vmatprep.subr.mxu0 %v14714_v21 }
 0x893   :  { %4571 = vmatpush1.msra.mxu1 %v14721_v48  ;;  %4696 = vmatpush1.msra.mxu0 %v14726_v35 }
 0x894   :  { %8794 = vmatprep.subr.msk.mxu1 %vm108_vm0, %v8793_v25  ;;  %8831 = vmatprep.subr.msk.mxu0 %vm108_vm0, %v8829_v39  ;;  %v17721_v25 = vld [vmem:[#allocation27_spill] sm:$0xff] }
 0x895   :  { %8795 = vmatpush2.msk.msra.mxu1 %vm108_vm0, %v8792_v27  ;;  %4604 = vmatprep.mubr.f32.mxu1 %v17678_v20 }
 0x896   :  { %8832 = vmatpush2.msk.msra.mxu0 %vm108_vm0, %v8828_v26  ;;  %4729 = vmatprep.mubr.f32.mxu0 %v17678_v20 }
 0x897   :  { %4605 = vmatmul.mubr.f32.vlgmr.msra.gmra.mxu1 %v17678_v20  ;;  %4730 = vmatmul.mubr.f32.vlgmr.msra.gmra.mxu0 %v17678_v20 }
 0x898   :  { %4829 = vmatprep.subr.mxu1 %v13944_v15  ;;  %4940 = vmatprep.subr.mxu0 %v14245_v45  ;;  %v17708_v15 = vld [vmem:[#allocation23_spill] sm:$0xff] }
 0x899   :  { %4830 = vmatpush1.msra.mxu1 %v13953_v43  ;;  %4941 = vmatpush1.msra.mxu0 %v14323_v4  ;;  %v17709_v43 = vld [vmem:[#allocation24_spill] sm:$0xff]  ;;  %v17720_v45 = vld [vmem:[#allocation15_spill] sm:$0xff] }
 0x89a   :  { %4831 = vmatprep.subr.mxu1 %v13962_v52  ;;  %4942 = vmatprep.subr.mxu0 %v14333_v18  ;;  %v17710_v52 = vld [vmem:[#allocation25_spill] sm:$0xff] }
 0x89b   :  { %4832 = vmatpush1.msra.mxu1 %v13971_v14  ;;  %4943 = vmatpush1.msra.mxu0 %v14347_v7  ;;  %v17712_v14 = vld [vmem:[#allocation7_spill] sm:$0xff] }
 0x89c   :  { %4833 = vmatprep.subr.mxu1 %v13980_v56  ;;  %4944 = vmatprep.subr.mxu0 %v14359_v54  ;;  %v17713_v56 = vld [vmem:[#allocation8_spill] sm:$0xff] }
 0x89d   :  { %4834 = vmatpush1.msra.mxu1 %v13989_v53  ;;  %4945 = vmatpush1.msra.mxu0 %v14375_v10  ;;  %v17714_v53 = vld [vmem:[#allocation9_spill] sm:$0xff] }
 0x89e   :  { %4835 = vmatprep.subr.mxu1 %v13998_v19  ;;  %4946 = vmatprep.subr.mxu0 %v14389_v31  ;;  %v17715_v19 = vld [vmem:[#allocation10_spill] sm:$0xff] }
 0x89f   :  { %4836 = vmatpush1.msra.mxu1 %v14007_v34  ;;  %4947 = vmatpush1.msra.mxu0 %v14401_v3  ;;  %v8870_v34 = vld [vmem:[%s17288_s2 + $0x438] sm:$0x1] }
 0x8a0   :  { %4837 = vmatprep.subr.mxu1 %v14016_v59  ;;  %4948 = vmatprep.subr.mxu0 %v14414_v55  ;;  %v8869_v59 = vld [vmem:[%s17288_s2 + $0x430] sm:$0x1] }
 0x8a1   :  { %4838 = vmatpush1.msra.mxu1 %v14025_v6  ;;  %4949 = vmatpush1.msra.mxu0 %v14431_v23  ;;  %v8907_v6 = vld [vmem:[%s17288_s2 + $0x548] sm:$0x1] }
 0x8a2   :  { %4839 = vmatprep.subr.mxu1 %v14034_v47  ;;  %4950 = vmatprep.subr.mxu0 %v14443_v16  ;;  %v17716_v47 = vld [vmem:[#allocation11_spill] sm:$0xff] }
 0x8a3   :  { %4840 = vmatpush1.msra.mxu1 %v14043_v63  ;;  %4951 = vmatpush1.msra.mxu0 %v14456_v8  ;;  %v8906_v63 = vld [vmem:[%s17288_s2 + $0x540] sm:$0x1]  ;;  %v17722_v8 = vld [vmem:[#allocation13_spill] sm:$0xff]  ;;  %v4737_v16 = vld [vmem:[#allocation2 + $0x8] sm:$0xff] }
 0x8a4   :  { %4841 = vmatprep.subr.mxu1 %v14052_v61  ;;  %4952 = vmatprep.subr.mxu0 %v14468_v51  ;;  %v8713_v61 = vld [vmem:[%s17289_s3 + $0xa] sm:$0x3] }
 0x8a5   :  { %4842 = vmatpush1.msra.mxu1 %v14061_v22  ;;  %4953 = vmatpush1.msra.mxu0 %v14485_v9 }
 0x8a6   :  { %4843 = vmatprep.subr.mxu1 %v14070_v32  ;;  %4954 = vmatprep.subr.mxu0 %v14498_v36 }
 0x8a7   :  { %4844 = vmatpush1.msra.mxu1 %v14079_v30  ;;  %4955 = vmatpush1.msra.mxu0 %v14510_v46 }
 0x8a8   :  { %4845 = vmatprep.subr.mxu1 %v14088_v42  ;;  %4956 = vmatprep.subr.mxu0 %v14524_v2  ;;  %v17717_v42 = vld [vmem:[#allocation14_spill] sm:$0xff] }
 0x8a9   :  { %4846 = vmatpush1.msra.mxu1 %v14097_v41  ;;  %4957 = vmatpush1.msra.mxu0 %v14540_v1 }
 0x8aa   :  { %4847 = vmatprep.subr.mxu1 %v14106_v40  ;;  %4958 = vmatprep.subr.mxu0 %v14552_v57  ;;  %v17718_v40 = vld [vmem:[#allocation26_spill] sm:$0xff] }
 0x8ab   :  { %4848 = vmatpush1.msra.mxu1 %v14115_v37  ;;  %4959 = vmatpush1.msra.mxu0 %v14566_v62  ;;  %v4245_v37 = vrot.slane %v8713_v61, %v17718_v40  ;;  %v4249_v62 = vrot.slane %v8713_v61, %v17721_v25 }
 0x8ac   :  { %4849 = vmatprep.subr.mxu1 %v14124_v38  ;;  %4960 = vmatprep.subr.mxu0 %v14578_v13 }
 0x8ad   :  { %4850 = vmatpush1.msra.mxu1 %v14133_v24  ;;  %4961 = vmatpush1.msra.mxu0 %v14594_v60  ;;  %v17711_v60 = vld [vmem:[#allocation6_spill] sm:$0xff] }
 0x8ae   :  { %4851 = vmatprep.subr.mxu1 %v14142_v49  ;;  %4962 = vmatprep.subr.mxu0 %v14607_v12  ;;  %v17719_v49 = vld [vmem:[#allocation12_spill] sm:$0xff] }
 0x8af   :  { %4852 = vmatpush1.msra.mxu1 %v14151_v50  ;;  %4963 = vmatpush1.msra.mxu0 %v14619_v58 }
 0x8b0   :  { %4853 = vmatprep.subr.mxu1 %v17708_v15  ;;  %4964 = vmatprep.subr.mxu0 %v14631_v0 }
 0x8b1   :  { %4854 = vmatpush1.msra.mxu1 %v17709_v43  ;;  %4965 = vmatpush1.msra.mxu0 %v14646_v11 }
 0x8b2   :  { %4855 = vmatprep.subr.mxu1 %v17710_v52  ;;  %4966 = vmatprep.subr.mxu0 %v14658_v29 }
 0x8b3   :  { %4856 = vmatpush1.msra.mxu1 %v17711_v60  ;;  %4967 = vmatpush1.msra.mxu0 %v14670_v5 }
 0x8b4   :  { %4857 = vmatprep.subr.mxu1 %v17712_v14  ;;  %4968 = vmatprep.subr.mxu0 %v14682_v44 }
 0x8b5   :  { %4858 = vmatpush1.msra.mxu1 %v17713_v56  ;;  %4969 = vmatpush1.msra.mxu0 %v14697_v33 }
 0x8b6   :  { %4859 = vmatprep.subr.mxu1 %v17714_v53  ;;  %4970 = vmatprep.subr.mxu0 %v14709_v17 }
 0x8b7   :  { %4860 = vmatpush1.msra.mxu1 %v17715_v19  ;;  %4971 = vmatpush1.msra.mxu0 %v14721_v48 }
 0x8b8   :  { %8871 = vmatprep.subr.msk.mxu1 %vm108_vm0, %v8870_v34  ;;  %8908 = vmatprep.subr.msk.mxu0 %vm108_vm0, %v8907_v6 }
 0x8b9   :  { %8872 = vmatpush2.msk.msra.mxu1 %vm108_vm0, %v8869_v59  ;;  %8909 = vmatpush2.msk.msra.mxu0 %vm108_vm0, %v8906_v63  ;;  %v17723_v63 = vld [vmem:[#allocation16_spill] sm:$0xff] }
 0x8ba   :  { %5063 = vmatprep.subr.mxu1 %v17716_v47 }
 0x929   :  { %v4000_v22 = vpop.f32.mrf.mxu1  ;;  %v4183_v32 = vpop.f32.mrf.mxu0 }
 0x92a   :  { %v4001_v30 = vadd.f32 %v4000_v22, %v14261_v28  ;;  %v4184_v41 = vadd.f32 %v4183_v32, %v17717_v42  ;;  %v4753_v32 = vld [vmem:[#allocation2 + $0x88] sm:$0xff] }
 0x92b   :  { %v4002_v38 = vpop.f32.mrf.mxu1  ;;  %v4185_v24 = vpop.f32.mrf.mxu0 }
 0x92c   :  { %4019 = vst [vmem:[#allocation2 + $0x70] sm:$0xff] %v4001_v30  ;;  %4202 = vst [vmem:[#allocation2 + $0xf0] sm:$0xff] %v4184_v41  ;;  %v4003_v50 = vadd.f32 %v4002_v38, %v17719_v49  ;;  %v4186_v27 = vadd.f32 %v4185_v24, %v17720_v45  ;;  %v8830_v41 = vld [vmem:[%s17290_s4 + $0x2] sm:$0x3] }
 0x92d   :  { %v4324_v20 = vpop.f32.mrf.mxu1  ;;  %v4494_v36 = vpop.f32.mrf.mxu0  ;;  %v4652_v38 = vrot.slane %v8830_v41, %v17718_v40  ;;  %v4656_v49 = vrot.slane %v8830_v41, %v17721_v25 }
 0x92e   :  { %4020 = vst.msk [vmem:[#allocation2 + $0x78] sm:$0xff] %vm83_vm1, %v4003_v50  ;;  %4203 = vst.msk [vmem:[#allocation2 + $0xf8] sm:$0xff] %vm83_vm1, %v4186_v27  ;;  %v14846_v28 = vadd.f32 %v4324_v20, %v4245_v37  ;;  %v4738_v55 = vadd.f32 %v4494_v36, %v17722_v8 }
 0x92f   :  { %v4326_v4 = vpop.f32.mrf.mxu1  ;;  %v4496_v2 = vpop.f32.mrf.mxu0 }
 0x930   :  { %v4327_v1 = vadd.f32 %v4326_v4, %v4249_v62  ;;  %v4739_v51 = vadd.f32 %v4737_v16, %v4496_v2  ;;  %v8833_v48 = vmul.f32 -1.442695, %v4738_v55 }
 0x932   :  { %4372 = vst.msk [vmem:[#allocation2 + $0x108] sm:$0xff] %vm83_vm1, %v4327_v1  ;;  %v4330_v18 = vpop.f32.mrf.mxu1  ;;  %v8834_v13 = vmul.f32 -1.442695, %v4739_v51  ;;  %9813 = vpow2.f32 %v8833_v48 }
 0x933   :  { %v14849_v17 = vadd.f32 %v4330_v18, %v4245_v37 }
 0x934   :  { %v4332_v7 = vpop.f32.mrf.mxu1  ;;  %9815 = vpow2.f32 %v8834_v13 }
 0x935   :  { %v4333_v54 = vadd.f32 %v4332_v7, %v4249_v62 }
 0x937   :  { %4374 = vst.msk [vmem:[#allocation2 + $0x118] sm:$0xff] %vm83_vm1, %v4333_v54  ;;  %v4336_v10 = vpop.f32.mrf.mxu1 }
 0x938   :  { %v4337_v31 = vadd.f32 %v4336_v10, %v4245_v37 }
 0x939   :  { %v4338_v3 = vpop.f32.mrf.mxu1  ;;  %v4769_v10 = vld [vmem:[#allocation2 + $0x108] sm:$0xff] }
 0x93a   :  { %4375 = vst [vmem:[#allocation2 + $0x120] sm:$0xff] %v4337_v31  ;;  %v4339_v23 = vadd.f32 %v4338_v3, %v4249_v62 }
 0x93c   :  { %4376 = vst.msk [vmem:[#allocation2 + $0x128] sm:$0xff] %vm83_vm1, %v4339_v23  ;;  %v4342_v46 = vpop.f32.mrf.mxu1 }
 0x93d   :  { %v4343_v9 = vadd.f32 %v4342_v46, %v4245_v37 }
 0x93e   :  { %v4344_v57 = vpop.f32.mrf.mxu1 }
 0x93f   :  { %4377 = vst [vmem:[#allocation2 + $0x130] sm:$0xff] %v4343_v9  ;;  %v4345_v58 = vadd.f32 %v4344_v57, %v4249_v62  ;;  %v9814_v60 = vpop.eup %9813 }
 0x940   :  { %v4746_v19 = vadd.f32 1.0, %v9814_v60  ;;  %v17732_v60 = vld [vmem:[#allocation30_spill] sm:$0xff] }
 0x941   :  { %4378 = vst.msk [vmem:[#allocation2 + $0x138] sm:$0xff] %vm83_vm1, %v4345_v58  ;;  %v4348_v11 = vpop.f32.mrf.mxu1  ;;  %v9816_v53 = vpop.eup %9815 }
 0x942   :  { %v4349_v12 = vadd.f32 %v4348_v11, %v4245_v37  ;;  %v4747_v6 = vadd.f32 1.0, %v9816_v53  ;;  %9817 = vrcp.f32 %v4746_v19  ;;  %v17735_v53 = vld [vmem:[#allocation33_spill] sm:$0xff] }
 0x943   :  { %v4350_v29 = vpop.f32.mrf.mxu1 }
 0x944   :  { %4379 = vst [vmem:[#allocation2 + $0x140] sm:$0xff] %v4349_v12  ;;  %v4351_v5 = vadd.f32 %v4350_v29, %v4249_v62  ;;  %9819 = vrcp.f32 %v4747_v6  ;;  %v17724_v12 = vld [vmem:[#allocation17_spill] sm:$0xff]  ;;  %v17725_v29 = vld [vmem:[#allocation18_spill] sm:$0xff]  ;;  %v17737_v6 = vld [vmem:[#allocation35_spill] sm:$0xff] }
 0x946   :  { %4380 = vst.msk [vmem:[#allocation2 + $0x148] sm:$0xff] %vm83_vm1, %v4351_v5  ;;  %v4354_v0 = vpop.f32.mrf.mxu1  ;;  %v17726_v5 = vld [vmem:[#allocation19_spill] sm:$0xff] }
 0x947   :  { %v4355_v33 = vadd.f32 %v4354_v0, %v4245_v37  ;;  %v17727_v0 = vld [vmem:[#allocation20_spill] sm:$0xff] }
 0x948   :  { %v4356_v44 = vpop.f32.mrf.mxu1 }
 0x949   :  { %4381 = vst [vmem:[#allocation2 + $0x150] sm:$0xff] %v4355_v33  ;;  %v4357_v26 = vadd.f32 %v4356_v44, %v4249_v62  ;;  %v17728_v33 = vld [vmem:[#allocation21_spill] sm:$0xff] }
 0x94b   :  { %4382 = vst.msk [vmem:[#allocation2 + $0x158] sm:$0xff] %vm83_vm1, %v4357_v26  ;;  %v4360_v39 = vpop.f32.mrf.mxu1  ;;  %v17729_v26 = vld [vmem:[#allocation22_spill] sm:$0xff] }
 0x94c   :  { %v4361_v15 = vadd.f32 %v4360_v39, %v4245_v37 }
 0x94d   :  { %v4362_v43 = vpop.f32.mrf.mxu1 }
 0x94e   :  { %4383 = vst [vmem:[#allocation2 + $0x160] sm:$0xff] %v4361_v15  ;;  %v4363_v52 = vadd.f32 %v4362_v43, %v4249_v62  ;;  %v17730_v15 = vld [vmem:[#allocation28_spill] sm:$0xff]  ;;  %v17731_v43 = vld [vmem:[#allocation29_spill] sm:$0xff] }
 0x94f   :  { %v9818_v27 = vpop.eup %9817 }
 0x950   :  { %4384 = vst.msk [vmem:[#allocation2 + $0x168] sm:$0xff] %vm83_vm1, %v4363_v52  ;;  %v4366_v14 = vpop.f32.mrf.mxu1 }
 0x951   :  { %v4367_v56 = vadd.f32 %v4366_v14, %v4245_v37  ;;  %v9820_v20 = vpop.eup %9819  ;;  %v17733_v14 = vld [vmem:[#allocation31_spill] sm:$0xff] }
 0x952   :  { %v4368_v34 = vpop.f32.mrf.mxu1 }
 0x953   :  { %4385 = vst [vmem:[#allocation2 + $0x170] sm:$0xff] %v4367_v56  ;;  %v4369_v59 = vadd.f32 %v4368_v34, %v4249_v62  ;;  %v17734_v56 = vld [vmem:[#allocation32_spill] sm:$0xff]  ;;  %v17736_v34 = vld [vmem:[#allocation34_spill] sm:$0xff] }
 0x955   :  { %4386 = vst.msk [vmem:[#allocation2 + $0x178] sm:$0xff] %vm83_vm1, %v4369_v59 }
 0x957   :  { %v4606_v47 = vpop.f32.mrf.mxu1  ;;  %v4731_v24 = vpop.f32.mrf.mxu0 }
 0x958   :  { %v4754_v61 = vadd.f32 %v4606_v47, %v17723_v63  ;;  %v4732_v50 = vadd.f32 %v4731_v24, %v4652_v38  ;;  %v17738_v47 = vld [vmem:[#allocation36_spill] sm:$0xff]  ;;  %v17739_v63 = vld [vmem:[#allocation37_spill] sm:$0xff] }
 0x959   :  { %v4608_v22 = vpop.f32.mrf.mxu1  ;;  %v4733_v45 = vpop.f32.mrf.mxu0  ;;  %v17746_v38 = vld [vmem:[#allocation44_spill] sm:$0xff] }
 0x95a   :  { %v8835_v30 = vmul.f32 -1.442695, %v4754_v61  ;;  %v4755_v42 = vadd.f32 %v4753_v32, %v4608_v22  ;;  %v4734_v62 = vadd.f32 %v4733_v45, %v4656_v49  ;;  %v4770_v4 = vmul.f32 %v9818_v27, %v4732_v50  ;;  %v17740_v61 = vld [vmem:[#allocation38_spill] sm:$0xff]  ;;  %v17741_v22 = vld [vmem:[#allocation39_spill] sm:$0xff]  ;;  %v17742_v32 = vld [vmem:[#allocation40_spill] sm:$0xff] }
 0x95b   :  { %v17747_v49 = vld [vmem:[#allocation45_spill] sm:$0xff]  ;;  %v17748_v45 = vld [vmem:[#allocation46_spill] sm:$0xff] }
 0x95c   :  { %9821 = vpow2.f32 %v8835_v30  ;;  %v8836_v37 = vmul.f32 -1.442695, %v4755_v42  ;;  %v4771_v18 = vmul.f32 %v9820_v20, %v4734_v62  ;;  %v4772_v54 = vadd.f32 %v4770_v4, %v14846_v28  ;;  %v17743_v30 = vld [vmem:[#allocation41_spill] sm:$0xff]  ;;  %v17744_v42 = vld [vmem:[#allocation42_spill] sm:$0xff]  ;;  %v17749_v62 = vld [vmem:[#allocation47_spill] sm:$0xff] }
 0x95d   :  { %v17750_v4 = vld [vmem:[#allocation48_spill] sm:$0xff] }
 0x95e   :  { %9823 = vpow2.f32 %v8836_v37  ;;  %v4773_v3 = vadd.f32 %v4771_v18, %v4769_v10  ;;  %v17745_v37 = vld [vmem:[#allocation43_spill] sm:$0xff] }
 0x969   :  { %v9822_v1 = vpop.eup %9821 }
 0x96a   :  { %v4762_v7 = vadd.f32 1.0, %v9822_v1  ;;  %v17751_v1 = vld [vmem:[#allocation49_spill] sm:$0xff] }
 0x96b   :  { %v9824_v36 = vpop.eup %9823 }
 0x96c   :  { %9825 = vrcp.f32 %v4762_v7  ;;  %v4763_v31 = vadd.f32 1.0, %v9824_v36  ;;  %v17752_v7 = vld [vmem:[#allocation50_spill] sm:$0xff] }
 0x96d   :  { %9827 = vtanh.f32 %v4772_v54  ;;  %v8944_v54 = vld [vmem:[%s17288_s2 + $0x658] sm:$0x1] }
 0x96e   :  { %9829 = vrcp.f32 %v4763_v31  ;;  %v8943_v31 = vld [vmem:[%s17288_s2 + $0x650] sm:$0x1] }
 0x96f   :  { %9831 = vtanh.f32 %v4773_v3 }
 0x979   :  { %v9826_v8 = vpop.eup %9825 }
 0x97a   :  { %v4776_v55 = vsub.f32 1.0, %v9826_v8  ;;  %v9828_v2 = vpop.eup %9827  ;;  %v4780_v46 = vmul.f32 0.0, %v9826_v8 }
 0x97b   :  { %v9830_v23 = vpop.eup %9829 }
 0x97c   :  { %v4778_v16 = vmul.f32 %v9828_v2, %v4776_v55  ;;  %v4777_v51 = vsub.f32 1.0, %v9830_v23  ;;  %v9832_v9 = vpop.eup %9831  ;;  %v4781_v28 = vmul.f32 0.0, %v9830_v23 }
 0x97e   :  { %v14866_v48 = vadd.f32 %v4780_v46, %v4778_v16  ;;  %v4779_v57 = vmul.f32 %v9832_v9, %v4777_v51  ;;  %v14927_v9 = vld [vmem:[%s17288_s2 + $0x428] sm:$0xff] }
 0x97f   :  { %5227 = vmatprep.subr.mxu0 %v14927_v9 }
 0x980   :  { %v7604_v58 = vmin.f32 %v14866_v48, 20.0  ;;  %v14869_v13 = vadd.f32 %v4781_v28, %v4779_v57  ;;  %vm7588_vm3 = vcmp.gt.f32.partialorder %v14866_v48, 20.0  ;;  %v14932_v57 = vld [vmem:[%s17288_s2 + $0x420] sm:$0xff]  ;;  %v14937_v28 = vld [vmem:[%s17288_s2 + $0x538] sm:$0xff] }
 0x982   :  { %v7620_v11 = vmul.f32 1.442695, %v7604_v58  ;;  %4785 = vst.msk [vmem:[#allocation3 + $0x8] sm:$0xff] %vm83_vm1, %v14869_v13  ;;  %8873 = vmatprep.mubr.msk.f32.mxu1 %vm83_vm1, %v14869_v13  ;;  %8910 = vmatprep.mubr.msk.f32.mxu0 %vm83_vm1, %v14869_v13  ;;  %v14944_v58 = vld [vmem:[%s17288_s2 + $0x418] sm:$0xff] }
 0x983   :  { %4894 = vmatmul.mubr.f32.vlgmr.msra.gmra.mxu1 %v14866_v48  ;;  %5005 = vmatmul.mubr.f32.vlgmr.msra.gmra.mxu0 %v14866_v48 }
 0x984   :  { %9833 = vpow2.f32 %v7620_v11  ;;  %5064 = vmatpush1.msra.mxu1 %v17724_v12  ;;  %8948 = vmatprep.mubr.msk.f32.mxu1 %vm83_vm1, %v14869_v13  ;;  %v14949_v11 = vld [vmem:[%s17288_s2 + $0x530] sm:$0xff] }
 0x985   :  { %5065 = vmatprep.subr.mxu1 %v17725_v29  ;;  %v14954_v12 = vld [vmem:[%s17288_s2 + $0x410] sm:$0xff]  ;;  %5228 = vmatpush1.msra.mxu0 %v14932_v57  ;;  %v14961_v29 = vld [vmem:[%s17288_s2 + $0x528] sm:$0xff] }
 0x986   :  { %5066 = vmatpush1.msra.mxu1 %v17726_v5  ;;  %v14966_v5 = vld [vmem:[%s17288_s2 + $0x408] sm:$0xff]  ;;  %5229 = vmatprep.subr.mxu0 %v14944_v58 }
 0x987   :  { %5067 = vmatprep.subr.mxu1 %v17727_v0  ;;  %v14971_v0 = vld [vmem:[%s17288_s2 + $0x520] sm:$0xff]  ;;  %5230 = vmatpush1.msra.mxu0 %v14954_v12 }
 0x988   :  { %5068 = vmatpush1.msra.mxu1 %v17728_v33  ;;  %v14978_v33 = vld [vmem:[%s17288_s2 + $0x400] sm:$0xff]  ;;  %5231 = vmatprep.subr.mxu0 %v14966_v5 }
 0x989   :  { %v7573_v44 = vld [vmem:[#allocation3 + $0x8] sm:$0xff]  ;;  %5069 = vmatprep.subr.mxu1 %v17729_v26  ;;  %v14990_v26 = vld [vmem:[%s17288_s2 + $0x3f8] sm:$0xff]  ;;  %5232 = vmatpush1.msra.mxu0 %v14978_v33 }
 0x98a   :  { %v7605_v39 = vmin.f32 %v7573_v44, 20.0  ;;  %5070 = vmatpush1.msra.mxu1 %v17730_v15  ;;  %vm7589_vm5 = vcmp.gt.f32.partialorder %v7573_v44, 20.0  ;;  %5233 = vmatprep.subr.mxu0 %v14990_v26  ;;  %v15005_v15 = vld [vmem:[%s17288_s2 + $0x3f0] sm:$0xff] }
 0x98b   :  { %5071 = vmatprep.subr.mxu1 %v17731_v43  ;;  %v15010_v43 = vld [vmem:[%s17288_s2 + $0x508] sm:$0xff]  ;;  %5234 = vmatpush1.msra.mxu0 %v15005_v15 }
 0x98c   :  { %v7622_v52 = vmul.f32 1.442695, %v7605_v39  ;;  %5072 = vmatpush1.msra.mxu1 %v17732_v60  ;;  %v14995_v39 = vld [vmem:[%s17288_s2 + $0x510] sm:$0xff]  ;;  %v15022_v60 = vld [vmem:[%s17288_s2 + $0x500] sm:$0xff] }
 0x98d   :  { %5073 = vmatprep.subr.mxu1 %v17733_v14  ;;  %v15029_v14 = vld [vmem:[%s17288_s2 + $0x3e0] sm:$0xff] }
 0x98e   :  { %9835 = vpow2.f32 %v7622_v52  ;;  %5074 = vmatpush1.msra.mxu1 %v17734_v56  ;;  %v15017_v52 = vld [vmem:[%s17288_s2 + $0x3e8] sm:$0xff]  ;;  %v15034_v56 = vld [vmem:[%s17288_s2 + $0x4f8] sm:$0xff] }
 0x98f   :  { %5075 = vmatprep.subr.mxu1 %v17735_v53  ;;  %5235 = vmatprep.subr.mxu0 %v15017_v52  ;;  %v15041_v53 = vld [vmem:[%s17288_s2 + $0x3d8] sm:$0xff] }
 0x990   :  { %5076 = vmatpush1.msra.mxu1 %v17736_v34  ;;  %5236 = vmatpush1.msra.mxu0 %v15029_v14  ;;  %v15053_v34 = vld [vmem:[%s17288_s2 + $0x3d0] sm:$0xff] }
 0x991   :  { %v9834_v19 = vpop.eup %9833  ;;  %5077 = vmatprep.subr.mxu1 %v17737_v6  ;;  %5237 = vmatprep.subr.mxu0 %v15041_v53  ;;  %v15065_v6 = vld [vmem:[%s17288_s2 + $0x3c8] sm:$0xff] }
 0x992   :  { %v7652_v59 = vadd.f32 1.0, %v9834_v19  ;;  %5078 = vmatpush1.msra.mxu1 %v17738_v47  ;;  %v7655_v41 = vmul.f32 -0.5, %v9834_v19  ;;  %v7658_v20 = vand.u32 2147483647, %v9834_v19  ;;  %5238 = vmatpush1.msra.mxu0 %v15053_v34  ;;  %v15070_v47 = vld [vmem:[%s17288_s2 + $0x4e0] sm:$0xff] }
 0x993   :  { %5079 = vmatprep.subr.mxu1 %v17739_v63  ;;  %17755 = vst [vmem:[#allocation25_spill] sm:$0xff] %v15070_v47  ;;  %5239 = vmatprep.subr.mxu0 %v15065_v6  ;;  %v15077_v63 = vld [vmem:[%s17288_s2 + $0x3c0] sm:$0xff] }
 0x994   :  { %9837 = vlog2.f32 %v7652_v59  ;;  %5080 = vmatpush1.msra.mxu1 %v17740_v61  ;;  %v7656_v27 = vadd.f32 1.0, %v7655_v41  ;;  %vm7659_vm2 = vcmp.lt.f32.partialorder %v7658_v20, 0.0004427343  ;;  %v15058_v59 = vld [vmem:[%s17288_s2 + $0x4e8] sm:$0xff]  ;;  %v15082_v61 = vld [vmem:[%s17288_s2 + $0x4d8] sm:$0xff]  ;;  %5240 = vmatpush1.msra.mxu0 %v15077_v63  ;;  %v15164_v20 = vld [vmem:[%s17288_s2 + $0x4a0] sm:$0xff] }
 0x995   :  { %5081 = vmatprep.subr.mxu1 %v17741_v22  ;;  %17754 = vst [vmem:[#allocation24_spill] sm:$0xff] %v15058_v59  ;;  %17756 = vst [vmem:[#allocation6_spill] sm:$0xff] %v15082_v61  ;;  %v15089_v22 = vld [vmem:[%s17288_s2 + $0x3b8] sm:$0xff]  ;;  %v15113_v41 = vld [vmem:[%s17288_s2 + $0x3a8] sm:$0xff] }
 0x996   :  { %5082 = vmatpush1.msra.mxu1 %v17742_v32  ;;  %v7657_v10 = vmul.f32 %v9834_v19, %v7656_v27  ;;  %v15046_v19 = vld [vmem:[%s17288_s2 + $0x4f0] sm:$0xff]  ;;  %5241 = vmatprep.subr.mxu0 %v15089_v22  ;;  %v15152_v27 = vld [vmem:[%s17288_s2 + $0x4a8] sm:$0xff]  ;;  %17763 = vst [vmem:[#allocation12_spill] sm:$0xff] %v15164_v20 }
 0x997   :  { %5083 = vmatprep.subr.mxu1 %v17743_v30  ;;  %17753 = vst [vmem:[#allocation23_spill] sm:$0xff] %v15046_v19  ;;  %v15094_v32 = vld [vmem:[%s17288_s2 + $0x4d0] sm:$0xff]  ;;  %17762 = vst [vmem:[#allocation14_spill] sm:$0xff] %v15152_v27 }
 0x998   :  { %5084 = vmatpush1.msra.mxu1 %v17744_v42  ;;  %17757 = vst [vmem:[#allocation7_spill] sm:$0xff] %v15094_v32  ;;  %v15101_v30 = vld [vmem:[%s17288_s2 + $0x3b0] sm:$0xff]  ;;  %v15106_v42 = vld [vmem:[%s17288_s2 + $0x4c8] sm:$0xff] }
 0x999   :  { %5085 = vmatprep.subr.mxu1 %v17745_v37  ;;  %17758 = vst [vmem:[#allocation8_spill] sm:$0xff] %v15106_v42  ;;  %5242 = vmatpush1.msra.mxu0 %v15101_v30  ;;  %v15118_v37 = vld [vmem:[%s17288_s2 + $0x4c0] sm:$0xff] }
 0x99a   :  { %5086 = vmatpush1.msra.mxu1 %v17746_v38  ;;  %17759 = vst [vmem:[#allocation9_spill] sm:$0xff] %v15118_v37  ;;  %5243 = vmatprep.subr.mxu0 %v15113_v41  ;;  %v15125_v38 = vld [vmem:[%s17288_s2 + $0x3a0] sm:$0xff] }
 0x99b   :  { %v9836_v24 = vpop.eup %9835  ;;  %5087 = vmatprep.subr.mxu1 %v17747_v49  ;;  %v15135_v49 = vld [vmem:[%s17288_s2 + $0x398] sm:$0xff]  ;;  %5244 = vmatpush1.msra.mxu0 %v15125_v38 }
 0x99c   :  { %v7661_v50 = vadd.f32 1.0, %v9836_v24  ;;  %5088 = vmatpush1.msra.mxu1 %v17748_v45  ;;  %v7664_v8 = vmul.f32 -0.5, %v9836_v24  ;;  %v7667_v2 = vand.u32 2147483647, %v9836_v24  ;;  %v15147_v45 = vld [vmem:[%s17288_s2 + $0x390] sm:$0xff]  ;;  %5245 = vmatprep.subr.mxu0 %v15135_v49 }
 0x99d   :  { %5089 = vmatprep.subr.mxu1 %v17749_v62  ;;  %v15159_v62 = vld [vmem:[%s17288_s2 + $0x388] sm:$0xff]  ;;  %5246 = vmatpush1.msra.mxu0 %v15147_v45 }
 0x99e   :  { %9839 = vlog2.f32 %v7661_v50  ;;  %5090 = vmatpush1.msra.mxu1 %v17750_v4  ;;  %vm7668_vm4 = vcmp.lt.f32.partialorder %v7667_v2, 0.0004427343  ;;  %v15142_v50 = vld [vmem:[%s17288_s2 + $0x4b0] sm:$0xff]  ;;  %v15169_v4 = vld [vmem:[%s17288_s2 + $0x380] sm:$0xff]  ;;  %5247 = vmatprep.subr.mxu0 %v15159_v62 }
 0x99f   :  { %5091 = vmatprep.subr.mxu1 %v17751_v1  ;;  %17761 = vst [vmem:[#allocation11_spill] sm:$0xff] %v15142_v50  ;;  %v15176_v1 = vld [vmem:[%s17288_s2 + $0x498] sm:$0xff]  ;;  %5248 = vmatpush1.msra.mxu0 %v15169_v4  ;;  %v15241_v2 = vld [vmem:[%s17288_s2 + $0x350] sm:$0xff] }
 0x9a0   :  { %5092 = vmatpush1.msra.mxu1 %v17752_v7  ;;  %17764 = vst [vmem:[#allocation15_spill] sm:$0xff] %v15176_v1  ;;  %v15186_v7 = vld [vmem:[%s17288_s2 + $0x490] sm:$0xff] }
 0x9a1   :  { %v9838_v18 = vpop.eup %9837  ;;  %5093 = vmatprep.subr.mxu1 %v14714_v21  ;;  %v7665_v21 = vadd.f32 1.0, %v7664_v8  ;;  %17765 = vst [vmem:[#allocation13_spill] sm:$0xff] %v15186_v7  ;;  %v15222_v8 = vld [vmem:[%s17288_s2 + $0x478] sm:$0xff] }
 0x9a2   :  { %v7654_v36 = vmul.f32 0.6931472, %v9838_v18  ;;  %5094 = vmatpush1.msra.mxu1 %v14726_v35  ;;  %v15181_v18 = vld [vmem:[%s17288_s2 + $0x378] sm:$0xff]  ;;  %17768 = vst [vmem:[#allocation18_spill] sm:$0xff] %v15222_v8 }
 0x9a3   :  { %8946 = vmatprep.subr.msk.mxu1 %vm108_vm0, %v8944_v54  ;;  %v7666_v46 = vmul.f32 %v9836_v24, %v7665_v21  ;;  %v15130_v24 = vld [vmem:[%s17288_s2 + $0x4b8] sm:$0xff]  ;;  %v15193_v54 = vld [vmem:[%s17288_s2 + $0x370] sm:$0xff]  ;;  %5249 = vmatprep.subr.mxu0 %v15181_v18 }
 0x9a4   :  { %v7660_v3 = vsel %vm7659_vm2, %v7657_v10, %v7654_v36  ;;  %8947 = vmatpush2.msk.msra.mxu1 %vm108_vm0, %v8943_v31  ;;  %17760 = vst [vmem:[#allocation10_spill] sm:$0xff] %v15130_v24  ;;  %v15198_v36 = vld [vmem:[%s17288_s2 + $0x488] sm:$0xff]  ;;  %v15210_v31 = vld [vmem:[%s17288_s2 + $0x480] sm:$0xff]  ;;  %5250 = vmatpush1.msra.mxu0 %v15193_v54  ;;  %v15234_v21 = vld [vmem:[%s17288_s2 + $0x470] sm:$0xff] }
 0x9a5   :  { %v7796_v55 = vsel %vm7588_vm3, %v14866_v48, %v7660_v3  ;;  %5128 = vmatmul.mubr.f32.vlgmr.msra.gmra.mxu1 %v14866_v48  ;;  %5338 = vmatprep.subr.mxu1 %v14937_v28  ;;  %17766 = vst [vmem:[#allocation16_spill] sm:$0xff] %v15198_v36  ;;  %v15205_v10 = vld [vmem:[%s17288_s2 + $0x368] sm:$0xff]  ;;  %17767 = vst [vmem:[#allocation17_spill] sm:$0xff] %v15210_v31  ;;  %v15217_v3 = vld [vmem:[%s17288_s2 + $0x360] sm:$0xff] }
 0x9a6   :  { %7812 = vst [vmem:[#allocation3] sm:$0xff] %v7796_v55  ;;  %5339 = vmatpush1.msra.mxu1 %v14949_v11  ;;  %v15229_v55 = vld [vmem:[%s17288_s2 + $0x358] sm:$0xff]  ;;  %17769 = vst [vmem:[#allocation19_spill] sm:$0xff] %v15234_v21  ;;  %5251 = vmatprep.subr.mxu0 %v15205_v10 }
 0x9a7   :  { %5340 = vmatprep.subr.mxu1 %v14961_v29  ;;  %5252 = vmatpush1.msra.mxu0 %v15217_v3 }
 0x9a8   :  { %5341 = vmatpush1.msra.mxu1 %v14971_v0  ;;  %5253 = vmatprep.subr.mxu0 %v15229_v55 }
 0x9a9   :  { %5254 = vmatpush1.msra.mxu0 %v15241_v2 }
 0x9ab   :  { %v9840_v23 = vpop.eup %9839 }
 0x9ac   :  { %v7663_v16 = vmul.f32 0.6931472, %v9840_v23  ;;  %v15246_v23 = vld [vmem:[%s17288_s2 + $0x468] sm:$0xff] }
 0x9ad   :  { %17770 = vst [vmem:[#allocation20_spill] sm:$0xff] %v15246_v23 }
 0x9ae   :  { %v7669_v35 = vsel %vm7668_vm4, %v7666_v46, %v7663_v16  ;;  %v15253_v16 = vld [vmem:[%s17288_s2 + $0x348] sm:$0xff]  ;;  %v15258_v46 = vld [vmem:[%s17288_s2 + $0x460] sm:$0xff] }
 0x9af   :  { %v7797_v51 = vsel %vm7589_vm5, %v7573_v44, %v7669_v35  ;;  %v14983_v44 = vld [vmem:[%s17288_s2 + $0x518] sm:$0xff]  ;;  %17771 = vst [vmem:[#allocation21_spill] sm:$0xff] %v15258_v46  ;;  %v15265_v35 = vld [vmem:[%s17288_s2 + $0x340] sm:$0xff]  ;;  %5255 = vmatprep.subr.mxu0 %v15253_v16 }
 0x9b0   :  { %7813 = vst.msk [vmem:[#allocation3 + $0x8] sm:$0xff] %vm83_vm1, %v7797_v51  ;;  %5342 = vmatprep.subr.mxu1 %v14983_v44  ;;  %v15270_v51 = vld [vmem:[%s17288_s2 + $0x458] sm:$0xff]  ;;  %5256 = vmatpush1.msra.mxu0 %v15265_v35 }
 0x9b1   :  { %5343 = vmatpush1.msra.mxu1 %v14995_v39  ;;  %17772 = vst [vmem:[#allocation22_spill] sm:$0xff] %v15270_v51 }
 0x9b2   :  { %5344 = vmatprep.subr.mxu1 %v15010_v43 }
 0x9b3   :  { %5345 = vmatpush1.msra.mxu1 %v15022_v60 }
 0x9b4   :  { %5346 = vmatprep.subr.mxu1 %v15034_v56 }
 0x9b5   :  { %5347 = vmatpush1.msra.mxu1 %v15046_v19 }
 0x9b6   :  { %5348 = vmatprep.subr.mxu1 %v15058_v59 }
 0x9b7   :  { %5349 = vmatpush1.msra.mxu1 %v15070_v47 }
 0x9b8   :  { %5350 = vmatprep.subr.mxu1 %v15082_v61  ;;  %v5151_v61 = vld [vmem:[#allocation2 + $0x98] sm:$0xff] }
 0x9b9   :  { %5351 = vmatpush1.msra.mxu1 %v15094_v32 }
 0x9ba   :  { %5352 = vmatprep.subr.mxu1 %v15106_v42 }
 0x9bb   :  { %5353 = vmatpush1.msra.mxu1 %v15118_v37  ;;  %v5150_v37 = vld [vmem:[#allocation2 + $0x90] sm:$0xff] }
 0x9bc   :  { %5354 = vmatprep.subr.mxu1 %v15130_v24 }
 0x9bd   :  { %5355 = vmatpush1.msra.mxu1 %v15142_v50 }
 0x9be   :  { %5356 = vmatprep.subr.mxu1 %v15152_v27 }
 0x9bf   :  { %5357 = vmatpush1.msra.mxu1 %v15164_v20 }
 0x9c0   :  { %5358 = vmatprep.subr.mxu1 %v15176_v1  ;;  %v15326_v1 = vld [vmem:[%s17288_s2 + $0x648] sm:$0xff] }
 0x9c1   :  { %5359 = vmatpush1.msra.mxu1 %v15186_v7  ;;  %v8985_v7 = vld [vmem:[%s17288_s2 + $0x430] sm:$0x1]  ;;  %17776 = vst [vmem:[#allocation31_spill] sm:$0xff] %v15326_v1 }
 0x9c2   :  { %5360 = vmatprep.subr.mxu1 %v15198_v36  ;;  %v8986_v36 = vld [vmem:[%s17288_s2 + $0x438] sm:$0x1] }
 0x9c3   :  { %5361 = vmatpush1.msra.mxu1 %v15210_v31  ;;  %v15289_v31 = vld [vmem:[%s17288_s2 + $0x330] sm:$0xff] }
 0x9c4   :  { %5362 = vmatprep.subr.mxu1 %v15222_v8  ;;  %v15277_v8 = vld [vmem:[%s17288_s2 + $0x338] sm:$0xff] }
 0x9c5   :  { %5363 = vmatpush1.msra.mxu1 %v15234_v21  ;;  %v15282_v21 = vld [vmem:[%s17288_s2 + $0x450] sm:$0xff]  ;;  %5257 = vmatprep.subr.mxu0 %v15277_v8 }
 0x9c6   :  { %5364 = vmatprep.subr.mxu1 %v15246_v23  ;;  %17773 = vst [vmem:[#allocation28_spill] sm:$0xff] %v15282_v21  ;;  %v15294_v23 = vld [vmem:[%s17288_s2 + $0x448] sm:$0xff]  ;;  %5258 = vmatpush1.msra.mxu0 %v15289_v31 }
 0x9c7   :  { %5365 = vmatpush1.msra.mxu1 %v15258_v46  ;;  %17774 = vst [vmem:[#allocation29_spill] sm:$0xff] %v15294_v23  ;;  %v15304_v46 = vld [vmem:[%s17288_s2 + $0x440] sm:$0xff]  ;;  %8987 = vmatprep.subr.msk.mxu0 %vm108_vm0, %v8986_v36 }
 0x9c8   :  { %5366 = vmatprep.subr.mxu1 %v15270_v51  ;;  %17775 = vst [vmem:[#allocation30_spill] sm:$0xff] %v15304_v46  ;;  %v9023_v51 = vld [vmem:[%s17288_s2 + $0x548] sm:$0x1]  ;;  %8988 = vmatpush2.msk.msra.mxu0 %vm108_vm0, %v8985_v7 }
 0x9c9   :  { %5367 = vmatpush1.msra.mxu1 %v15282_v21  ;;  %v9022_v21 = vld [vmem:[%s17288_s2 + $0x540] sm:$0x1]  ;;  %5461 = vmatprep.subr.mxu0 %v15326_v1 }
 0x9ca   :  { %5368 = vmatprep.subr.mxu1 %v15294_v23 }
 0x9cb   :  { %5369 = vmatpush1.msra.mxu1 %v15304_v46  ;;  %v5134_v46 = vld [vmem:[#allocation2 + $0x10] sm:$0xff] }
 0x9cc   :  { %9024 = vmatprep.subr.msk.mxu1 %vm108_vm0, %v9023_v51  ;;  %v5135_v51 = vld [vmem:[#allocation2 + $0x18] sm:$0xff] }
 0x9cd   :  { %9025 = vmatpush2.msk.msra.mxu1 %vm108_vm0, %v9022_v21 }
 0x9ce   :  { %5625 = vmatprep.subr.mxu1 %v14927_v9 }
 0xa43   :  { %v4895_v36 = vpop.f32.mrf.mxu1  ;;  %v5006_v50 = vpop.f32.mrf.mxu0 }
 0xa44   :  { %v5136_v7 = vadd.f32 %v5134_v46, %v4895_v36  ;;  %v5152_v32 = vadd.f32 %v5150_v37, %v5006_v50 }
 0xa45   :  { %v4897_v23 = vpop.f32.mrf.mxu1  ;;  %v5008_v42 = vpop.f32.mrf.mxu0 }
 0xa46   :  { %v8949_v20 = vmul.f32 -1.442695, %v5136_v7  ;;  %v5137_v27 = vadd.f32 %v5135_v51, %v4897_v23  ;;  %v5153_v21 = vadd.f32 %v5151_v61, %v5008_v42  ;;  %v8951_v47 = vmul.f32 -1.442695, %v5152_v32 }
 0xa48   :  { %9841 = vpow2.f32 %v8949_v20  ;;  %v8950_v24 = vmul.f32 -1.442695, %v5137_v27  ;;  %v8952_v1 = vmul.f32 -1.442695, %v5153_v21  ;;  %v8945_v27 = vld [vmem:[%s17290_s4 + $0x2] sm:$0x3] }
 0xa49   :  { %v5050_v20 = vrot.slane %v8945_v27, %v17718_v40  ;;  %v5054_v61 = vrot.slane %v8945_v27, %v17721_v25 }
 0xa4a   :  { %9843 = vpow2.f32 %v8950_v24 }
 0xa4b   :  { %9845 = vpow2.f32 %v8951_v47 }
 0xa4c   :  { %9847 = vpow2.f32 %v8952_v1 }
 0xa55   :  { %v9842_v9 = vpop.eup %9841 }
 0xa56   :  { %v5144_v59 = vadd.f32 1.0, %v9842_v9 }
 0xa57   :  { %v9844_v46 = vpop.eup %9843 }
 0xa58   :  { %9849 = vrcp.f32 %v5144_v59  ;;  %v5145_v36 = vadd.f32 1.0, %v9844_v46  ;;  %v9846_v24 = vpop.eup %9845  ;;  %v5167_v46 = vld [vmem:[#allocation2 + $0x118] sm:$0xff] }
 0xa59   :  { %v9848_v37 = vpop.eup %9847  ;;  %v5160_v50 = vadd.f32 1.0, %v9846_v24 }
 0xa5a   :  { %9851 = vrcp.f32 %v5145_v36  ;;  %v5161_v42 = vadd.f32 1.0, %v9848_v37 }
 0xa5b   :  { %9853 = vrcp.f32 %v5160_v50 }
 0xa5c   :  { %9855 = vrcp.f32 %v5161_v42 }
 0xa65   :  { %v9850_v32 = vpop.eup %9849  ;;  %v5129_v47 = vpop.f32.mrf.mxu1 }
 0xa66   :  { %v5130_v23 = vadd.f32 %v5129_v47, %v5050_v20 }
 0xa67   :  { %v9852_v1 = vpop.eup %9851  ;;  %v5131_v7 = vpop.f32.mrf.mxu1 }
 0xa68   :  { %v5168_v59 = vmul.f32 %v9850_v32, %v5130_v23  ;;  %v5132_v51 = vadd.f32 %v5131_v7, %v5054_v61  ;;  %v9854_v24 = vpop.eup %9853  ;;  %v15347_v23 = vld [vmem:[%s17288_s2 + $0x640] sm:$0xff]  ;;  %v15393_v7 = vld [vmem:[%s17288_s2 + $0x610] sm:$0xff] }
 0xa69   :  { %v9856_v40 = vpop.eup %9855  ;;  %v5174_v27 = vsub.f32 1.0, %v9854_v24  ;;  %v5178_v20 = vmul.f32 %v9854_v24, %v14866_v48  ;;  %v15365_v48 = vld [vmem:[%s17288_s2 + $0x630] sm:$0xff] }
 0xa6a   :  { %v5170_v21 = vadd.f32 %v5168_v59, %v14849_v17  ;;  %v5169_v9 = vmul.f32 %v9852_v1, %v5132_v51  ;;  %v5175_v19 = vsub.f32 1.0, %v9856_v40  ;;  %v5179_v61 = vmul.f32 %v9856_v40, %v14869_v13  ;;  %v15373_v13 = vld [vmem:[%s17288_s2 + $0x628] sm:$0xff]  ;;  %v15386_v1 = vld [vmem:[%s17288_s2 + $0x618] sm:$0xff]  ;;  %v15540_v24 = vld [vmem:[%s17288_s2 + $0x570] sm:$0xff] }
 0xa6b   :  { %v15417_v51 = vld [vmem:[%s17288_s2 + $0x5f8] sm:$0xff] }
 0xa6c   :  { %9857 = vtanh.f32 %v5170_v21  ;;  %v5171_v36 = vadd.f32 %v5169_v9, %v5167_v46  ;;  %v15431_v21 = vld [vmem:[%s17288_s2 + $0x5e8] sm:$0xff]  ;;  %v15476_v46 = vld [vmem:[%s17288_s2 + $0x5b8] sm:$0xff] }
 0xa6e   :  { %9859 = vtanh.f32 %v5171_v36  ;;  %v15533_v36 = vld [vmem:[%s17288_s2 + $0x578] sm:$0xff] }
 0xa79   :  { %v9858_v25 = vpop.eup %9857 }
 0xa7a   :  { %v5176_v37 = vmul.f32 %v9858_v25, %v5174_v27  ;;  %v15358_v25 = vld [vmem:[%s17288_s2 + $0x638] sm:$0xff]  ;;  %v15547_v27 = vld [vmem:[%s17288_s2 + $0x568] sm:$0xff] }
 0xa7b   :  { %v9860_v47 = vpop.eup %9859 }
 0xa7c   :  { %v5177_v50 = vmul.f32 %v9860_v47, %v5175_v19  ;;  %v15339_v32 = vadd.f32 %v5178_v20, %v5176_v37  ;;  %v15379_v19 = vld [vmem:[%s17288_s2 + $0x620] sm:$0xff]  ;;  %v15561_v37 = vld [vmem:[%s17288_s2 + $0x558] sm:$0xff]  ;;  %v15569_v20 = vld [vmem:[%s17288_s2 + $0x550] sm:$0xff] }
 0xa7d   :  { %v9059_v47 = vld [vmem:[%s17288_s2 + $0x650] sm:$0x1] }
 0xa7e   :  { %v15341_v17 = vadd.f32 %v5179_v61, %v5177_v50  ;;  %v7606_v42 = vmin.f32 %v15339_v32, 20.0  ;;  %vm7590_vm7 = vcmp.gt.f32.partialorder %v15339_v32, 20.0 }
 0xa80   :  { %5183 = vst.msk [vmem:[#allocation3 + $0x18] sm:$0xff] %vm83_vm1, %v15341_v17  ;;  %8989 = vmatprep.mubr.msk.f32.mxu0 %vm83_vm1, %v15341_v17  ;;  %9026 = vmatprep.mubr.msk.f32.mxu1 %vm83_vm1, %v15341_v17  ;;  %v7624_v40 = vmul.f32 1.442695, %v7606_v42 }
 0xa81   :  { %5292 = vmatmul.mubr.f32.vlgmr.msra.gmra.mxu0 %v15339_v32  ;;  %5403 = vmatmul.mubr.f32.vlgmr.msra.gmra.mxu1 %v15339_v32 }
 0xa82   :  { %9861 = vpow2.f32 %v7624_v40  ;;  %5462 = vmatpush1.msra.mxu0 %v15347_v23  ;;  %9064 = vmatprep.mubr.msk.f32.mxu0 %vm83_vm1, %v15341_v17 }
 0xa83   :  { %5463 = vmatprep.subr.mxu0 %v15358_v25  ;;  %5626 = vmatpush1.msra.mxu1 %v14932_v57  ;;  %v15400_v57 = vld [vmem:[%s17288_s2 + $0x608] sm:$0xff] }
 0xa84   :  { %5464 = vmatpush1.msra.mxu0 %v15365_v48  ;;  %5627 = vmatprep.subr.mxu1 %v14944_v58  ;;  %v15409_v58 = vld [vmem:[%s17288_s2 + $0x600] sm:$0xff] }
 0xa85   :  { %5465 = vmatprep.subr.mxu0 %v15373_v13  ;;  %5628 = vmatpush1.msra.mxu1 %v14954_v12 }
 0xa86   :  { %5466 = vmatpush1.msra.mxu0 %v15379_v19  ;;  %5629 = vmatprep.subr.mxu1 %v14966_v5  ;;  %v15424_v5 = vld [vmem:[%s17288_s2 + $0x5f0] sm:$0xff] }
 0xa87   :  { %v15403_v59 = vld [vmem:[#allocation3 + $0x18] sm:$0xff]  ;;  %5467 = vmatprep.subr.mxu0 %v15386_v1  ;;  %5630 = vmatpush1.msra.mxu1 %v14978_v33 }
 0xa88   :  { %v7607_v12 = vmin.f32 %v15403_v59, 20.0  ;;  %5468 = vmatpush1.msra.mxu0 %v15393_v7  ;;  %5631 = vmatprep.subr.mxu1 %v14990_v26  ;;  %v15438_v26 = vld [vmem:[%s17288_s2 + $0x5e0] sm:$0xff]  ;;  %vm7591_vm9 = vcmp.gt.f32.partialorder %v15403_v59, 20.0 }
 0xa89   :  { %5469 = vmatprep.subr.mxu0 %v15400_v57  ;;  %5632 = vmatpush1.msra.mxu1 %v15005_v15  ;;  %v15445_v15 = vld [vmem:[%s17288_s2 + $0x5d8] sm:$0xff] }
 0xa8a   :  { %v7626_v33 = vmul.f32 1.442695, %v7607_v12  ;;  %5470 = vmatpush1.msra.mxu0 %v15409_v58  ;;  %5633 = vmatprep.subr.mxu1 %v15017_v52  ;;  %v15452_v52 = vld [vmem:[%s17288_s2 + $0x5d0] sm:$0xff] }
 0xa8b   :  { %5471 = vmatprep.subr.mxu0 %v15417_v51  ;;  %5634 = vmatpush1.msra.mxu1 %v15029_v14  ;;  %v15459_v14 = vld [vmem:[%s17288_s2 + $0x5c8] sm:$0xff] }
 0xa8c   :  { %9863 = vpow2.f32 %v7626_v33  ;;  %5472 = vmatpush1.msra.mxu0 %v15424_v5  ;;  %5635 = vmatprep.subr.mxu1 %v15041_v53  ;;  %v15468_v53 = vld [vmem:[%s17288_s2 + $0x5c0] sm:$0xff] }
 0xa8d   :  { %5473 = vmatprep.subr.mxu0 %v15431_v21  ;;  %5636 = vmatpush1.msra.mxu1 %v15053_v34  ;;  %v17784_v33 = vld [vmem:[#allocation10_spill] sm:$0xff] }
 0xa8e   :  { %5474 = vmatpush1.msra.mxu0 %v15438_v26  ;;  %5637 = vmatprep.subr.mxu1 %v15065_v6  ;;  %v15483_v6 = vld [vmem:[%s17288_s2 + $0x5b0] sm:$0xff] }
 0xa8f   :  { %v15462_v9 = vpop.eup %9861  ;;  %5475 = vmatprep.subr.mxu0 %v15445_v15  ;;  %5638 = vmatpush1.msra.mxu1 %v15077_v63  ;;  %v15490_v63 = vld [vmem:[%s17288_s2 + $0x5a8] sm:$0xff] }
 0xa90   :  { %v7670_v34 = vadd.f32 1.0, %v15462_v9  ;;  %5476 = vmatpush1.msra.mxu0 %v15452_v52  ;;  %5639 = vmatprep.subr.mxu1 %v15089_v22  ;;  %v15497_v22 = vld [vmem:[%s17288_s2 + $0x5a0] sm:$0xff] }
 0xa91   :  { %5477 = vmatprep.subr.mxu0 %v15459_v14  ;;  %5640 = vmatpush1.msra.mxu1 %v15101_v30  ;;  %v15504_v30 = vld [vmem:[%s17288_s2 + $0x598] sm:$0xff] }
 0xa92   :  { %9865 = vlog2.f32 %v7670_v34  ;;  %5478 = vmatpush1.msra.mxu0 %v15468_v53  ;;  %5641 = vmatprep.subr.mxu1 %v15113_v41  ;;  %v15511_v41 = vld [vmem:[%s17288_s2 + $0x590] sm:$0xff]  ;;  %v17786_v34 = vld [vmem:[#allocation14_spill] sm:$0xff] }
 0xa93   :  { %5479 = vmatprep.subr.mxu0 %v15476_v46  ;;  %5642 = vmatpush1.msra.mxu1 %v15125_v38  ;;  %v15518_v38 = vld [vmem:[%s17288_s2 + $0x588] sm:$0xff] }
 0xa94   :  { %5480 = vmatpush1.msra.mxu0 %v15483_v6  ;;  %5643 = vmatprep.subr.mxu1 %v15135_v49  ;;  %v15525_v49 = vld [vmem:[%s17288_s2 + $0x580] sm:$0xff] }
 0xa95   :  { %5481 = vmatprep.subr.mxu0 %v15490_v63  ;;  %5644 = vmatpush1.msra.mxu1 %v15147_v45  ;;  %v7673_v45 = vmul.f32 -0.5, %v15462_v9 }
 0xa96   :  { %5482 = vmatpush1.msra.mxu0 %v15497_v22  ;;  %5645 = vmatprep.subr.mxu1 %v15159_v62 }
 0xa97   :  { %5483 = vmatprep.subr.mxu0 %v15504_v30  ;;  %5646 = vmatpush1.msra.mxu1 %v15169_v4 }
 0xa98   :  { %5484 = vmatpush1.msra.mxu0 %v15511_v41  ;;  %5647 = vmatprep.subr.mxu1 %v15181_v18  ;;  %v15554_v18 = vld [vmem:[%s17288_s2 + $0x560] sm:$0xff] }
 0xa99   :  { %v9864_v62 = vpop.eup %9863  ;;  %5485 = vmatprep.subr.mxu0 %v15518_v38  ;;  %5648 = vmatpush1.msra.mxu1 %v15193_v54  ;;  %v7674_v54 = vadd.f32 1.0, %v7673_v45  ;;  %v17788_v45 = vld [vmem:[#allocation15_spill] sm:$0xff] }
 0xa9a   :  { %v7679_v4 = vadd.f32 1.0, %v9864_v62  ;;  %5486 = vmatpush1.msra.mxu0 %v15525_v49  ;;  %5649 = vmatprep.subr.mxu1 %v15205_v10  ;;  %v7676_v10 = vand.u32 2147483647, %v15462_v9 }
 0xa9b   :  { %5487 = vmatprep.subr.mxu0 %v15533_v36  ;;  %5650 = vmatpush1.msra.mxu1 %v15217_v3  ;;  %v9060_v3 = vld [vmem:[%s17288_s2 + $0x658] sm:$0x1] }
 0xa9c   :  { %9867 = vlog2.f32 %v7679_v4  ;;  %5488 = vmatpush1.msra.mxu0 %v15540_v24  ;;  %5651 = vmatprep.subr.mxu1 %v15229_v55  ;;  %vm7677_vm6 = vcmp.lt.f32.partialorder %v7676_v10, 0.0004427343  ;;  %v17790_v4 = vld [vmem:[#allocation16_spill] sm:$0xff]  ;;  %v17792_v10 = vld [vmem:[#allocation18_spill] sm:$0xff] }
 0xa9d   :  { %5489 = vmatprep.subr.mxu0 %v15547_v27  ;;  %5652 = vmatpush1.msra.mxu1 %v15241_v2  ;;  %v7675_v2 = vmul.f32 %v15462_v9, %v7674_v54  ;;  %v17785_v9 = vld [vmem:[#allocation11_spill] sm:$0xff]  ;;  %v17791_v54 = vld [vmem:[#allocation17_spill] sm:$0xff] }
 0xa9e   :  { %5490 = vmatpush1.msra.mxu0 %v15554_v18  ;;  %5653 = vmatprep.subr.mxu1 %v15253_v16  ;;  %v7682_v16 = vmul.f32 -0.5, %v9864_v62 }
 0xa9f   :  { %v9866_v55 = vpop.eup %9865  ;;  %5491 = vmatprep.subr.mxu0 %v15561_v37  ;;  %5654 = vmatpush1.msra.mxu1 %v15265_v35 }
 0xaa0   :  { %v7672_v50 = vmul.f32 0.6931472, %v9866_v55  ;;  %5492 = vmatpush1.msra.mxu0 %v15569_v20  ;;  %5655 = vmatprep.subr.mxu1 %v15277_v8  ;;  %v7683_v8 = vadd.f32 1.0, %v7682_v16  ;;  %v17794_v55 = vld [vmem:[#allocation20_spill] sm:$0xff]  ;;  %v17798_v16 = vld [vmem:[#allocation29_spill] sm:$0xff] }
 0xaa1   :  { %9062 = vmatprep.subr.msk.mxu0 %vm108_vm0, %v9060_v3  ;;  %5656 = vmatpush1.msra.mxu1 %v15289_v31  ;;  %v7685_v31 = vand.u32 2147483647, %v9864_v62  ;;  %v17793_v3 = vld [vmem:[#allocation19_spill] sm:$0xff] }
 0xaa2   :  { %v7678_v61 = vsel %vm7677_vm6, %v7675_v2, %v7672_v50  ;;  %9063 = vmatpush2.msk.msra.mxu0 %vm108_vm0, %v9059_v47  ;;  %v7684_v12 = vmul.f32 %v9864_v62, %v7683_v8  ;;  %v17789_v62 = vld [vmem:[#allocation13_spill] sm:$0xff]  ;;  %v17796_v50 = vld [vmem:[#allocation22_spill] sm:$0xff]  ;;  %v17797_v2 = vld [vmem:[#allocation28_spill] sm:$0xff] }
 0xaa3   :  { %v7798_v35 = vsel %vm7590_vm7, %v15339_v32, %v7678_v61  ;;  %5526 = vmatmul.mubr.f32.vlgmr.msra.gmra.mxu0 %v15339_v32  ;;  %5736 = vmatprep.subr.mxu0 %v14937_v28  ;;  %vm7686_vm8 = vcmp.lt.f32.partialorder %v7685_v31, 0.0004427343  ;;  %v17795_v47 = vld [vmem:[#allocation21_spill] sm:$0xff]  ;;  %v17799_v61 = vld [vmem:[#allocation30_spill] sm:$0xff]  ;;  %v9101_v8 = vld [vmem:[%s17288_s2 + $0x430] sm:$0x1] }
 0xaa4   :  { %7814 = vst [vmem:[#allocation3 + $0x10] sm:$0xff] %v7798_v35  ;;  %5737 = vmatpush1.msra.mxu0 %v14949_v11  ;;  %v17777_v11 = vld [vmem:[#allocation23_spill] sm:$0xff]  ;;  %v9102_v35 = vld [vmem:[%s17288_s2 + $0x438] sm:$0x1] }
 0xaa5   :  { %5738 = vmatprep.subr.mxu0 %v14961_v29  ;;  %v9139_v31 = vld [vmem:[%s17288_s2 + $0x548] sm:$0x1]  ;;  %9103 = vmatprep.subr.msk.mxu1 %vm108_vm0, %v9102_v35 }
 0xaa6   :  { %5739 = vmatpush1.msra.mxu0 %v14971_v0  ;;  %v17778_v0 = vld [vmem:[#allocation24_spill] sm:$0xff]  ;;  %9104 = vmatpush2.msk.msra.mxu1 %vm108_vm0, %v9101_v8  ;;  %v17802_v35 = vld [vmem:[#allocation27_spill] sm:$0xff] }
 0xaa7   :  { %5740 = vmatprep.subr.mxu0 %v14983_v44  ;;  %v17779_v44 = vld [vmem:[#allocation25_spill] sm:$0xff] }
 0xaa8   :  { %5741 = vmatpush1.msra.mxu0 %v14995_v39  ;;  %v17780_v39 = vld [vmem:[#allocation6_spill] sm:$0xff] }
 0xaa9   :  { %v9868_v42 = vpop.eup %9867  ;;  %5742 = vmatprep.subr.mxu0 %v15010_v43  ;;  %v17781_v43 = vld [vmem:[#allocation7_spill] sm:$0xff] }
 0xaaa   :  { %v7681_v40 = vmul.f32 0.6931472, %v9868_v42  ;;  %5743 = vmatpush1.msra.mxu0 %v15022_v60  ;;  %v17782_v60 = vld [vmem:[#allocation8_spill] sm:$0xff]  ;;  %v17800_v42 = vld [vmem:[#allocation31_spill] sm:$0xff] }
 0xaab   :  { %5744 = vmatprep.subr.mxu0 %v15034_v56  ;;  %v17783_v56 = vld [vmem:[#allocation9_spill] sm:$0xff]  ;;  %5859 = vmatprep.subr.mxu1 %v17800_v42 }
 0xaac   :  { %v7687_v28 = vsel %vm7686_vm8, %v7684_v12, %v7681_v40  ;;  %5745 = vmatpush1.msra.mxu0 %v17777_v11  ;;  %v9138_v40 = vld [vmem:[%s17288_s2 + $0x540] sm:$0x1] }
 0xaad   :  { %v7799_v29 = vsel %vm7591_vm9, %v15403_v59, %v7687_v28  ;;  %5746 = vmatprep.subr.mxu0 %v17778_v0  ;;  %v17787_v59 = vld [vmem:[#allocation12_spill] sm:$0xff]  ;;  %v5532_v28 = vld [vmem:[#allocation2 + $0x20] sm:$0xff]  ;;  %v5533_v0 = vld [vmem:[#allocation2 + $0x28] sm:$0xff] }
 0xaae   :  { %7815 = vst.msk [vmem:[#allocation3 + $0x18] sm:$0xff] %vm83_vm1, %v7799_v29  ;;  %5747 = vmatpush1.msra.mxu0 %v17779_v44 }
 0xaaf   :  { %5748 = vmatprep.subr.mxu0 %v17780_v39 }
 0xab0   :  { %5749 = vmatpush1.msra.mxu0 %v17781_v43 }
 0xab1   :  { %5750 = vmatprep.subr.mxu0 %v17782_v60 }
 0xab2   :  { %5751 = vmatpush1.msra.mxu0 %v17783_v56  ;;  %v5548_v56 = vld [vmem:[#allocation2 + $0xa0] sm:$0xff] }
 0xab3   :  { %5752 = vmatprep.subr.mxu0 %v17784_v33 }
 0xab4   :  { %5753 = vmatpush1.msra.mxu0 %v17785_v9 }
 0xab5   :  { %5754 = vmatprep.subr.mxu0 %v17786_v34  ;;  %v5549_v34 = vld [vmem:[#allocation2 + $0xa8] sm:$0xff] }
 0xab6   :  { %5755 = vmatpush1.msra.mxu0 %v17787_v59 }
 0xab7   :  { %5756 = vmatprep.subr.mxu0 %v17788_v45 }
 0xab8   :  { %5757 = vmatpush1.msra.mxu0 %v17789_v62 }
 0xab9   :  { %5758 = vmatprep.subr.mxu0 %v17790_v4 }
 0xaba   :  { %5759 = vmatpush1.msra.mxu0 %v17791_v54 }
 0xabb   :  { %5760 = vmatprep.subr.mxu0 %v17792_v10 }
 0xabc   :  { %5761 = vmatpush1.msra.mxu0 %v17793_v3 }
 0xabd   :  { %5762 = vmatprep.subr.mxu0 %v17794_v55  ;;  %v9061_v55 = vld [vmem:[%s17290_s4 + $0x2] sm:$0x3] }
 0xabe   :  { %5763 = vmatpush1.msra.mxu0 %v17795_v47  ;;  %v5452_v8 = vrot.slane %v9061_v55, %v17802_v35 }
 0xabf   :  { %5764 = vmatprep.subr.mxu0 %v17796_v50  ;;  %v17801_v50 = vld [vmem:[#allocation26_spill] sm:$0xff] }
 0xac0   :  { %5765 = vmatpush1.msra.mxu0 %v17797_v2  ;;  %v5448_v2 = vrot.slane %v9061_v55, %v17801_v50 }
 0xac1   :  { %5766 = vmatprep.subr.mxu0 %v17798_v16 }
 0xac2   :  { %5767 = vmatpush1.msra.mxu0 %v17799_v61 }
 0xac3   :  { %9140 = vmatprep.subr.msk.mxu0 %vm108_vm0, %v9139_v31 }
 0xac4   :  { %9141 = vmatpush2.msk.msra.mxu0 %vm108_vm0, %v9138_v40 }
 0xb41   :  { %v5293_v12 = vpop.f32.mrf.mxu0  ;;  %v5404_v43 = vpop.f32.mrf.mxu1 }
 0xb42   :  { %v5534_v11 = vadd.f32 %v5532_v28, %v5293_v12  ;;  %v5550_v9 = vadd.f32 %v5548_v56, %v5404_v43 }
 0xb43   :  { %v5295_v29 = vpop.f32.mrf.mxu0  ;;  %v5406_v33 = vpop.f32.mrf.mxu1 }
 0xb44   :  { %v9065_v44 = vmul.f32 -1.442695, %v5534_v11  ;;  %v5535_v39 = vadd.f32 %v5533_v0, %v5295_v29  ;;  %v5551_v59 = vadd.f32 %v5549_v34, %v5406_v33  ;;  %v9067_v45 = vmul.f32 -1.442695, %v5550_v9 }
 0xb46   :  { %9869 = vpow2.f32 %v9065_v44  ;;  %v9066_v60 = vmul.f32 -1.442695, %v5535_v39  ;;  %v9068_v62 = vmul.f32 -1.442695, %v5551_v59  ;;  %v5564_v44 = vld [vmem:[#allocation2 + $0x120] sm:$0xff] }
 0xb48   :  { %9871 = vpow2.f32 %v9066_v60  ;;  %v5565_v60 = vld [vmem:[#allocation2 + $0x128] sm:$0xff] }
 0xb49   :  { %9873 = vpow2.f32 %v9067_v45 }
 0xb4a   :  { %9875 = vpow2.f32 %v9068_v62 }
 0xb53   :  { %v9870_v4 = vpop.eup %9869 }
 0xb54   :  { %v5542_v54 = vadd.f32 1.0, %v9870_v4 }
 0xb55   :  { %v9872_v10 = vpop.eup %9871 }
 0xb56   :  { %9877 = vrcp.f32 %v5542_v54  ;;  %v5543_v3 = vadd.f32 1.0, %v9872_v10  ;;  %v9874_v47 = vpop.eup %9873 }
 0xb57   :  { %v9876_v16 = vpop.eup %9875  ;;  %v5558_v61 = vadd.f32 1.0, %v9874_v47 }
 0xb58   :  { %9879 = vrcp.f32 %v5543_v3  ;;  %v5559_v40 = vadd.f32 1.0, %v9876_v16 }
 0xb59   :  { %9881 = vrcp.f32 %v5558_v61  ;;  %v15755_v61 = vld [vmem:[%s17288_s2 + $0x520] sm:$0xff] }
 0xb5a   :  { %9883 = vrcp.f32 %v5559_v40  ;;  %v15779_v40 = vld [vmem:[%s17288_s2 + $0x510] sm:$0xff] }
 0xb63   :  { %v9878_v31 = vpop.eup %9877  ;;  %v5527_v42 = vpop.f32.mrf.mxu0 }
 0xb64   :  { %v5528_v12 = vadd.f32 %v5527_v42, %v5448_v2  ;;  %v15774_v42 = vld [vmem:[%s17288_s2 + $0x3f8] sm:$0xff] }
 0xb65   :  { %v9880_v28 = vpop.eup %9879  ;;  %v5529_v11 = vpop.f32.mrf.mxu0 }
 0xb66   :  { %v5566_v29 = vmul.f32 %v9878_v31, %v5528_v12  ;;  %v5530_v0 = vadd.f32 %v5529_v11, %v5452_v8  ;;  %v9882_v33 = vpop.eup %9881  ;;  %v15762_v8 = vld [vmem:[%s17288_s2 + $0x400] sm:$0xff]  ;;  %v15767_v31 = vld [vmem:[%s17288_s2 + $0x518] sm:$0xff]  ;;  %v15789_v12 = vld [vmem:[%s17288_s2 + $0x3f0] sm:$0xff] }
 0xb67   :  { %v9884_v9 = vpop.eup %9883  ;;  %v5572_v34 = vsub.f32 1.0, %v9882_v33  ;;  %v5576_v4 = vmul.f32 %v9882_v33, %v15339_v32  ;;  %v15801_v11 = vld [vmem:[%s17288_s2 + $0x3e8] sm:$0xff] }
 0xb68   :  { %v5568_v39 = vadd.f32 %v5566_v29, %v5564_v44  ;;  %v5567_v43 = vmul.f32 %v9880_v28, %v5530_v0  ;;  %v5573_v45 = vsub.f32 1.0, %v9884_v9  ;;  %v5577_v3 = vmul.f32 %v9884_v9, %v15341_v17  ;;  %v15794_v28 = vld [vmem:[%s17288_s2 + $0x508] sm:$0xff]  ;;  %v15806_v29 = vld [vmem:[%s17288_s2 + $0x500] sm:$0xff]  ;;  %v15818_v44 = vld [vmem:[%s17288_s2 + $0x4f8] sm:$0xff] }
 0xb69   :  { %v15813_v0 = vld [vmem:[%s17288_s2 + $0x3e0] sm:$0xff]  ;;  %v15849_v33 = vld [vmem:[%s17288_s2 + $0x3c8] sm:$0xff] }
 0xb6a   :  { %9885 = vtanh.f32 %v5568_v39  ;;  %v5569_v56 = vadd.f32 %v5567_v43, %v5565_v60  ;;  %v15825_v39 = vld [vmem:[%s17288_s2 + $0x3d8] sm:$0xff]  ;;  %v15830_v43 = vld [vmem:[%s17288_s2 + $0x4f0] sm:$0xff]  ;;  %v15854_v9 = vld [vmem:[%s17288_s2 + $0x4e0] sm:$0xff] }
 0xb6b   :  { %17803 = vst [vmem:[#allocation32_spill] sm:$0xff] %v15830_v43  ;;  %v15837_v60 = vld [vmem:[%s17288_s2 + $0x3d0] sm:$0xff]  ;;  %17805 = vst [vmem:[#allocation34_spill] sm:$0xff] %v15854_v9 }
 0xb6c   :  { %9887 = vtanh.f32 %v5569_v56  ;;  %v15842_v56 = vld [vmem:[%s17288_s2 + $0x4e8] sm:$0xff] }
 0xb6d   :  { %17804 = vst [vmem:[#allocation33_spill] sm:$0xff] %v15842_v56 }
 0xb77   :  { %v9886_v59 = vpop.eup %9885 }
 0xb78   :  { %v5574_v62 = vmul.f32 %v9886_v59, %v5572_v34  ;;  %v15861_v34 = vld [vmem:[%s17288_s2 + $0x3c0] sm:$0xff]  ;;  %v15866_v59 = vld [vmem:[%s17288_s2 + $0x4d8] sm:$0xff] }
 0xb79   :  { %v9888_v54 = vpop.eup %9887  ;;  %17806 = vst [vmem:[#allocation35_spill] sm:$0xff] %v15866_v59 }
 0xb7a   :  { %v5575_v10 = vmul.f32 %v9888_v54, %v5573_v45  ;;  %v15650_v55 = vadd.f32 %v5576_v4, %v5574_v62  ;;  %v15873_v45 = vld [vmem:[%s17288_s2 + $0x3b8] sm:$0xff]  ;;  %v15878_v62 = vld [vmem:[%s17288_s2 + $0x4d0] sm:$0xff]  ;;  %v15890_v54 = vld [vmem:[%s17288_s2 + $0x4c8] sm:$0xff] }
 0xb7b   :  { %17807 = vst [vmem:[#allocation36_spill] sm:$0xff] %v15878_v62  ;;  %v15885_v4 = vld [vmem:[%s17288_s2 + $0x3b0] sm:$0xff]  ;;  %17808 = vst [vmem:[#allocation37_spill] sm:$0xff] %v15890_v54 }
 0xb7c   :  { %v15652_v47 = vadd.f32 %v5577_v3, %v5575_v10  ;;  %v7608_v2 = vmin.f32 %v15650_v55, 20.0  ;;  %vm7592_vm11 = vcmp.gt.f32.partialorder %v15650_v55, 20.0  ;;  %v15897_v10 = vld [vmem:[%s17288_s2 + $0x3a8] sm:$0xff]  ;;  %v15902_v3 = vld [vmem:[%s17288_s2 + $0x4c0] sm:$0xff] }
 0xb7d   :  { %17809 = vst [vmem:[#allocation38_spill] sm:$0xff] %v15902_v3 }
 0xb7e   :  { %5581 = vst.msk [vmem:[#allocation3 + $0x28] sm:$0xff] %vm83_vm1, %v15652_v47  ;;  %9105 = vmatprep.mubr.msk.f32.mxu1 %vm83_vm1, %v15652_v47  ;;  %9142 = vmatprep.mubr.msk.f32.mxu0 %vm83_vm1, %v15652_v47  ;;  %v7628_v32 = vmul.f32 1.442695, %v7608_v2  ;;  %v15909_v2 = vld [vmem:[%s17288_s2 + $0x3a0] sm:$0xff] }
 0xb7f   :  { %5690 = vmatmul.mubr.f32.vlgmr.msra.gmra.mxu1 %v15650_v55  ;;  %5801 = vmatmul.mubr.f32.vlgmr.msra.gmra.mxu0 %v15650_v55 }
 0xb80   :  { %9889 = vpow2.f32 %v7628_v32  ;;  %5860 = vmatpush1.msra.mxu1 %v15347_v23  ;;  %9180 = vmatprep.mubr.msk.f32.mxu1 %vm83_vm1, %v15652_v47  ;;  %v15914_v32 = vld [vmem:[%s17288_s2 + $0x4b8] sm:$0xff] }
 0xb81   :  { %5861 = vmatprep.subr.mxu1 %v15358_v25  ;;  %17810 = vst [vmem:[#allocation39_spill] sm:$0xff] %v15914_v32 }
 0xb82   :  { %5862 = vmatpush1.msra.mxu1 %v15365_v48 }
 0xb83   :  { %5863 = vmatprep.subr.mxu1 %v15373_v13 }
 0xb84   :  { %5864 = vmatpush1.msra.mxu1 %v15379_v19 }
 0xb85   :  { %v7577_v17 = vld [vmem:[#allocation3 + $0x28] sm:$0xff]  ;;  %5865 = vmatprep.subr.mxu1 %v15386_v1 }
 0xb86   :  { %v7609_v16 = vmin.f32 %v7577_v17, 20.0  ;;  %5866 = vmatpush1.msra.mxu1 %v15393_v7  ;;  %vm7593_vm13 = vcmp.gt.f32.partialorder %v7577_v17, 20.0 }
 0xb87   :  { %5867 = vmatprep.subr.mxu1 %v15400_v57 }
 0xb88   :  { %v7630_v23 = vmul.f32 1.442695, %v7609_v16  ;;  %5868 = vmatpush1.msra.mxu1 %v15409_v58  ;;  %v9176_v58 = vld [vmem:[%s17288_s2 + $0x658] sm:$0x1]  ;;  %v15926_v16 = vld [vmem:[%s17288_s2 + $0x4b0] sm:$0xff] }
 0xb89   :  { %5869 = vmatprep.subr.mxu1 %v15417_v51  ;;  %17811 = vst [vmem:[#allocation40_spill] sm:$0xff] %v15926_v16 }
 0xb8a   :  { %9891 = vpow2.f32 %v7630_v23  ;;  %5870 = vmatpush1.msra.mxu1 %v15424_v5  ;;  %v9175_v5 = vld [vmem:[%s17288_s2 + $0x650] sm:$0x1] }
 0xb8b   :  { %5871 = vmatprep.subr.mxu1 %v15431_v21  ;;  %v15931_v23 = vld [vmem:[%s17288_s2 + $0x390] sm:$0xff] }
 0xb8c   :  { %5872 = vmatpush1.msra.mxu1 %v15438_v26 }
 0xb8d   :  { %v9890_v25 = vpop.eup %9889  ;;  %5873 = vmatprep.subr.mxu1 %v15445_v15 }
 0xb8e   :  { %v7688_v48 = vadd.f32 1.0, %v9890_v25  ;;  %5874 = vmatpush1.msra.mxu1 %v15452_v52  ;;  %v7691_v13 = vmul.f32 -0.5, %v9890_v25  ;;  %v7694_v57 = vand.u32 2147483647, %v9890_v25 }
 0xb8f   :  { %5875 = vmatprep.subr.mxu1 %v15459_v14 }
 0xb90   :  { %9893 = vlog2.f32 %v7688_v48  ;;  %5876 = vmatpush1.msra.mxu1 %v15468_v53  ;;  %v7692_v7 = vadd.f32 1.0, %v7691_v13  ;;  %vm7695_vm10 = vcmp.lt.f32.partialorder %v7694_v57, 0.0004427343  ;;  %v15943_v48 = vld [vmem:[%s17288_s2 + $0x388] sm:$0xff]  ;;  %v15948_v13 = vld [vmem:[%s17288_s2 + $0x4a0] sm:$0xff]  ;;  %v15970_v57 = vld [vmem:[%s17288_s2 + $0x490] sm:$0xff] }
 0xb91   :  { %5877 = vmatprep.subr.mxu1 %v15476_v46  ;;  %17813 = vst [vmem:[#allocation42_spill] sm:$0xff] %v15948_v13  ;;  %17815 = vst [vmem:[#allocation44_spill] sm:$0xff] %v15970_v57 }
 0xb92   :  { %5878 = vmatpush1.msra.mxu1 %v15483_v6  ;;  %v7693_v26 = vmul.f32 %v9890_v25, %v7692_v7  ;;  %v15936_v25 = vld [vmem:[%s17288_s2 + $0x4a8] sm:$0xff]  ;;  %v15965_v7 = vld [vmem:[%s17288_s2 + $0x378] sm:$0xff] }
 0xb93   :  { %5879 = vmatprep.subr.mxu1 %v15490_v63  ;;  %17812 = vst [vmem:[#allocation41_spill] sm:$0xff] %v15936_v25 }
 0xb94   :  { %5880 = vmatpush1.msra.mxu1 %v15497_v22 }
 0xb95   :  { %5881 = vmatprep.subr.mxu1 %v15504_v30 }
 0xb96   :  { %5882 = vmatpush1.msra.mxu1 %v15511_v41 }
 0xb97   :  { %v9892_v19 = vpop.eup %9891  ;;  %5883 = vmatprep.subr.mxu1 %v15518_v38  ;;  %v15711_v38 = vld [vmem:[%s17288_s2 + $0x428] sm:$0xff] }
 0xb98   :  { %v7697_v1 = vadd.f32 1.0, %v9892_v19  ;;  %5884 = vmatpush1.msra.mxu1 %v15525_v49  ;;  %v7700_v15 = vmul.f32 -0.5, %v9892_v19  ;;  %v7703_v46 = vand.u32 2147483647, %v9892_v19  ;;  %v15716_v49 = vld [vmem:[%s17288_s2 + $0x420] sm:$0xff]  ;;  %6023 = vmatprep.subr.mxu0 %v15711_v38 }
 0xb99   :  { %5885 = vmatprep.subr.mxu1 %v15533_v36  ;;  %v15721_v36 = vld [vmem:[%s17288_s2 + $0x538] sm:$0xff]  ;;  %6024 = vmatpush1.msra.mxu0 %v15716_v49 }
 0xb9a   :  { %9895 = vlog2.f32 %v7697_v1  ;;  %5886 = vmatpush1.msra.mxu1 %v15540_v24  ;;  %v7701_v53 = vadd.f32 1.0, %v7700_v15  ;;  %vm7704_vm12 = vcmp.lt.f32.partialorder %v7703_v46, 0.0004427343  ;;  %v15728_v24 = vld [vmem:[%s17288_s2 + $0x418] sm:$0xff]  ;;  %v16030_v46 = vld [vmem:[%s17288_s2 + $0x468] sm:$0xff] }
 0xb9b   :  { %5887 = vmatprep.subr.mxu1 %v15547_v27  ;;  %v15733_v27 = vld [vmem:[%s17288_s2 + $0x530] sm:$0xff]  ;;  %6025 = vmatprep.subr.mxu0 %v15728_v24  ;;  %v15960_v1 = vld [vmem:[%s17288_s2 + $0x498] sm:$0xff]  ;;  %17820 = vst [vmem:[#allocation49_spill] sm:$0xff] %v16030_v46 }
 0xb9c   :  { %5888 = vmatpush1.msra.mxu1 %v15554_v18  ;;  %v7702_v22 = vmul.f32 %v9892_v19, %v7701_v53  ;;  %v15738_v18 = vld [vmem:[%s17288_s2 + $0x410] sm:$0xff]  ;;  %v15953_v19 = vld [vmem:[%s17288_s2 + $0x380] sm:$0xff]  ;;  %17814 = vst [vmem:[#allocation43_spill] sm:$0xff] %v15960_v1  ;;  %v16006_v15 = vld [vmem:[%s17288_s2 + $0x478] sm:$0xff] }
 0xb9d   :  { %v9894_v51 = vpop.eup %9893  ;;  %5889 = vmatprep.subr.mxu1 %v15561_v37  ;;  %v15745_v37 = vld [vmem:[%s17288_s2 + $0x528] sm:$0xff]  ;;  %6026 = vmatpush1.msra.mxu0 %v15738_v18  ;;  %17818 = vst [vmem:[#allocation47_spill] sm:$0xff] %v16006_v15  ;;  %v16025_v53 = vld [vmem:[%s17288_s2 + $0x350] sm:$0xff] }
 0xb9e   :  { %v7690_v21 = vmul.f32 0.6931472, %v9894_v51  ;;  %5890 = vmatpush1.msra.mxu1 %v15569_v20  ;;  %v15750_v20 = vld [vmem:[%s17288_s2 + $0x408] sm:$0xff] }
 0xb9f   :  { %9178 = vmatprep.subr.msk.mxu1 %vm108_vm0, %v9176_v58  ;;  %6027 = vmatprep.subr.mxu0 %v15750_v20  ;;  %v15977_v58 = vld [vmem:[%s17288_s2 + $0x370] sm:$0xff]  ;;  %v15982_v51 = vld [vmem:[%s17288_s2 + $0x488] sm:$0xff] }
 0xba0   :  { %v7696_v52 = vsel %vm7695_vm10, %v7693_v26, %v7690_v21  ;;  %9179 = vmatpush2.msk.msra.mxu1 %vm108_vm0, %v9175_v5  ;;  %6028 = vmatpush1.msra.mxu0 %v15762_v8  ;;  %17816 = vst [vmem:[#allocation45_spill] sm:$0xff] %v15982_v51  ;;  %v15989_v5 = vld [vmem:[%s17288_s2 + $0x368] sm:$0xff]  ;;  %v15994_v21 = vld [vmem:[%s17288_s2 + $0x480] sm:$0xff] }
 0xba1   :  { %v7800_v14 = vsel %vm7592_vm11, %v15650_v55, %v7696_v52  ;;  %5924 = vmatmul.mubr.f32.vlgmr.msra.gmra.mxu1 %v15650_v55  ;;  %6134 = vmatprep.subr.mxu1 %v15721_v36  ;;  %17817 = vst [vmem:[#allocation46_spill] sm:$0xff] %v15994_v21  ;;  %v16001_v26 = vld [vmem:[%s17288_s2 + $0x360] sm:$0xff]  ;;  %v16013_v52 = vld [vmem:[%s17288_s2 + $0x358] sm:$0xff] }
 0xba2   :  { %7816 = vst [vmem:[#allocation3 + $0x20] sm:$0xff] %v7800_v14  ;;  %6135 = vmatpush1.msra.mxu1 %v15733_v27  ;;  %6029 = vmatprep.subr.mxu0 %v15774_v42  ;;  %v16018_v14 = vld [vmem:[%s17288_s2 + $0x470] sm:$0xff] }
 0xba3   :  { %6136 = vmatprep.subr.mxu1 %v15745_v37  ;;  %6030 = vmatpush1.msra.mxu0 %v15789_v12  ;;  %17819 = vst [vmem:[#allocation48_spill] sm:$0xff] %v16018_v14 }
 0xba4   :  { %6137 = vmatpush1.msra.mxu1 %v15755_v61  ;;  %6031 = vmatprep.subr.mxu0 %v15801_v11 }
 0xba5   :  { %6138 = vmatprep.subr.mxu1 %v15767_v31  ;;  %6032 = vmatpush1.msra.mxu0 %v15813_v0 }
 0xba6   :  { %6139 = vmatpush1.msra.mxu1 %v15779_v40  ;;  %6033 = vmatprep.subr.mxu0 %v15825_v39 }
 0xba7   :  { %v9896_v6 = vpop.eup %9895  ;;  %6140 = vmatprep.subr.mxu1 %v15794_v28  ;;  %6034 = vmatpush1.msra.mxu0 %v15837_v60 }
 0xba8   :  { %v7699_v63 = vmul.f32 0.6931472, %v9896_v6  ;;  %6141 = vmatpush1.msra.mxu1 %v15806_v29  ;;  %6035 = vmatprep.subr.mxu0 %v15849_v33  ;;  %v16037_v6 = vld [vmem:[%s17288_s2 + $0x348] sm:$0xff] }
 0xba9   :  { %6142 = vmatprep.subr.mxu1 %v15818_v44  ;;  %6036 = vmatpush1.msra.mxu0 %v15861_v34 }
 0xbaa   :  { %v7705_v30 = vsel %vm7704_vm12, %v7702_v22, %v7699_v63  ;;  %6143 = vmatpush1.msra.mxu1 %v15830_v43  ;;  %6037 = vmatprep.subr.mxu0 %v15873_v45  ;;  %v16042_v63 = vld [vmem:[%s17288_s2 + $0x460] sm:$0xff] }
 0xbab   :  { %v7801_v41 = vsel %vm7593_vm13, %v7577_v17, %v7705_v30  ;;  %6144 = vmatprep.subr.mxu1 %v15842_v56  ;;  %6038 = vmatpush1.msra.mxu0 %v15885_v4  ;;  %v15919_v17 = vld [vmem:[%s17288_s2 + $0x398] sm:$0xff]  ;;  %17821 = vst [vmem:[#allocation50_spill] sm:$0xff] %v16042_v63  ;;  %v16049_v22 = vld [vmem:[%s17288_s2 + $0x340] sm:$0xff] }
 0xbac   :  { %7817 = vst.msk [vmem:[#allocation3 + $0x28] sm:$0xff] %vm83_vm1, %v7801_v41  ;;  %6145 = vmatpush1.msra.mxu1 %v15854_v9  ;;  %6039 = vmatprep.subr.mxu0 %v15897_v10  ;;  %v16054_v30 = vld [vmem:[%s17288_s2 + $0x458] sm:$0xff] }
 0xbad   :  { %6146 = vmatprep.subr.mxu1 %v15866_v59  ;;  %6040 = vmatpush1.msra.mxu0 %v15909_v2  ;;  %17822 = vst [vmem:[#allocation23_spill] sm:$0xff] %v16054_v30  ;;  %v16061_v41 = vld [vmem:[%s17288_s2 + $0x338] sm:$0xff] }
 0xbae   :  { %6147 = vmatpush1.msra.mxu1 %v15878_v62  ;;  %6041 = vmatprep.subr.mxu0 %v15919_v17  ;;  %v5947_v62 = vld [vmem:[#allocation2 + $0xb8] sm:$0xff] }
 0xbaf   :  { %6148 = vmatprep.subr.mxu1 %v15890_v54  ;;  %6042 = vmatpush1.msra.mxu0 %v15931_v23 }
 0xbb0   :  { %6149 = vmatpush1.msra.mxu1 %v15902_v3  ;;  %6043 = vmatprep.subr.mxu0 %v15943_v48 }
 0xbb1   :  { %6150 = vmatprep.subr.mxu1 %v15914_v32  ;;  %6044 = vmatpush1.msra.mxu0 %v15953_v19  ;;  %v5946_v32 = vld [vmem:[#allocation2 + $0xb0] sm:$0xff] }
 0xbb2   :  { %6151 = vmatpush1.msra.mxu1 %v15926_v16  ;;  %6045 = vmatprep.subr.mxu0 %v15965_v7 }
 0xbb3   :  { %6152 = vmatprep.subr.mxu1 %v15936_v25  ;;  %6046 = vmatpush1.msra.mxu0 %v15977_v58 }
 0xbb4   :  { %6153 = vmatpush1.msra.mxu1 %v15948_v13  ;;  %6047 = vmatprep.subr.mxu0 %v15989_v5 }
 0xbb5   :  { %6154 = vmatprep.subr.mxu1 %v15960_v1  ;;  %6048 = vmatpush1.msra.mxu0 %v16001_v26 }
 0xbb6   :  { %6155 = vmatpush1.msra.mxu1 %v15970_v57  ;;  %6049 = vmatprep.subr.mxu0 %v16013_v52  ;;  %v16110_v57 = vld [vmem:[%s17288_s2 + $0x648] sm:$0xff] }
 0xbb7   :  { %6156 = vmatprep.subr.mxu1 %v15982_v51  ;;  %6050 = vmatpush1.msra.mxu0 %v16025_v53  ;;  %v9217_v51 = vld [vmem:[%s17288_s2 + $0x430] sm:$0x1]  ;;  %17826 = vst [vmem:[#allocation7_spill] sm:$0xff] %v16110_v57 }
 0xbb8   :  { %6157 = vmatpush1.msra.mxu1 %v15994_v21  ;;  %6051 = vmatprep.subr.mxu0 %v16037_v6  ;;  %v9218_v21 = vld [vmem:[%s17288_s2 + $0x438] sm:$0x1] }
 0xbb9   :  { %6158 = vmatprep.subr.mxu1 %v16006_v15  ;;  %v16073_v15 = vld [vmem:[%s17288_s2 + $0x330] sm:$0xff]  ;;  %6052 = vmatpush1.msra.mxu0 %v16049_v22 }
 0xbba   :  { %6159 = vmatpush1.msra.mxu1 %v16018_v14  ;;  %v16066_v14 = vld [vmem:[%s17288_s2 + $0x450] sm:$0xff]  ;;  %6053 = vmatprep.subr.mxu0 %v16061_v41 }
 0xbbb   :  { %6160 = vmatprep.subr.mxu1 %v16030_v46  ;;  %17823 = vst [vmem:[#allocation24_spill] sm:$0xff] %v16066_v14  ;;  %v16078_v46 = vld [vmem:[%s17288_s2 + $0x448] sm:$0xff]  ;;  %6054 = vmatpush1.msra.mxu0 %v16073_v15 }
 0xbbc   :  { %6161 = vmatpush1.msra.mxu1 %v16042_v63  ;;  %17824 = vst [vmem:[#allocation25_spill] sm:$0xff] %v16078_v46  ;;  %v16088_v63 = vld [vmem:[%s17288_s2 + $0x440] sm:$0xff]  ;;  %9219 = vmatprep.subr.msk.mxu0 %vm108_vm0, %v9218_v21 }
 0xbbd   :  { %6162 = vmatprep.subr.mxu1 %v16054_v30  ;;  %17825 = vst [vmem:[#allocation6_spill] sm:$0xff] %v16088_v63  ;;  %v9255_v30 = vld [vmem:[%s17288_s2 + $0x548] sm:$0x1]  ;;  %9220 = vmatpush2.msk.msra.mxu0 %vm108_vm0, %v9217_v51 }
 0xbbe   :  { %6163 = vmatpush1.msra.mxu1 %v16066_v14  ;;  %v9254_v14 = vld [vmem:[%s17288_s2 + $0x540] sm:$0x1]  ;;  %6257 = vmatprep.subr.mxu0 %v16110_v57 }
 0xbbf   :  { %6164 = vmatprep.subr.mxu1 %v16078_v46 }
 0xbc0   :  { %6165 = vmatpush1.msra.mxu1 %v16088_v63  ;;  %v5930_v63 = vld [vmem:[#allocation2 + $0x30] sm:$0xff] }
 0xbc1   :  { %9256 = vmatprep.subr.msk.mxu1 %vm108_vm0, %v9255_v30  ;;  %v5931_v30 = vld [vmem:[#allocation2 + $0x38] sm:$0xff] }
 0xbc2   :  { %9257 = vmatpush2.msk.msra.mxu1 %vm108_vm0, %v9254_v14 }
 0xbc3   :  { %6421 = vmatprep.subr.mxu1 %v15711_v38 }
 0xc3f   :  { %v5691_v21 = vpop.f32.mrf.mxu1  ;;  %v5802_v25 = vpop.f32.mrf.mxu0 }
 0xc40   :  { %v5932_v51 = vadd.f32 %v5930_v63, %v5691_v21  ;;  %v5948_v54 = vadd.f32 %v5946_v32, %v5802_v25 }
 0xc41   :  { %v5693_v46 = vpop.f32.mrf.mxu1  ;;  %v5804_v3 = vpop.f32.mrf.mxu0 }
 0xc42   :  { %v9181_v1 = vmul.f32 -1.442695, %v5932_v51  ;;  %v5933_v13 = vadd.f32 %v5931_v30, %v5693_v46  ;;  %v5949_v14 = vadd.f32 %v5947_v62, %v5804_v3  ;;  %v9183_v59 = vmul.f32 -1.442695, %v5948_v54 }
 0xc44   :  { %9897 = vpow2.f32 %v9181_v1  ;;  %v9182_v16 = vmul.f32 -1.442695, %v5933_v13  ;;  %v9184_v57 = vmul.f32 -1.442695, %v5949_v14  ;;  %v9177_v13 = vld [vmem:[%s17290_s4 + $0x2] sm:$0x3] }
 0xc45   :  { %v5846_v1 = vrot.slane %v9177_v13, %v17801_v50  ;;  %v5850_v62 = vrot.slane %v9177_v13, %v17802_v35  ;;  %v5962_v14 = vld [vmem:[#allocation2 + $0x130] sm:$0xff] }
 0xc46   :  { %9899 = vpow2.f32 %v9182_v16 }
 0xc47   :  { %9901 = vpow2.f32 %v9183_v59 }
 0xc48   :  { %9903 = vpow2.f32 %v9184_v57 }
 0xc51   :  { %v9898_v38 = vpop.eup %9897 }
 0xc52   :  { %v5940_v9 = vadd.f32 1.0, %v9898_v38 }
 0xc53   :  { %v9900_v63 = vpop.eup %9899 }
 0xc54   :  { %9905 = vrcp.f32 %v5940_v9  ;;  %v5941_v21 = vadd.f32 1.0, %v9900_v63  ;;  %v9902_v16 = vpop.eup %9901 }
 0xc55   :  { %v9904_v32 = vpop.eup %9903  ;;  %v5956_v25 = vadd.f32 1.0, %v9902_v16 }
 0xc56   :  { %9907 = vrcp.f32 %v5941_v21  ;;  %v5957_v3 = vadd.f32 1.0, %v9904_v32  ;;  %v5963_v21 = vld [vmem:[#allocation2 + $0x138] sm:$0xff] }
 0xc57   :  { %9909 = vrcp.f32 %v5956_v25 }
 0xc58   :  { %9911 = vrcp.f32 %v5957_v3 }
 0xc61   :  { %v9906_v54 = vpop.eup %9905  ;;  %v5925_v59 = vpop.f32.mrf.mxu1 }
 0xc62   :  { %v5926_v46 = vadd.f32 %v5925_v59, %v5846_v1 }
 0xc63   :  { %v9908_v57 = vpop.eup %9907  ;;  %v5927_v51 = vpop.f32.mrf.mxu1 }
 0xc64   :  { %v5964_v9 = vmul.f32 %v9906_v54, %v5926_v46  ;;  %v5928_v30 = vadd.f32 %v5927_v51, %v5850_v62  ;;  %v9910_v16 = vpop.eup %9909  ;;  %v16176_v51 = vld [vmem:[%s17288_s2 + $0x610] sm:$0xff] }
 0xc65   :  { %v9912_v56 = vpop.eup %9911  ;;  %v5970_v13 = vsub.f32 1.0, %v9910_v16  ;;  %v5974_v1 = vmul.f32 %v9910_v16, %v15650_v55  ;;  %v16141_v55 = vld [vmem:[%s17288_s2 + $0x638] sm:$0xff]  ;;  %v16323_v16 = vld [vmem:[%s17288_s2 + $0x570] sm:$0xff] }
 0xc66   :  { %v5966_v38 = vadd.f32 %v5964_v9, %v5962_v14  ;;  %v5965_v63 = vmul.f32 %v9908_v57, %v5928_v30  ;;  %v5971_v43 = vsub.f32 1.0, %v9912_v56  ;;  %v5975_v62 = vmul.f32 %v9912_v56, %v15652_v47  ;;  %v16148_v47 = vld [vmem:[%s17288_s2 + $0x630] sm:$0xff]  ;;  %v16162_v56 = vld [vmem:[%s17288_s2 + $0x620] sm:$0xff]  ;;  %v16169_v57 = vld [vmem:[%s17288_s2 + $0x618] sm:$0xff] }
 0xc67   :  { %v16200_v30 = vld [vmem:[%s17288_s2 + $0x5f8] sm:$0xff]  ;;  %v16214_v14 = vld [vmem:[%s17288_s2 + $0x5e8] sm:$0xff] }
 0xc68   :  { %9913 = vtanh.f32 %v5966_v38  ;;  %v5967_v50 = vadd.f32 %v5965_v63, %v5963_v21  ;;  %v16259_v63 = vld [vmem:[%s17288_s2 + $0x5b8] sm:$0xff] }
 0xc69   :  { %v16316_v21 = vld [vmem:[%s17288_s2 + $0x578] sm:$0xff] }
 0xc6a   :  { %9915 = vtanh.f32 %v5967_v50  ;;  %v16130_v50 = vld [vmem:[%s17288_s2 + $0x640] sm:$0xff] }
 0xc75   :  { %v9914_v35 = vpop.eup %9913 }
 0xc76   :  { %v5972_v32 = vmul.f32 %v9914_v35, %v5970_v13  ;;  %v16330_v13 = vld [vmem:[%s17288_s2 + $0x568] sm:$0xff] }
 0xc77   :  { %v9916_v59 = vpop.eup %9915 }
 0xc78   :  { %v5973_v25 = vmul.f32 %v9916_v59, %v5971_v43  ;;  %v16122_v54 = vadd.f32 %v5974_v1, %v5972_v32  ;;  %v16156_v43 = vld [vmem:[%s17288_s2 + $0x628] sm:$0xff]  ;;  %v16344_v32 = vld [vmem:[%s17288_s2 + $0x558] sm:$0xff]  ;;  %v16352_v1 = vld [vmem:[%s17288_s2 + $0x550] sm:$0xff] }
 0xc79   :  { %v9291_v59 = vld [vmem:[%s17288_s2 + $0x650] sm:$0x1] }
 0xc7a   :  { %v16124_v3 = vadd.f32 %v5975_v62, %v5973_v25  ;;  %v7610_v46 = vmin.f32 %v16122_v54, 20.0  ;;  %vm7594_vm15 = vcmp.gt.f32.partialorder %v16122_v54, 20.0 }
 0xc7c   :  { %5979 = vst.msk [vmem:[#allocation3 + $0x38] sm:$0xff] %vm83_vm1, %v16124_v3  ;;  %9221 = vmatprep.mubr.msk.f32.mxu0 %vm83_vm1, %v16124_v3  ;;  %9258 = vmatprep.mubr.msk.f32.mxu1 %vm83_vm1, %v16124_v3  ;;  %v7632_v35 = vmul.f32 1.442695, %v7610_v46 }
 0xc7d   :  { %6088 = vmatmul.mubr.f32.vlgmr.msra.gmra.mxu0 %v16122_v54  ;;  %6199 = vmatmul.mubr.f32.vlgmr.msra.gmra.mxu1 %v16122_v54 }
 0xc7e   :  { %9917 = vpow2.f32 %v7632_v35  ;;  %6258 = vmatpush1.msra.mxu0 %v16130_v50  ;;  %9296 = vmatprep.mubr.msk.f32.mxu0 %vm83_vm1, %v16124_v3 }
 0xc7f   :  { %6259 = vmatprep.subr.mxu0 %v16141_v55  ;;  %6422 = vmatpush1.msra.mxu1 %v15716_v49  ;;  %v16183_v49 = vld [vmem:[%s17288_s2 + $0x608] sm:$0xff] }
 0xc80   :  { %6260 = vmatpush1.msra.mxu0 %v16148_v47  ;;  %6423 = vmatprep.subr.mxu1 %v15728_v24  ;;  %v16192_v24 = vld [vmem:[%s17288_s2 + $0x600] sm:$0xff] }
 0xc81   :  { %6261 = vmatprep.subr.mxu0 %v16156_v43  ;;  %6424 = vmatpush1.msra.mxu1 %v15738_v18 }
 0xc82   :  { %6262 = vmatpush1.msra.mxu0 %v16162_v56  ;;  %6425 = vmatprep.subr.mxu1 %v15750_v20  ;;  %v16207_v20 = vld [vmem:[%s17288_s2 + $0x5f0] sm:$0xff] }
 0xc83   :  { %v16186_v9 = vld [vmem:[#allocation3 + $0x38] sm:$0xff]  ;;  %6263 = vmatprep.subr.mxu0 %v16169_v57  ;;  %6426 = vmatpush1.msra.mxu1 %v15762_v8 }
 0xc84   :  { %v7611_v18 = vmin.f32 %v16186_v9, 20.0  ;;  %6264 = vmatpush1.msra.mxu0 %v16176_v51  ;;  %6427 = vmatprep.subr.mxu1 %v15774_v42  ;;  %v16221_v42 = vld [vmem:[%s17288_s2 + $0x5e0] sm:$0xff]  ;;  %vm7595_vm3 = vcmp.gt.f32.partialorder %v16186_v9, 20.0 }
 0xc85   :  { %6265 = vmatprep.subr.mxu0 %v16183_v49  ;;  %6428 = vmatpush1.msra.mxu1 %v15789_v12  ;;  %v16228_v12 = vld [vmem:[%s17288_s2 + $0x5d8] sm:$0xff] }
 0xc86   :  { %v7634_v8 = vmul.f32 1.442695, %v7611_v18  ;;  %6266 = vmatpush1.msra.mxu0 %v16192_v24  ;;  %6429 = vmatprep.subr.mxu1 %v15801_v11  ;;  %v16235_v11 = vld [vmem:[%s17288_s2 + $0x5d0] sm:$0xff] }
 0xc87   :  { %6267 = vmatprep.subr.mxu0 %v16200_v30  ;;  %6430 = vmatpush1.msra.mxu1 %v15813_v0  ;;  %v16242_v0 = vld [vmem:[%s17288_s2 + $0x5c8] sm:$0xff] }
 0xc88   :  { %9919 = vpow2.f32 %v7634_v8  ;;  %6268 = vmatpush1.msra.mxu0 %v16207_v20  ;;  %6431 = vmatprep.subr.mxu1 %v15825_v39  ;;  %v16251_v39 = vld [vmem:[%s17288_s2 + $0x5c0] sm:$0xff]  ;;  %v17834_v8 = vld [vmem:[#allocation39_spill] sm:$0xff] }
 0xc89   :  { %6269 = vmatprep.subr.mxu0 %v16214_v14  ;;  %6432 = vmatpush1.msra.mxu1 %v15837_v60 }
 0xc8a   :  { %6270 = vmatpush1.msra.mxu0 %v16221_v42  ;;  %6433 = vmatprep.subr.mxu1 %v15849_v33  ;;  %v16266_v33 = vld [vmem:[%s17288_s2 + $0x5b0] sm:$0xff] }
 0xc8b   :  { %v16245_v38 = vpop.eup %9917  ;;  %6271 = vmatprep.subr.mxu0 %v16228_v12  ;;  %6434 = vmatpush1.msra.mxu1 %v15861_v34  ;;  %v16273_v34 = vld [vmem:[%s17288_s2 + $0x5a8] sm:$0xff] }
 0xc8c   :  { %v7706_v60 = vadd.f32 1.0, %v16245_v38  ;;  %6272 = vmatpush1.msra.mxu0 %v16235_v11  ;;  %6435 = vmatprep.subr.mxu1 %v15873_v45  ;;  %v16280_v45 = vld [vmem:[%s17288_s2 + $0x5a0] sm:$0xff] }
 0xc8d   :  { %6273 = vmatprep.subr.mxu0 %v16242_v0  ;;  %6436 = vmatpush1.msra.mxu1 %v15885_v4  ;;  %v16287_v4 = vld [vmem:[%s17288_s2 + $0x598] sm:$0xff] }
 0xc8e   :  { %9921 = vlog2.f32 %v7706_v60  ;;  %6274 = vmatpush1.msra.mxu0 %v16251_v39  ;;  %6437 = vmatprep.subr.mxu1 %v15897_v10  ;;  %v16294_v10 = vld [vmem:[%s17288_s2 + $0x590] sm:$0xff]  ;;  %v17836_v60 = vld [vmem:[#allocation41_spill] sm:$0xff] }
 0xc8f   :  { %6275 = vmatprep.subr.mxu0 %v16259_v63  ;;  %6438 = vmatpush1.msra.mxu1 %v15909_v2  ;;  %v16301_v2 = vld [vmem:[%s17288_s2 + $0x588] sm:$0xff] }
 0xc90   :  { %6276 = vmatpush1.msra.mxu0 %v16266_v33  ;;  %6439 = vmatprep.subr.mxu1 %v15919_v17  ;;  %v16308_v17 = vld [vmem:[%s17288_s2 + $0x580] sm:$0xff] }
 0xc91   :  { %6277 = vmatprep.subr.mxu0 %v16273_v34  ;;  %6440 = vmatpush1.msra.mxu1 %v15931_v23  ;;  %v7709_v23 = vmul.f32 -0.5, %v16245_v38 }
 0xc92   :  { %6278 = vmatpush1.msra.mxu0 %v16280_v45  ;;  %6441 = vmatprep.subr.mxu1 %v15943_v48 }
 0xc93   :  { %6279 = vmatprep.subr.mxu0 %v16287_v4  ;;  %6442 = vmatpush1.msra.mxu1 %v15953_v19 }
 0xc94   :  { %6280 = vmatpush1.msra.mxu0 %v16294_v10  ;;  %6443 = vmatprep.subr.mxu1 %v15965_v7  ;;  %v16337_v7 = vld [vmem:[%s17288_s2 + $0x560] sm:$0xff] }
 0xc95   :  { %v9920_v48 = vpop.eup %9919  ;;  %6281 = vmatprep.subr.mxu0 %v16301_v2  ;;  %6444 = vmatpush1.msra.mxu1 %v15977_v58  ;;  %v7710_v58 = vadd.f32 1.0, %v7709_v23  ;;  %v17838_v23 = vld [vmem:[#allocation43_spill] sm:$0xff] }
 0xc96   :  { %v7715_v19 = vadd.f32 1.0, %v9920_v48  ;;  %6282 = vmatpush1.msra.mxu0 %v16308_v17  ;;  %6445 = vmatprep.subr.mxu1 %v15989_v5  ;;  %v7712_v5 = vand.u32 2147483647, %v16245_v38 }
 0xc97   :  { %6283 = vmatprep.subr.mxu0 %v16316_v21  ;;  %6446 = vmatpush1.msra.mxu1 %v16001_v26  ;;  %v9292_v26 = vld [vmem:[%s17288_s2 + $0x658] sm:$0x1] }
 0xc98   :  { %9923 = vlog2.f32 %v7715_v19  ;;  %6284 = vmatpush1.msra.mxu0 %v16323_v16  ;;  %6447 = vmatprep.subr.mxu1 %v16013_v52  ;;  %vm7713_vm14 = vcmp.lt.f32.partialorder %v7712_v5, 0.0004427343  ;;  %v17840_v19 = vld [vmem:[#allocation45_spill] sm:$0xff]  ;;  %v17842_v5 = vld [vmem:[#allocation47_spill] sm:$0xff] }
 0xc99   :  { %6285 = vmatprep.subr.mxu0 %v16330_v13  ;;  %6448 = vmatpush1.msra.mxu1 %v16025_v53  ;;  %v7711_v53 = vmul.f32 %v16245_v38, %v7710_v58  ;;  %v17835_v38 = vld [vmem:[#allocation40_spill] sm:$0xff]  ;;  %v17841_v58 = vld [vmem:[#allocation46_spill] sm:$0xff] }
 0xc9a   :  { %6286 = vmatpush1.msra.mxu0 %v16337_v7  ;;  %6449 = vmatprep.subr.mxu1 %v16037_v6  ;;  %v7718_v6 = vmul.f32 -0.5, %v9920_v48 }
 0xc9b   :  { %v9922_v52 = vpop.eup %9921  ;;  %6287 = vmatprep.subr.mxu0 %v16344_v32  ;;  %6450 = vmatpush1.msra.mxu1 %v16049_v22 }
 0xc9c   :  { %v7708_v25 = vmul.f32 0.6931472, %v9922_v52  ;;  %6288 = vmatpush1.msra.mxu0 %v16352_v1  ;;  %6451 = vmatprep.subr.mxu1 %v16061_v41  ;;  %v7719_v41 = vadd.f32 1.0, %v7718_v6  ;;  %v17844_v52 = vld [vmem:[#allocation49_spill] sm:$0xff] }
 0xc9d   :  { %9294 = vmatprep.subr.msk.mxu0 %vm108_vm0, %v9292_v26  ;;  %6452 = vmatpush1.msra.mxu1 %v16073_v15  ;;  %v7721_v15 = vand.u32 2147483647, %v9920_v48  ;;  %v17843_v26 = vld [vmem:[#allocation48_spill] sm:$0xff]  ;;  %v17848_v6 = vld [vmem:[#allocation25_spill] sm:$0xff] }
 0xc9e   :  { %v7714_v62 = vsel %vm7713_vm14, %v7711_v53, %v7708_v25  ;;  %9295 = vmatpush2.msk.msra.mxu0 %vm108_vm0, %v9291_v59  ;;  %v7720_v18 = vmul.f32 %v9920_v48, %v7719_v41  ;;  %v17839_v48 = vld [vmem:[#allocation44_spill] sm:$0xff]  ;;  %v17845_v59 = vld [vmem:[#allocation50_spill] sm:$0xff]  ;;  %v17846_v25 = vld [vmem:[#allocation23_spill] sm:$0xff] }
 0xc9f   :  { %v7802_v22 = vsel %vm7594_vm15, %v16122_v54, %v7714_v62  ;;  %6322 = vmatmul.mubr.f32.vlgmr.msra.gmra.mxu0 %v16122_v54  ;;  %6532 = vmatprep.subr.mxu0 %v15721_v36  ;;  %vm7722_vm2 = vcmp.lt.f32.partialorder %v7721_v15, 0.0004427343  ;;  %v17847_v53 = vld [vmem:[#allocation24_spill] sm:$0xff]  ;;  %v17849_v62 = vld [vmem:[#allocation6_spill] sm:$0xff]  ;;  %v9371_v15 = vld [vmem:[%s17288_s2 + $0x548] sm:$0x1] }
 0xca0   :  { %7818 = vst [vmem:[#allocation3 + $0x30] sm:$0xff] %v7802_v22  ;;  %6533 = vmatpush1.msra.mxu0 %v15733_v27  ;;  %v17827_v27 = vld [vmem:[#allocation32_spill] sm:$0xff]  ;;  %v9334_v22 = vld [vmem:[%s17288_s2 + $0x438] sm:$0x1] }
 0xca1   :  { %6534 = vmatprep.subr.mxu0 %v15745_v37  ;;  %v9333_v41 = vld [vmem:[%s17288_s2 + $0x430] sm:$0x1]  ;;  %9335 = vmatprep.subr.msk.mxu1 %vm108_vm0, %v9334_v22  ;;  %v17852_v22 = vld [vmem:[#allocation27_spill] sm:$0xff] }
 0xca2   :  { %6535 = vmatpush1.msra.mxu0 %v15755_v61  ;;  %v17828_v61 = vld [vmem:[#allocation33_spill] sm:$0xff]  ;;  %9336 = vmatpush2.msk.msra.mxu1 %vm108_vm0, %v9333_v41 }
 0xca3   :  { %6536 = vmatprep.subr.mxu0 %v15767_v31  ;;  %v17829_v31 = vld [vmem:[#allocation34_spill] sm:$0xff] }
 0xca4   :  { %6537 = vmatpush1.msra.mxu0 %v15779_v40  ;;  %v17830_v40 = vld [vmem:[#allocation35_spill] sm:$0xff] }
 0xca5   :  { %v9924_v46 = vpop.eup %9923  ;;  %6538 = vmatprep.subr.mxu0 %v15794_v28  ;;  %v17831_v28 = vld [vmem:[#allocation36_spill] sm:$0xff] }
 0xca6   :  { %v7717_v35 = vmul.f32 0.6931472, %v9924_v46  ;;  %6539 = vmatpush1.msra.mxu0 %v15806_v29  ;;  %v17832_v29 = vld [vmem:[#allocation37_spill] sm:$0xff]  ;;  %v17850_v46 = vld [vmem:[#allocation7_spill] sm:$0xff] }
 0xca7   :  { %6540 = vmatprep.subr.mxu0 %v15818_v44  ;;  %v17833_v44 = vld [vmem:[#allocation38_spill] sm:$0xff]  ;;  %6655 = vmatprep.subr.mxu1 %v17850_v46 }
 0xca8   :  { %v7723_v36 = vsel %vm7722_vm2, %v7720_v18, %v7717_v35  ;;  %6541 = vmatpush1.msra.mxu0 %v17827_v27  ;;  %v9370_v35 = vld [vmem:[%s17288_s2 + $0x540] sm:$0x1] }
 0xca9   :  { %v7803_v37 = vsel %vm7595_vm3, %v16186_v9, %v7723_v36  ;;  %6542 = vmatprep.subr.mxu0 %v17828_v61  ;;  %v17837_v9 = vld [vmem:[#allocation42_spill] sm:$0xff]  ;;  %v6329_v61 = vld [vmem:[#allocation2 + $0x48] sm:$0xff] }
 0xcaa   :  { %7819 = vst.msk [vmem:[#allocation3 + $0x38] sm:$0xff] %vm83_vm1, %v7803_v37  ;;  %6543 = vmatpush1.msra.mxu0 %v17829_v31  ;;  %v6328_v36 = vld [vmem:[#allocation2 + $0x40] sm:$0xff] }
 0xcab   :  { %6544 = vmatprep.subr.mxu0 %v17830_v40 }
 0xcac   :  { %6545 = vmatpush1.msra.mxu0 %v17831_v28 }
 0xcad   :  { %6546 = vmatprep.subr.mxu0 %v17832_v29 }
 0xcae   :  { %6547 = vmatpush1.msra.mxu0 %v17833_v44  ;;  %v6344_v44 = vld [vmem:[#allocation2 + $0xc0] sm:$0xff] }
 0xcaf   :  { %6548 = vmatprep.subr.mxu0 %v17834_v8 }
 0xcb0   :  { %6549 = vmatpush1.msra.mxu0 %v17835_v38 }
 0xcb1   :  { %6550 = vmatprep.subr.mxu0 %v17836_v60  ;;  %v6345_v60 = vld [vmem:[#allocation2 + $0xc8] sm:$0xff] }
 0xcb2   :  { %6551 = vmatpush1.msra.mxu0 %v17837_v9 }
 0xcb3   :  { %6552 = vmatprep.subr.mxu0 %v17838_v23 }
 0xcb4   :  { %6553 = vmatpush1.msra.mxu0 %v17839_v48 }
 0xcb5   :  { %6554 = vmatprep.subr.mxu0 %v17840_v19 }
 0xcb6   :  { %6555 = vmatpush1.msra.mxu0 %v17841_v58 }
 0xcb7   :  { %6556 = vmatprep.subr.mxu0 %v17842_v5 }
 0xcb8   :  { %6557 = vmatpush1.msra.mxu0 %v17843_v26 }
 0xcb9   :  { %6558 = vmatprep.subr.mxu0 %v17844_v52  ;;  %v9293_v52 = vld [vmem:[%s17290_s4 + $0x2] sm:$0x3] }
 0xcba   :  { %6559 = vmatpush1.msra.mxu0 %v17845_v59  ;;  %v6248_v41 = vrot.slane %v9293_v52, %v17852_v22 }
 0xcbb   :  { %6560 = vmatprep.subr.mxu0 %v17846_v25  ;;  %v17851_v25 = vld [vmem:[#allocation26_spill] sm:$0xff] }
 0xcbc   :  { %6561 = vmatpush1.msra.mxu0 %v17847_v53  ;;  %v6244_v53 = vrot.slane %v9293_v52, %v17851_v25 }
 0xcbd   :  { %6562 = vmatprep.subr.mxu0 %v17848_v6 }
 0xcbe   :  { %6563 = vmatpush1.msra.mxu0 %v17849_v62 }
 0xcbf   :  { %9372 = vmatprep.subr.msk.mxu0 %vm108_vm0, %v9371_v15 }
 0xcc0   :  { %9373 = vmatpush2.msk.msra.mxu0 %vm108_vm0, %v9370_v35 }
 0xd3d   :  { %v6089_v18 = vpop.f32.mrf.mxu0  ;;  %v6200_v28 = vpop.f32.mrf.mxu1 }
 0xd3e   :  { %v6330_v27 = vadd.f32 %v6328_v36, %v6089_v18  ;;  %v6346_v38 = vadd.f32 %v6344_v44, %v6200_v28 }
 0xd3f   :  { %v6091_v37 = vpop.f32.mrf.mxu0  ;;  %v6202_v8 = vpop.f32.mrf.mxu1 }
 0xd40   :  { %v9297_v31 = vmul.f32 -1.442695, %v6330_v27  ;;  %v6331_v40 = vadd.f32 %v6329_v61, %v6091_v37  ;;  %v6347_v9 = vadd.f32 %v6345_v60, %v6202_v8  ;;  %v9299_v23 = vmul.f32 -1.442695, %v6346_v38 }
 0xd42   :  { %9925 = vpow2.f32 %v9297_v31  ;;  %v9298_v29 = vmul.f32 -1.442695, %v6331_v40  ;;  %v9300_v48 = vmul.f32 -1.442695, %v6347_v9  ;;  %v6360_v31 = vld [vmem:[#allocation2 + $0x140] sm:$0xff] }
 0xd44   :  { %9927 = vpow2.f32 %v9298_v29  ;;  %v6361_v29 = vld [vmem:[#allocation2 + $0x148] sm:$0xff] }
 0xd45   :  { %9929 = vpow2.f32 %v9299_v23 }
 0xd46   :  { %9931 = vpow2.f32 %v9300_v48 }
 0xd4f   :  { %v9926_v19 = vpop.eup %9925 }
 0xd50   :  { %v6338_v58 = vadd.f32 1.0, %v9926_v19 }
 0xd51   :  { %v9928_v5 = vpop.eup %9927 }
 0xd52   :  { %9933 = vrcp.f32 %v6338_v58  ;;  %v6339_v26 = vadd.f32 1.0, %v9928_v5  ;;  %v9930_v59 = vpop.eup %9929 }
 0xd53   :  { %v9932_v6 = vpop.eup %9931  ;;  %v6354_v62 = vadd.f32 1.0, %v9930_v59 }
 0xd54   :  { %9935 = vrcp.f32 %v6339_v26  ;;  %v6355_v35 = vadd.f32 1.0, %v9932_v6 }
 0xd55   :  { %9937 = vrcp.f32 %v6354_v62  ;;  %v16538_v62 = vld [vmem:[%s17288_s2 + $0x520] sm:$0xff] }
 0xd56   :  { %9939 = vrcp.f32 %v6355_v35  ;;  %v16562_v35 = vld [vmem:[%s17288_s2 + $0x510] sm:$0xff] }
 0xd5f   :  { %v9934_v15 = vpop.eup %9933  ;;  %v6323_v46 = vpop.f32.mrf.mxu0 }
 0xd60   :  { %v6324_v18 = vadd.f32 %v6323_v46, %v6244_v53  ;;  %v16557_v46 = vld [vmem:[%s17288_s2 + $0x3f8] sm:$0xff] }
 0xd61   :  { %v9936_v36 = vpop.eup %9935  ;;  %v6325_v27 = vpop.f32.mrf.mxu0 }
 0xd62   :  { %v6362_v37 = vmul.f32 %v9934_v15, %v6324_v18  ;;  %v6326_v61 = vadd.f32 %v6325_v27, %v6248_v41  ;;  %v9938_v8 = vpop.eup %9937  ;;  %v16545_v41 = vld [vmem:[%s17288_s2 + $0x400] sm:$0xff]  ;;  %v16550_v15 = vld [vmem:[%s17288_s2 + $0x518] sm:$0xff]  ;;  %v16572_v18 = vld [vmem:[%s17288_s2 + $0x3f0] sm:$0xff] }
 0xd63   :  { %v9940_v38 = vpop.eup %9939  ;;  %v6368_v60 = vsub.f32 1.0, %v9938_v8  ;;  %v6372_v19 = vmul.f32 %v9938_v8, %v16122_v54  ;;  %v16584_v27 = vld [vmem:[%s17288_s2 + $0x3e8] sm:$0xff] }
 0xd64   :  { %v6364_v40 = vadd.f32 %v6362_v37, %v6360_v31  ;;  %v6363_v28 = vmul.f32 %v9936_v36, %v6326_v61  ;;  %v6369_v23 = vsub.f32 1.0, %v9940_v38  ;;  %v6373_v26 = vmul.f32 %v9940_v38, %v16124_v3  ;;  %v16577_v36 = vld [vmem:[%s17288_s2 + $0x508] sm:$0xff]  ;;  %v16589_v37 = vld [vmem:[%s17288_s2 + $0x500] sm:$0xff]  ;;  %v16601_v31 = vld [vmem:[%s17288_s2 + $0x4f8] sm:$0xff] }
 0xd65   :  { %v16596_v61 = vld [vmem:[%s17288_s2 + $0x3e0] sm:$0xff]  ;;  %v16632_v8 = vld [vmem:[%s17288_s2 + $0x3c8] sm:$0xff] }
 0xd66   :  { %9941 = vtanh.f32 %v6364_v40  ;;  %v6365_v44 = vadd.f32 %v6363_v28, %v6361_v29  ;;  %v16608_v40 = vld [vmem:[%s17288_s2 + $0x3d8] sm:$0xff]  ;;  %v16613_v28 = vld [vmem:[%s17288_s2 + $0x4f0] sm:$0xff]  ;;  %v16637_v38 = vld [vmem:[%s17288_s2 + $0x4e0] sm:$0xff] }
 0xd67   :  { %17853 = vst [vmem:[#allocation8_spill] sm:$0xff] %v16613_v28  ;;  %v16620_v29 = vld [vmem:[%s17288_s2 + $0x3d0] sm:$0xff]  ;;  %17855 = vst [vmem:[#allocation10_spill] sm:$0xff] %v16637_v38 }
 0xd68   :  { %9943 = vtanh.f32 %v6365_v44  ;;  %v16625_v44 = vld [vmem:[%s17288_s2 + $0x4e8] sm:$0xff] }
 0xd69   :  { %17854 = vst [vmem:[#allocation9_spill] sm:$0xff] %v16625_v44 }
 0xd73   :  { %v9942_v9 = vpop.eup %9941 }
 0xd74   :  { %v6370_v48 = vmul.f32 %v9942_v9, %v6368_v60  ;;  %v16644_v60 = vld [vmem:[%s17288_s2 + $0x3c0] sm:$0xff]  ;;  %v16649_v9 = vld [vmem:[%s17288_s2 + $0x4d8] sm:$0xff] }
 0xd75   :  { %v9944_v58 = vpop.eup %9943  ;;  %17856 = vst [vmem:[#allocation11_spill] sm:$0xff] %v16649_v9 }
 0xd76   :  { %v6371_v5 = vmul.f32 %v9944_v58, %v6369_v23  ;;  %v16433_v52 = vadd.f32 %v6372_v19, %v6370_v48  ;;  %v16656_v23 = vld [vmem:[%s17288_s2 + $0x3b8] sm:$0xff]  ;;  %v16661_v48 = vld [vmem:[%s17288_s2 + $0x4d0] sm:$0xff]  ;;  %v16673_v58 = vld [vmem:[%s17288_s2 + $0x4c8] sm:$0xff] }
 0xd77   :  { %17857 = vst [vmem:[#allocation14_spill] sm:$0xff] %v16661_v48  ;;  %v16668_v19 = vld [vmem:[%s17288_s2 + $0x3b0] sm:$0xff]  ;;  %17858 = vst [vmem:[#allocation12_spill] sm:$0xff] %v16673_v58 }
 0xd78   :  { %v16435_v59 = vadd.f32 %v6373_v26, %v6371_v5  ;;  %v7612_v53 = vmin.f32 %v16433_v52, 20.0  ;;  %vm7596_vm5 = vcmp.gt.f32.partialorder %v16433_v52, 20.0  ;;  %v16680_v5 = vld [vmem:[%s17288_s2 + $0x3a8] sm:$0xff]  ;;  %v16685_v26 = vld [vmem:[%s17288_s2 + $0x4c0] sm:$0xff] }
 0xd79   :  { %17859 = vst [vmem:[#allocation15_spill] sm:$0xff] %v16685_v26 }
 0xd7a   :  { %6377 = vst.msk [vmem:[#allocation3 + $0x48] sm:$0xff] %vm83_vm1, %v16435_v59  ;;  %9337 = vmatprep.mubr.msk.f32.mxu1 %vm83_vm1, %v16435_v59  ;;  %9374 = vmatprep.mubr.msk.f32.mxu0 %vm83_vm1, %v16435_v59  ;;  %v7636_v54 = vmul.f32 1.442695, %v7612_v53  ;;  %v16692_v53 = vld [vmem:[%s17288_s2 + $0x3a0] sm:$0xff] }
 0xd7b   :  { %6486 = vmatmul.mubr.f32.vlgmr.msra.gmra.mxu1 %v16433_v52  ;;  %6597 = vmatmul.mubr.f32.vlgmr.msra.gmra.mxu0 %v16433_v52 }
 0xd7c   :  { %9945 = vpow2.f32 %v7636_v54  ;;  %6656 = vmatpush1.msra.mxu1 %v16130_v50  ;;  %9412 = vmatprep.mubr.msk.f32.mxu1 %vm83_vm1, %v16435_v59  ;;  %v16697_v54 = vld [vmem:[%s17288_s2 + $0x4b8] sm:$0xff] }
 0xd7d   :  { %6657 = vmatprep.subr.mxu1 %v16141_v55  ;;  %17860 = vst [vmem:[#allocation13_spill] sm:$0xff] %v16697_v54 }
 0xd7e   :  { %6658 = vmatpush1.msra.mxu1 %v16148_v47 }
 0xd7f   :  { %6659 = vmatprep.subr.mxu1 %v16156_v43 }
 0xd80   :  { %6660 = vmatpush1.msra.mxu1 %v16162_v56 }
 0xd81   :  { %v7581_v3 = vld [vmem:[#allocation3 + $0x48] sm:$0xff]  ;;  %6661 = vmatprep.subr.mxu1 %v16169_v57 }
 0xd82   :  { %v7613_v6 = vmin.f32 %v7581_v3, 20.0  ;;  %6662 = vmatpush1.msra.mxu1 %v16176_v51  ;;  %vm7597_vm7 = vcmp.gt.f32.partialorder %v7581_v3, 20.0 }
 0xd83   :  { %6663 = vmatprep.subr.mxu1 %v16183_v49 }
 0xd84   :  { %v7638_v50 = vmul.f32 1.442695, %v7613_v6  ;;  %6664 = vmatpush1.msra.mxu1 %v16192_v24  ;;  %v9408_v24 = vld [vmem:[%s17288_s2 + $0x658] sm:$0x1]  ;;  %v16709_v6 = vld [vmem:[%s17288_s2 + $0x4b0] sm:$0xff] }
 0xd85   :  { %6665 = vmatprep.subr.mxu1 %v16200_v30  ;;  %17861 = vst [vmem:[#allocation16_spill] sm:$0xff] %v16709_v6 }
 0xd86   :  { %9947 = vpow2.f32 %v7638_v50  ;;  %6666 = vmatpush1.msra.mxu1 %v16207_v20  ;;  %v9407_v20 = vld [vmem:[%s17288_s2 + $0x650] sm:$0x1] }
 0xd87   :  { %6667 = vmatprep.subr.mxu1 %v16214_v14  ;;  %v16714_v50 = vld [vmem:[%s17288_s2 + $0x390] sm:$0xff] }
 0xd88   :  { %6668 = vmatpush1.msra.mxu1 %v16221_v42 }
 0xd89   :  { %v9946_v55 = vpop.eup %9945  ;;  %6669 = vmatprep.subr.mxu1 %v16228_v12 }
 0xd8a   :  { %v7724_v47 = vadd.f32 1.0, %v9946_v55  ;;  %6670 = vmatpush1.msra.mxu1 %v16235_v11  ;;  %v7727_v43 = vmul.f32 -0.5, %v9946_v55  ;;  %v7730_v49 = vand.u32 2147483647, %v9946_v55 }
 0xd8b   :  { %6671 = vmatprep.subr.mxu1 %v16242_v0 }
 0xd8c   :  { %9949 = vlog2.f32 %v7724_v47  ;;  %6672 = vmatpush1.msra.mxu1 %v16251_v39  ;;  %v7728_v51 = vadd.f32 1.0, %v7727_v43  ;;  %vm7731_vm4 = vcmp.lt.f32.partialorder %v7730_v49, 0.0004427343  ;;  %v16726_v47 = vld [vmem:[%s17288_s2 + $0x388] sm:$0xff]  ;;  %v16731_v43 = vld [vmem:[%s17288_s2 + $0x4a0] sm:$0xff]  ;;  %v16753_v49 = vld [vmem:[%s17288_s2 + $0x490] sm:$0xff] }
 0xd8d   :  { %6673 = vmatprep.subr.mxu1 %v16259_v63  ;;  %17863 = vst [vmem:[#allocation18_spill] sm:$0xff] %v16731_v43  ;;  %17865 = vst [vmem:[#allocation20_spill] sm:$0xff] %v16753_v49 }
 0xd8e   :  { %6674 = vmatpush1.msra.mxu1 %v16266_v33  ;;  %v7729_v42 = vmul.f32 %v9946_v55, %v7728_v51  ;;  %v16719_v55 = vld [vmem:[%s17288_s2 + $0x4a8] sm:$0xff]  ;;  %v16748_v51 = vld [vmem:[%s17288_s2 + $0x378] sm:$0xff] }
 0xd8f   :  { %6675 = vmatprep.subr.mxu1 %v16273_v34  ;;  %17862 = vst [vmem:[#allocation17_spill] sm:$0xff] %v16719_v55 }
 0xd90   :  { %6676 = vmatpush1.msra.mxu1 %v16280_v45 }
 0xd91   :  { %6677 = vmatprep.subr.mxu1 %v16287_v4 }
 0xd92   :  { %6678 = vmatpush1.msra.mxu1 %v16294_v10 }
 0xd93   :  { %v9948_v56 = vpop.eup %9947  ;;  %6679 = vmatprep.subr.mxu1 %v16301_v2  ;;  %v16494_v2 = vld [vmem:[%s17288_s2 + $0x428] sm:$0xff] }
 0xd94   :  { %v7733_v57 = vadd.f32 1.0, %v9948_v56  ;;  %6680 = vmatpush1.msra.mxu1 %v16308_v17  ;;  %v7736_v12 = vmul.f32 -0.5, %v9948_v56  ;;  %v7739_v63 = vand.u32 2147483647, %v9948_v56  ;;  %v16499_v17 = vld [vmem:[%s17288_s2 + $0x420] sm:$0xff]  ;;  %6819 = vmatprep.subr.mxu0 %v16494_v2 }
 0xd95   :  { %6681 = vmatprep.subr.mxu1 %v16316_v21  ;;  %v16504_v21 = vld [vmem:[%s17288_s2 + $0x538] sm:$0xff]  ;;  %6820 = vmatpush1.msra.mxu0 %v16499_v17 }
 0xd96   :  { %9951 = vlog2.f32 %v7733_v57  ;;  %6682 = vmatpush1.msra.mxu1 %v16323_v16  ;;  %v7737_v39 = vadd.f32 1.0, %v7736_v12  ;;  %vm7740_vm6 = vcmp.lt.f32.partialorder %v7739_v63, 0.0004427343  ;;  %v16511_v16 = vld [vmem:[%s17288_s2 + $0x418] sm:$0xff]  ;;  %v16813_v63 = vld [vmem:[%s17288_s2 + $0x468] sm:$0xff] }
 0xd97   :  { %6683 = vmatprep.subr.mxu1 %v16330_v13  ;;  %v16516_v13 = vld [vmem:[%s17288_s2 + $0x530] sm:$0xff]  ;;  %6821 = vmatprep.subr.mxu0 %v16511_v16  ;;  %v16743_v57 = vld [vmem:[%s17288_s2 + $0x498] sm:$0xff]  ;;  %17870 = vst [vmem:[#allocation30_spill] sm:$0xff] %v16813_v63 }
 0xd98   :  { %6684 = vmatpush1.msra.mxu1 %v16337_v7  ;;  %v7738_v45 = vmul.f32 %v9948_v56, %v7737_v39  ;;  %v16521_v7 = vld [vmem:[%s17288_s2 + $0x410] sm:$0xff]  ;;  %v16736_v56 = vld [vmem:[%s17288_s2 + $0x380] sm:$0xff]  ;;  %17864 = vst [vmem:[#allocation19_spill] sm:$0xff] %v16743_v57  ;;  %v16789_v12 = vld [vmem:[%s17288_s2 + $0x478] sm:$0xff] }
 0xd99   :  { %v9950_v30 = vpop.eup %9949  ;;  %6685 = vmatprep.subr.mxu1 %v16344_v32  ;;  %v16528_v32 = vld [vmem:[%s17288_s2 + $0x528] sm:$0xff]  ;;  %6822 = vmatpush1.msra.mxu0 %v16521_v7  ;;  %17868 = vst [vmem:[#allocation28_spill] sm:$0xff] %v16789_v12  ;;  %v16808_v39 = vld [vmem:[%s17288_s2 + $0x350] sm:$0xff] }
 0xd9a   :  { %v7726_v14 = vmul.f32 0.6931472, %v9950_v30  ;;  %6686 = vmatpush1.msra.mxu1 %v16352_v1  ;;  %v16533_v1 = vld [vmem:[%s17288_s2 + $0x408] sm:$0xff] }
 0xd9b   :  { %9410 = vmatprep.subr.msk.mxu1 %vm108_vm0, %v9408_v24  ;;  %6823 = vmatprep.subr.mxu0 %v16533_v1  ;;  %v16760_v24 = vld [vmem:[%s17288_s2 + $0x370] sm:$0xff]  ;;  %v16765_v30 = vld [vmem:[%s17288_s2 + $0x488] sm:$0xff] }
 0xd9c   :  { %v7732_v11 = vsel %vm7731_vm4, %v7729_v42, %v7726_v14  ;;  %9411 = vmatpush2.msk.msra.mxu1 %vm108_vm0, %v9407_v20  ;;  %6824 = vmatpush1.msra.mxu0 %v16545_v41  ;;  %17866 = vst [vmem:[#allocation21_spill] sm:$0xff] %v16765_v30  ;;  %v16772_v20 = vld [vmem:[%s17288_s2 + $0x368] sm:$0xff]  ;;  %v16777_v14 = vld [vmem:[%s17288_s2 + $0x480] sm:$0xff] }
 0xd9d   :  { %v7804_v0 = vsel %vm7596_vm5, %v16433_v52, %v7732_v11  ;;  %6720 = vmatmul.mubr.f32.vlgmr.msra.gmra.mxu1 %v16433_v52  ;;  %6930 = vmatprep.subr.mxu1 %v16504_v21  ;;  %17867 = vst [vmem:[#allocation22_spill] sm:$0xff] %v16777_v14  ;;  %v16784_v42 = vld [vmem:[%s17288_s2 + $0x360] sm:$0xff]  ;;  %v16796_v11 = vld [vmem:[%s17288_s2 + $0x358] sm:$0xff] }
 0xd9e   :  { %7820 = vst [vmem:[#allocation3 + $0x40] sm:$0xff] %v7804_v0  ;;  %6931 = vmatpush1.msra.mxu1 %v16516_v13  ;;  %6825 = vmatprep.subr.mxu0 %v16557_v46  ;;  %v16801_v0 = vld [vmem:[%s17288_s2 + $0x470] sm:$0xff] }
 0xd9f   :  { %6932 = vmatprep.subr.mxu1 %v16528_v32  ;;  %6826 = vmatpush1.msra.mxu0 %v16572_v18  ;;  %17869 = vst [vmem:[#allocation29_spill] sm:$0xff] %v16801_v0 }
 0xda0   :  { %6933 = vmatpush1.msra.mxu1 %v16538_v62  ;;  %6827 = vmatprep.subr.mxu0 %v16584_v27 }
 0xda1   :  { %6934 = vmatprep.subr.mxu1 %v16550_v15  ;;  %6828 = vmatpush1.msra.mxu0 %v16596_v61 }
 0xda2   :  { %6935 = vmatpush1.msra.mxu1 %v16562_v35  ;;  %6829 = vmatprep.subr.mxu0 %v16608_v40 }
 0xda3   :  { %v9952_v33 = vpop.eup %9951  ;;  %6936 = vmatprep.subr.mxu1 %v16577_v36  ;;  %6830 = vmatpush1.msra.mxu0 %v16620_v29 }
 0xda4   :  { %v7735_v34 = vmul.f32 0.6931472, %v9952_v33  ;;  %6937 = vmatpush1.msra.mxu1 %v16589_v37  ;;  %6831 = vmatprep.subr.mxu0 %v16632_v8  ;;  %v16820_v33 = vld [vmem:[%s17288_s2 + $0x348] sm:$0xff] }
 0xda5   :  { %6938 = vmatprep.subr.mxu1 %v16601_v31  ;;  %6832 = vmatpush1.msra.mxu0 %v16644_v60 }
 0xda6   :  { %v7741_v4 = vsel %vm7740_vm6, %v7738_v45, %v7735_v34  ;;  %6939 = vmatpush1.msra.mxu1 %v16613_v28  ;;  %6833 = vmatprep.subr.mxu0 %v16656_v23  ;;  %v16825_v34 = vld [vmem:[%s17288_s2 + $0x460] sm:$0xff] }
 0xda7   :  { %v7805_v10 = vsel %vm7597_vm7, %v7581_v3, %v7741_v4  ;;  %6940 = vmatprep.subr.mxu1 %v16625_v44  ;;  %6834 = vmatpush1.msra.mxu0 %v16668_v19  ;;  %v16702_v3 = vld [vmem:[%s17288_s2 + $0x398] sm:$0xff]  ;;  %17871 = vst [vmem:[#allocation31_spill] sm:$0xff] %v16825_v34  ;;  %v16832_v45 = vld [vmem:[%s17288_s2 + $0x340] sm:$0xff] }
 0xda8   :  { %7821 = vst.msk [vmem:[#allocation3 + $0x48] sm:$0xff] %vm83_vm1, %v7805_v10  ;;  %6941 = vmatpush1.msra.mxu1 %v16637_v38  ;;  %6835 = vmatprep.subr.mxu0 %v16680_v5  ;;  %v16837_v4 = vld [vmem:[%s17288_s2 + $0x458] sm:$0xff] }
 0xda9   :  { %6942 = vmatprep.subr.mxu1 %v16649_v9  ;;  %6836 = vmatpush1.msra.mxu0 %v16692_v53  ;;  %17872 = vst [vmem:[#allocation32_spill] sm:$0xff] %v16837_v4  ;;  %v16844_v10 = vld [vmem:[%s17288_s2 + $0x338] sm:$0xff] }
 0xdaa   :  { %6943 = vmatpush1.msra.mxu1 %v16661_v48  ;;  %6837 = vmatprep.subr.mxu0 %v16702_v3  ;;  %v6743_v48 = vld [vmem:[#allocation2 + $0xd8] sm:$0xff] }
 0xdab   :  { %6944 = vmatprep.subr.mxu1 %v16673_v58  ;;  %6838 = vmatpush1.msra.mxu0 %v16714_v50 }
 0xdac   :  { %6945 = vmatpush1.msra.mxu1 %v16685_v26  ;;  %6839 = vmatprep.subr.mxu0 %v16726_v47 }
 0xdad   :  { %6946 = vmatprep.subr.mxu1 %v16697_v54  ;;  %6840 = vmatpush1.msra.mxu0 %v16736_v56  ;;  %v6742_v54 = vld [vmem:[#allocation2 + $0xd0] sm:$0xff] }
 0xdae   :  { %6947 = vmatpush1.msra.mxu1 %v16709_v6  ;;  %6841 = vmatprep.subr.mxu0 %v16748_v51 }
 0xdaf   :  { %6948 = vmatprep.subr.mxu1 %v16719_v55  ;;  %6842 = vmatpush1.msra.mxu0 %v16760_v24 }
 0xdb0   :  { %6949 = vmatpush1.msra.mxu1 %v16731_v43  ;;  %6843 = vmatprep.subr.mxu0 %v16772_v20 }
 0xdb1   :  { %6950 = vmatprep.subr.mxu1 %v16743_v57  ;;  %6844 = vmatpush1.msra.mxu0 %v16784_v42 }
 0xdb2   :  { %6951 = vmatpush1.msra.mxu1 %v16753_v49  ;;  %6845 = vmatprep.subr.mxu0 %v16796_v11  ;;  %v16893_v49 = vld [vmem:[%s17288_s2 + $0x648] sm:$0xff] }
 0xdb3   :  { %6952 = vmatprep.subr.mxu1 %v16765_v30  ;;  %6846 = vmatpush1.msra.mxu0 %v16808_v39  ;;  %v9449_v30 = vld [vmem:[%s17288_s2 + $0x430] sm:$0x1]  ;;  %17876 = vst [vmem:[#allocation36_spill] sm:$0xff] %v16893_v49 }
 0xdb4   :  { %6953 = vmatpush1.msra.mxu1 %v16777_v14  ;;  %6847 = vmatprep.subr.mxu0 %v16820_v33  ;;  %v9450_v14 = vld [vmem:[%s17288_s2 + $0x438] sm:$0x1] }
 0xdb5   :  { %6954 = vmatprep.subr.mxu1 %v16789_v12  ;;  %v16856_v12 = vld [vmem:[%s17288_s2 + $0x330] sm:$0xff]  ;;  %6848 = vmatpush1.msra.mxu0 %v16832_v45 }
 0xdb6   :  { %6955 = vmatpush1.msra.mxu1 %v16801_v0  ;;  %v16849_v0 = vld [vmem:[%s17288_s2 + $0x450] sm:$0xff]  ;;  %6849 = vmatprep.subr.mxu0 %v16844_v10 }
 0xdb7   :  { %6956 = vmatprep.subr.mxu1 %v16813_v63  ;;  %17873 = vst [vmem:[#allocation33_spill] sm:$0xff] %v16849_v0  ;;  %v16861_v63 = vld [vmem:[%s17288_s2 + $0x448] sm:$0xff]  ;;  %6850 = vmatpush1.msra.mxu0 %v16856_v12 }
 0xdb8   :  { %6957 = vmatpush1.msra.mxu1 %v16825_v34  ;;  %17874 = vst [vmem:[#allocation34_spill] sm:$0xff] %v16861_v63  ;;  %v16871_v34 = vld [vmem:[%s17288_s2 + $0x440] sm:$0xff]  ;;  %9451 = vmatprep.subr.msk.mxu0 %vm108_vm0, %v9450_v14 }
 0xdb9   :  { %6958 = vmatprep.subr.mxu1 %v16837_v4  ;;  %17875 = vst [vmem:[#allocation35_spill] sm:$0xff] %v16871_v34  ;;  %v9487_v4 = vld [vmem:[%s17288_s2 + $0x548] sm:$0x1]  ;;  %9452 = vmatpush2.msk.msra.mxu0 %vm108_vm0, %v9449_v30 }
 0xdba   :  { %6959 = vmatpush1.msra.mxu1 %v16849_v0  ;;  %v9486_v0 = vld [vmem:[%s17288_s2 + $0x540] sm:$0x1]  ;;  %7053 = vmatprep.subr.mxu0 %v16893_v49 }
 0xdbb   :  { %6960 = vmatprep.subr.mxu1 %v16861_v63 }
 0xdbc   :  { %6961 = vmatpush1.msra.mxu1 %v16871_v34  ;;  %v6726_v34 = vld [vmem:[#allocation2 + $0x50] sm:$0xff] }
 0xdbd   :  { %9488 = vmatprep.subr.msk.mxu1 %vm108_vm0, %v9487_v4  ;;  %v6727_v4 = vld [vmem:[#allocation2 + $0x58] sm:$0xff] }
 0xdbe   :  { %9489 = vmatpush2.msk.msra.mxu1 %vm108_vm0, %v9486_v0 }
 0xdbf   :  { %7217 = vmatprep.subr.mxu1 %v16494_v2 }
 0xe3b   :  { %v6487_v14 = vpop.f32.mrf.mxu1  ;;  %v6598_v55 = vpop.f32.mrf.mxu0 }
 0xe3c   :  { %v6728_v30 = vadd.f32 %v6726_v34, %v6487_v14  ;;  %v6744_v58 = vadd.f32 %v6742_v54, %v6598_v55 }
 0xe3d   :  { %v6489_v63 = vpop.f32.mrf.mxu1  ;;  %v6600_v26 = vpop.f32.mrf.mxu0 }
 0xe3e   :  { %v9413_v57 = vmul.f32 -1.442695, %v6728_v30  ;;  %v6729_v43 = vadd.f32 %v6727_v4, %v6489_v63  ;;  %v6745_v0 = vadd.f32 %v6743_v48, %v6600_v26  ;;  %v9415_v9 = vmul.f32 -1.442695, %v6744_v58 }
 0xe40   :  { %9953 = vpow2.f32 %v9413_v57  ;;  %v9414_v6 = vmul.f32 -1.442695, %v6729_v43  ;;  %v9416_v49 = vmul.f32 -1.442695, %v6745_v0  ;;  %v9409_v43 = vld [vmem:[%s17290_s4 + $0x2] sm:$0x3] }
 0xe41   :  { %v6642_v57 = vrot.slane %v9409_v43, %v17851_v25  ;;  %v6646_v48 = vrot.slane %v9409_v43, %v17852_v22  ;;  %v6758_v0 = vld [vmem:[#allocation2 + $0x150] sm:$0xff] }
 0xe42   :  { %9955 = vpow2.f32 %v9414_v6 }
 0xe43   :  { %9957 = vpow2.f32 %v9415_v9 }
 0xe44   :  { %9959 = vpow2.f32 %v9416_v49 }
 0xe4d   :  { %v9954_v2 = vpop.eup %9953 }
 0xe4e   :  { %v6736_v38 = vadd.f32 1.0, %v9954_v2 }
 0xe4f   :  { %v9956_v34 = vpop.eup %9955 }
 0xe50   :  { %9961 = vrcp.f32 %v6736_v38  ;;  %v6737_v14 = vadd.f32 1.0, %v9956_v34  ;;  %v9958_v6 = vpop.eup %9957 }
 0xe51   :  { %v9960_v54 = vpop.eup %9959  ;;  %v6752_v55 = vadd.f32 1.0, %v9958_v6 }
 0xe52   :  { %9963 = vrcp.f32 %v6737_v14  ;;  %v6753_v26 = vadd.f32 1.0, %v9960_v54  ;;  %v6759_v14 = vld [vmem:[#allocation2 + $0x158] sm:$0xff] }
 0xe53   :  { %9965 = vrcp.f32 %v6752_v55 }
 0xe54   :  { %9967 = vrcp.f32 %v6753_v26 }
 0xe5d   :  { %v9962_v58 = vpop.eup %9961  ;;  %v6721_v9 = vpop.f32.mrf.mxu1 }
 0xe5e   :  { %v6722_v63 = vadd.f32 %v6721_v9, %v6642_v57 }
 0xe5f   :  { %v9964_v49 = vpop.eup %9963  ;;  %v6723_v30 = vpop.f32.mrf.mxu1 }
 0xe60   :  { %v6760_v38 = vmul.f32 %v9962_v58, %v6722_v63  ;;  %v6724_v4 = vadd.f32 %v6723_v30, %v6646_v48  ;;  %v9966_v6 = vpop.eup %9965  ;;  %v16959_v30 = vld [vmem:[%s17288_s2 + $0x610] sm:$0xff] }
 0xe61   :  { %v9968_v44 = vpop.eup %9967  ;;  %v6766_v43 = vsub.f32 1.0, %v9966_v6  ;;  %v6770_v57 = vmul.f32 %v9966_v6, %v16433_v52  ;;  %v16924_v52 = vld [vmem:[%s17288_s2 + $0x638] sm:$0xff]  ;;  %v17106_v6 = vld [vmem:[%s17288_s2 + $0x570] sm:$0xff] }
 0xe62   :  { %v6762_v2 = vadd.f32 %v6760_v38, %v6758_v0  ;;  %v6761_v34 = vmul.f32 %v9964_v49, %v6724_v4  ;;  %v6767_v28 = vsub.f32 1.0, %v9968_v44  ;;  %v6771_v48 = vmul.f32 %v9968_v44, %v16435_v59  ;;  %v16931_v59 = vld [vmem:[%s17288_s2 + $0x630] sm:$0xff]  ;;  %v16945_v44 = vld [vmem:[%s17288_s2 + $0x620] sm:$0xff]  ;;  %v16952_v49 = vld [vmem:[%s17288_s2 + $0x618] sm:$0xff] }
 0xe63   :  { %v16983_v4 = vld [vmem:[%s17288_s2 + $0x5f8] sm:$0xff]  ;;  %v16997_v0 = vld [vmem:[%s17288_s2 + $0x5e8] sm:$0xff] }
 0xe64   :  { %9969 = vtanh.f32 %v6762_v2  ;;  %v6763_v25 = vadd.f32 %v6761_v34, %v6759_v14  ;;  %v17042_v34 = vld [vmem:[%s17288_s2 + $0x5b8] sm:$0xff] }
 0xe65   :  { %v17099_v14 = vld [vmem:[%s17288_s2 + $0x578] sm:$0xff] }
 0xe66   :  { %9971 = vtanh.f32 %v6763_v25  ;;  %v16913_v25 = vld [vmem:[%s17288_s2 + $0x640] sm:$0xff] }
 0xe71   :  { %v9970_v22 = vpop.eup %9969 }
 0xe72   :  { %v6768_v54 = vmul.f32 %v9970_v22, %v6766_v43  ;;  %v17113_v43 = vld [vmem:[%s17288_s2 + $0x568] sm:$0xff] }
 0xe73   :  { %v9972_v9 = vpop.eup %9971 }
 0xe74   :  { %v6769_v55 = vmul.f32 %v9972_v9, %v6767_v28  ;;  %v16905_v58 = vadd.f32 %v6770_v57, %v6768_v54  ;;  %v16939_v28 = vld [vmem:[%s17288_s2 + $0x628] sm:$0xff]  ;;  %v17127_v54 = vld [vmem:[%s17288_s2 + $0x558] sm:$0xff]  ;;  %v17135_v57 = vld [vmem:[%s17288_s2 + $0x550] sm:$0xff] }
 0xe75   :  { %v9523_v9 = vld [vmem:[%s17288_s2 + $0x650] sm:$0x1] }
 0xe76   :  { %v16907_v26 = vadd.f32 %v6771_v48, %v6769_v55  ;;  %v7614_v63 = vmin.f32 %v16905_v58, 20.0  ;;  %vm7598_vm9 = vcmp.gt.f32.partialorder %v16905_v58, 20.0 }
 0xe78   :  { %6775 = vst.msk [vmem:[#allocation3 + $0x58] sm:$0xff] %vm83_vm1, %v16907_v26  ;;  %9453 = vmatprep.mubr.msk.f32.mxu0 %vm83_vm1, %v16907_v26  ;;  %9490 = vmatprep.mubr.msk.f32.mxu1 %vm83_vm1, %v16907_v26  ;;  %v7640_v22 = vmul.f32 1.442695, %v7614_v63 }
 0xe79   :  { %6884 = vmatmul.mubr.f32.vlgmr.msra.gmra.mxu0 %v16905_v58  ;;  %6995 = vmatmul.mubr.f32.vlgmr.msra.gmra.mxu1 %v16905_v58 }
 0xe7a   :  { %9973 = vpow2.f32 %v7640_v22  ;;  %7054 = vmatpush1.msra.mxu0 %v16913_v25  ;;  %9528 = vmatprep.mubr.msk.f32.mxu0 %vm83_vm1, %v16907_v26 }
 0xe7b   :  { %7055 = vmatprep.subr.mxu0 %v16924_v52  ;;  %7218 = vmatpush1.msra.mxu1 %v16499_v17  ;;  %v16966_v17 = vld [vmem:[%s17288_s2 + $0x608] sm:$0xff] }
 0xe7c   :  { %7056 = vmatpush1.msra.mxu0 %v16931_v59  ;;  %7219 = vmatprep.subr.mxu1 %v16511_v16  ;;  %v16975_v16 = vld [vmem:[%s17288_s2 + $0x600] sm:$0xff] }
 0xe7d   :  { %7057 = vmatprep.subr.mxu0 %v16939_v28  ;;  %7220 = vmatpush1.msra.mxu1 %v16521_v7 }
 0xe7e   :  { %7058 = vmatpush1.msra.mxu0 %v16945_v44  ;;  %7221 = vmatprep.subr.mxu1 %v16533_v1  ;;  %v16990_v1 = vld [vmem:[%s17288_s2 + $0x5f0] sm:$0xff] }
 0xe7f   :  { %v16969_v38 = vld [vmem:[#allocation3 + $0x58] sm:$0xff]  ;;  %7059 = vmatprep.subr.mxu0 %v16952_v49  ;;  %7222 = vmatpush1.msra.mxu1 %v16545_v41 }
 0xe80   :  { %v7615_v7 = vmin.f32 %v16969_v38, 20.0  ;;  %7060 = vmatpush1.msra.mxu0 %v16959_v30  ;;  %7223 = vmatprep.subr.mxu1 %v16557_v46  ;;  %v17004_v46 = vld [vmem:[%s17288_s2 + $0x5e0] sm:$0xff]  ;;  %vm7599_vm11 = vcmp.gt.f32.partialorder %v16969_v38, 20.0 }
 0xe81   :  { %7061 = vmatprep.subr.mxu0 %v16966_v17  ;;  %7224 = vmatpush1.msra.mxu1 %v16572_v18  ;;  %v17011_v18 = vld [vmem:[%s17288_s2 + $0x5d8] sm:$0xff] }
 0xe82   :  { %v7642_v41 = vmul.f32 1.442695, %v7615_v7  ;;  %7062 = vmatpush1.msra.mxu0 %v16975_v16  ;;  %7225 = vmatprep.subr.mxu1 %v16584_v27  ;;  %v17018_v27 = vld [vmem:[%s17288_s2 + $0x5d0] sm:$0xff] }
 0xe83   :  { %7063 = vmatprep.subr.mxu0 %v16983_v4  ;;  %7226 = vmatpush1.msra.mxu1 %v16596_v61  ;;  %v17025_v61 = vld [vmem:[%s17288_s2 + $0x5c8] sm:$0xff] }
 0xe84   :  { %9975 = vpow2.f32 %v7642_v41  ;;  %7064 = vmatpush1.msra.mxu0 %v16990_v1  ;;  %7227 = vmatprep.subr.mxu1 %v16608_v40  ;;  %v17034_v40 = vld [vmem:[%s17288_s2 + $0x5c0] sm:$0xff]  ;;  %v17884_v41 = vld [vmem:[#allocation13_spill] sm:$0xff] }
 0xe85   :  { %7065 = vmatprep.subr.mxu0 %v16997_v0  ;;  %7228 = vmatpush1.msra.mxu1 %v16620_v29 }
 0xe86   :  { %7066 = vmatpush1.msra.mxu0 %v17004_v46  ;;  %7229 = vmatprep.subr.mxu1 %v16632_v8  ;;  %v17049_v8 = vld [vmem:[%s17288_s2 + $0x5b0] sm:$0xff] }
 0xe87   :  { %v17028_v2 = vpop.eup %9973  ;;  %7067 = vmatprep.subr.mxu0 %v17011_v18  ;;  %7230 = vmatpush1.msra.mxu1 %v16644_v60  ;;  %v17056_v60 = vld [vmem:[%s17288_s2 + $0x5a8] sm:$0xff] }
 0xe88   :  { %v7742_v29 = vadd.f32 1.0, %v17028_v2  ;;  %7068 = vmatpush1.msra.mxu0 %v17018_v27  ;;  %7231 = vmatprep.subr.mxu1 %v16656_v23  ;;  %v17063_v23 = vld [vmem:[%s17288_s2 + $0x5a0] sm:$0xff] }
 0xe89   :  { %7069 = vmatprep.subr.mxu0 %v17025_v61  ;;  %7232 = vmatpush1.msra.mxu1 %v16668_v19  ;;  %v17070_v19 = vld [vmem:[%s17288_s2 + $0x598] sm:$0xff] }
 0xe8a   :  { %9977 = vlog2.f32 %v7742_v29  ;;  %7070 = vmatpush1.msra.mxu0 %v17034_v40  ;;  %7233 = vmatprep.subr.mxu1 %v16680_v5  ;;  %v17077_v5 = vld [vmem:[%s17288_s2 + $0x590] sm:$0xff]  ;;  %v17886_v29 = vld [vmem:[#allocation17_spill] sm:$0xff] }
 0xe8b   :  { %7071 = vmatprep.subr.mxu0 %v17042_v34  ;;  %7234 = vmatpush1.msra.mxu1 %v16692_v53  ;;  %v17084_v53 = vld [vmem:[%s17288_s2 + $0x588] sm:$0xff] }
 0xe8c   :  { %7072 = vmatpush1.msra.mxu0 %v17049_v8  ;;  %7235 = vmatprep.subr.mxu1 %v16702_v3  ;;  %v17091_v3 = vld [vmem:[%s17288_s2 + $0x580] sm:$0xff] }
 0xe8d   :  { %7073 = vmatprep.subr.mxu0 %v17056_v60  ;;  %7236 = vmatpush1.msra.mxu1 %v16714_v50  ;;  %v7745_v50 = vmul.f32 -0.5, %v17028_v2 }
 0xe8e   :  { %7074 = vmatpush1.msra.mxu0 %v17063_v23  ;;  %7237 = vmatprep.subr.mxu1 %v16726_v47 }
 0xe8f   :  { %7075 = vmatprep.subr.mxu0 %v17070_v19  ;;  %7238 = vmatpush1.msra.mxu1 %v16736_v56 }
 0xe90   :  { %7076 = vmatpush1.msra.mxu0 %v17077_v5  ;;  %7239 = vmatprep.subr.mxu1 %v16748_v51  ;;  %v17120_v51 = vld [vmem:[%s17288_s2 + $0x560] sm:$0xff] }
 0xe91   :  { %v9976_v47 = vpop.eup %9975  ;;  %7077 = vmatprep.subr.mxu0 %v17084_v53  ;;  %7240 = vmatpush1.msra.mxu1 %v16760_v24  ;;  %v7746_v24 = vadd.f32 1.0, %v7745_v50  ;;  %v17888_v50 = vld [vmem:[#allocation19_spill] sm:$0xff] }
 0xe92   :  { %v7751_v56 = vadd.f32 1.0, %v9976_v47  ;;  %7078 = vmatpush1.msra.mxu0 %v17091_v3  ;;  %7241 = vmatprep.subr.mxu1 %v16772_v20  ;;  %v7748_v20 = vand.u32 2147483647, %v17028_v2 }
 0xe93   :  { %7079 = vmatprep.subr.mxu0 %v17099_v14  ;;  %7242 = vmatpush1.msra.mxu1 %v16784_v42  ;;  %v9524_v42 = vld [vmem:[%s17288_s2 + $0x658] sm:$0x1] }
 0xe94   :  { %9979 = vlog2.f32 %v7751_v56  ;;  %7080 = vmatpush1.msra.mxu0 %v17106_v6  ;;  %7243 = vmatprep.subr.mxu1 %v16796_v11  ;;  %vm7749_vm8 = vcmp.lt.f32.partialorder %v7748_v20, 0.0004427343  ;;  %v17890_v56 = vld [vmem:[#allocation21_spill] sm:$0xff]  ;;  %v17892_v20 = vld [vmem:[#allocation28_spill] sm:$0xff] }
 0xe95   :  { %7081 = vmatprep.subr.mxu0 %v17113_v43  ;;  %7244 = vmatpush1.msra.mxu1 %v16808_v39  ;;  %v7747_v39 = vmul.f32 %v17028_v2, %v7746_v24  ;;  %v17885_v2 = vld [vmem:[#allocation16_spill] sm:$0xff]  ;;  %v17891_v24 = vld [vmem:[#allocation22_spill] sm:$0xff] }
 0xe96   :  { %7082 = vmatpush1.msra.mxu0 %v17120_v51  ;;  %7245 = vmatprep.subr.mxu1 %v16820_v33  ;;  %v7754_v33 = vmul.f32 -0.5, %v9976_v47 }
 0xe97   :  { %v9978_v11 = vpop.eup %9977  ;;  %7083 = vmatprep.subr.mxu0 %v17127_v54  ;;  %7246 = vmatpush1.msra.mxu1 %v16832_v45 }
 0xe98   :  { %v7744_v55 = vmul.f32 0.6931472, %v9978_v11  ;;  %7084 = vmatpush1.msra.mxu0 %v17135_v57  ;;  %7247 = vmatprep.subr.mxu1 %v16844_v10  ;;  %v7755_v10 = vadd.f32 1.0, %v7754_v33  ;;  %v17894_v11 = vld [vmem:[#allocation30_spill] sm:$0xff] }
 0xe99   :  { %9526 = vmatprep.subr.msk.mxu0 %vm108_vm0, %v9524_v42  ;;  %7248 = vmatpush1.msra.mxu1 %v16856_v12  ;;  %v7757_v12 = vand.u32 2147483647, %v9976_v47  ;;  %v17893_v42 = vld [vmem:[#allocation29_spill] sm:$0xff]  ;;  %v17898_v33 = vld [vmem:[#allocation34_spill] sm:$0xff] }
 0xe9a   :  { %v7750_v48 = vsel %vm7749_vm8, %v7747_v39, %v7744_v55  ;;  %9527 = vmatpush2.msk.msra.mxu0 %vm108_vm0, %v9523_v9  ;;  %v7756_v7 = vmul.f32 %v9976_v47, %v7755_v10  ;;  %v17889_v47 = vld [vmem:[#allocation20_spill] sm:$0xff]  ;;  %v17895_v9 = vld [vmem:[#allocation31_spill] sm:$0xff]  ;;  %v17897_v39 = vld [vmem:[#allocation33_spill] sm:$0xff] }
 0xe9b   :  { %v7806_v45 = vsel %vm7598_vm9, %v16905_v58, %v7750_v48  ;;  %7118 = vmatmul.mubr.f32.vlgmr.msra.gmra.mxu0 %v16905_v58  ;;  %7328 = vmatprep.subr.mxu0 %v16504_v21  ;;  %vm7758_vm10 = vcmp.lt.f32.partialorder %v7757_v12, 0.0004427343  ;;  %v17896_v55 = vld [vmem:[#allocation32_spill] sm:$0xff]  ;;  %v17899_v48 = vld [vmem:[#allocation35_spill] sm:$0xff] }
 0xe9c   :  { %7822 = vst [vmem:[#allocation3 + $0x50] sm:$0xff] %v7806_v45  ;;  %7329 = vmatpush1.msra.mxu0 %v16516_v13  ;;  %v17877_v13 = vld [vmem:[#allocation8_spill] sm:$0xff]  ;;  %v9566_v45 = vld [vmem:[%s17288_s2 + $0x438] sm:$0x1]  ;;  %v9603_v12 = vld [vmem:[%s17288_s2 + $0x548] sm:$0x1] }
 0xe9d   :  { %7330 = vmatprep.subr.mxu0 %v16528_v32  ;;  %v9565_v10 = vld [vmem:[%s17288_s2 + $0x430] sm:$0x1]  ;;  %9567 = vmatprep.subr.msk.mxu1 %vm108_vm0, %v9566_v45  ;;  %v17902_v45 = vld [vmem:[#allocation27_spill] sm:$0xff] }
 0xe9e   :  { %7331 = vmatpush1.msra.mxu0 %v16538_v62  ;;  %v17878_v62 = vld [vmem:[#allocation9_spill] sm:$0xff]  ;;  %9568 = vmatpush2.msk.msra.mxu1 %vm108_vm0, %v9565_v10 }
 0xe9f   :  { %7332 = vmatprep.subr.mxu0 %v16550_v15  ;;  %v17879_v15 = vld [vmem:[#allocation10_spill] sm:$0xff] }
 0xea0   :  { %7333 = vmatpush1.msra.mxu0 %v16562_v35  ;;  %v17880_v35 = vld [vmem:[#allocation11_spill] sm:$0xff] }
 0xea1   :  { %v9980_v63 = vpop.eup %9979  ;;  %7334 = vmatprep.subr.mxu0 %v16577_v36  ;;  %v17881_v36 = vld [vmem:[#allocation14_spill] sm:$0xff] }
 0xea2   :  { %v7753_v22 = vmul.f32 0.6931472, %v9980_v63  ;;  %7335 = vmatpush1.msra.mxu0 %v16589_v37  ;;  %v17882_v37 = vld [vmem:[#allocation12_spill] sm:$0xff] }
 0xea3   :  { %7336 = vmatprep.subr.mxu0 %v16601_v31  ;;  %v17883_v31 = vld [vmem:[#allocation15_spill] sm:$0xff]  ;;  %v17900_v63 = vld [vmem:[#allocation36_spill] sm:$0xff] }
 0xea4   :  { %v7759_v21 = vsel %vm7758_vm10, %v7756_v7, %v7753_v22  ;;  %7337 = vmatpush1.msra.mxu0 %v17877_v13  ;;  %7451 = vmatprep.subr.mxu1 %v17900_v63  ;;  %v9602_v22 = vld [vmem:[%s17288_s2 + $0x540] sm:$0x1] }
 0xea5   :  { %v7807_v32 = vsel %vm7599_vm11, %v16969_v38, %v7759_v21  ;;  %7338 = vmatprep.subr.mxu0 %v17878_v62  ;;  %v17887_v38 = vld [vmem:[#allocation18_spill] sm:$0xff]  ;;  %v7125_v62 = vld [vmem:[#allocation2 + $0x68] sm:$0xff] }
 0xea6   :  { %7823 = vst.msk [vmem:[#allocation3 + $0x58] sm:$0xff] %vm83_vm1, %v7807_v32  ;;  %7339 = vmatpush1.msra.mxu0 %v17879_v15  ;;  %v7124_v21 = vld [vmem:[#allocation2 + $0x60] sm:$0xff] }
 0xea7   :  { %7340 = vmatprep.subr.mxu0 %v17880_v35 }
 0xea8   :  { %7341 = vmatpush1.msra.mxu0 %v17881_v36 }
 0xea9   :  { %7342 = vmatprep.subr.mxu0 %v17882_v37 }
 0xeaa   :  { %7343 = vmatpush1.msra.mxu0 %v17883_v31  ;;  %v7140_v31 = vld [vmem:[#allocation2 + $0xe0] sm:$0xff] }
 0xeab   :  { %7344 = vmatprep.subr.mxu0 %v17884_v41 }
 0xeac   :  { %7345 = vmatpush1.msra.mxu0 %v17885_v2 }
 0xead   :  { %7346 = vmatprep.subr.mxu0 %v17886_v29  ;;  %v7141_v29 = vld [vmem:[#allocation2 + $0xe8] sm:$0xff] }
 0xeae   :  { %7347 = vmatpush1.msra.mxu0 %v17887_v38 }
 0xeaf   :  { %7348 = vmatprep.subr.mxu0 %v17888_v50 }
 0xeb0   :  { %7349 = vmatpush1.msra.mxu0 %v17889_v47 }
 0xeb1   :  { %7350 = vmatprep.subr.mxu0 %v17890_v56 }
 0xeb2   :  { %7351 = vmatpush1.msra.mxu0 %v17891_v24 }
 0xeb3   :  { %7352 = vmatprep.subr.mxu0 %v17892_v20 }
 0xeb4   :  { %7353 = vmatpush1.msra.mxu0 %v17893_v42 }
 0xeb5   :  { %7354 = vmatprep.subr.mxu0 %v17894_v11  ;;  %v9525_v11 = vld [vmem:[%s17290_s4 + $0x2] sm:$0x3] }
 0xeb6   :  { %7355 = vmatpush1.msra.mxu0 %v17895_v9  ;;  %v7044_v10 = vrot.slane %v9525_v11, %v17902_v45 }
 0xeb7   :  { %7356 = vmatprep.subr.mxu0 %v17896_v55  ;;  %v17901_v55 = vld [vmem:[#allocation26_spill] sm:$0xff] }
 0xeb8   :  { %7357 = vmatpush1.msra.mxu0 %v17897_v39  ;;  %v7040_v39 = vrot.slane %v9525_v11, %v17901_v55 }
 0xeb9   :  { %7358 = vmatprep.subr.mxu0 %v17898_v33 }
 0xeba   :  { %7359 = vmatpush1.msra.mxu0 %v17899_v48 }
 0xebb   :  { %9604 = vmatprep.subr.msk.mxu0 %vm108_vm0, %v9603_v12 }
 0xebc   :  { %9605 = vmatpush2.msk.msra.mxu0 %vm108_vm0, %v9602_v22 }
 0xf39   :  { %v6885_v7 = vpop.f32.mrf.mxu0  ;;  %v6996_v36 = vpop.f32.mrf.mxu1 }
 0xf3a   :  { %v7126_v13 = vadd.f32 %v7124_v21, %v6885_v7  ;;  %v7142_v2 = vadd.f32 %v7140_v31, %v6996_v36 }
 0xf3b   :  { %v6887_v32 = vpop.f32.mrf.mxu0  ;;  %v6998_v41 = vpop.f32.mrf.mxu1 }
 0xf3c   :  { %v9529_v15 = vmul.f32 -1.442695, %v7126_v13  ;;  %v7127_v35 = vadd.f32 %v7125_v62, %v6887_v32  ;;  %v7143_v38 = vadd.f32 %v7141_v29, %v6998_v41  ;;  %v9531_v50 = vmul.f32 -1.442695, %v7142_v2 }
 0xf3e   :  { %9981 = vpow2.f32 %v9529_v15  ;;  %v9530_v37 = vmul.f32 -1.442695, %v7127_v35  ;;  %v9532_v47 = vmul.f32 -1.442695, %v7143_v38  ;;  %v7156_v15 = vld [vmem:[#allocation2 + $0x160] sm:$0xff] }
 0xf40   :  { %9983 = vpow2.f32 %v9530_v37  ;;  %v7157_v37 = vld [vmem:[#allocation2 + $0x168] sm:$0xff] }
 0xf41   :  { %9985 = vpow2.f32 %v9531_v50 }
 0xf42   :  { %9987 = vpow2.f32 %v9532_v47 }
 0xf4b   :  { %v9982_v56 = vpop.eup %9981 }
 0xf4c   :  { %v7134_v24 = vadd.f32 1.0, %v9982_v56 }
 0xf4d   :  { %v9984_v20 = vpop.eup %9983 }
 0xf4e   :  { %9989 = vrcp.f32 %v7134_v24  ;;  %v7135_v42 = vadd.f32 1.0, %v9984_v20  ;;  %v9986_v9 = vpop.eup %9985 }
 0xf4f   :  { %v9988_v33 = vpop.eup %9987  ;;  %v7150_v48 = vadd.f32 1.0, %v9986_v9 }
 0xf50   :  { %9991 = vrcp.f32 %v7135_v42  ;;  %v7151_v22 = vadd.f32 1.0, %v9988_v33 }
 0xf51   :  { %9993 = vrcp.f32 %v7150_v48 }
 0xf52   :  { %9995 = vrcp.f32 %v7151_v22  ;;  %v7539_v22 = vld [vmem:[#allocation2 + $0xf8] sm:$0xff] }
 0xf5b   :  { %v9990_v12 = vpop.eup %9989  ;;  %v7119_v63 = vpop.f32.mrf.mxu0 }
 0xf5c   :  { %v7120_v7 = vadd.f32 %v7119_v63, %v7040_v39 }
 0xf5d   :  { %v9992_v21 = vpop.eup %9991  ;;  %v7121_v13 = vpop.f32.mrf.mxu0 }
 0xf5e   :  { %v7158_v32 = vmul.f32 %v9990_v12, %v7120_v7  ;;  %v7122_v62 = vadd.f32 %v7121_v13, %v7044_v10  ;;  %v9994_v41 = vpop.eup %9993  ;;  %v7538_v10 = vld [vmem:[#allocation2 + $0xf0] sm:$0xff] }
 0xf5f   :  { %v9996_v2 = vpop.eup %9995  ;;  %v7164_v29 = vsub.f32 1.0, %v9994_v41  ;;  %v7168_v56 = vmul.f32 %v9994_v41, %v16905_v58 }
 0xf60   :  { %v7160_v35 = vadd.f32 %v7158_v32, %v7156_v15  ;;  %v7159_v36 = vmul.f32 %v9992_v21, %v7122_v62  ;;  %v7165_v50 = vsub.f32 1.0, %v9996_v2  ;;  %v7169_v42 = vmul.f32 %v9996_v2, %v16907_v26 }
 0xf62   :  { %9997 = vtanh.f32 %v7160_v35  ;;  %v7161_v31 = vadd.f32 %v7159_v36, %v7157_v37  ;;  %v9641_v36 = vld [vmem:[%s17290_s4 + $0x2] sm:$0x3]  ;;  %s10060_s4 = smov [#allocation3]  }
 0xf63   :  { %s7833_s22 = sshll.u32 %s10060_s4, 4  ;;  %s7834_s22 = int_to_ptr.vmem [resolvable:$true] %s7833_s22 }
 0xf64   :  { %9999 = vtanh.f32 %v7161_v31  ;;  %v7438_v31 = vrot.slane %v9641_v36, %v17901_v55  ;;  %s10037_s23 = scalar_lea.vmem %s7834_s22, 2048  ;;  %p10042_p1 = scmp.lt.s32.totalorder %s7834_s22, %s7834_s22 }
 0xf65   :  { %p10038_p0 = scmp.ne.s32.totalorder %s7834_s22, %s10037_s23  ;;  %p10043_p2 = scmp.lt.s32.totalorder %s10037_s23, %s10037_s23 }
 0xf67   :  { %p10044_p3 = por %p10043_p2, %p10042_p1 }
 0xf69   :  { %p10045_p4 = pnand %p10044_p3, %p10038_p0 }
 0xf6f   :  { %v9998_v38 = vpop.eup %9997 }
 0xf70   :  { %v7166_v47 = vmul.f32 %v9998_v38, %v7164_v29  ;;  %v7442_v29 = vrot.slane %v9641_v36, %v17902_v45 }
 0xf71   :  { %v10000_v24 = vpop.eup %9999 }
 0xf72   :  { %v7167_v20 = vmul.f32 %v10000_v24, %v7165_v50  ;;  %v17216_v11 = vadd.f32 %v7168_v56, %v7166_v47 }
 0xf74   :  { %v17218_v9 = vadd.f32 %v7169_v42, %v7167_v20  ;;  %v7616_v39 = vmin.f32 %v17216_v11, 20.0  ;;  %vm7600_vm13 = vcmp.gt.f32.partialorder %v17216_v11, 20.0 }
 0xf76   :  { %7173 = vst.msk [vmem:[#allocation3 + $0x68] sm:$0xff] %vm83_vm1, %v17218_v9  ;;  %9569 = vmatprep.mubr.msk.f32.mxu1 %vm83_vm1, %v17218_v9  ;;  %9606 = vmatprep.mubr.msk.f32.mxu0 %vm83_vm1, %v17218_v9  ;;  %v7644_v58 = vmul.f32 1.442695, %v7616_v39 }
 0xf77   :  { %7282 = vmatmul.mubr.f32.vlgmr.msra.gmra.mxu1 %v17216_v11  ;;  %7393 = vmatmul.mubr.f32.vlgmr.msra.gmra.mxu0 %v17216_v11 }
 0xf78   :  { %10001 = vpow2.f32 %v7644_v58  ;;  %7452 = vmatpush1.msra.mxu1 %v16913_v25  ;;  %9644 = vmatprep.mubr.msk.f32.mxu1 %vm83_vm1, %v17218_v9  ;;  %v7554_v58 = vld [vmem:[#allocation2 + $0x170] sm:$0xff] }
 0xf79   :  { %7453 = vmatprep.subr.mxu1 %v16924_v52 }
 0xf7a   :  { %7454 = vmatpush1.msra.mxu1 %v16931_v59 }
 0xf7b   :  { %7455 = vmatprep.subr.mxu1 %v16939_v28 }
 0xf7c   :  { %7456 = vmatpush1.msra.mxu1 %v16945_v44 }
 0xf7d   :  { %v7585_v26 = vld [vmem:[#allocation3 + $0x68] sm:$0xff]  ;;  %7457 = vmatprep.subr.mxu1 %v16952_v49 }
 0xf7e   :  { %v7617_v33 = vmin.f32 %v7585_v26, 20.0  ;;  %7458 = vmatpush1.msra.mxu1 %v16959_v30  ;;  %vm7601_vm15 = vcmp.gt.f32.partialorder %v7585_v26, 20.0 }
 0xf7f   :  { %7459 = vmatprep.subr.mxu1 %v16966_v17 }
 0xf80   :  { %v7646_v25 = vmul.f32 1.442695, %v7617_v33  ;;  %7460 = vmatpush1.msra.mxu1 %v16975_v16  ;;  %v9640_v16 = vld [vmem:[%s17288_s2 + $0x658] sm:$0x1] }
 0xf81   :  { %7461 = vmatprep.subr.mxu1 %v16983_v4 }
 0xf82   :  { %10003 = vpow2.f32 %v7646_v25  ;;  %7462 = vmatpush1.msra.mxu1 %v16990_v1  ;;  %v9639_v1 = vld [vmem:[%s17288_s2 + $0x650] sm:$0x1]  ;;  %v7555_v25 = vld [vmem:[#allocation2 + $0x178] sm:$0xff] }
 0xf83   :  { %7463 = vmatprep.subr.mxu1 %v16997_v0 }
 0xf84   :  { %7464 = vmatpush1.msra.mxu1 %v17004_v46 }
 0xf85   :  { %v10002_v52 = vpop.eup %10001  ;;  %7465 = vmatprep.subr.mxu1 %v17011_v18 }
 0xf86   :  { %v7760_v59 = vadd.f32 1.0, %v10002_v52  ;;  %7466 = vmatpush1.msra.mxu1 %v17018_v27  ;;  %v7763_v28 = vmul.f32 -0.5, %v10002_v52  ;;  %v7766_v17 = vand.u32 2147483647, %v10002_v52 }
 0xf87   :  { %7467 = vmatprep.subr.mxu1 %v17025_v61 }
 0xf88   :  { %10005 = vlog2.f32 %v7760_v59  ;;  %7468 = vmatpush1.msra.mxu1 %v17034_v40  ;;  %v7764_v30 = vadd.f32 1.0, %v7763_v28  ;;  %vm7767_vm12 = vcmp.lt.f32.partialorder %v7766_v17, 0.0004427343 }
 0xf89   :  { %7469 = vmatprep.subr.mxu1 %v17042_v34 }
 0xf8a   :  { %7470 = vmatpush1.msra.mxu1 %v17049_v8  ;;  %v7765_v46 = vmul.f32 %v10002_v52, %v7764_v30 }
 0xf8b   :  { %7471 = vmatprep.subr.mxu1 %v17056_v60 }
 0xf8c   :  { %7472 = vmatpush1.msra.mxu1 %v17063_v23 }
 0xf8d   :  { %7473 = vmatprep.subr.mxu1 %v17070_v19 }
 0xf8e   :  { %7474 = vmatpush1.msra.mxu1 %v17077_v5 }
 0xf8f   :  { %v10004_v44 = vpop.eup %10003  ;;  %7475 = vmatprep.subr.mxu1 %v17084_v53 }
 0xf90   :  { %v7769_v49 = vadd.f32 1.0, %v10004_v44  ;;  %7476 = vmatpush1.msra.mxu1 %v17091_v3  ;;  %v7772_v18 = vmul.f32 -0.5, %v10004_v44  ;;  %v7775_v34 = vand.u32 2147483647, %v10004_v44  ;;  %v7522_v3 = vld [vmem:[#allocation2 + $0x70] sm:$0xff] }
 0xf91   :  { %7477 = vmatprep.subr.mxu1 %v17099_v14 }
 0xf92   :  { %10007 = vlog2.f32 %v7769_v49  ;;  %7478 = vmatpush1.msra.mxu1 %v17106_v6  ;;  %v7773_v40 = vadd.f32 1.0, %v7772_v18  ;;  %vm7776_vm14 = vcmp.lt.f32.partialorder %v7775_v34, 0.0004427343 }
 0xf93   :  { %7479 = vmatprep.subr.mxu1 %v17113_v43  ;;  %v7523_v43 = vld [vmem:[#allocation2 + $0x78] sm:$0xff] }
 0xf94   :  { %7480 = vmatpush1.msra.mxu1 %v17120_v51  ;;  %v7774_v23 = vmul.f32 %v10004_v44, %v7773_v40 }
 0xf95   :  { %v10006_v4 = vpop.eup %10005  ;;  %7481 = vmatprep.subr.mxu1 %v17127_v54 }
 0xf96   :  { %v7762_v0 = vmul.f32 0.6931472, %v10006_v4  ;;  %7482 = vmatpush1.msra.mxu1 %v17135_v57 }
 0xf97   :  { %9642 = vmatprep.subr.msk.mxu1 %vm108_vm0, %v9640_v16 }
 0xf98   :  { %v7768_v27 = vsel %vm7767_vm12, %v7765_v46, %v7762_v0  ;;  %9643 = vmatpush2.msk.msra.mxu1 %vm108_vm0, %v9639_v1 }
 0xf99   :  { %v7808_v61 = vsel %vm7600_vm13, %v17216_v11, %v7768_v27  ;;  %7516 = vmatmul.mubr.f32.vlgmr.msra.gmra.mxu1 %v17216_v11 }
 0xf9a   :  { %7824 = vst [vmem:[#allocation3 + $0x60] sm:$0xff] %v7808_v61 }
 0xf9f   :  { %v10008_v8 = vpop.eup %10007 }
 0xfa0   :  { %v7771_v60 = vmul.f32 0.6931472, %v10008_v8 }
 0xfa2   :  { %v7777_v19 = vsel %vm7776_vm14, %v7774_v23, %v7771_v60 }
 0xfa3   :  { %v7809_v5 = vsel %vm7601_vm15, %v7585_v26, %v7777_v19 }
 0xfa4   :  { %7825 = vst.msk [vmem:[#allocation3 + $0x68] sm:$0xff] %vm83_vm1, %v7809_v5 }
0x1037   :  { %v7283_v53 = vpop.f32.mrf.mxu1  ;;  %v7394_v57 = vpop.f32.mrf.mxu0 }
0x1038   :  { %v7524_v14 = vadd.f32 %v7522_v3, %v7283_v53  ;;  %v7540_v63 = vadd.f32 %v7538_v10, %v7394_v57 }
0x1039   :  { %v7285_v6 = vpop.f32.mrf.mxu1  ;;  %v7396_v12 = vpop.f32.mrf.mxu0 }
0x103a   :  { %v9645_v51 = vmul.f32 -1.442695, %v7524_v14  ;;  %v7525_v54 = vadd.f32 %v7523_v43, %v7285_v6  ;;  %v7541_v7 = vadd.f32 %v7539_v22, %v7396_v12  ;;  %v9647_v21 = vmul.f32 -1.442695, %v7540_v63 }
0x103c   :  { %10009 = vpow2.f32 %v9645_v51  ;;  %v9646_v48 = vmul.f32 -1.442695, %v7525_v54  ;;  %v9648_v13 = vmul.f32 -1.442695, %v7541_v7 }
0x103e   :  { %10011 = vpow2.f32 %v9646_v48 }
0x103f   :  { %10013 = vpow2.f32 %v9647_v21 }
0x1040   :  { %10015 = vpow2.f32 %v9648_v13 }
0x1049   :  { %v10010_v32 = vpop.eup %10009 }
0x104a   :  { %v7532_v62 = vadd.f32 1.0, %v10010_v32 }
0x104b   :  { %v10012_v15 = vpop.eup %10011 }
0x104c   :  { %10017 = vrcp.f32 %v7532_v62  ;;  %v7533_v35 = vadd.f32 1.0, %v10012_v15  ;;  %v10014_v37 = vpop.eup %10013 }
0x104d   :  { %v10016_v41 = vpop.eup %10015  ;;  %v7548_v2 = vadd.f32 1.0, %v10014_v37 }
0x104e   :  { %10019 = vrcp.f32 %v7533_v35  ;;  %v7549_v47 = vadd.f32 1.0, %v10016_v41 }
0x104f   :  { %10021 = vrcp.f32 %v7548_v2 }
0x1050   :  { %10023 = vrcp.f32 %v7549_v47 }
0x1059   :  { %v10018_v38 = vpop.eup %10017  ;;  %v7517_v50 = vpop.f32.mrf.mxu1 }
0x105a   :  { %v7518_v56 = vadd.f32 %v7517_v50, %v7438_v31 }
0x105b   :  { %v10020_v24 = vpop.eup %10019  ;;  %v7519_v20 = vpop.f32.mrf.mxu1 }
0x105c   :  { %v7556_v42 = vmul.f32 %v10018_v38, %v7518_v56  ;;  %v7520_v39 = vadd.f32 %v7519_v20, %v7442_v29  ;;  %v10022_v52 = vpop.eup %10021 }
0x105d   :  { %v10024_v59 = vpop.eup %10023  ;;  %v7562_v45 = vsub.f32 1.0, %v10022_v52  ;;  %v7566_v44 = vmul.f32 %v10022_v52, %v17216_v11 }
0x105e   :  { %v7558_v26 = vadd.f32 %v7556_v42, %v7554_v58  ;;  %v7557_v33 = vmul.f32 %v10020_v24, %v7520_v39  ;;  %v7563_v49 = vsub.f32 1.0, %v10024_v59  ;;  %v7567_v16 = vmul.f32 %v10024_v59, %v17218_v9 }
0x1060   :  { %10025 = vtanh.f32 %v7558_v26  ;;  %v7559_v55 = vadd.f32 %v7557_v33, %v7555_v25 }
0x1062   :  { %10027 = vtanh.f32 %v7559_v55 }
0x106d   :  { %v10026_v28 = vpop.eup %10025 }
0x106e   :  { %v7564_v30 = vmul.f32 %v10026_v28, %v7562_v45 }
0x106f   :  { %v10028_v17 = vpop.eup %10027 }
0x1070   :  { %v7568_v4 = vadd.f32 %v7566_v44, %v7564_v30  ;;  %v7565_v1 = vmul.f32 %v10028_v17, %v7563_v49 }
0x1072   :  { %v7618_v0 = vmin.f32 %v7568_v4, 20.0  ;;  %v7569_v46 = vadd.f32 %v7567_v16, %v7565_v1  ;;  %vm7602_vm2 = vcmp.gt.f32.partialorder %v7568_v4, 20.0 }
0x1074   :  { %v7648_v18 = vmul.f32 1.442695, %v7618_v0  ;;  %7571 = vst.msk [vmem:[#allocation3 + $0x78] sm:$0xff] %vm83_vm1, %v7569_v46 }
0x1076   :  { %10029 = vpow2.f32 %v7648_v18 }
0x107b   :  { %v7587_v27 = vld [vmem:[#allocation3 + $0x78] sm:$0xff] }
0x107c   :  { %v7619_v61 = vmin.f32 %v7587_v27, 20.0  ;;  %vm7603_vm4 = vcmp.gt.f32.partialorder %v7587_v27, 20.0 }
0x107e   :  { %v7650_v40 = vmul.f32 1.442695, %v7619_v61 }
0x1080   :  { %10031 = vpow2.f32 %v7650_v40 }
0x1083   :  { %v10030_v34 = vpop.eup %10029 }
0x1084   :  { %v7778_v8 = vadd.f32 1.0, %v10030_v34  ;;  %v7781_v11 = vmul.f32 -0.5, %v10030_v34  ;;  %v7784_v9 = vand.u32 2147483647, %v10030_v34 }
0x1086   :  { %10033 = vlog2.f32 %v7778_v8  ;;  %v7782_v19 = vadd.f32 1.0, %v7781_v11  ;;  %vm7785_vm0 = vcmp.lt.f32.partialorder %v7784_v9, 0.0004427343 }
0x1088   :  { %v7783_v3 = vmul.f32 %v10030_v34, %v7782_v19 }
0x108d   :  { %v10032_v60 = vpop.eup %10031 }
0x108e   :  { %v7787_v23 = vadd.f32 1.0, %v10032_v60  ;;  %v7790_v6 = vmul.f32 -0.5, %v10032_v60  ;;  %v7793_v54 = vand.u32 2147483647, %v10032_v60 }
0x1090   :  { %10035 = vlog2.f32 %v7787_v23  ;;  %v7791_v51 = vadd.f32 1.0, %v7790_v6  ;;  %vm7794_vm3 = vcmp.lt.f32.partialorder %v7793_v54, 0.0004427343 }
0x1092   :  { %v7792_v10 = vmul.f32 %v10032_v60, %v7791_v51 }
0x1093   :  { %v10034_v5 = vpop.eup %10033 }
0x1094   :  { %v7780_v53 = vmul.f32 0.6931472, %v10034_v5 }
0x1096   :  { %v7786_v14 = vsel %vm7785_vm0, %v7783_v3, %v7780_v53 }
0x1097   :  { %v7810_v43 = vsel %vm7602_vm2, %v7568_v4, %v7786_v14 }
0x1098   :  { %7826 = vst [vmem:[#allocation3 + $0x70] sm:$0xff] %v7810_v43 }
0x109d   :  { %v10036_v57 = vpop.eup %10035 }
0x109e   :  { %v7789_v48 = vmul.f32 0.6931472, %v10036_v57 }
0x10a0   :  { %v7795_v12 = vsel %vm7794_vm3, %v7792_v10, %v7789_v48 }
0x10a1   :  { %v7811_v63 = vsel %vm7603_vm4, %v7587_v27, %v7795_v12 }
0x10a2   :  { %7827 = vst.msk [vmem:[#allocation3 + $0x78] sm:$0xff] %vm83_vm1, %v7811_v63 }
0x10a3   :  { %10048 = shalt.err (!%p10045_p4)
}
0x10a4   :  { %s10061_s24 = smov 256   ;;  %s10062_s25 = smov 16  }
0x10a5   :  { %7839 = dma.vmem_to_hbm [thread:$0]  %s7834_s22, 2048, %s17291_s5, [#allocation4], %s10061_s24, %s10061_s24, %s10062_s25  }
0x10a6   :  { %10057 = dma.done.wait [#allocation4], 2048  }
0x10a7   :  { %10058 = vsyncadd [#allocation4], 4294965248 }
0x10a8   :  { %7843 = vsyncpa [#allocation4], 1 }

</bundles_post_ra>
